<compile_context>
chip_gen: v6e
topology: v6e:2x2x1
jax: 0.10.0
libtpu: 0.0.40
codegen_flags: <defaults>
</compile_context>

<pallas_src>
import jax
import jax.numpy as jnp
from jax.experimental import pallas as pl
from jax.experimental.pallas import tpu as pltpu

SELU_ALPHA = 1.6732632423543772
SELU_SCALE = 1.0507009873554805


def _selu(v):
    # f32 elementwise math (accumulation is already f32; EUP handles the exp).
    return SELU_SCALE * jnp.where(v > 0, v, SELU_ALPHA * (jnp.exp(v) - 1.0))


def _decoder_kernel(emb_ref, dir_ref,
                    w1e_ref, w1d_ref, b1_ref,
                    w2_ref, b2_ref,
                    w3_ref, b3_ref,
                    w4_ref, b4_ref,
                    o_ref):
    # Layer 1: cat(emb, dir) @ W1, with W1 split into its emb / dir row blocks.
    emb = emb_ref[...].astype(jnp.bfloat16)                     # (tm, n_coeff)
    h = jnp.dot(emb, w1e_ref[...], preferred_element_type=jnp.float32)

    # Direction part: rank-2 update on the VPU (K=2 is too skinny for the MXU).
    # bf16-round dir / w1d so numerics match a bf16 matmul of the concat input.
    d = dir_ref[...].astype(jnp.bfloat16).astype(jnp.float32)   # (tm, 2)
    w1d = w1d_ref[...].astype(jnp.float32)                      # (2, D)
    h = h + d[:, 0:1] * w1d[0:1, :] + d[:, 1:2] * w1d[1:2, :]
    h = _selu(h + b1_ref[...])

    h = _selu(jnp.dot(h.astype(jnp.bfloat16), w2_ref[...],
                      preferred_element_type=jnp.float32) + b2_ref[...])
    h = _selu(jnp.dot(h.astype(jnp.bfloat16), w3_ref[...],
                      preferred_element_type=jnp.float32) + b3_ref[...])
    rgb = (jnp.dot(h.astype(jnp.bfloat16), w4_ref[...],
                   preferred_element_type=jnp.float32) + b4_ref[...])
    # (tm, 3) store: masked vst (3 of 128 lanes) -- output is only 12 B/row of
    # the ~140 B/row total stream, so not worth a feature-major transpose.
    o_ref[...] = rgb.astype(o_ref.dtype)


def prepare_params(params, n_coeff):
    """One-time conversion from PyTorch-style f32 Linear params (W: (out, in),
    b: (out,)) to kernel layout: W -> (in, out) bf16 (W1 split into emb / dir
    row blocks), b -> (1, out) f32."""
    w1t = params["w1"].T                                  # (D, D), rows = inputs
    def w(k): return params[k].T.astype(jnp.bfloat16)
    def b(k): return params[k].reshape(1, -1).astype(jnp.float32)
    return {
        "w1e": w1t[:n_coeff].astype(jnp.bfloat16),        # (n_coeff, D)
        "w1d": w1t[n_coeff:].astype(jnp.bfloat16),        # (2, D)
        "b1": b("b1"),
        "w2": w("w2"), "b2": b("b2"),
        "w3": w("w3"), "b3": b("b3"),
        "w4": w("w4"), "b4": b("b4"),
    }


def _choose_tm(N, *, max_tm=2048, min_tm=256, target_steps=8):
    """Large tiles amortize the ~0.35 us per-grid-step overhead; keep at least
    ~target_steps steps for small N so the 'parallel' axis can still use both
    TensorCores on v7x."""
    tm = -(-N // target_steps)
    tm = ((tm + 255) // 256) * 256            # multiple of 256 rows
    return int(max(min_tm, min(max_tm, tm)))


def neural_rti_decoder(embedding, direction, prepped, *, tm=None):
    """embedding: (N, n_coeff) f32, direction: (N, 2) f32 -> rgb (N, 3) f32.

    `prepped` must come from prepare_params (weights pre-transposed / bf16).
    """
    N, n_coeff = embedding.shape
    D = n_coeff + 2
    assert direction.shape == (N, 2)
    if tm is None:
        tm = _choose_tm(N)

    # Ragged N: non-divisible grid; tail rows of the last block are garbage on
    # read (rows are independent) and dropped on write.  No padding copy.
    n_blocks = pl.cdiv(N, tm)

    row_spec = lambda cols: pl.BlockSpec((tm, cols), lambda i: (i, 0))
    full = lambda shape: pl.BlockSpec(shape, lambda i: (0, 0))   # resident weights

    p = prepped
    return pl.pallas_call(
        _decoder_kernel,
        out_shape=jax.ShapeDtypeStruct((N, 3), jnp.float32),
        grid_spec=pltpu.PrefetchScalarGridSpec(
            num_scalar_prefetch=0,
            grid=(n_blocks,),
            in_specs=[
                row_spec(n_coeff),                 # embedding rows
                row_spec(2),                       # direction rows
                full((n_coeff, D)), full((2, D)), full((1, D)),   # layer 1
                full((D, D)), full((1, D)),                       # layer 2
                full((D, D)), full((1, D)),                       # layer 3
                full((D, 3)), full((1, 3)),                       # layer 4
            ],
            out_specs=pl.BlockSpec((tm, 3), lambda i: (i, 0)),
        ),
        compiler_params=pltpu.CompilerParams(
            dimension_semantics=("parallel",),
            # cheap insurance vs v5e's 16 MiB scoped default; well within
            # v7x's 64 MiB physical VMEM.
            vmem_limit_bytes=32 * 1024 * 1024,
        ),
    )(embedding, direction,
      p["w1e"], p["w1d"], p["b1"],
      p["w2"], p["b2"], p["w3"], p["b3"], p["w4"], p["b4"])


def _reference(embedding, direction, params):
    """Pure-JAX reference mimicking the kernel's bf16 matmul / f32 accumulate."""
    x = jnp.concatenate([embedding, direction], axis=-1)

    def lin(h, wk, bk):
        return (jnp.dot(h.astype(jnp.bfloat16),
                        params[wk].T.astype(jnp.bfloat16),
                        preferred_element_type=jnp.float32)
                + params[bk])

    h = _selu(lin(x, "w1", "b1"))
    h = _selu(lin(h, "w2", "b2"))
    h = _selu(lin(h, "w3", "b3"))
    return lin(h, "w4", "b4")


def init_params(key, n_coeff):
    """Deterministic init, PyTorch Linear weight shapes (out, in)."""
    D = n_coeff + 2
    ks = jax.random.split(key, 8)
    s = 1.0 / jnp.sqrt(D)
    return {
        "w1": jax.random.uniform(ks[0], (D, D), jnp.float32, -s, s),
        "b1": jax.random.uniform(ks[1], (D,), jnp.float32, -s, s),
        "w2": jax.random.uniform(ks[2], (D, D), jnp.float32, -s, s),
        "b2": jax.random.uniform(ks[3], (D,), jnp.float32, -s, s),
        "w3": jax.random.uniform(ks[4], (D, D), jnp.float32, -s, s),
        "b3": jax.random.uniform(ks[5], (D,), jnp.float32, -s, s),
        "w4": jax.random.uniform(ks[6], (3, D), jnp.float32, -s, s),
        "b4": jax.random.uniform(ks[7], (3,), jnp.float32, -s, s),
    }


if __name__ == "__main__":
    n_coeff = 30          # latent coefficients -> hidden width D = 32
    N = 5000              # deliberately ragged: exercises partial-last-block path

    key = jax.random.PRNGKey(0)
    k_emb, k_dir, k_par = jax.random.split(key, 3)
    embedding = jax.random.normal(k_emb, (N, n_coeff), jnp.float32)
    direction = jax.random.normal(k_dir, (N, 2), jnp.float32)
    params = init_params(k_par, n_coeff)

    prepped = prepare_params(params, n_coeff)   # one-time transpose/split + bf16 cast
    fwd = jax.jit(neural_rti_decoder)

    rgb = jax.block_until_ready(fwd(embedding, direction, prepped))

    ref = _reference(embedding, direction, params)
    assert rgb.shape == (N, 3)
    assert jnp.allclose(rgb, ref, atol=5e-3, rtol=5e-3), "mismatch vs reference"

    print("KERNEL_OK")
</pallas_src>

<mosaic_0001>
module attributes {stable_mosaic.version = 11 : i64} {
  func.func @_decoder_kernel(%arg0: i32, %arg1: memref<768x30xf32, #tpu.memory_space<vmem>>, %arg2: memref<768x2xf32, #tpu.memory_space<vmem>>, %arg3: memref<30x32xbf16, #tpu.memory_space<vmem>>, %arg4: memref<2x32xbf16, #tpu.memory_space<vmem>>, %arg5: memref<1x32xf32, #tpu.memory_space<vmem>>, %arg6: memref<32x32xbf16, #tpu.memory_space<vmem>>, %arg7: memref<1x32xf32, #tpu.memory_space<vmem>>, %arg8: memref<32x32xbf16, #tpu.memory_space<vmem>>, %arg9: memref<1x32xf32, #tpu.memory_space<vmem>>, %arg10: memref<32x3xbf16, #tpu.memory_space<vmem>>, %arg11: memref<1x3xf32, #tpu.memory_space<vmem>>, %arg12: memref<768x3xf32, #tpu.memory_space<vmem>>) attributes {dimension_semantics = [#tpu.dimension_semantics<parallel>], iteration_bounds = array<i64: 7>, scalar_prefetch = 0 : i64, scratch_operands = 0 : i64, tpu.core_type = #tpu.core_type<tc>, window_params = [{transform_indices = @transform_0, window_bounds = array<i64: 768, 30>}, {transform_indices = @transform_1, window_bounds = array<i64: 768, 2>}, {pipeline_mode = #tpu.pipeline_mode<synchronous>, transform_indices = @transform_2, window_bounds = array<i64: 30, 32>}, {pipeline_mode = #tpu.pipeline_mode<synchronous>, transform_indices = @transform_3, window_bounds = array<i64: 2, 32>}, {pipeline_mode = #tpu.pipeline_mode<synchronous>, transform_indices = @transform_4, window_bounds = array<i64: 1, 32>}, {pipeline_mode = #tpu.pipeline_mode<synchronous>, transform_indices = @transform_5, window_bounds = array<i64: 32, 32>}, {pipeline_mode = #tpu.pipeline_mode<synchronous>, transform_indices = @transform_6, window_bounds = array<i64: 1, 32>}, {pipeline_mode = #tpu.pipeline_mode<synchronous>, transform_indices = @transform_7, window_bounds = array<i64: 32, 32>}, {pipeline_mode = #tpu.pipeline_mode<synchronous>, transform_indices = @transform_8, window_bounds = array<i64: 1, 32>}, {pipeline_mode = #tpu.pipeline_mode<synchronous>, transform_indices = @transform_9, window_bounds = array<i64: 32, 3>}, {pipeline_mode = #tpu.pipeline_mode<synchronous>, transform_indices = @transform_10, window_bounds = array<i64: 1, 3>}, {transform_indices = @transform_11, window_bounds = array<i64: 768, 3>}]} {
    %c0 = arith.constant 0 : index
    %c0_0 = arith.constant 0 : index
    %0 = vector.load %arg1[%c0, %c0_0] : memref<768x30xf32, #tpu.memory_space<vmem>>, vector<768x30xf32>
    %1 = arith.truncf %0 : vector<768x30xf32> to vector<768x30xbf16>
    %c0_1 = arith.constant 0 : index
    %c0_2 = arith.constant 0 : index
    %2 = vector.load %arg3[%c0_1, %c0_2] : memref<30x32xbf16, #tpu.memory_space<vmem>>, vector<30x32xbf16>
    %cst = arith.constant dense<0.000000e+00> : vector<768x32xf32>
    %3 = tpu.matmul %1, %2, %cst {dimension_numbers = #tpu.dot_dimension_numbers<[1], [0], [0], [1], [0, 0, 1, 1], [], []>} : vector<768x30xbf16>, vector<30x32xbf16>, vector<768x32xf32> -> vector<768x32xf32>
    %c0_3 = arith.constant 0 : index
    %c0_4 = arith.constant 0 : index
    %4 = vector.load %arg2[%c0_3, %c0_4] : memref<768x2xf32, #tpu.memory_space<vmem>>, vector<768x2xf32>
    %5 = arith.truncf %4 : vector<768x2xf32> to vector<768x2xbf16>
    %6 = arith.extf %5 : vector<768x2xbf16> to vector<768x2xf32>
    %c0_5 = arith.constant 0 : index
    %c0_6 = arith.constant 0 : index
    %7 = vector.load %arg4[%c0_5, %c0_6] : memref<2x32xbf16, #tpu.memory_space<vmem>>, vector<2x32xbf16>
    %8 = arith.extf %7 : vector<2x32xbf16> to vector<2x32xf32>
    %9 = vector.extract_strided_slice %6 {offsets = [0, 0], sizes = [768, 1], strides = [1, 1]} : vector<768x2xf32> to vector<768x1xf32>
    %10 = vector.extract_strided_slice %8 {offsets = [0, 0], sizes = [1, 32], strides = [1, 1]} : vector<2x32xf32> to vector<1x32xf32>
    %11 = vector.broadcast %9 : vector<768x1xf32> to vector<768x32xf32>
    %12 = vector.broadcast %10 : vector<1x32xf32> to vector<768x32xf32>
    %13 = arith.mulf %11, %12 : vector<768x32xf32>
    %14 = arith.addf %3, %13 : vector<768x32xf32>
    %15 = vector.extract_strided_slice %6 {offsets = [0, 1], sizes = [768, 1], strides = [1, 1]} : vector<768x2xf32> to vector<768x1xf32>
    %16 = vector.extract_strided_slice %8 {offsets = [1, 0], sizes = [1, 32], strides = [1, 1]} : vector<2x32xf32> to vector<1x32xf32>
    %17 = vector.broadcast %15 : vector<768x1xf32> to vector<768x32xf32>
    %18 = vector.broadcast %16 : vector<1x32xf32> to vector<768x32xf32>
    %19 = arith.mulf %17, %18 : vector<768x32xf32>
    %20 = arith.addf %14, %19 : vector<768x32xf32>
    %c0_7 = arith.constant 0 : index
    %c0_8 = arith.constant 0 : index
    %21 = vector.load %arg5[%c0_7, %c0_8] : memref<1x32xf32, #tpu.memory_space<vmem>>, vector<1x32xf32>
    %22 = vector.broadcast %21 : vector<1x32xf32> to vector<768x32xf32>
    %23 = arith.addf %20, %22 : vector<768x32xf32>
    %cst_9 = arith.constant 0.000000e+00 : f32
    %24 = vector.broadcast %cst_9 : f32 to vector<768x32xf32>
    %25 = arith.cmpf ogt, %23, %24 : vector<768x32xf32>
    %26 = math.exp %23 : vector<768x32xf32>
    %cst_10 = arith.constant 1.000000e+00 : f32
    %27 = vector.broadcast %cst_10 : f32 to vector<768x32xf32>
    %28 = arith.subf %26, %27 : vector<768x32xf32>
    %cst_11 = arith.constant 1.67326319 : f32
    %29 = vector.broadcast %cst_11 : f32 to vector<768x32xf32>
    %30 = arith.mulf %29, %28 : vector<768x32xf32>
    %31 = arith.select %25, %23, %30 : vector<768x32xi1>, vector<768x32xf32>
    %cst_12 = arith.constant 1.05070102 : f32
    %32 = vector.broadcast %cst_12 : f32 to vector<768x32xf32>
    %33 = arith.mulf %32, %31 : vector<768x32xf32>
    %34 = arith.truncf %33 : vector<768x32xf32> to vector<768x32xbf16>
    %c0_13 = arith.constant 0 : index
    %c0_14 = arith.constant 0 : index
    %35 = vector.load %arg6[%c0_13, %c0_14] : memref<32x32xbf16, #tpu.memory_space<vmem>>, vector<32x32xbf16>
    %cst_15 = arith.constant dense<0.000000e+00> : vector<768x32xf32>
    %36 = tpu.matmul %34, %35, %cst_15 {dimension_numbers = #tpu.dot_dimension_numbers<[1], [0], [0], [1], [0, 0, 1, 1], [], []>} : vector<768x32xbf16>, vector<32x32xbf16>, vector<768x32xf32> -> vector<768x32xf32>
    %c0_16 = arith.constant 0 : index
    %c0_17 = arith.constant 0 : index
    %37 = vector.load %arg7[%c0_16, %c0_17] : memref<1x32xf32, #tpu.memory_space<vmem>>, vector<1x32xf32>
    %38 = vector.broadcast %37 : vector<1x32xf32> to vector<768x32xf32>
    %39 = arith.addf %36, %38 : vector<768x32xf32>
    %cst_18 = arith.constant 0.000000e+00 : f32
    %40 = vector.broadcast %cst_18 : f32 to vector<768x32xf32>
    %41 = arith.cmpf ogt, %39, %40 : vector<768x32xf32>
    %42 = math.exp %39 : vector<768x32xf32>
    %cst_19 = arith.constant 1.000000e+00 : f32
    %43 = vector.broadcast %cst_19 : f32 to vector<768x32xf32>
    %44 = arith.subf %42, %43 : vector<768x32xf32>
    %cst_20 = arith.constant 1.67326319 : f32
    %45 = vector.broadcast %cst_20 : f32 to vector<768x32xf32>
    %46 = arith.mulf %45, %44 : vector<768x32xf32>
    %47 = arith.select %41, %39, %46 : vector<768x32xi1>, vector<768x32xf32>
    %cst_21 = arith.constant 1.05070102 : f32
    %48 = vector.broadcast %cst_21 : f32 to vector<768x32xf32>
    %49 = arith.mulf %48, %47 : vector<768x32xf32>
    %50 = arith.truncf %49 : vector<768x32xf32> to vector<768x32xbf16>
    %c0_22 = arith.constant 0 : index
    %c0_23 = arith.constant 0 : index
    %51 = vector.load %arg8[%c0_22, %c0_23] : memref<32x32xbf16, #tpu.memory_space<vmem>>, vector<32x32xbf16>
    %cst_24 = arith.constant dense<0.000000e+00> : vector<768x32xf32>
    %52 = tpu.matmul %50, %51, %cst_24 {dimension_numbers = #tpu.dot_dimension_numbers<[1], [0], [0], [1], [0, 0, 1, 1], [], []>} : vector<768x32xbf16>, vector<32x32xbf16>, vector<768x32xf32> -> vector<768x32xf32>
    %c0_25 = arith.constant 0 : index
    %c0_26 = arith.constant 0 : index
    %53 = vector.load %arg9[%c0_25, %c0_26] : memref<1x32xf32, #tpu.memory_space<vmem>>, vector<1x32xf32>
    %54 = vector.broadcast %53 : vector<1x32xf32> to vector<768x32xf32>
    %55 = arith.addf %52, %54 : vector<768x32xf32>
    %cst_27 = arith.constant 0.000000e+00 : f32
    %56 = vector.broadcast %cst_27 : f32 to vector<768x32xf32>
    %57 = arith.cmpf ogt, %55, %56 : vector<768x32xf32>
    %58 = math.exp %55 : vector<768x32xf32>
    %cst_28 = arith.constant 1.000000e+00 : f32
    %59 = vector.broadcast %cst_28 : f32 to vector<768x32xf32>
    %60 = arith.subf %58, %59 : vector<768x32xf32>
    %cst_29 = arith.constant 1.67326319 : f32
    %61 = vector.broadcast %cst_29 : f32 to vector<768x32xf32>
    %62 = arith.mulf %61, %60 : vector<768x32xf32>
    %63 = arith.select %57, %55, %62 : vector<768x32xi1>, vector<768x32xf32>
    %cst_30 = arith.constant 1.05070102 : f32
    %64 = vector.broadcast %cst_30 : f32 to vector<768x32xf32>
    %65 = arith.mulf %64, %63 : vector<768x32xf32>
    %66 = arith.truncf %65 : vector<768x32xf32> to vector<768x32xbf16>
    %c0_31 = arith.constant 0 : index
    %c0_32 = arith.constant 0 : index
    %67 = vector.load %arg10[%c0_31, %c0_32] : memref<32x3xbf16, #tpu.memory_space<vmem>>, vector<32x3xbf16>
    %cst_33 = arith.constant dense<0.000000e+00> : vector<768x3xf32>
    %68 = tpu.matmul %66, %67, %cst_33 {dimension_numbers = #tpu.dot_dimension_numbers<[1], [0], [0], [1], [0, 0, 1, 1], [], []>} : vector<768x32xbf16>, vector<32x3xbf16>, vector<768x3xf32> -> vector<768x3xf32>
    %c0_34 = arith.constant 0 : index
    %c0_35 = arith.constant 0 : index
    %69 = vector.load %arg11[%c0_34, %c0_35] : memref<1x3xf32, #tpu.memory_space<vmem>>, vector<1x3xf32>
    %70 = vector.broadcast %69 : vector<1x3xf32> to vector<768x3xf32>
    %71 = arith.addf %68, %70 : vector<768x3xf32>
    %c0_36 = arith.constant 0 : index
    %c0_37 = arith.constant 0 : index
    %72 = vector.load %arg12[%c0_36, %c0_37] : memref<768x3xf32, #tpu.memory_space<vmem>>, vector<768x3xf32>
    tpu.vector_store %arg12[%c0_36, %c0_37], %71 {strides = array<i32>} : memref<768x3xf32, #tpu.memory_space<vmem>>, vector<768x3xf32>,
    return
  }
  func.func @transform_0(%arg0: i32) -> (i32, i32) {
    %c0_i32 = arith.constant 0 : i32
    %c0_i32_0 = arith.constant 0 : i32
    return %arg0, %c0_i32 : i32, i32
  }
  func.func @transform_1(%arg0: i32) -> (i32, i32) {
    %c0_i32 = arith.constant 0 : i32
    %c0_i32_0 = arith.constant 0 : i32
    return %arg0, %c0_i32 : i32, i32
  }
  func.func @transform_2(%arg0: i32) -> (i32, i32) {
    %c0_i32 = arith.constant 0 : i32
    %c0_i32_0 = arith.constant 0 : i32
    %c0_i32_1 = arith.constant 0 : i32
    return %c0_i32, %c0_i32_0 : i32, i32
  }
  func.func @transform_3(%arg0: i32) -> (i32, i32) {
    %c0_i32 = arith.constant 0 : i32
    %c0_i32_0 = arith.constant 0 : i32
    %c0_i32_1 = arith.constant 0 : i32
    return %c0_i32, %c0_i32_0 : i32, i32
  }
  func.func @transform_4(%arg0: i32) -> (i32, i32) {
    %c0_i32 = arith.constant 0 : i32
    %c0_i32_0 = arith.constant 0 : i32
    %c0_i32_1 = arith.constant 0 : i32
    return %c0_i32, %c0_i32_0 : i32, i32
  }
  func.func @transform_5(%arg0: i32) -> (i32, i32) {
    %c0_i32 = arith.constant 0 : i32
    %c0_i32_0 = arith.constant 0 : i32
    %c0_i32_1 = arith.constant 0 : i32
    return %c0_i32, %c0_i32_0 : i32, i32
  }
  func.func @transform_6(%arg0: i32) -> (i32, i32) {
    %c0_i32 = arith.constant 0 : i32
    %c0_i32_0 = arith.constant 0 : i32
    %c0_i32_1 = arith.constant 0 : i32
    return %c0_i32, %c0_i32_0 : i32, i32
  }
  func.func @transform_7(%arg0: i32) -> (i32, i32) {
    %c0_i32 = arith.constant 0 : i32
    %c0_i32_0 = arith.constant 0 : i32
    %c0_i32_1 = arith.constant 0 : i32
    return %c0_i32, %c0_i32_0 : i32, i32
  }
  func.func @transform_8(%arg0: i32) -> (i32, i32) {
    %c0_i32 = arith.constant 0 : i32
    %c0_i32_0 = arith.constant 0 : i32
    %c0_i32_1 = arith.constant 0 : i32
    return %c0_i32, %c0_i32_0 : i32, i32
  }
  func.func @transform_9(%arg0: i32) -> (i32, i32) {
    %c0_i32 = arith.constant 0 : i32
    %c0_i32_0 = arith.constant 0 : i32
    %c0_i32_1 = arith.constant 0 : i32
    return %c0_i32, %c0_i32_0 : i32, i32
  }
  func.func @transform_10(%arg0: i32) -> (i32, i32) {
    %c0_i32 = arith.constant 0 : i32
    %c0_i32_0 = arith.constant 0 : i32
    %c0_i32_1 = arith.constant 0 : i32
    return %c0_i32, %c0_i32_0 : i32, i32
  }
  func.func @transform_11(%arg0: i32) -> (i32, i32) {
    %c0_i32 = arith.constant 0 : i32
    %c0_i32_0 = arith.constant 0 : i32
    return %arg0, %c0_i32 : i32, i32
  }
}

</mosaic_0001>

<bundles_post_ra>
// kernel: neural_rti_decoder.1
= control target key start
LH: loop header
LB: loop body
LE: loop exit
PB: predicated region body
PF: predicated region fallthrough
CT: control target
= control target key end

     0   :  { %s9660_s17 = smov 0   ;;  %s9662_s18 = smov 0   ;;  %s14073_s0 = inlined_call_operand.vmem [shape: f32[5000,30], index: 0, kind: input, shape index: {}]   ;;  %s14074_s1 = inlined_call_operand.vmem [shape: f32[5000,2], index: 1, kind: input, shape index: {}]   ;;  %s14075_s2 = inlined_call_operand.vmem [shape: bf16[30,32], index: 2, kind: input, shape index: {}]   ;;  %s14076_s3 = inlined_call_operand.vmem [shape: bf16[2,32], index: 3, kind: input, shape index: {}]   ;;  %s14077_s4 = inlined_call_operand.vmem [shape: f32[1,32], index: 4, kind: input, shape index: {}]   ;;  %s14078_s5 = inlined_call_operand.vmem [shape: bf16[32,32], index: 5, kind: input, shape index: {}]   ;;  %s14079_s6 = inlined_call_operand.vmem [shape: f32[1,32], index: 6, kind: input, shape index: {}]   ;;  %s14080_s7 = inlined_call_operand.vmem [shape: bf16[32,32], index: 7, kind: input, shape index: {}]   ;;  %s14081_s8 = inlined_call_operand.vmem [shape: f32[1,32], index: 8, kind: input, shape index: {}]   ;;  %s14082_s9 = inlined_call_operand.vmem [shape: bf16[32,3], index: 9, kind: input, shape index: {}]   ;;  %s14083_s10 = inlined_call_operand.vmem [shape: f32[1,3], index: 10, kind: input, shape index: {}]   ;;  %s14084_s11 = inlined_call_operand.vmem [shape: f32[5000,3], index: 11, kind: output, shape index: {}]  }
   0x1   :  { %s9664_s19 = smov 0  }
   0x2 LB: > { %s9673_s20 = sadd.s32 4294967295, %s9564_s19   ;;  %s9675_s21 = sadd.s32 1, %s9564_s19   ;;  %s9564_s19 = sphi %s9664_s19, %s14201_s19   ;;  %s9560_s18 = sphi %s9662_s18, %s14200_s18   ;;  %s9556_s17 = sphi %s9660_s17, %s14199_s17  }
   0x3   : > { %s266_s22 = ssub.s32 %s9564_s19, %s9675_s21  ;;  %s269_s23 = sadd.s32 1, %s9560_s18 }
   0x4   : > { %p267_p0 = scmp.eq.s32.totalorder %s266_s22, 0  ;;  %p279_p1 = scmp.ne.s32.totalorder %s9560_s18, %s9556_s17 }
   0x5   : > { %p280_p2 = scmp.eq.s32.totalorder %s9673_s20, 6  ;;  %p7174_p3 = scmp.ge.s32.totalorder %s9564_s19, 1 }
   0x6   : > { %s9683_s24 = scalar_select %p267_p0, %s9560_s18, %s269_s23  }
   0x7   : > { %p9685_p4 = por %p280_p2, %p279_p1  ;;  %p365_p5 = scmp.lt.s32.totalorder %s9564_s19, 8 }
   0x9   : > { %p366_p6 = pnand %p7174_p3, %p365_p5 }
   0xb   : > { %369 = sbr.rel (%p366_p6) target bundleno = 1293 (0x50d), region = 64 }
  0x10   : > { %v8920_v0 = vld [vmem:[%s14075_s2 + $0x8] sm:$0x7f]   ;;  %vm1577_vm0 = vcmask 1046528   ;;  %v8921_v1 = vld [vmem:[%s14075_s2] sm:$0xff]   ;;  %s9696_s30 = smul.u32 96, %s9673_s20  ;;  %v14085_v3 = vmov 1  }
  0x11   : > { %8287 = vmatprep.subr.msk.bf16.mxu0 %vm1577_vm0, %v8920_v0  ;;  %v1579_v2 = vsel %vm1577_vm0, %v8920_v0, 0  ;;  %8390 = vset.pattern.permute.xlu1 %v14085_v3  ;;  %v14089_v4 = vmov 0   ;;  %vm1432_vm1 = vcmask 244736   ;;  %vm3424_vm7 = vcmask 261120   ;;  %s414_s14 = sand.u32 1, %s9556_s17   ;;  %s7684_s27 = smul.u32 (%p9685_p4), 768, %s9673_s20 }
  0x12   : > { %7888 = vmatpush3.bf16.msra.mxu0 %v1579_v2  ;;  %p422_p7 = scmp.lt.s32.totalorder %s9696_s30, 624  ;;  %8379 = vset.pattern.permute.xlu0 %v14089_v4  ;;  %s13532_s17 = smul.u32 768, %s414_s14 }
  0x13   : > { %7889 = vmatprep.subr.bf16.mxu0 %v8921_v1 }
  0x14   : > { %s423_s12 = scalar_select %p422_p7, %s9696_s30, 624 }
  0x15   : > { %s13561_s26 = scalar_lea.vmem [#allocation2], %s13532_s17  }
  0x16   : > { %7890 = vmatpush3.bf16.msra.mxu0 %v8921_v1  ;;  %s7175_s13 = sshll.u32 %s423_s12, 3  ;;  %s13874_s12 = scalar_lea.vmem (%p9685_p4), %s14084_s11, %s7684_s27  }
  0x17   : > { %s9705_s16 = scalar_lea.vmem %s14073_s0, %s7175_s13  ;;  %s9710_s23 = scalar_lea.vmem %s14074_s1, %s7175_s13 }
  0x18   : > { %v451_v5 = vld [vmem:[%s9705_s16] sm:$0xff]  ;;  %v452_v6 = vld [vmem:[%s9705_s16 + $0x8] sm:$0xff]  ;;  %v453_v7 = vld [vmem:[%s9705_s16 + $0x10] sm:$0xff] }
  0x19   : > { %v547_v8 = vpack.c.bf16 %v452_v6, %v451_v5  ;;  %v454_v9 = vld [vmem:[%s9705_s16 + $0x18] sm:$0xff]  ;;  %v599_v10 = vld [vmem:[%s9710_s23] sm:$0xff]  ;;  %v600_v11 = vld [vmem:[%s9710_s23 + $0x8] sm:$0xff] }
  0x1a   : > { %v548_v12 = vpack.c.bf16 %v454_v9, %v453_v7  ;;  %v601_v13 = vld [vmem:[%s9710_s23 + $0x10] sm:$0xff]  ;;  %v602_v14 = vld [vmem:[%s9710_s23 + $0x18] sm:$0xff]  ;;  %v455_v15 = vld [vmem:[%s9705_s16 + $0x20] sm:$0xff]  ;;  %v8391_v22 = vpack.i.bf16 %v600_v11, %v599_v10 }
  0x1b   : > { %7891 = vmatprep.mubr.msk.bf16.mxu0 %vm1432_vm1, %v547_v8  ;;  %v456_v16 = vld [vmem:[%s9705_s16 + $0x28] sm:$0xff]  ;;  %v605_v18 = vld [vmem:[%s9710_s23 + $0x30] sm:$0xff]  ;;  %v606_v19 = vld [vmem:[%s9710_s23 + $0x38] sm:$0xff]  ;;  %v8396_v25 = vpack.i.bf16 %v602_v14, %v601_v13 }
  0x1c   : > { %7892 = vmatmul.mubr.msk.bf16.vlgmr.msra.gmra.mxu0 %vm1432_vm1, %v548_v12  ;;  %v549_v17 = vpack.c.bf16 %v456_v16, %v455_v15  ;;  %v457_v20 = vld [vmem:[%s9705_s16 + $0x30] sm:$0xff]  ;;  %v458_v21 = vld [vmem:[%s9705_s16 + $0x38] sm:$0xff]  ;;  %v459_v23 = vld [vmem:[%s9705_s16 + $0x40] sm:$0xff]  ;;  %8392 = vperm.xlu1 %8390, %v8391_v22   ;;  %v8407_v30 = vpack.i.bf16 %v606_v19, %v605_v18 }
  0x1d   : > { %v460_v24 = vld [vmem:[%s9705_s16 + $0x48] sm:$0xff]  ;;  %v550_v26 = vpack.c.bf16 %v458_v21, %v457_v20  ;;  %8381 = vperm.xlu0 %8379, %v8391_v22   ;;  %v607_v28 = vld [vmem:[%s9710_s23 + $0x40] sm:$0xff]  ;;  %v461_v31 = vld [vmem:[%s9705_s16 + $0x50] sm:$0xff] }
  0x1e   : > { %7895 = vmatprep.mubr.msk.bf16.mxu0 %vm1432_vm1, %v549_v17  ;;  %v551_v27 = vpack.c.bf16 %v460_v24, %v459_v23  ;;  %v608_v29 = vld [vmem:[%s9710_s23 + $0x48] sm:$0xff]  ;;  %v462_v32 = vld [vmem:[%s9705_s16 + $0x58] sm:$0xff]  ;;  %v463_v33 = vld [vmem:[%s9705_s16 + $0x60] sm:$0xff] }
  0x1f   : > { %v464_v34 = vld [vmem:[%s9705_s16 + $0x68] sm:$0xff]  ;;  %v552_v35 = vpack.c.bf16 %v462_v32, %v461_v31  ;;  %v609_v36 = vld [vmem:[%s9710_s23 + $0x50] sm:$0xff]  ;;  %v610_v37 = vld [vmem:[%s9710_s23 + $0x58] sm:$0xff]  ;;  %v8419_v45 = vpack.i.bf16 %v608_v29, %v607_v28 }
  0x20   : > { %8397 = vperm.xlu1 %8390, %v8396_v25   ;;  %v553_v38 = vpack.c.bf16 %v464_v34, %v463_v33  ;;  %v603_v39 = vld [vmem:[%s9710_s23 + $0x20] sm:$0xff]  ;;  %v604_v40 = vld [vmem:[%s9710_s23 + $0x28] sm:$0xff]  ;;  %v465_v41 = vld [vmem:[%s9705_s16 + $0x70] sm:$0xff]  ;;  %v8424_v51 = vpack.i.bf16 %v610_v37, %v609_v36 }
  0x21   : > { %8386 = vperm.xlu0 %8379, %v8396_v25   ;;  %v466_v42 = vld [vmem:[%s9705_s16 + $0x78] sm:$0xff]  ;;  %v467_v43 = vld [vmem:[%s9705_s16 + $0x80] sm:$0xff]  ;;  %v468_v44 = vld [vmem:[%s9705_s16 + $0x88] sm:$0xff]  ;;  %v8401_v46 = vpack.i.bf16 %v604_v40, %v603_v39 }
  0x22   : > { %v611_v47 = vld [vmem:[%s9710_s23 + $0x60] sm:$0xff]  ;;  %v612_v48 = vld [vmem:[%s9710_s23 + $0x68] sm:$0xff]  ;;  %v554_v49 = vpack.c.bf16 %v466_v42, %v465_v41  ;;  %v555_v50 = vpack.c.bf16 %v468_v44, %v467_v43  ;;  %v613_v52 = vld [vmem:[%s9710_s23 + $0x70] sm:$0xff] }
  0x23   : > { %v614_v53 = vld [vmem:[%s9710_s23 + $0x78] sm:$0xff]  ;;  %v469_v54 = vld [vmem:[%s9705_s16 + $0x90] sm:$0xff]  ;;  %v471_v56 = vld [vmem:[%s9705_s16 + $0xa0] sm:$0xff]  ;;  %v8452_v62 = vpack.i.bf16 %v612_v48, %v611_v47 }
  0x24   : > { %7896 = vmatmul.mubr.msk.bf16.gmra.mxu0 %vm1432_vm1, %v550_v26  ;;  %8406 = vset.pattern.permute.xlu1 %v14089_v4  ;;  %v470_v55 = vld [vmem:[%s9705_s16 + $0x98] sm:$0xff]  ;;  %v472_v57 = vld [vmem:[%s9705_s16 + $0xa8] sm:$0xff]  ;;  %v617_v60 = vld [vmem:[%s9710_s23 + $0x90] sm:$0xff]  ;;  %v8447_v5 = vpack.i.bf16 %v614_v53, %v613_v52 }
  0x25   : > { %7899 = vmatprep.mubr.msk.bf16.mxu0 %vm1432_vm1, %v551_v27  ;;  %8408 = vperm.xlu1 %8406, %v8407_v30   ;;  %v556_v58 = vpack.c.bf16 %v470_v55, %v469_v54  ;;  %v557_v59 = vpack.c.bf16 %v472_v57, %v471_v56  ;;  %v618_v61 = vld [vmem:[%s9710_s23 + $0x98] sm:$0xff]  ;;  %v615_v63 = vld [vmem:[%s9710_s23 + $0x80] sm:$0xff]  ;;  %v616_v0 = vld [vmem:[%s9710_s23 + $0x88] sm:$0xff] }
  0x26   : > { %8402 = vperm.xlu0 %8379, %v8401_v46   ;;  %v619_v1 = vld [vmem:[%s9710_s23 + $0xa0] sm:$0xff]  ;;  %v620_v2 = vld [vmem:[%s9710_s23 + $0xa8] sm:$0xff]  ;;  %v473_v6 = vld [vmem:[%s9705_s16 + $0xb0] sm:$0xff]  ;;  %v8475_v14 = vpack.i.bf16 %v618_v61, %v617_v60  ;;  %v8470_v19 = vpack.i.bf16 %v616_v0, %v615_v63 }
  0x27   : > { %v474_v7 = vld [vmem:[%s9705_s16 + $0xb8] sm:$0xff]  ;;  %v475_v8 = vld [vmem:[%s9705_s16 + $0xc0] sm:$0xff]  ;;  %v476_v9 = vld [vmem:[%s9705_s16 + $0xc8] sm:$0xff]  ;;  %v8491_v20 = vpack.i.bf16 %v620_v2, %v619_v1 }
  0x28   : > { %v558_v10 = vpack.c.bf16 %v474_v7, %v473_v6  ;;  %v559_v11 = vpack.c.bf16 %v476_v9, %v475_v8  ;;  %v625_v12 = vld [vmem:[%s9710_s23 + $0xd0] sm:$0xff]  ;;  %v626_v13 = vld [vmem:[%s9710_s23 + $0xd8] sm:$0xff]  ;;  %v479_v17 = vld [vmem:[%s9705_s16 + $0xe0] sm:$0xff] }
  0x29   : > { %8412 = vset.pattern.permute.xlu1 %v14085_v3  ;;  %v477_v15 = vld [vmem:[%s9705_s16 + $0xd0] sm:$0xff]  ;;  %v478_v16 = vld [vmem:[%s9705_s16 + $0xd8] sm:$0xff]  ;;  %v480_v18 = vld [vmem:[%s9705_s16 + $0xe8] sm:$0xff]  ;;  %v9794_v29 = vpack.i.bf16 %v626_v13, %v625_v12 }
  0x2a   : > { %8414 = vperm.xlu1 %8412, %v8407_v30   ;;  %8425 = vperm.xlu0 %8379, %v8424_v51   ;;  %v560_v21 = vpack.c.bf16 %v478_v16, %v477_v15  ;;  %v621_v22 = vld [vmem:[%s9710_s23 + $0xb0] sm:$0xff]  ;;  %v561_v23 = vpack.c.bf16 %v480_v18, %v479_v17  ;;  %v622_v24 = vld [vmem:[%s9710_s23 + $0xb8] sm:$0xff]  ;;  %v627_v27 = vld [vmem:[%s9710_s23 + $0xe0] sm:$0xff] }
  0x2b   : > { %v657_v25 = vld [vmem:[%s9710_s23 + $0x1d0] sm:$0xff]  ;;  %v658_v26 = vld [vmem:[%s9710_s23 + $0x1d8] sm:$0xff]  ;;  %v628_v28 = vld [vmem:[%s9710_s23 + $0xe8] sm:$0xff]  ;;  %v8497_v39 = vpack.i.bf16 %v622_v24, %v621_v22 }
  0x2c   : > { %7900 = vmatmul.mubr.msk.bf16.gmra.mxu0 %vm1432_vm1, %v552_v35  ;;  %v481_v30 = vld [vmem:[%s9705_s16 + $0xf0] sm:$0xff]  ;;  %v482_v31 = vld [vmem:[%s9705_s16 + $0xf8] sm:$0xff]  ;;  %v483_v32 = vld [vmem:[%s9705_s16 + $0x100] sm:$0xff]  ;;  %v9804_v36 = vpack.i.bf16 %v658_v26, %v657_v25  ;;  %v8542_v43 = vpack.i.bf16 %v628_v28, %v627_v27 }
  0x2d   : > { %7903 = vmatprep.mubr.msk.bf16.mxu0 %vm1432_vm1, %v553_v38  ;;  %v484_v33 = vld [vmem:[%s9705_s16 + $0x108] sm:$0xff]  ;;  %v562_v34 = vpack.c.bf16 %v482_v31, %v481_v30  ;;  %v623_v37 = vld [vmem:[%s9710_s23 + $0xc0] sm:$0xff]  ;;  %v485_v40 = vld [vmem:[%s9705_s16 + $0x110] sm:$0xff] }
  0x2e   : > { %8418 = vset.pattern.permute.xlu1 %v14089_v4  ;;  %8429 = vset.pattern.permute.xlu0 %v14085_v3  ;;  %v563_v35 = vpack.c.bf16 %v484_v33, %v483_v32  ;;  %v624_v38 = vld [vmem:[%s9710_s23 + $0xc8] sm:$0xff]  ;;  %v486_v41 = vld [vmem:[%s9705_s16 + $0x118] sm:$0xff]  ;;  %v487_v42 = vld [vmem:[%s9705_s16 + $0x120] sm:$0xff] }
  0x2f   : > { %8420 = vperm.xlu1 %8418, %v8419_v45   ;;  %8431 = vperm.xlu0 %8429, %v8401_v46   ;;  %v488_v44 = vld [vmem:[%s9705_s16 + $0x128] sm:$0xff]  ;;  %v634_v46 = vld [vmem:[%s9710_s23 + $0x118] sm:$0xff]  ;;  %v564_v47 = vpack.c.bf16 %v486_v41, %v485_v40  ;;  %v635_v48 = vld [vmem:[%s9710_s23 + $0x120] sm:$0xff] }
  0x30   : > { %v666_v52 = vld [vmem:[%s9710_s23 + $0x218] sm:$0xff]  ;;  %v489_v53 = vld [vmem:[%s9705_s16 + $0x130] sm:$0xff]  ;;  %v491_v55 = vld [vmem:[%s9705_s16 + $0x140] sm:$0xff] }
  0x31   : > { %v490_v54 = vld [vmem:[%s9705_s16 + $0x138] sm:$0xff]  ;;  %v492_v56 = vld [vmem:[%s9705_s16 + $0x148] sm:$0xff]  ;;  %v641_v57 = vld [vmem:[%s9710_s23 + $0x150] sm:$0xff] }
  0x32   : > { %v566_v61 = vpack.c.bf16 %v490_v54, %v489_v53  ;;  %v629_v63 = vld [vmem:[%s9710_s23 + $0xf0] sm:$0xff]  ;;  %v630_v0 = vld [vmem:[%s9710_s23 + $0xf8] sm:$0xff]  ;;  %v643_v7 = vld [vmem:[%s9710_s23 + $0x160] sm:$0xff] }
  0x33   : > { %8435 = vset.pattern.permute.xlu1 %v14085_v3  ;;  %8453 = vperm.xlu0 %8429, %v8452_v62   ;;  %v494_v6 = vld [vmem:[%s9705_s16 + $0x158] sm:$0xff]  ;;  %v644_v8 = vld [vmem:[%s9710_s23 + $0x168] sm:$0xff]  ;;  %v495_v9 = vld [vmem:[%s9705_s16 + $0x160] sm:$0xff]  ;;  %v8537_v16 = vpack.i.bf16 %v630_v0, %v629_v63 }
  0x34   : > { %7904 = vmatmul.mubr.msk.bf16.gmra.mxu0 %vm1432_vm1, %v554_v49  ;;  %8437 = vperm.xlu1 %8435, %v8419_v45   ;;  %v633_v45 = vld [vmem:[%s9710_s23 + $0x110] sm:$0xff]  ;;  %v636_v49 = vld [vmem:[%s9710_s23 + $0x128] sm:$0xff]  ;;  %v498_v18 = vld [vmem:[%s9705_s16 + $0x178] sm:$0xff]  ;;  %v8632_v22 = vpack.i.bf16 %v644_v8, %v643_v7 }
  0x35   : > { %7907 = vmatprep.mubr.msk.bf16.mxu0 %vm1432_vm1, %v555_v50  ;;  %v565_v50 = vpack.c.bf16 %v488_v44, %v487_v42  ;;  %v9832_v60 = vpack.i.bf16 %v634_v46, %v633_v45  ;;  %v8581_v2 = vpack.i.bf16 %v636_v49, %v635_v48  ;;  %v632_v15 = vld [vmem:[%s9710_s23 + $0x108] sm:$0xff]  ;;  %v497_v17 = vld [vmem:[%s9705_s16 + $0x170] sm:$0xff]  ;;  %v650_v24 = vld [vmem:[%s9710_s23 + $0x198] sm:$0xff] }
  0x36   : > { %v651_v26 = vld [vmem:[%s9710_s23 + $0x1a0] sm:$0xff]  ;;  %v652_v27 = vld [vmem:[%s9710_s23 + $0x1a8] sm:$0xff]  ;;  %v501_v28 = vld [vmem:[%s9705_s16 + $0x190] sm:$0xff] }
  0x37   : > { %8457 = vset.pattern.permute.xlu0 %v14089_v4  ;;  %v673_v30 = vld [vmem:[%s9710_s23 + $0x250] sm:$0xff]  ;;  %v674_v31 = vld [vmem:[%s9710_s23 + $0x258] sm:$0xff]  ;;  %v503_v32 = vld [vmem:[%s9705_s16 + $0x1a0] sm:$0xff] }
  0x38   : > { %8442 = vperm.xlu1 %8435, %v8424_v51   ;;  %8459 = vperm.xlu0 %8457, %v8452_v62   ;;  %v665_v51 = vld [vmem:[%s9710_s23 + $0x210] sm:$0xff]  ;;  %v567_v62 = vpack.c.bf16 %v492_v56, %v491_v55  ;;  %v504_v33 = vld [vmem:[%s9705_s16 + $0x1a8] sm:$0xff]  ;;  %v638_v40 = vld [vmem:[%s9710_s23 + $0x138] sm:$0xff] }
  0x39   : > { %v9837_v1 = vpack.i.bf16 %v666_v52, %v665_v51  ;;  %v505_v41 = vld [vmem:[%s9705_s16 + $0x1b0] sm:$0xff]  ;;  %v506_v42 = vld [vmem:[%s9705_s16 + $0x1b8] sm:$0xff]  ;;  %v507_v44 = vld [vmem:[%s9705_s16 + $0x1c0] sm:$0xff] }
  0x3a   : > { %v508_v45 = vld [vmem:[%s9705_s16 + $0x1c8] sm:$0xff]  ;;  %v659_v48 = vld [vmem:[%s9710_s23 + $0x1e0] sm:$0xff]  ;;  %v509_v56 = vld [vmem:[%s9705_s16 + $0x1d0] sm:$0xff] }
  0x3b   : > { %v8922_v46 = vld [vmem:[%s14078_s5 + $0x8] sm:$0xff]   ;;  %v575_v51 = vpack.c.bf16 %v508_v45, %v507_v44  ;;  %v639_v52 = vld [vmem:[%s9710_s23 + $0x140] sm:$0xff] }
  0x3c   : > { %7908 = vmatmul.mubr.msk.bf16.gmra.mxu0 %vm1432_vm1, %v556_v58  ;;  %8446 = vset.pattern.permute.xlu1 %v14089_v4  ;;  %v642_v58 = vld [vmem:[%s9710_s23 + $0x158] sm:$0xff]  ;;  %v660_v49 = vld [vmem:[%s9710_s23 + $0x1e8] sm:$0xff]  ;;  %v8923_v54 = vld [vmem:[%s14078_s5] sm:$0xff]  }
  0x3d   : > { %7911 = vmatprep.mubr.msk.bf16.mxu0 %vm1432_vm1, %v557_v59  ;;  %8448 = vperm.xlu1 %8446, %v8447_v5   ;;  %v8509_v59 = vpack.i.bf16 %v624_v38, %v623_v37  ;;  %v573_v37 = vpack.c.bf16 %v504_v33, %v503_v32  ;;  %v640_v53 = vld [vmem:[%s9710_s23 + $0x148] sm:$0xff]  ;;  %v667_v63 = vld [vmem:[%s9710_s23 + $0x220] sm:$0xff]  ;;  %v681_v33 = vld [vmem:[%s9710_s23 + $0x290] sm:$0xff] }
  0x3e   : > { %8476 = vperm.xlu0 %8457, %v8475_v14   ;;  %7987 = vmatprep.subr.bf16.mxu1 %v8922_v46  ;;  %v668_v0 = vld [vmem:[%s9710_s23 + $0x228] sm:$0xff]  ;;  %v8599_v8 = vpack.i.bf16 %v640_v53, %v639_v52  ;;  %v529_v53 = vld [vmem:[%s9705_s16 + $0x270] sm:$0xff] }
  0x3f   : > { %7988 = vmatpush3.bf16.msra.mxu1 %v8922_v46  ;;  %v516_v7 = vld [vmem:[%s9705_s16 + $0x208] sm:$0xff] }
  0x40   : > { %7989 = vmatprep.subr.bf16.mxu1 %v8923_v54  ;;  %v684_v44 = vld [vmem:[%s9710_s23 + $0x2a8] sm:$0xff] }
  0x41   : > { %8463 = vset.pattern.permute.xlu1 %v14085_v3 }
  0x42   : > { %8465 = vperm.xlu1 %8463, %v8447_v5   ;;  %8492 = vperm.xlu0 %8457, %v8491_v20   ;;  %v493_v5 = vld [vmem:[%s9705_s16 + $0x150] sm:$0xff] }
  0x43   : > { %v568_v12 = vpack.c.bf16 %v494_v6, %v493_v5  ;;  %7990 = vmatpush3.bf16.msra.mxu1 %v8923_v54  ;;  %v514_v5 = vld [vmem:[%s9705_s16 + $0x1f8] sm:$0xff]  ;;  %v515_v6 = vld [vmem:[%s9705_s16 + $0x200] sm:$0xff] }
  0x44   : > { %7912 = vmatmul.mubr.msk.bf16.gmra.mxu0 %vm1432_vm1, %v558_v10  ;;  %v496_v10 = vld [vmem:[%s9705_s16 + $0x168] sm:$0xff]  ;;  %v530_v54 = vld [vmem:[%s9705_s16 + $0x278] sm:$0xff] }
  0x45   : > { %7915 = vmatprep.mubr.msk.bf16.mxu0 %vm1432_vm1, %v559_v11  ;;  %v9849_v11 = vpack.i.bf16 %v642_v58, %v641_v57  ;;  %v569_v13 = vpack.c.bf16 %v496_v10, %v495_v9  ;;  %v510_v57 = vld [vmem:[%s9705_s16 + $0x1d8] sm:$0xff]  ;;  %v511_v58 = vld [vmem:[%s9705_s16 + $0x1e0] sm:$0xff]  ;;  %v579_v10 = vpack.c.bf16 %v516_v7, %v515_v6  ;;  %v692_v7 = vld [vmem:[%s9710_s23 + $0x2e8] sm:$0xff] }
  0x46   : > { %8469 = vset.pattern.permute.xlu1 %v14089_v4  ;;  %8515 = vperm.xlu0 %8457, %v9794_v29   ;;  %v691_v6 = vld [vmem:[%s9710_s23 + $0x2e0] sm:$0xff] }
  0x47   : > { %8471 = vperm.xlu1 %8469, %v8470_v19  }
  0x4a   : > { %8519 = vset.pattern.permute.xlu0 %v14085_v3 }
  0x4b   : > { %8480 = vset.pattern.permute.xlu1 %v14085_v3  ;;  %8521 = vperm.xlu0 %8519, %v8491_v20   ;;  %v500_v20 = vld [vmem:[%s9705_s16 + $0x188] sm:$0xff] }
  0x4c   : > { %7916 = vmatmul.mubr.msk.bf16.gmra.mxu0 %vm1432_vm1, %v560_v21  ;;  %8482 = vperm.xlu1 %8480, %v8470_v19   ;;  %v499_v19 = vld [vmem:[%s9705_s16 + $0x180] sm:$0xff]  ;;  %v570_v21 = vpack.c.bf16 %v498_v18, %v497_v17  ;;  %v520_v17 = vld [vmem:[%s9705_s16 + $0x228] sm:$0xff]  ;;  %v8761_v18 = vpack.i.bf16 %v668_v0, %v667_v63 }
  0x4d   : > { %7919 = vmatprep.mubr.msk.bf16.mxu0 %vm1432_vm1, %v561_v23  ;;  %v649_v23 = vld [vmem:[%s9710_s23 + $0x190] sm:$0xff]  ;;  %v571_v25 = vpack.c.bf16 %v500_v20, %v499_v19  ;;  %v655_v0 = vld [vmem:[%s9710_s23 + $0x1c0] sm:$0xff] }
  0x4e   : > { %v9877_v38 = vpack.i.bf16 %v650_v24, %v649_v23  ;;  %v647_v24 = vld [vmem:[%s9710_s23 + $0x180] sm:$0xff] }
  0x4f   : > { %8543 = vperm.xlu0 %8519, %v8542_v43  }
  0x50   : > { %8487 = vperm.xlu1 %8480, %v8475_v14   ;;  %v631_v14 = vld [vmem:[%s9710_s23 + $0x100] sm:$0xff] }
  0x53   : > { %8547 = vset.pattern.permute.xlu0 %v14089_v4 }
  0x54   : > { %7920 = vmatmul.mubr.msk.bf16.gmra.mxu0 %vm1432_vm1, %v562_v34  ;;  %8496 = vset.pattern.permute.xlu1 %v14089_v4  ;;  %v8560_v34 = vpack.i.bf16 %v632_v15, %v631_v14  ;;  %v517_v14 = vld [vmem:[%s9705_s16 + $0x210] sm:$0xff]  ;;  %v518_v15 = vld [vmem:[%s9705_s16 + $0x218] sm:$0xff] }
  0x55   : > { %7923 = vmatprep.mubr.msk.bf16.mxu0 %vm1432_vm1, %v563_v35  ;;  %8498 = vperm.xlu1 %8496, %v8497_v39   ;;  %v580_v19 = vpack.c.bf16 %v518_v15, %v517_v14 }
  0x56   : > { %8549 = vperm.xlu0 %8547, %v8542_v43   ;;  %v8671_v43 = vpack.i.bf16 %v652_v27, %v651_v26  ;;  %v521_v27 = vld [vmem:[%s9705_s16 + $0x230] sm:$0xff] }
  0x59   : > { %8502 = vset.pattern.permute.xlu1 %v14085_v3 }
  0x5a   : > { %8504 = vperm.xlu1 %8502, %v8497_v39   ;;  %8566 = vperm.xlu0 %8547, %v9832_v60   ;;  %v637_v39 = vld [vmem:[%s9710_s23 + $0x130] sm:$0xff] }
  0x5b   : > { %v8587_v55 = vpack.i.bf16 %v638_v40, %v637_v39  ;;  %v526_v40 = vld [vmem:[%s9705_s16 + $0x258] sm:$0xff] }
  0x5c   : > { %7924 = vmatmul.mubr.msk.bf16.gmra.mxu0 %vm1432_vm1, %v564_v47  ;;  %v9892_v47 = vpack.i.bf16 %v674_v31, %v673_v30  ;;  %v524_v30 = vld [vmem:[%s9705_s16 + $0x248] sm:$0xff] }
  0x5d   : > { %7927 = vmatprep.mubr.msk.bf16.mxu0 %vm1432_vm1, %v565_v50  ;;  %v574_v50 = vpack.c.bf16 %v506_v42, %v505_v41  ;;  %v527_v41 = vld [vmem:[%s9705_s16 + $0x260] sm:$0xff]  ;;  %v528_v42 = vld [vmem:[%s9705_s16 + $0x268] sm:$0xff] }
  0x5e   : > { %8508 = vset.pattern.permute.xlu1 %v14089_v4  ;;  %8582 = vperm.xlu0 %8547, %v8581_v2  }
  0x5f   : > { %8510 = vperm.xlu1 %8508, %v8509_v59  }
  0x62   : > { %8605 = vperm.xlu0 %8547, %v9849_v11  }
  0x63   : > { %8525 = vset.pattern.permute.xlu1 %v14085_v3 }
  0x64   : > { %7928 = vmatmul.mubr.msk.bf16.gmra.mxu0 %vm1432_vm1, %v566_v61  ;;  %8527 = vperm.xlu1 %8525, %v8509_v59   ;;  %v512_v59 = vld [vmem:[%s9705_s16 + $0x1e8] sm:$0xff] }
  0x65   : > { %7931 = vmatprep.mubr.msk.bf16.mxu0 %vm1432_vm1, %v567_v62  ;;  %v577_v61 = vpack.c.bf16 %v512_v59, %v511_v58  ;;  %v8722_v62 = vpack.i.bf16 %v660_v49, %v659_v48  ;;  %v585_v48 = vpack.c.bf16 %v528_v42, %v527_v41  ;;  %v586_v58 = vpack.c.bf16 %v530_v54, %v529_v53  ;;  %v689_v59 = vld [vmem:[%s9710_s23 + $0x2d0] sm:$0xff]  ;;  %v543_v41 = vld [vmem:[%s9705_s16 + $0x2e0] sm:$0xff]  ;;  %v544_v42 = vld [vmem:[%s9705_s16 + $0x2e8] sm:$0xff] }
  0x66   : > { %8609 = vset.pattern.permute.xlu0 %v14085_v3  ;;  %v671_v53 = vld [vmem:[%s9710_s23 + $0x240] sm:$0xff]  ;;  %v672_v54 = vld [vmem:[%s9710_s23 + $0x248] sm:$0xff] }
  0x67   : > { %8611 = vperm.xlu0 %8609, %v8581_v2   ;;  %v513_v2 = vld [vmem:[%s9705_s16 + $0x1f0] sm:$0xff] }
  0x68   : > { %8532 = vperm.xlu1 %8525, %v9794_v29   ;;  %v502_v29 = vld [vmem:[%s9705_s16 + $0x198] sm:$0xff]  ;;  %v578_v9 = vpack.c.bf16 %v514_v5, %v513_v2  ;;  %v656_v2 = vld [vmem:[%s9710_s23 + $0x1c8] sm:$0xff] }
  0x69   : > { %v572_v35 = vpack.c.bf16 %v502_v29, %v501_v28  ;;  %v522_v28 = vld [vmem:[%s9705_s16 + $0x238] sm:$0xff]  ;;  %v523_v29 = vld [vmem:[%s9705_s16 + $0x240] sm:$0xff] }
  0x6a   : > { %v583_v32 = vpack.c.bf16 %v524_v30, %v523_v29  ;;  %v661_v29 = vld [vmem:[%s9710_s23 + $0x1f0] sm:$0xff]  ;;  %v662_v30 = vld [vmem:[%s9710_s23 + $0x1f8] sm:$0xff] }
  0x6b   : > { %8633 = vperm.xlu0 %8609, %v8632_v22  }
  0x6c   : > { %7932 = vmatmul.mubr.msk.bf16.gmra.mxu0 %vm1432_vm1, %v568_v12  ;;  %8536 = vset.pattern.permute.xlu1 %v14089_v4  ;;  %v645_v12 = vld [vmem:[%s9710_s23 + $0x170] sm:$0xff] }
  0x6d   : > { %7935 = vmatprep.mubr.msk.bf16.mxu0 %vm1432_vm1, %v569_v13  ;;  %8538 = vperm.xlu1 %8536, %v8537_v16   ;;  %v646_v13 = vld [vmem:[%s9710_s23 + $0x178] sm:$0xff] }
  0x6e   : > { %v8627_v26 = vpack.i.bf16 %v646_v13, %v645_v12  ;;  %v535_v12 = vld [vmem:[%s9705_s16 + $0x2a0] sm:$0xff]  ;;  %v536_v13 = vld [vmem:[%s9705_s16 + $0x2a8] sm:$0xff] }
  0x6f   : > { %8637 = vset.pattern.permute.xlu0 %v14089_v4  ;;  %v589_v15 = vpack.c.bf16 %v536_v13, %v535_v12 }
  0x70   : > { %8639 = vperm.xlu0 %8637, %v8632_v22   ;;  %v676_v22 = vld [vmem:[%s9710_s23 + $0x268] sm:$0xff] }
  0x71   : > { %8553 = vset.pattern.permute.xlu1 %v14085_v3 }
  0x72   : > { %8555 = vperm.xlu1 %8553, %v8537_v16   ;;  %v519_v16 = vld [vmem:[%s9705_s16 + $0x220] sm:$0xff] }
  0x73   : > { %v581_v20 = vpack.c.bf16 %v520_v17, %v519_v16 }
  0x74   : > { %7936 = vmatmul.mubr.msk.bf16.gmra.mxu0 %vm1432_vm1, %v570_v21  ;;  %8656 = vperm.xlu0 %8637, %v9877_v38   ;;  %v675_v21 = vld [vmem:[%s9710_s23 + $0x260] sm:$0xff] }
  0x75   : > { %7939 = vmatprep.mubr.msk.bf16.mxu0 %vm1432_vm1, %v571_v25  ;;  %v648_v25 = vld [vmem:[%s9710_s23 + $0x188] sm:$0xff]  ;;  %v8812_v39 = vpack.i.bf16 %v676_v22, %v675_v21  ;;  %v539_v21 = vld [vmem:[%s9705_s16 + $0x2c0] sm:$0xff] }
  0x76   : > { %8559 = vset.pattern.permute.xlu1 %v14089_v4  ;;  %v8650_v45 = vpack.i.bf16 %v648_v25, %v647_v24  ;;  %v540_v22 = vld [vmem:[%s9705_s16 + $0x2c8] sm:$0xff]  ;;  %v8689_v24 = vpack.i.bf16 %v656_v2, %v655_v0  ;;  %v8897_v25 = vpack.i.bf16 %v692_v7, %v691_v6  ;;  %v8717_v2 = vpack.i.bf16 %v662_v30, %v661_v29  ;;  %v545_v6 = vld [vmem:[%s9705_s16 + $0x2f0] sm:$0xff]  ;;  %v546_v7 = vld [vmem:[%s9705_s16 + $0x2f8] sm:$0xff] }
  0x77   : > { %8561 = vperm.xlu1 %8559, %v8560_v34   ;;  %v680_v0 = vld [vmem:[%s9710_s23 + $0x288] sm:$0xff]  ;;  %v594_v12 = vpack.c.bf16 %v546_v7, %v545_v6  ;;  %v686_v29 = vld [vmem:[%s9710_s23 + $0x2b8] sm:$0xff] }
  0x78   : > { %8672 = vperm.xlu0 %8637, %v8671_v43  }
  0x7b   : > { %8570 = vset.pattern.permute.xlu1 %v14085_v3 }
  0x7c   : > { %7940 = vmatmul.mubr.msk.bf16.gmra.mxu0 %vm1432_vm1, %v572_v35  ;;  %8572 = vperm.xlu1 %8570, %v8560_v34   ;;  %v682_v34 = vld [vmem:[%s9710_s23 + $0x298] sm:$0xff] }
  0x7d   : > { %7943 = vmatprep.mubr.msk.bf16.mxu0 %vm1432_vm1, %v573_v37  ;;  %8695 = vperm.xlu0 %8637, %v9804_v36   ;;  %v525_v37 = vld [vmem:[%s9705_s16 + $0x250] sm:$0xff]  ;;  %v9969_v52 = vpack.i.bf16 %v682_v34, %v681_v33  ;;  %v542_v34 = vld [vmem:[%s9705_s16 + $0x2d8] sm:$0xff] }
  0x7e   : > { %v584_v46 = vpack.c.bf16 %v526_v40, %v525_v37  ;;  %v541_v33 = vld [vmem:[%s9705_s16 + $0x2d0] sm:$0xff]  ;;  %v663_v37 = vld [vmem:[%s9710_s23 + $0x200] sm:$0xff] }
  0x7f   : > { %14101 = vst [vmem:[#allocation3_spill] sm:$0xff] %v9969_v52 }
  0x80   : > { %8577 = vperm.xlu1 %8570, %v9832_v60   ;;  %v576_v60 = vpack.c.bf16 %v510_v57, %v509_v56  ;;  %v531_v56 = vld [vmem:[%s9705_s16 + $0x280] sm:$0xff]  ;;  %v532_v57 = vld [vmem:[%s9705_s16 + $0x288] sm:$0xff] }
  0x81   : > { %8699 = vset.pattern.permute.xlu0 %v14085_v3 }
  0x82   : > { %8701 = vperm.xlu0 %8699, %v8671_v43   ;;  %v683_v43 = vld [vmem:[%s9710_s23 + $0x2a0] sm:$0xff] }
  0x83   : > { %v8851_v63 = vpack.i.bf16 %v684_v44, %v683_v43  ;;  %v669_v44 = vld [vmem:[%s9710_s23 + $0x230] sm:$0xff] }
  0x84   : > { %7944 = vmatmul.mubr.msk.bf16.gmra.mxu0 %vm1432_vm1, %v574_v50  ;;  %8586 = vset.pattern.permute.xlu1 %v14089_v4  ;;  %v653_v50 = vld [vmem:[%s9710_s23 + $0x1b0] sm:$0xff] }
  0x85   : > { %7947 = vmatprep.mubr.msk.bf16.mxu0 %vm1432_vm1, %v575_v51  ;;  %8588 = vperm.xlu1 %8586, %v8587_v55   ;;  %v654_v51 = vld [vmem:[%s9710_s23 + $0x1b8] sm:$0xff] }
  0x86   : > { %8723 = vperm.xlu0 %8699, %v8722_v62  }
  0x89   : > { %8592 = vset.pattern.permute.xlu1 %v14085_v3 }
  0x8a   : > { %8594 = vperm.xlu1 %8592, %v8587_v55   ;;  %8727 = vset.pattern.permute.xlu0 %v14089_v4 }
  0x8b   : > { %8729 = vperm.xlu0 %8727, %v8722_v62  }
  0x8c   : > { %7948 = vmatmul.mubr.msk.bf16.gmra.mxu0 %vm1432_vm1, %v576_v60  ;;  %v690_v60 = vld [vmem:[%s9710_s23 + $0x2d8] sm:$0xff] }
  0x8d   : > { %7951 = vmatprep.mubr.msk.bf16.mxu0 %vm1432_vm1, %v577_v61  ;;  %v587_v61 = vpack.c.bf16 %v532_v57, %v531_v56  ;;  %v10005_v17 = vpack.i.bf16 %v690_v60, %v689_v59  ;;  %v677_v56 = vld [vmem:[%s9710_s23 + $0x270] sm:$0xff]  ;;  %v678_v57 = vld [vmem:[%s9710_s23 + $0x278] sm:$0xff] }
  0x8e   : > { %8598 = vset.pattern.permute.xlu1 %v14089_v4 }
  0x8f   : > { %8600 = vperm.xlu1 %8598, %v8599_v8   ;;  %8746 = vperm.xlu0 %8727, %v9837_v1   ;;  %14102 = vst [vmem:[#allocation4_spill] sm:$0xff] %v10005_v17 }
  0x93   : > { %8615 = vset.pattern.permute.xlu1 %v14085_v3  ;;  %8762 = vperm.xlu0 %8727, %v8761_v18  }
  0x94   : > { %7952 = vmatmul.mubr.msk.bf16.gmra.mxu0 %vm1432_vm1, %v578_v9  ;;  %8617 = vperm.xlu1 %8615, %v8599_v8   ;;  %v8677_v8 = vpack.i.bf16 %v654_v51, %v653_v50  ;;  %v533_v9 = vld [vmem:[%s9705_s16 + $0x290] sm:$0xff]  ;;  %v593_v50 = vpack.c.bf16 %v544_v42, %v543_v41 }
  0x95   : > { %7955 = vmatprep.mubr.msk.bf16.mxu0 %vm1432_vm1, %v579_v10  ;;  %v534_v10 = vld [vmem:[%s9705_s16 + $0x298] sm:$0xff] }
  0x97   : > { %v9935_v23 = vpop.permute.xlu1 %8392  ;;  %8785 = vperm.xlu0 %8727, %v9892_v47  }
  0x98   : > { %8622 = vperm.xlu1 %8615, %v9849_v11   ;;  %v582_v11 = vpack.c.bf16 %v522_v28, %v521_v27  ;;  %v9983_v62 = vpop.permute.xlu0 %8381  ;;  %v591_v28 = vpack.c.bf16 %v540_v22, %v539_v21  ;;  %v8395_v13 = vunpack.i.h.bf16 %v9935_v23 }
  0x99   : > { %v8384_v22 = vunpack.i.h.bf16 %v9983_v62 }
  0x9b   : > { %v9946_v31 = vpop.permute.xlu1 %8397  ;;  %8789 = vset.pattern.permute.xlu0 %v14085_v3 }
  0x9c   : > { %7956 = vmatmul.mubr.msk.bf16.gmra.mxu0 %vm1432_vm1, %v580_v19  ;;  %8626 = vset.pattern.permute.xlu1 %v14089_v4  ;;  %v9999_v14 = vpop.permute.xlu0 %8386  ;;  %v538_v19 = vld [vmem:[%s9705_s16 + $0x2b8] sm:$0xff]  ;;  %v8399_v21 = vunpack.i.l.bf16 %v9946_v31 }
  0x9d   : > { %7959 = vmatprep.mubr.msk.bf16.mxu0 %vm1432_vm1, %v581_v20  ;;  %8628 = vperm.xlu1 %8626, %v8627_v26  }
  0x9e   : > { %8791 = vperm.xlu0 %8789, %v8761_v18   ;;  %v537_v18 = vld [vmem:[%s9705_s16 + $0x2b0] sm:$0xff] }
  0x9f   : > { %v590_v27 = vpack.c.bf16 %v538_v19, %v537_v18  ;;  %v8383_v18 = vunpack.i.l.bf16 %v9983_v62 }
  0xa0   : > { %v9953_v35 = vpop.permute.xlu1 %8408 }
  0xa1   : > { %8643 = vset.pattern.permute.xlu1 %v14085_v3  ;;  %v10012_v20 = vpop.permute.xlu0 %8402  ;;  %v8410_v30 = vunpack.i.l.bf16 %v9953_v35  ;;  %v8411_v42 = vunpack.i.h.bf16 %v9953_v35 }
  0xa2   : > { %8645 = vperm.xlu1 %8643, %v8627_v26   ;;  %8813 = vperm.xlu0 %8789, %v8812_v39  }
  0xa4   : > { %7960 = vmatmul.mubr.msk.bf16.gmra.mxu0 %vm1432_vm1, %v582_v11  ;;  %v1321_v11 = vlaneseq }
  0xa5   : > { %7963 = vmatprep.mubr.msk.bf16.mxu0 %vm1432_vm1, %v583_v32  ;;  %v9964_v49 = vpop.permute.xlu1 %8414  ;;  %v10023_v32 = vpop.permute.xlu0 %8425 }
  0xa6   : > { %8649 = vset.pattern.permute.xlu1 %v14089_v4  ;;  %8817 = vset.pattern.permute.xlu0 %v14089_v4  ;;  %v1322_v43 = vshrl.u32 %v1321_v11, 7  ;;  %v10085_v11 = vpack.i.bf16 %v672_v54, %v671_v53 }
  0xa7   : > { %8651 = vperm.xlu1 %8649, %v8650_v45   ;;  %8819 = vperm.xlu0 %8817, %v8812_v39   ;;  %v664_v39 = vld [vmem:[%s9710_s23 + $0x208] sm:$0xff] }
  0xa8   : > { %v2384_v59 = vsub.s32 1, %v1322_v43  ;;  %v1323_v60 = vsub.s32 0, %v1322_v43 }
  0xaa   : > { %v9976_v55 = vpop.permute.xlu1 %8420  ;;  %v10042_v51 = vpop.permute.xlu0 %8431 }
  0xab   : > { %8660 = vset.pattern.permute.xlu1 %v14085_v3  ;;  %8836 = vperm.xlu0 %8817, %v9969_v52   ;;  %v8423_v54 = vunpack.i.h.bf16 %v9976_v55  ;;  %v8422_v35 = vunpack.i.l.bf16 %v9976_v55 }
  0xac   : > { %7964 = vmatmul.mubr.msk.bf16.gmra.mxu0 %vm1432_vm1, %v584_v46  ;;  %8662 = vperm.xlu1 %8660, %v8650_v45   ;;  %v670_v45 = vld [vmem:[%s9710_s23 + $0x238] sm:$0xff]  ;;  %v839_v46 = vld [vmem:[%s14076_s3] sm:$0x1] }
  0xad   : > { %7967 = vmatprep.mubr.msk.bf16.mxu0 %vm1432_vm1, %v585_v48  ;;  %v592_v48 = vpack.c.bf16 %v542_v34, %v541_v33  ;;  %v10071_v19 = vpack.i.bf16 %v670_v45, %v669_v44  ;;  %v10087_v33 = vpack.i.bf16 %v678_v57, %v677_v56  ;;  %v8405_v56 = vunpack.i.h.bf16 %v10012_v20 }
  0xae   : > { %v8404_v57 = vunpack.i.l.bf16 %v10012_v20  ;;  %v8433_v20 = vunpack.i.l.bf16 %v10042_v51 }
  0xaf   : > { %v9988_v5 = vpop.permute.xlu1 %8437  ;;  %8852 = vperm.xlu0 %8817, %v8851_v63  }
  0xb0   : > { %8667 = vperm.xlu1 %8660, %v9877_v38   ;;  %v588_v38 = vpack.c.bf16 %v534_v10, %v533_v9 }
  0xb3   : > { %8862 = vset.pattern.permute.xlu0 %v14085_v3  ;;  %v10003_v16 = vpop.permute.xlu1 %8442 }
  0xb4   : > { %7968 = vmatmul.mubr.msk.bf16.gmra.mxu0 %vm1432_vm1, %v586_v58  ;;  %8676 = vset.pattern.permute.xlu1 %v14089_v4  ;;  %v840_v58 = vunpack.c.l.bf16 %v839_v46 }
  0xb5   : > { %7971 = vmatprep.mubr.msk.bf16.mxu0 %vm1432_vm1, %v587_v61  ;;  %8678 = vperm.xlu1 %8676, %v8677_v8  }
  0xb6   : > { %8864 = vperm.xlu0 %8862, %v8851_v63   ;;  %v679_v63 = vld [vmem:[%s9710_s23 + $0x280] sm:$0xff]  ;;  %v10059_v9 = vrot.slane %v840_v58, %v2384_v59  ;;  %v10061_v10 = vrot.slane %v840_v58, %v1323_v60  ;;  %v8428_v58 = vunpack.i.h.bf16 %v10023_v32  ;;  %v8427_v59 = vunpack.i.l.bf16 %v10023_v32 }
  0xb7   : > { %v10106_v41 = vpack.i.bf16 %v680_v0, %v679_v63  ;;  %v8439_v60 = vunpack.i.l.bf16 %v9988_v5  ;;  %v8434_v0 = vunpack.i.h.bf16 %v10042_v51 }
  0xb8   : > { %v10018_v26 = vpop.permute.xlu1 %8448  ;;  %14103 = vst [vmem:[#allocation5_spill] sm:$0xff] %v10061_v10  ;;  %v10090_v62 = vmul.f32 %v8395_v13, %v10059_v9  ;;  %v10119_v53 = vmul.f32 %v8410_v30, %v10061_v10  ;;  %v10133_v55 = vmul.f32 %v8411_v42, %v10061_v10  ;;  %v10148_v13 = vmul.f32 %v8404_v57, %v10061_v10 }
  0xb9   : > { %8682 = vset.pattern.permute.xlu1 %v14085_v3  ;;  %v10157_v51 = vmul.f32 %v8423_v54, %v10061_v10  ;;  %v10174_v42 = vmul.f32 %v8434_v0, %v10059_v9  ;;  %v10182_v54 = vmul.f32 %v8433_v20, %v10059_v9 }
  0xba   : > { %8684 = vperm.xlu1 %8682, %v8677_v8   ;;  %8880 = vset.pattern.permute.xlu0 %v14089_v4  ;;  %v10057_v8 = vpop.permute.xlu0 %8453 }
  0xbb   : > { %8882 = vperm.xlu0 %8880, %v10005_v17  }
  0xbc   : > { %7972 = vmatmul.mubr.msk.bf16.gmra.mxu0 %vm1432_vm1, %v588_v38  ;;  %v8394_v38 = vunpack.i.l.bf16 %v9935_v23  ;;  %v8388_v23 = vunpack.i.l.bf16 %v9999_v14 }
  0xbd   : > { %7975 = vmatprep.mubr.msk.bf16.mxu0 %vm1432_vm1, %v589_v15  ;;  %v10031_v40 = vpop.permute.xlu1 %8465 }
  0xbe   : > { %8688 = vset.pattern.permute.xlu1 %v14089_v4  ;;  %v10096_v34 = vmul.f32 %v8394_v38, %v10059_v9  ;;  %v1327_v44 = vmul.f32 %v8388_v23, %v10061_v10  ;;  %v10151_v38 = vmul.f32 %v8405_v56, %v10061_v10 }
  0xbf   : > { %8690 = vperm.xlu1 %8688, %v8689_v24   ;;  %8898 = vperm.xlu0 %8880, %v8897_v25  }
  0xc2   : > { %v10048_v61 = vpop.permute.xlu1 %8471 }
  0xc3   : > { %8705 = vset.pattern.permute.xlu1 %v14085_v3  ;;  %8908 = vset.pattern.permute.xlu0 %v14085_v3 }
  0xc4   : > { %7976 = vmatmul.mubr.msk.bf16.gmra.mxu0 %vm1432_vm1, %v590_v27  ;;  %8707 = vperm.xlu1 %8705, %v8689_v24   ;;  %v10075_v24 = vpop.permute.xlu0 %8459  ;;  %v8389_v27 = vunpack.i.h.bf16 %v9999_v14  ;;  %v10099_v14 = vmul.f32 %v8399_v21, %v10059_v9  ;;  %v8445_v21 = vunpack.i.h.bf16 %v10003_v16 }
  0xc5   : > { %7979 = vmatprep.mubr.msk.bf16.mxu0 %vm1432_vm1, %v591_v28  ;;  %8910 = vperm.xlu0 %8908, %v8897_v25   ;;  %v8400_v25 = vunpack.i.h.bf16 %v9946_v31  ;;  %v685_v28 = vld [vmem:[%s9710_s23 + $0x2b0] sm:$0xff]  ;;  %v10093_v31 = vmul.f32 %v8383_v18, %v10061_v10  ;;  %v10154_v18 = vmul.f32 %v8422_v35, %v10061_v10  ;;  %v8462_v57 = vunpack.i.h.bf16 %v10075_v24 }
  0xc6   : > { %v1328_v45 = vmul.f32 %v8389_v27, %v10061_v10  ;;  %v10167_v27 = vpack.i.bf16 %v686_v29, %v685_v28  ;;  %v8455_v29 = vunpack.i.l.bf16 %v10057_v8 }
  0xc7   : > { %v10068_v15 = vpop.permute.xlu1 %8482  ;;  %v10114_v46 = vmul.f32 %v8400_v25, %v10059_v9  ;;  %v10165_v25 = vmul.f32 %v8428_v58, %v10061_v10  ;;  %v8461_v58 = vunpack.i.l.bf16 %v10075_v24 }
  0xc8   : > { %8712 = vperm.xlu1 %8705, %v9804_v36   ;;  %v10064_v36 = vpack.i.bf16 %v664_v39, %v663_v37  ;;  %v10102_v37 = vmul.f32 %v8384_v22, %v10061_v10  ;;  %v10104_v39 = vpop.permute.xlu0 %8476  ;;  %v10162_v22 = vmul.f32 %v8427_v59, %v10061_v10  ;;  %14104 = vst [vmem:[#allocation6_spill] sm:$0xff] %v10167_v27  ;;  %v8468_v59 = vunpack.i.h.bf16 %v10031_v40 }
  0xc9   : > { %v8478_v24 = vunpack.i.l.bf16 %v10104_v39 }
  0xcb   : > { %v10109_v43 = vpop.permute.xlu1 %8487 }
  0xcc   : > { %7980 = vmatmul.mubr.msk.bf16.gmra.mxu0 %vm1432_vm1, %v592_v48  ;;  %8716 = vset.pattern.permute.xlu1 %v14089_v4  ;;  %v8417_v48 = vunpack.i.h.bf16 %v9964_v49  ;;  %v10143_v32 = vpop.permute.xlu0 %8492 }
  0xcd   : > { %7983 = vmatprep.mubr.msk.bf16.mxu0 %vm1432_vm1, %v593_v50  ;;  %8718 = vperm.xlu1 %8716, %v8717_v2   ;;  %v8416_v50 = vunpack.i.l.bf16 %v9964_v49  ;;  %v8440_v49 = vunpack.i.h.bf16 %v9988_v5 }
  0xce   : > { %v10141_v7 = vmul.f32 %v8417_v48, %v10059_v9  ;;  %v10178_v48 = vmul.f32 %v8439_v60, %v10059_v9  ;;  %v10194_v60 = vmul.f32 %v8445_v21, %v10059_v9  ;;  %v10207_v21 = vmul.f32 %v8455_v29, %v10059_v9 }
  0xcf   : > { %v10138_v6 = vmul.f32 %v8416_v50, %v10059_v9  ;;  %v10170_v23 = vmul.f32 %v8440_v49, %v10059_v9  ;;  %v8450_v50 = vunpack.i.l.bf16 %v10018_v26  ;;  %v8467_v49 = vunpack.i.l.bf16 %v10031_v40 }
  0xd0   : > { %v8516_v0 = vpop.permute.xlu0 %8515  ;;  %v8473_v40 = vunpack.i.l.bf16 %v10048_v61  ;;  %v8495_v29 = vunpack.i.h.bf16 %v10143_v32 }
  0xd1   : > { %8733 = vset.pattern.permute.xlu1 %v14085_v3  ;;  %v8517_v17 = vunpack.i.l.bf16 %v8516_v0 }
  0xd2   : > { %8735 = vperm.xlu1 %8733, %v8717_v2   ;;  %v8444_v2 = vunpack.i.l.bf16 %v10003_v16  ;;  %v8456_v16 = vunpack.i.h.bf16 %v10057_v8  ;;  %v10265_v52 = vmul.f32 %v8495_v29, %v10061_v10  ;;  %v14111_v29 = vmov 1  }
  0xd4   : > { %7984 = vmatmul.mubr.msk.bf16.gmra.mxu0 %vm1432_vm1, %v594_v12  ;;  %v10145_v12 = vpop.permute.xlu1 %8498  ;;  %v10185_v28 = vmul.f32 %v8444_v2, %v10059_v9  ;;  %v10200_v8 = vmul.f32 %v8456_v16, %v10059_v9  ;;  %14109 = vst [vmem:[#allocation11_spill] sm:$0xff] %v10265_v52 }
  0xd6   : > { %8739 = vset.pattern.permute.xlu1 %v14089_v4  ;;  %14105 = vst [vmem:[#allocation7_spill] sm:$0xff] %v10200_v8 }
  0xd7   : > { %8741 = vperm.xlu1 %8739, %v10064_v36  }
  0xd8   : > { %v10196_v2 = vpop.permute.xlu1 %8504 }
  0xdb   : > { %8750 = vset.pattern.permute.xlu1 %v14085_v3  ;;  %v10210_v3 = vmul.f32 %v8450_v50, %v10061_v10  ;;  %v10228_v50 = vmul.f32 %v8467_v49, %v10059_v9 }
  0xdc   : > { %v7893_v63 = vpop.f32.mrf.mxu0  ;;  %8752 = vperm.xlu1 %8750, %v10064_v36   ;;  %v8451_v36 = vunpack.i.h.bf16 %v10018_v26 }
  0xdd   : > { %v1624_v35 = vadd.f32 %v7893_v63, %v1327_v44  ;;  %v8479_v44 = vunpack.i.h.bf16 %v10104_v39  ;;  %v8474_v63 = vunpack.i.h.bf16 %v10048_v61  ;;  %v10220_v39 = vmul.f32 %v8462_v57, %v10061_v10  ;;  %v10225_v61 = vld [vmem:[%s14077_s4] ss:$0 sm:$0xff] }
  0xde   : > { %v1615_v5 = vpop.f32.mrf.mxu0  ;;  %v10217_v16 = vmul.f32 %v8451_v36, %v10061_v10 }
  0xdf   : > { %v10241_v27 = vmul.f32 %v8479_v44, %v10061_v10  ;;  %v1616_v49 = vadd.f32 %v1615_v5, %v10093_v31  ;;  %v10256_v31 = vpop.permute.xlu1 %8510 }
  0xe0   : > { %v7894_v30 = vpop.f32.mrf.mxu0  ;;  %8757 = vperm.xlu1 %8750, %v9837_v1   ;;  %v2484_v1 = vadd.f32 %v10099_v14, %v1624_v35  ;;  %v10231_v14 = vmul.f32 %v8468_v59, %v10059_v9  ;;  %v8494_v35 = vunpack.i.l.bf16 %v10143_v32  ;;  %v10246_v59 = vmul.f32 %v8473_v40, %v10061_v10 }
  0xe1   : > { %v1627_v20 = vadd.f32 %v7894_v30, %v1328_v45  ;;  %v10214_v30 = vmul.f32 %v8461_v58, %v10061_v10  ;;  %v10238_v58 = vmul.f32 %v8478_v24, %v10061_v10  ;;  %14106 = vst [vmem:[#allocation8_spill] sm:$0xff] %v10241_v27  ;;  %v8518_v32 = vunpack.i.h.bf16 %v8516_v0 }
  0xe2   : > { %v1618_v56 = vpop.f32.mrf.mxu0  ;;  %v8485_v24 = vunpack.i.h.bf16 %v10068_v15  ;;  %v10254_v44 = vadd.f32 %v10225_v61, %v2484_v1  ;;  %v8490_v0 = vunpack.i.h.bf16 %v10109_v43 }
  0xe3   : > { %v2485_v36 = vadd.f32 %v10114_v46, %v1627_v20  ;;  %v10249_v46 = vmul.f32 %v8474_v63, %v10061_v10  ;;  %v8522_v20 = vpop.permute.xlu0 %8521  ;;  %v1619_v5 = vadd.f32 %v1618_v56, %v10102_v37  ;;  %v10275_v37 = vmul.f32 %v8517_v17, %v10061_v10  ;;  %v687_v56 = vld [vmem:[%s9710_s23 + $0x2c0] sm:$0xff] }
  0xe4   : > { %v7897_v26 = vpop.f32.mrf.mxu0  ;;  %8766 = vset.pattern.permute.xlu1 %v14089_v4  ;;  %v8484_v4 = vunpack.i.l.bf16 %v10068_v15  ;;  %v8489_v15 = vunpack.i.l.bf16 %v10109_v43  ;;  %v8524_v52 = vunpack.i.h.bf16 %v8522_v20  ;;  %v10283_v43 = vmul.f32 %v8518_v32, %v10061_v10 }
  0xe5   : > { %8768 = vperm.xlu1 %8766, %v10071_v19   ;;  %14107 = vst [vmem:[#allocation9_spill] sm:$0xff] %v10249_v46  ;;  %v1640_v63 = vadd.f32 %v7897_v26, %v10119_v53  ;;  %v10262_v46 = vmul.f32 %v8494_v35, %v10061_v10  ;;  %v10269_v1 = vadd.f32 %v10225_v61, %v2485_v36  ;;  %14110 = vst [vmem:[#allocation12_spill] sm:$0xff] %v10275_v37  ;;  %v688_v53 = vld [vmem:[%s9710_s23 + $0x2c8] sm:$0xff] }
  0xe6   : > { %v1631_v45 = vpop.f32.mrf.mxu0  ;;  %v2482_v26 = vadd.f32 %v10096_v34, %v1616_v49  ;;  %14112 = vst [vmem:[#allocation13_spill] sm:$0xff] %v10283_v43  ;;  %v10286_v36 = vmul.f32 %v8485_v24, %v10059_v9  ;;  %v2781_v17 = vmul.f32 1.442695, %v10254_v44  ;;  %v8523_v32 = vunpack.i.l.bf16 %v8522_v20 }
  0xe7   : > { %14108 = vst [vmem:[#allocation10_spill] sm:$0xff] %v10262_v46  ;;  %v1632_v8 = vadd.f32 %v1631_v45, %v10148_v13  ;;  %v10289_v13 = vmul.f32 %v8484_v4, %v10059_v9  ;;  %v2483_v45 = vadd.f32 %v10090_v62, %v1619_v5  ;;  %v2488_v49 = vadd.f32 %v10138_v6, %v1640_v63 }
  0xe8   : > { %v7898_v57 = vpop.f32.mrf.mxu0  ;;  %14113 = vst [vmem:[#allocation14_spill] sm:$0xff] %v10286_v36  ;;  %v10299_v24 = vmul.f32 %v8489_v15, %v10059_v9  ;;  %v8500_v4 = vunpack.i.l.bf16 %v10145_v12  ;;  %v2783_v43 = vmul.f32 1.442695, %v10269_v1  ;;  %v10303_v36 = vpop.permute.xlu1 %8527  ;;  %v8501_v5 = vunpack.i.h.bf16 %v10145_v12 }
  0xe9   : > { %v1643_v35 = vadd.f32 %v7898_v57, %v10133_v55  ;;  %8772 = vset.pattern.permute.xlu1 %v14111_v29  ;;  %v8544_v55 = vpop.permute.xlu0 %8543  ;;  %v10295_v57 = vmul.f32 %v8490_v0, %v10059_v9  ;;  %v2486_v62 = vadd.f32 %v10182_v54, %v1632_v8  ;;  %v10308_v0 = vadd.f32 %v10225_v61, %v2482_v26 }
  0xea   : > { %v1634_v40 = vpop.f32.mrf.mxu0  ;;  %8774 = vperm.xlu1 %8772, %v10071_v19   ;;  %v10312_v20 = vmul.f32 %v8524_v52, %v10059_v9  ;;  %8928 = vpow2.f32 %v2781_v17  ;;  %v10315_v63 = vadd.f32 %v10225_v61, %v2483_v45  ;;  %v14116_v15 = vmov 0  }
  0xeb   : > { %14114 = vst [vmem:[#allocation15_spill] sm:$0xff] %v10295_v57  ;;  %v2489_v6 = vadd.f32 %v10141_v7, %v1643_v35  ;;  %v8546_v54 = vunpack.i.h.bf16 %v8544_v55  ;;  %v8545_v8 = vunpack.i.l.bf16 %v8544_v55  ;;  %v10321_v12 = vadd.f32 %v10225_v61, %v2488_v49 }
  0xec   : > { %v10272_v27 = vpop.f32.mrf.mxu0  ;;  %14115 = vst [vmem:[#allocation16_spill] sm:$0xff] %v10312_v20  ;;  %v10325_v7 = vmul.f32 %v8523_v32, %v10059_v9  ;;  %8930 = vpow2.f32 %v2783_v43  ;;  %v10328_v52 = vadd.f32 %v10225_v61, %v2486_v62  ;;  %v1635_v26 = vadd.f32 %v1634_v40, %v10151_v38  ;;  %v10344_v38 = vpop.permute.xlu1 %8532 }
  0xed   : > { %v10332_v17 = vmul.f32 %v8500_v4, %v10061_v10  ;;  %v8550_v45 = vpop.permute.xlu0 %8549  ;;  %v8507_v55 = vunpack.i.h.bf16 %v10196_v2  ;;  %v2777_v49 = vmul.f32 1.442695, %v10308_v0  ;;  %v10337_v20 = vadd.f32 %v10225_v61, %v2489_v6 }
  0xee   : > { %v1647_v34 = vpop.f32.mrf.mxu0  ;;  %8778 = vset.pattern.permute.xlu1 %v14116_v15  ;;  %14117 = vst [vmem:[#allocation17_spill] sm:$0xff] %v10325_v7  ;;  %v10340_v32 = vmul.f32 %v8501_v5, %v10061_v10  ;;  %v8506_v43 = vunpack.i.l.bf16 %v10196_v2  ;;  %v2779_v62 = vmul.f32 1.442695, %v10315_v63  ;;  %v10349_v4 = vmul.f32 %v8546_v54, %v10059_v9 }
  0xef   : > { %8780 = vperm.xlu1 %8778, %v10085_v11   ;;  %14118 = vst [vmem:[#allocation18_spill] sm:$0xff] %v10332_v17  ;;  %v10352_v7 = vmul.f32 %v8545_v8, %v10059_v9  ;;  %v2789_v6 = vmul.f32 1.442695, %v10321_v12  ;;  %v1648_v46 = vadd.f32 %v1647_v34, %v10154_v18  ;;  %v8551_v5 = vunpack.i.l.bf16 %v8550_v45 }
  0xf0   : > { %v7902_v19 = vpop.f32.mrf.mxu0  ;;  %14119 = vst [vmem:[#allocation19_spill] sm:$0xff] %v10340_v32  ;;  %14120 = vst [vmem:[#allocation20_spill] sm:$0xff] %v10349_v4  ;;  %v10357_v2 = vpack.i.bf16 %v688_v53, %v687_v56  ;;  %v2785_v32 = vmul.f32 1.442695, %v10328_v52  ;;  %v2487_v17 = vadd.f32 %v10174_v42, %v1635_v26  ;;  %v8552_v8 = vunpack.i.h.bf16 %v8550_v45 }
  0xf1   : > { %14121 = vst [vmem:[#allocation21_spill] sm:$0xff] %v10352_v7  ;;  %v1659_v57 = vadd.f32 %v7902_v19, %v10165_v25  ;;  %v8567_v4 = vpop.permute.xlu0 %8566  ;;  %v10366_v7 = vmul.f32 %v8507_v55, %v10059_v9  ;;  %v8512_v18 = vunpack.i.l.bf16 %v10256_v31  ;;  %8932 = vpow2.f32 %v2777_v49  ;;  %v10385_v55 = vpop.permute.xlu1 %8538 }
  0xf2   : > { %v10318_v37 = vpop.f32.mrf.mxu0  ;;  %v2791_v56 = vmul.f32 1.442695, %v10337_v20  ;;  %v10371_v53 = vmul.f32 %v8506_v43, %v10059_v9  ;;  %v8513_v42 = vunpack.i.h.bf16 %v10256_v31  ;;  %8934 = vpow2.f32 %v2779_v62 }
  0xf3   : > { %8795 = vset.pattern.permute.xlu1 %v14111_v29  ;;  %8936 = vpow2.f32 %v2789_v6  ;;  %v2490_v34 = vadd.f32 %v10178_v48, %v1648_v46  ;;  %v10380_v19 = vmul.f32 %v8551_v5, %v10061_v10  ;;  %v8568_v26 = vunpack.i.l.bf16 %v8567_v4 }
  0xf4   : > { %v7905_v35 = vpop.f32.mrf.mxu0  ;;  %8797 = vperm.xlu1 %8795, %v10085_v11   ;;  %v1656_v11 = vadd.f32 %v10272_v27, %v10162_v22  ;;  %8938 = vpow2.f32 %v2785_v32  ;;  %v10383_v45 = vadd.f32 %v10225_v61, %v2487_v17  ;;  %v2493_v31 = vadd.f32 %v10194_v60, %v1659_v57 }
  0xf5   : > { %14122 = vst [vmem:[#allocation22_spill] sm:$0xff] %v10380_v19  ;;  %v8569_v27 = vunpack.i.h.bf16 %v8567_v4  ;;  %8940 = vpow2.f32 %v2791_v56  ;;  %v1672_v48 = vadd.f32 %v7905_v35, %v10210_v3  ;;  %v10393_v46 = vmul.f32 %v8512_v18, %v10061_v10  ;;  %v10422_v5 = vpop.permute.xlu0 %8582 }
  0xf6   : > { %v10346_v40 = vpop.f32.mrf.mxu0  ;;  %v10396_v49 = vmul.f32 %v8552_v8, %v10061_v10  ;;  %v8530_v17 = vunpack.i.h.bf16 %v10303_v36  ;;  %v8529_v32 = vunpack.i.l.bf16 %v10303_v36  ;;  %v2492_v60 = vadd.f32 %v10185_v28, %v1656_v11  ;;  %14126 = vst [vmem:[#allocation26_spill] sm:$0xff] %v10422_v5 }
  0xf7   : > { %v8929_v43 = vpop.eup %8928  ;;  %v8535_v3 = vunpack.i.h.bf16 %v10344_v38  ;;  %v10408_v35 = vadd.f32 %v10225_v61, %v2490_v34  ;;  %v1651_v62 = vadd.f32 %v10318_v37, %v10157_v51  ;;  %v10413_v4 = vmul.f32 %v8568_v26, %v10061_v10 }
  0xf8   : > { %v10363_v54 = vpop.f32.mrf.mxu0  ;;  %8802 = vperm.xlu1 %8795, %v9892_v47   ;;  %14123 = vst [vmem:[#allocation23_spill] sm:$0xff] %v10396_v49  ;;  %v10404_v47 = vmul.f32 %v8513_v42, %v10061_v10  ;;  %v2787_v36 = vmul.f32 1.442695, %v10383_v45  ;;  %v10417_v28 = vadd.f32 %v10225_v61, %v2493_v31  ;;  %v10425_v8 = vmul.f32 %v8569_v27, %v10061_v10  ;;  %v8556_v31 = vpop.permute.xlu1 %8555 }
  0xf9   : > { %14125 = vst [vmem:[#allocation25_spill] sm:$0xff] %v10413_v4  ;;  %v8931_v18 = vpop.eup %8930  ;;  %vm2683_vm2 = vcmp.gt.f32.partialorder %v10254_v44, 0.0  ;;  %v8534_v51 = vunpack.i.l.bf16 %v10344_v38  ;;  %v2496_v37 = vadd.f32 %v10228_v50, %v1672_v48  ;;  %v7230_v42 = vadd.f32 -1.0, %v8929_v43 }
  0xfa   : > { %v10376_v25 = vpop.f32.mrf.mxu0  ;;  %14124 = vst [vmem:[#allocation24_spill] sm:$0xff] %v10404_v47  ;;  %14127 = vst [vmem:[#allocation27_spill] sm:$0xff] %v10425_v8  ;;  %v10433_v11 = vmul.f32 %v8530_v17, %v10059_v9  ;;  %v10436_v34 = vmul.f32 %v8529_v32, %v10059_v9  ;;  %v10439_v26 = vadd.f32 %v10225_v61, %v2492_v60  ;;  %vm2684_vm3 = vcmp.gt.f32.partialorder %v10269_v1, 0.0  ;;  %v8924_v32 = vld [vmem:[%s14080_s7 + $0x8] sm:$0xff]  }
  0xfb   : > { %v10445_v50 = vmul.f32 %v8535_v3, %v10059_v9  ;;  %v2793_v38 = vmul.f32 1.442695, %v10408_v35  ;;  %v2491_v48 = vadd.f32 %v10170_v23, %v1651_v62  ;;  %v7231_v60 = vadd.f32 -1.0, %v8931_v18  ;;  %8087 = vmatprep.subr.bf16.mxu0 %v8924_v32 }
  0xfc   : > { %v10389_v22 = vpop.f32.mrf.mxu0  ;;  %8806 = vset.pattern.permute.xlu1 %v14116_v15  ;;  %14128 = vst [vmem:[#allocation28_spill] sm:$0xff] %v10433_v11  ;;  %8942 = vpow2.f32 %v2787_v36  ;;  %v8540_v43 = vunpack.i.l.bf16 %v10385_v55  ;;  %v2799_v56 = vmul.f32 1.442695, %v10417_v28  ;;  %v10458_v3 = vmul.f32 %v8534_v51, %v10059_v9  ;;  %8088 = vmatpush3.bf16.msra.mxu0 %v8924_v32 }
  0xfd   : > { %8808 = vperm.xlu1 %8806, %v10087_v33   ;;  %v8541_v49 = vunpack.i.h.bf16 %v10385_v55  ;;  %v8558_v23 = vunpack.i.h.bf16 %v8556_v31  ;;  %v10462_v62 = vadd.f32 %v10225_v61, %v2496_v37  ;;  %v3067_v36 = vmul.f32 1.6732632, %v7230_v42 }
  0xfe   : > { %v10401_v57 = vpop.f32.mrf.mxu0  ;;  %v8933_v18 = vpop.eup %8932  ;;  %v2797_v17 = vmul.f32 1.442695, %v10439_v26  ;;  %v8557_v5 = vunpack.i.l.bf16 %v8556_v31  ;;  %v1664_v4 = vadd.f32 %v10346_v40, %v10214_v30  ;;  %vm2681_vm4 = vcmp.gt.f32.partialorder %v10308_v0, 0.0 }
  0xff   : > { %v8935_v51 = vpop.eup %8934  ;;  %8944 = vpow2.f32 %v2793_v38  ;;  %v10473_v37 = vadd.f32 %v10225_v61, %v2491_v48  ;;  %v1675_v42 = vadd.f32 %v10363_v54, %v10217_v16  ;;  %vm2682_vm5 = vcmp.gt.f32.partialorder %v10315_v63, 0.0  ;;  %v10478_v31 = vpop.permute.xlu0 %8605 }
 0x100   : > { %v10420_v6 = vpop.f32.mrf.mxu0  ;;  %14129 = vst [vmem:[#allocation29_spill] sm:$0xff] %v10478_v31  ;;  %v8937_v30 = vpop.eup %8936  ;;  %v3068_v40 = vmul.f32 1.6732632, %v7231_v60  ;;  %8946 = vpow2.f32 %v2799_v56  ;;  %v10487_v48 = vmul.f32 %v8558_v23, %v10059_v9  ;;  %v2805_v16 = vmul.f32 1.442695, %v10462_v62 }
 0x101   : > { %8823 = vset.pattern.permute.xlu1 %v14111_v29  ;;  %v8939_v32 = vpop.eup %8938  ;;  %v7228_v54 = vadd.f32 -1.0, %v8933_v18  ;;  %v10491_v19 = vmul.f32 %v8541_v49, %v10061_v10  ;;  %v3163_v56 = vsel %vm2683_vm2, %v10254_v44, %v3067_v36  ;;  %8948 = vpow2.f32 %v2797_v17 }
 0x102   : > { %v10441_v27 = vpop.f32.mrf.mxu0  ;;  %8825 = vperm.xlu1 %8823, %v10087_v33   ;;  %v10483_v33 = vmul.f32 %v8540_v43, %v10061_v10  ;;  %14130 = vst [vmem:[#allocation30_spill] sm:$0xff] %v10487_v48  ;;  %v8941_v47 = vpop.eup %8940  ;;  %v10497_v60 = vmul.f32 %v8557_v5, %v10059_v9  ;;  %v2494_v23 = vadd.f32 %v10207_v21, %v1664_v4  ;;  %vm2687_vm6 = vcmp.gt.f32.partialorder %v10321_v12, 0.0 }
 0x103   : > { %v10499_v43 = vpop.permute.xlu1 %8561  ;;  %v2795_v49 = vmul.f32 1.442695, %v10473_v37  ;;  %v2497_v18 = vadd.f32 %v10231_v14, %v1675_v42  ;;  %v1688_v44 = vadd.f32 %v10389_v22, %v10238_v58  ;;  %v7229_v17 = vadd.f32 -1.0, %v8935_v51  ;;  %v14132_v42 = vld [vmem:[#allocation8_spill] sm:$0xff] }
 0x104   : > { %v10455_v8 = vpop.f32.mrf.mxu0  ;;  %14131 = vst [vmem:[#allocation31_spill] sm:$0xff] %v10499_v43  ;;  %v3164_v21 = vsel %vm2684_vm3, %v10269_v1, %v3068_v40  ;;  %v7234_v4 = vadd.f32 -1.0, %v8937_v30  ;;  %vm2685_vm8 = vcmp.gt.f32.partialorder %v10328_v52, 0.0  ;;  %v7232_v5 = vadd.f32 -1.0, %v8939_v32 }
 0x105   : > { %v1667_v36 = vadd.f32 %v10376_v25, %v10220_v39  ;;  %vm2688_vm9 = vcmp.gt.f32.partialorder %v10337_v20, 0.0  ;;  %v7235_v14 = vadd.f32 -1.0, %v8941_v47  ;;  %8950 = vpow2.f32 %v2805_v16 }
 0x106   : > { %v10470_v55 = vpop.f32.mrf.mxu0  ;;  %8829 = vset.pattern.permute.xlu1 %v14116_v15  ;;  %v1680_v58 = vadd.f32 %v10401_v57, %v10246_v59  ;;  %v3065_v22 = vmul.f32 1.6732632, %v7228_v54  ;;  %v3259_v51 = vmul.f32 1.050701, %v3163_v56  ;;  %v10523_v1 = vadd.f32 %v10225_v61, %v2494_v23 }
 0x107   : > { %8831 = vperm.xlu1 %8829, %v10106_v41   ;;  %v1691_v30 = vadd.f32 %v10420_v6, %v14132_v42  ;;  %v3066_v40 = vmul.f32 1.6732632, %v7229_v17  ;;  %v10531_v25 = vadd.f32 %v10225_v61, %v2497_v18  ;;  %v2500_v47 = vadd.f32 %v10299_v24, %v1688_v44  ;;  %v10538_v54 = vpop.permute.xlu1 %8572  ;;  %v14133_v6 = vld [vmem:[#allocation7_spill] sm:$0xff] }
 0x108   : > { %v10480_v11 = vpop.f32.mrf.mxu0  ;;  %v3161_v59 = vsel %vm2681_vm4, %v10308_v0, %v3065_v22  ;;  %v3260_v57 = vmul.f32 1.050701, %v3164_v21  ;;  %v3071_v16 = vmul.f32 1.6732632, %v7234_v4  ;;  %v2495_v56 = vadd.f32 %v14133_v6, %v1667_v36  ;;  %v14134_v4 = vld [vmem:[#allocation15_spill] sm:$0xff] }
 0x109   : > { %v3162_v23 = vsel %vm2682_vm5, %v10315_v63, %v3066_v40  ;;  %v8943_v24 = vpop.eup %8942  ;;  %v3069_v44 = vmul.f32 1.6732632, %v7232_v5  ;;  %v3072_v17 = vmul.f32 1.6732632, %v7235_v14  ;;  %vm2686_vm10 = vcmp.gt.f32.partialorder %v10383_v45, 0.0 }
 0x10a   : > { %v10503_v38 = vpop.f32.mrf.mxu0  ;;  %8952 = vpow2.f32 %v2795_v49  ;;  %v2498_v0 = vadd.f32 %v10289_v13, %v1680_v58  ;;  %v2801_v21 = vmul.f32 1.442695, %v10523_v1  ;;  %v2501_v36 = vadd.f32 %v14134_v4, %v1691_v30 }
 0x10b   : > { %8840 = vset.pattern.permute.xlu1 %v14111_v29  ;;  %v3257_v22 = vmul.f32 1.050701, %v3161_v59  ;;  %v3258_v42 = vmul.f32 1.050701, %v3162_v23  ;;  %v2807_v63 = vmul.f32 1.442695, %v10531_v25  ;;  %v10557_v14 = vadd.f32 %v10225_v61, %v2500_v47 }
 0x10c   : > { %v10517_v31 = vpop.f32.mrf.mxu0  ;;  %8842 = vperm.xlu1 %8840, %v10106_v41   ;;  %v8945_v49 = vpop.eup %8944  ;;  %v3167_v13 = vsel %vm2687_vm6, %v10321_v12, %v3071_v16  ;;  %v7233_v58 = vadd.f32 -1.0, %v8943_v24  ;;  %v10563_v30 = vadd.f32 %v10225_v61, %v2495_v56  ;;  %v14135_v59 = vld [vmem:[#allocation3_spill] sm:$0xff]  ;;  %v3165_v47 = vsel %vm2685_vm8, %v10328_v52, %v3069_v44  ;;  %v14136_v24 = vld [vmem:[#allocation18_spill] sm:$0xff] }
 0x10d   : > { %v3353_v40 = vpack.c.bf16 %v3258_v42, %v3257_v22  ;;  %v8947_v4 = vpop.eup %8946  ;;  %v10573_v41 = vadd.f32 %v10225_v61, %v2498_v0  ;;  %v3354_v12 = vpack.c.bf16 %v3260_v57, %v3259_v51  ;;  %v3168_v16 = vsel %vm2688_vm9, %v10337_v20, %v3072_v17  ;;  %v14137_v57 = vld [vmem:[#allocation10_spill] sm:$0xff] }
 0x10e   : > { %v10527_v32 = vpop.f32.mrf.mxu0  ;;  %8954 = vpow2.f32 %v2801_v21  ;;  %v10579_v56 = vadd.f32 %v10225_v61, %v2501_v36  ;;  %v1704_v22 = vadd.f32 %v10455_v8, %v14136_v24  ;;  %v8949_v44 = vpop.eup %8948  ;;  %v3263_v42 = vmul.f32 1.050701, %v3167_v13  ;;  %v14140_v24 = vld [vmem:[#allocation19_spill] sm:$0xff] }
 0x10f   : > { %7991 = vmatprep.mubr.msk.bf16.mxu1 %vm3424_vm7, %v3353_v40  ;;  %8956 = vpow2.f32 %v2807_v63  ;;  %v2813_v51 = vmul.f32 1.442695, %v10557_v14  ;;  %v1696_v20 = vadd.f32 %v10470_v55, %v14137_v57  ;;  %vm2689_vm11 = vcmp.gt.f32.partialorder %v10408_v35, 0.0 }
 0x110   : > { %v10545_v18 = vpop.f32.mrf.mxu0  ;;  %8847 = vperm.xlu1 %8840, %v14135_v59   ;;  %7992 = vmatmul.mubr.msk.bf16.vlgmr.msra.gmra.mxu1 %vm3424_vm7, %v3354_v12  ;;  %v7236_v17 = vadd.f32 -1.0, %v8945_v49  ;;  %v7239_v0 = vadd.f32 -1.0, %v8947_v4  ;;  %v2803_v21 = vmul.f32 1.442695, %v10563_v30  ;;  %v3070_v36 = vmul.f32 1.6732632, %v7233_v58 }
 0x111   : > { %v3261_v13 = vmul.f32 1.050701, %v3165_v47  ;;  %v3264_v63 = vmul.f32 1.050701, %v3168_v16  ;;  %vm2692_vm12 = vcmp.gt.f32.partialorder %v10417_v28, 0.0  ;;  %v14138_v59 = vld [vmem:[#allocation9_spill] sm:$0xff]  ;;  %v2504_v58 = vadd.f32 %v10371_v53, %v1704_v22  ;;  %v8578_v53 = vpop.permute.xlu1 %8577 }
 0x112   : > { %v10551_v6 = vpop.f32.mrf.mxu0  ;;  %v2809_v40 = vmul.f32 1.442695, %v10573_v41  ;;  %v1683_v55 = vadd.f32 %v10441_v27, %v14138_v59  ;;  %v14139_v12 = vld [vmem:[#allocation6_spill] sm:$0xff]  ;;  %v8951_v49 = vpop.eup %8950  ;;  %v2815_v4 = vmul.f32 1.442695, %v10579_v56  ;;  %v1707_v57 = vadd.f32 %v10480_v11, %v14140_v24  ;;  %v14142_v27 = vld [vmem:[#allocation17_spill] sm:$0xff] }
 0x113   : > { %v3166_v47 = vsel %vm2686_vm10, %v10383_v45, %v3070_v36  ;;  %vm2691_vm13 = vcmp.gt.f32.partialorder %v10439_v26, 0.0  ;;  %v7238_v39 = vadd.f32 -1.0, %v8949_v44  ;;  %8958 = vpow2.f32 %v2813_v51  ;;  %v14143_v22 = vld [vmem:[#allocation12_spill] sm:$0xff]  ;;  %v14144_v45 = vld [vmem:[#allocation14_spill] sm:$0xff] }
 0x114   : > { %v10566_v23 = vpop.f32.mrf.mxu0  ;;  %8856 = vset.pattern.permute.xlu1 %v14116_v15  ;;  %v2502_v59 = vadd.f32 %v14142_v27, %v1696_v20  ;;  %v3262_v5 = vmul.f32 1.050701, %v3166_v47  ;;  %v3073_v43 = vmul.f32 1.6732632, %v7236_v17  ;;  %v3076_v10 = vmul.f32 1.6732632, %v7239_v0 }
 0x115   : > { %8858 = vperm.xlu1 %8856, %v14139_v12   ;;  %8960 = vpow2.f32 %v2803_v21  ;;  %v1720_v11 = vadd.f32 %v10517_v31, %v14143_v22  ;;  %v7242_v48 = vadd.f32 -1.0, %v8951_v49  ;;  %v2499_v36 = vadd.f32 %v14144_v45, %v1683_v55 }
 0x116   : > { %v10584_v52 = vpop.f32.mrf.mxu0  ;;  %8962 = vpow2.f32 %v2809_v40  ;;  %v10618_v51 = vadd.f32 %v10225_v61, %v2504_v58  ;;  %v2505_v20 = vadd.f32 %v10366_v7, %v1707_v57  ;;  %v3356_v17 = vpack.c.bf16 %v3264_v63, %v3263_v42  ;;  %v10653_v57 = vpop.permute.xlu1 %8588 }
 0x117   : > { %v8953_v44 = vpop.eup %8952  ;;  %8964 = vpow2.f32 %v2815_v4  ;;  %vm2690_vm14 = vcmp.gt.f32.partialorder %v10473_v37, 0.0  ;;  %v8580_v0 = vunpack.i.h.bf16 %v8578_v53  ;;  %v8579_v21 = vunpack.i.l.bf16 %v8578_v53 }
 0x118   : > { %v10593_v8 = vpop.f32.mrf.mxu0  ;;  %vm2695_vm15 = vcmp.gt.f32.partialorder %v10462_v62, 0.0  ;;  %v14145_v7 = vunpack.i.h.bf16 %v10538_v54  ;;  %v2508_v63 = vadd.f32 %v10458_v3, %v1720_v11  ;;  %v3169_v55 = vsel %vm2689_vm11, %v10408_v35, %v3073_v43 }
 0x119   : > { %8868 = vset.pattern.permute.xlu1 %v14111_v29  ;;  %v10648_v4 = vadd.f32 %v10225_v61, %v2499_v36  ;;  %v3172_v58 = vsel %vm2692_vm12, %v10417_v28, %v3076_v10  ;;  %v3079_v3 = vmul.f32 1.6732632, %v7242_v48  ;;  %v2821_v47 = vmul.f32 1.442695, %v10618_v51  ;;  %v14147_v28 = vld [vmem:[#allocation11_spill] sm:$0xff] }
 0x11a   : > { %v10607_v16 = vpop.f32.mrf.mxu0  ;;  %8870 = vperm.xlu1 %8868, %v14139_v12   ;;  %v10633_v42 = vmul.f32 %v14145_v7, %v10059_v9  ;;  %v7237_v12 = vadd.f32 -1.0, %v8953_v44  ;;  %v10657_v35 = vadd.f32 %v10225_v61, %v2505_v20  ;;  %v10666_v27 = vmul.f32 %v8579_v21, %v10059_v9  ;;  %v14148_v20 = vld [vmem:[#allocation13_spill] sm:$0xff]  ;;  %v14149_v7 = vld [vmem:[#allocation16_spill] sm:$0xff] }
 0x11b   : > { %14141 = vst [vmem:[#allocation8_spill] sm:$0xff] %v10607_v16  ;;  %v3355_v16 = vpack.c.bf16 %v3262_v5, %v3261_v13  ;;  %v10626_v5 = vadd.f32 %v10225_v61, %v2502_v59  ;;  %v3075_v13 = vmul.f32 1.6732632, %v7238_v39  ;;  %v14146_v39 = vunpack.i.l.bf16 %v10538_v54  ;;  %v8955_v54 = vpop.eup %8954 }
 0x11c   : > { %v10613_v24 = vpop.f32.mrf.mxu0  ;;  %v1699_v48 = vadd.f32 %v10503_v38, %v14147_v28  ;;  %v8957_v59 = vpop.eup %8956  ;;  %v3265_v22 = vmul.f32 1.050701, %v3169_v55  ;;  %v10676_v11 = vadd.f32 %v10225_v61, %v2508_v63  ;;  %v1712_v45 = vadd.f32 %v10527_v32, %v10393_v46 }
 0x11d   : > { %7995 = vmatprep.mubr.msk.bf16.mxu1 %vm3424_vm7, %v3355_v16  ;;  %v10645_v49 = vmul.f32 %v14146_v39, %v10059_v9  ;;  %v10663_v16 = vmul.f32 %v8580_v0, %v10059_v9  ;;  %v2817_v10 = vmul.f32 1.442695, %v10626_v5  ;;  %v3171_v53 = vsel %vm2691_vm13, %v10439_v26, %v3075_v13 }
 0x11e   : > { %v10622_v31 = vpop.f32.mrf.mxu0  ;;  %7996 = vmatmul.mubr.msk.bf16.gmra.mxu1 %vm3424_vm7, %v3356_v17  ;;  %8874 = vset.pattern.permute.xlu1 %v14116_v15  ;;  %v3268_v44 = vmul.f32 1.050701, %v3172_v58  ;;  %vm2693_vm0 = vcmp.gt.f32.partialorder %v10523_v1, 0.0  ;;  %v2811_v38 = vmul.f32 1.442695, %v10648_v4  ;;  %v1723_v17 = vadd.f32 %v10545_v18, %v14148_v20 }
 0x11f   : > { %8876 = vperm.xlu1 %8874, %v10357_v2   ;;  %v3074_v0 = vmul.f32 1.6732632, %v7237_v12  ;;  %v3175_v26 = vsel %vm2695_vm15, %v10462_v62, %v3079_v3  ;;  %v7240_v21 = vadd.f32 -1.0, %v8955_v54  ;;  %vm2696_vm1 = vcmp.gt.f32.partialorder %v10531_v25, 0.0  ;;  %v8595_v62 = vpop.permute.xlu1 %8594 }
 0x120   : > { %v10637_v40 = vpop.f32.mrf.mxu0  ;;  %8966 = vpow2.f32 %v2821_v47  ;;  %v2823_v46 = vmul.f32 1.442695, %v10657_v35  ;;  %v7243_v13 = vadd.f32 -1.0, %v8957_v59  ;;  %v2503_v63 = vadd.f32 %v14149_v7, %v1699_v48  ;;  %v8959_v55 = vpop.eup %8958 }
 0x121   : > { %8968 = vpow2.f32 %v2817_v10  ;;  %v3170_v18 = vsel %vm2690_vm14, %v10473_v37, %v3074_v0  ;;  %v2829_v12 = vmul.f32 1.442695, %v10676_v11  ;;  %v2506_v39 = vadd.f32 %v10436_v34, %v1712_v45 }
 0x122   : > { %v10660_v43 = vpop.f32.mrf.mxu0  ;;  %v3266_v58 = vmul.f32 1.050701, %v3170_v18  ;;  %v1736_v3 = vadd.f32 %v10566_v23, %v10483_v33  ;;  %v8961_v54 = vpop.eup %8960  ;;  %v3267_v10 = vmul.f32 1.050701, %v3171_v53  ;;  %8970 = vpow2.f32 %v2811_v38 }
 0x123   : > { %8886 = vset.pattern.permute.xlu1 %v14111_v29  ;;  %v2509_v28 = vadd.f32 %v10445_v50, %v1723_v17  ;;  %v8963_v48 = vpop.eup %8962  ;;  %v10707_v59 = vmul.f32 1.050701, %v3175_v26  ;;  %v3077_v20 = vmul.f32 1.6732632, %v7240_v21  ;;  %vm2699_vm2 = vcmp.gt.f32.partialorder %v10557_v14, 0.0  ;;  %v14163_v26 = vld [vmem:[#allocation5_spill] sm:$0xff] }
 0x124   : > { %v10680_v36 = vpop.f32.mrf.mxu0  ;;  %8888 = vperm.xlu1 %8886, %v10357_v2   ;;  %8972 = vpow2.f32 %v2823_v46  ;;  %v3357_v34 = vpack.c.bf16 %v3266_v58, %v3265_v22  ;;  %v8965_v2 = vpop.eup %8964  ;;  %v3080_v23 = vmul.f32 1.6732632, %v7243_v13  ;;  %vm2694_vm3 = vcmp.gt.f32.partialorder %v10563_v30, 0.0  ;;  %v14150_v46 = vld [vmem:[#allocation24_spill] sm:$0xff] }
 0x125   : > { %v7246_v53 = vadd.f32 -1.0, %v8959_v55  ;;  %v10714_v45 = vadd.f32 %v10225_v61, %v2503_v63  ;;  %v3358_v38 = vpack.c.bf16 %v3268_v44, %v3267_v10  ;;  %v7241_v50 = vadd.f32 -1.0, %v8961_v54  ;;  %v10735_v55 = vpop.permute.xlu1 %8600 }
 0x126   : > { %v10691_v32 = vpop.f32.mrf.mxu0  ;;  %8974 = vpow2.f32 %v2829_v12  ;;  %v10717_v17 = vadd.f32 %v10225_v61, %v2506_v39  ;;  %7999 = vmatprep.mubr.msk.bf16.mxu1 %vm3424_vm7, %v3357_v34  ;;  %v2512_v22 = vadd.f32 %v10497_v60, %v1736_v3  ;;  %vm2697_vm4 = vcmp.gt.f32.partialorder %v10573_v41, 0.0  ;;  %v14151_v3 = vld [vmem:[#allocation22_spill] sm:$0xff] }
 0x127   : > { %vm2700_vm5 = vcmp.gt.f32.partialorder %v10579_v56, 0.0  ;;  %v8597_v21 = vunpack.i.h.bf16 %v8595_v62  ;;  %v10727_v44 = vadd.f32 %v10225_v61, %v2509_v28  ;;  %v1715_v13 = vadd.f32 %v10551_v6, %v14150_v46  ;;  %8000 = vmatmul.mubr.msk.bf16.gmra.mxu1 %vm3424_vm7, %v3358_v38 }
 0x128   : > { %v10703_v47 = vpop.f32.mrf.mxu0  ;;  %v3173_v60 = vsel %vm2693_vm0, %v10523_v1, %v3077_v20  ;;  %v7244_v7 = vadd.f32 -1.0, %v8963_v48  ;;  %v7247_v63 = vadd.f32 -1.0, %v8965_v2  ;;  %v8596_v18 = vunpack.i.l.bf16 %v8595_v62  ;;  %v14152_v2 = vld [vmem:[#allocation28_spill] sm:$0xff] }
 0x129   : > { %v3176_v39 = vsel %vm2696_vm1, %v10531_v25, %v3080_v23  ;;  %v3083_v58 = vmul.f32 1.6732632, %v7246_v53  ;;  %v2819_v6 = vmul.f32 1.442695, %v10714_v45  ;;  %v1728_v54 = vadd.f32 %v10584_v52, %v14151_v3 }
 0x12a   : > { %v10710_v33 = vpop.f32.mrf.mxu0  ;;  %v2825_v10 = vmul.f32 1.442695, %v10717_v17  ;;  %v10747_v1 = vadd.f32 %v10225_v61, %v2512_v22  ;;  %v1739_v62 = vadd.f32 %v10593_v8, %v10491_v19  ;;  %v3078_v28 = vmul.f32 1.6732632, %v7241_v50 }
 0x12b   : > { %v3269_v20 = vmul.f32 1.050701, %v3173_v60  ;;  %v10754_v25 = vmul.f32 %v8597_v21, %v10059_v9  ;;  %v2831_v34 = vmul.f32 1.442695, %v10727_v44  ;;  %v2507_v23 = vadd.f32 %v14152_v2, %v1715_v13  ;;  %v14154_v21 = vld [vmem:[#allocation21_spill] sm:$0xff]  ;;  %v10768_v13 = vpop.permute.xlu1 %8617 }
 0x12c   : > { %v10721_v0 = vpop.f32.mrf.mxu0  ;;  %v3272_v52 = vmul.f32 1.050701, %v3176_v39  ;;  %v3081_v53 = vmul.f32 1.6732632, %v7244_v7  ;;  %v3084_v38 = vmul.f32 1.6732632, %v7247_v63  ;;  %v10759_v22 = vmul.f32 %v8596_v18, %v10059_v9 }
 0x12d   : > { %v8967_v19 = vpop.eup %8966  ;;  %v3179_v8 = vsel %vm2699_vm2, %v10557_v14, %v3083_v58  ;;  %8976 = vpow2.f32 %v2819_v6  ;;  %v2510_v60 = vadd.f32 %v14154_v21, %v1728_v54  ;;  %v2837_v7 = vmul.f32 1.442695, %v10747_v1  ;;  %v14155_v63 = vld [vmem:[#allocation30_spill] sm:$0xff] }
 0x12e   : > { %v10737_v12 = vpop.f32.mrf.mxu0  ;;  %v8969_v3 = vpop.eup %8968  ;;  %8978 = vpow2.f32 %v2825_v10  ;;  %v2513_v18 = vadd.f32 %v14155_v63, %v1739_v62  ;;  %v3174_v39 = vsel %vm2694_vm3, %v10563_v30, %v3078_v28  ;;  %vm2703_vm6 = vcmp.gt.f32.partialorder %v10618_v51, 0.0 }
 0x12f   : > { %8980 = vpow2.f32 %v2831_v34  ;;  %v10780_v58 = vadd.f32 %v10225_v61, %v2507_v23  ;;  %v3270_v6 = vmul.f32 1.050701, %v3174_v39  ;;  %v8971_v54 = vpop.eup %8970  ;;  %v10782_v10 = vmul.f32 1.050701, %v3179_v8  ;;  %v14157_v39 = vld [vmem:[#allocation25_spill] sm:$0xff] }
 0x130   : > { %v10751_v48 = vpop.f32.mrf.mxu0  ;;  %v3177_v62 = vsel %vm2697_vm4, %v10573_v41, %v3081_v53  ;;  %v3180_v30 = vsel %vm2700_vm5, %v10579_v56, %v3084_v38  ;;  %v7250_v28 = vadd.f32 -1.0, %v8967_v19  ;;  %vm2701_vm8 = vcmp.gt.f32.partialorder %v10626_v5, 0.0  ;;  %v14158_v56 = vld [vmem:[#allocation23_spill] sm:$0xff]  ;;  %v14159_v38 = vld [vmem:[#allocation8_spill] sm:$0xff] }
 0x131   : > { %v8973_v34 = vpop.eup %8972  ;;  %vm2698_vm9 = vcmp.gt.f32.partialorder %v10648_v4, 0.0  ;;  %v7248_v23 = vadd.f32 -1.0, %v8969_v3  ;;  %v10795_v8 = vadd.f32 %v10225_v61, %v2510_v60  ;;  %v3359_v63 = vpack.c.bf16 %v3270_v6, %v3269_v20 }
 0x132   : > { %v10761_v46 = vpop.f32.mrf.mxu0  ;;  %v1752_v41 = vadd.f32 %v10613_v24, %v14157_v39  ;;  %8982 = vpow2.f32 %v2837_v7  ;;  %v10800_v53 = vadd.f32 %v10225_v61, %v2513_v18  ;;  %v1731_v19 = vadd.f32 %v14159_v38, %v14158_v56  ;;  %v8623_v39 = vpop.permute.xlu1 %8622 }
 0x133   : > { %14153 = vst [vmem:[#allocation7_spill] sm:$0xff] %v10761_v46  ;;  %v3360_v50 = vpack.c.bf16 %v3272_v52, %v10707_v59  ;;  %v8975_v37 = vpop.eup %8974  ;;  %v10807_v3 = vmul.f32 1.050701, %v3177_v62  ;;  %v7245_v60 = vadd.f32 -1.0, %v8971_v54  ;;  %vm2704_vm10 = vcmp.gt.f32.partialorder %v10657_v35, 0.0  ;;  %8003 = vmatprep.mubr.msk.bf16.mxu1 %vm3424_vm7, %v3359_v63 }
 0x134   : > { %v10775_v2 = vpop.f32.mrf.mxu0  ;;  %v2827_v20 = vmul.f32 1.442695, %v10780_v58  ;;  %v3087_v24 = vmul.f32 1.6732632, %v7250_v28  ;;  %v7251_v7 = vadd.f32 -1.0, %v8973_v34  ;;  %v8620_v18 = vunpack.i.h.bf16 %v10768_v13  ;;  %v14162_v34 = vld [vmem:[#allocation20_spill] sm:$0xff] }
 0x135   : > { %v8619_v6 = vunpack.i.l.bf16 %v10768_v13  ;;  %8004 = vmatmul.mubr.msk.bf16.gmra.mxu1 %vm3424_vm7, %v3360_v50  ;;  %v3276_v52 = vmul.f32 1.050701, %v3180_v30  ;;  %v3085_v62 = vmul.f32 1.6732632, %v7248_v23  ;;  %vm2707_vm11 = vcmp.gt.f32.partialorder %v10676_v11, 0.0  ;;  %v14164_v13 = vld [vmem:[#allocation31_spill] sm:$0xff] }
 0x136   : > { %v10791_v21 = vpop.f32.mrf.mxu0  ;;  %v2833_v54 = vmul.f32 1.442695, %v10795_v8  ;;  %v2516_v56 = vadd.f32 %v10666_v27, %v1752_v41  ;;  %v7254_v63 = vadd.f32 -1.0, %v8975_v37  ;;  %v2839_v28 = vmul.f32 1.442695, %v10800_v53 }
 0x137   : > { %14156 = vst [vmem:[#allocation15_spill] sm:$0xff] %v10791_v21  ;;  %v2511_v38 = vadd.f32 %v14162_v34, %v1731_v19  ;;  %8984 = vpow2.f32 %v2827_v20  ;;  %v8625_v30 = vunpack.i.h.bf16 %v8623_v39  ;;  %v8624_v23 = vunpack.i.l.bf16 %v8623_v39  ;;  %v14167_v20 = vld [vmem:[#allocation27_spill] sm:$0xff] }
 0x138   : > { %v10805_v14 = vpop.f32.mrf.mxu0  ;;  %v3183_v46 = vsel %vm2703_vm6, %v10618_v51, %v3087_v24  ;;  %v3088_v27 = vmul.f32 1.6732632, %v7251_v7  ;;  %v10831_v37 = vmul.f32 %v8620_v18, %v10059_v9  ;;  %8986 = vpow2.f32 %v2833_v54 }
 0x139   : > { %14160 = vst [vmem:[#allocation3_spill] sm:$0xff] %v10805_v14  ;;  %v14165_v14 = vunpack.i.l.bf16 %v14164_v13  ;;  %v10838_v19 = vadd.f32 %v10225_v61, %v2516_v56  ;;  %v3091_v34 = vmul.f32 1.6732632, %v7254_v63  ;;  %8988 = vpow2.f32 %v2839_v28 }
 0x13a   : > { %v10815_v59 = vpop.f32.mrf.mxu0  ;;  %v8977_v39 = vpop.eup %8976  ;;  %v10843_v51 = vadd.f32 %v10225_v61, %v2511_v38  ;;  %v10851_v24 = vmul.f32 %v8619_v6, %v10059_v9  ;;  %v10854_v7 = vmul.f32 %v8625_v30, %v10059_v9  ;;  %v10859_v61 = vmul.f32 1.050701, %v3183_v46 }
 0x13b   : > { %14161 = vst [vmem:[#allocation18_spill] sm:$0xff] %v10815_v59  ;;  %v1357_v21 = vmul.f32 %v14165_v14, %v14163_v26  ;;  %v3082_v59 = vmul.f32 1.6732632, %v7245_v60  ;;  %v3181_v14 = vsel %vm2701_vm8, %v10626_v5, %v3085_v62  ;;  %v1755_v60 = vadd.f32 %v10637_v40, %v14167_v20  ;;  %v8979_v5 = vpop.eup %8978  ;;  %v10867_v6 = vpop.permute.xlu1 %8628 }
 0x13c   : > { %v10825_v50 = vpop.f32.mrf.mxu0  ;;  %v10857_v40 = vmul.f32 %v8624_v23, %v10059_v9  ;;  %v8981_v62 = vpop.eup %8980  ;;  %v10861_v54 = vmul.f32 1.050701, %v3181_v14  ;;  %vm2702_vm12 = vcmp.gt.f32.partialorder %v10714_v45, 0.0  ;;  %v7249_v56 = vadd.f32 -1.0, %v8977_v39 }
 0x13d   : > { %14166 = vst [vmem:[#allocation10_spill] sm:$0xff] %v10825_v50  ;;  %v1744_v41 = vadd.f32 %v10622_v31, %v1357_v21  ;;  %v3178_v31 = vsel %vm2698_vm9, %v10648_v4, %v3082_v59  ;;  %v3184_v4 = vsel %vm2704_vm10, %v10657_v35, %v3088_v27  ;;  %v2845_v63 = vmul.f32 1.442695, %v10838_v19  ;;  %v10873_v38 = vpop.permute.xlu0 %8611 }
 0x13e   : > { %v10848_v21 = vpop.f32.mrf.mxu0  ;;  %v3274_v18 = vmul.f32 1.050701, %v3178_v31  ;;  %v2517_v28 = vadd.f32 %v10663_v16, %v1755_v60  ;;  %v3187_v30 = vsel %vm2707_vm11, %v10676_v11, %v3091_v34  ;;  %vm2705_vm13 = vcmp.gt.f32.partialorder %v10717_v17, 0.0  ;;  %v10892_v11 = vld [vmem:[%s14077_s4] ss:$0 sm:$0xff]  ;;  %v14171_v34 = vld [vmem:[#allocation26_spill] sm:$0xff] }
 0x13f   : > { %14168 = vst [vmem:[#allocation9_spill] sm:$0xff] %v10848_v21  ;;  %v2514_v59 = vadd.f32 %v10645_v49, %v1744_v41  ;;  %v7252_v35 = vadd.f32 -1.0, %v8979_v5  ;;  %v2835_v23 = vmul.f32 1.442695, %v10843_v51  ;;  %v3362_v49 = vpack.c.bf16 %v3276_v52, %v10782_v10  ;;  %v8983_v41 = vpop.eup %8982 }
 0x140   : > { %v3361_v46 = vpack.c.bf16 %v3274_v18, %v10807_v3  ;;  %v10881_v27 = vpop.f32.mrf.mxu0  ;;  %v10883_v14 = vmul.f32 1.050701, %v3184_v4  ;;  %vm2708_vm14 = vcmp.gt.f32.partialorder %v10727_v44, 0.0  ;;  %v7255_v16 = vadd.f32 -1.0, %v8981_v62 }
 0x141   : > { %14169 = vst [vmem:[#allocation6_spill] sm:$0xff] %v10881_v27  ;;  %v10895_v10 = vadd.f32 %v10892_v11, %v2514_v59  ;;  %v14170_v52 = vunpack.i.h.bf16 %v14164_v13  ;;  %v8613_v39 = vunpack.i.l.bf16 %v10873_v38  ;;  %v14172_v31 = vunpack.i.l.bf16 %v14171_v34 }
 0x142   : > { %8007 = vmatprep.mubr.msk.bf16.mxu1 %vm3424_vm7, %v3361_v46  ;;  %v10905_v18 = vmul.f32 1.050701, %v3187_v30  ;;  %vm2711_vm15 = vcmp.gt.f32.partialorder %v10747_v1, 0.0  ;;  %8990 = vpow2.f32 %v2845_v63  ;;  %v10909_v62 = vadd.f32 %v10892_v11, %v2517_v28  ;;  %v8646_v30 = vpop.permute.xlu1 %8645 }
 0x143   : > { %v1358_v60 = vmul.f32 %v14170_v52, %v14163_v26  ;;  %8008 = vmatmul.mubr.msk.bf16.gmra.mxu1 %vm3424_vm7, %v3362_v49  ;;  %v1361_v5 = vmul.f32 %v14172_v31, %v14163_v26  ;;  %v14173_v13 = vunpack.i.l.bf16 %v10653_v57  ;;  %v3089_v59 = vmul.f32 1.6732632, %v7252_v35  ;;  %v10915_v52 = vpop.f32.mrf.mxu0 }
 0x144   : > { %v7258_v46 = vadd.f32 -1.0, %v8983_v41  ;;  %8992 = vpow2.f32 %v2835_v23  ;;  %14174 = vst [vmem:[#allocation19_spill] sm:$0xff] %v10915_v52  ;;  %v3092_v31 = vmul.f32 1.6732632, %v7255_v16  ;;  %v14175_v63 = vunpack.i.h.bf16 %v10653_v57  ;;  %v8985_v27 = vpop.eup %8984 }
 0x145   : > { %v1363_v4 = vmul.f32 %v14173_v13, %v14163_v26  ;;  %v1747_v49 = vadd.f32 %v10660_v43, %v1358_v60  ;;  %v3086_v20 = vmul.f32 1.6732632, %v7249_v56  ;;  %v2841_v21 = vmul.f32 1.442695, %v10895_v10  ;;  %v14176_v13 = vld [vmem:[#allocation29_spill] sm:$0xff]  ;;  %v8987_v57 = vpop.eup %8986  ;;  %v10931_v52 = vpop.f32.mrf.mxu0 }
 0x146   : > { %v1364_v28 = vmul.f32 %v14175_v63, %v14163_v26  ;;  %v8607_v35 = vunpack.i.l.bf16 %v14176_v13  ;;  %v2422_v23 = vmul.f32 %v8613_v39, %v10059_v9  ;;  %v1760_v43 = vadd.f32 %v10691_v32, %v1361_v5  ;;  %v8989_v50 = vpop.eup %8988 }
 0x147   : > { %v1768_v3 = vadd.f32 %v10680_v36, %v1363_v4  ;;  %v2847_v41 = vmul.f32 1.442695, %v10909_v62  ;;  %v3182_v36 = vsel %vm2702_vm12, %v10714_v45, %v3086_v20  ;;  %v3095_v60 = vmul.f32 1.6732632, %v7258_v46 }
 0x148   : > { %v1771_v16 = vadd.f32 %v10703_v47, %v1364_v28  ;;  %v8648_v56 = vunpack.i.h.bf16 %v8646_v30  ;;  %v8647_v4 = vunpack.i.l.bf16 %v8646_v30  ;;  %v2515_v63 = vadd.f32 %v10633_v42, %v1747_v49  ;;  %v14177_v28 = vld [vmem:[#allocation4_spill] sm:$0xff] }
 0x149   : > { %v3185_v32 = vsel %vm2705_vm13, %v10717_v17, %v3089_v59  ;;  %v10936_v39 = vadd.f32 -1.0, %v8985_v27  ;;  %v2520_v47 = vadd.f32 %v10759_v22, %v1768_v3  ;;  %v3278_v5 = vmul.f32 1.050701, %v3182_v36  ;;  %8893 = vperm.xlu1 %8886, %v14177_v28   ;;  %v10955_v59 = vpop.f32.mrf.mxu0  ;;  %v11003_v28 = vpop.permute.xlu0 %8633 }
 0x14a   : > { %v3188_v45 = vsel %vm2708_vm14, %v10727_v44, %v3092_v31  ;;  %vm2709_vm0 = vcmp.gt.f32.partialorder %v10795_v8, 0.0  ;;  %8994 = vpow2.f32 %v2841_v21  ;;  %v2518_v42 = vadd.f32 %v2422_v23, %v1760_v43  ;;  %v694_v43 = vld [vmem:[%s9710_s23 + $0x2f8] sm:$0xff] }
 0x14b   : > { %v1367_v20 = vmul.f32 %v8607_v35, %v14163_v26  ;;  %v7256_v46 = vadd.f32 -1.0, %v8987_v57  ;;  %8996 = vpow2.f32 %v2847_v41  ;;  %v8614_v17 = vunpack.i.h.bf16 %v10873_v38  ;;  %v10960_v38 = vpop.permute.xlu1 %8651 }
 0x14c   : > { %v2521_v27 = vadd.f32 %v10754_v25, %v1771_v16  ;;  %v3191_v22 = vsel %vm2711_vm15, %v10747_v1, %v3095_v60  ;;  %vm2712_vm1 = vcmp.gt.f32.partialorder %v10800_v53, 0.0  ;;  %v7259_v3 = vadd.f32 -1.0, %v8989_v50 }
 0x14d   : > { %v10952_v44 = vadd.f32 %v10892_v11, %v2515_v63  ;;  %v3363_v21 = vpack.c.bf16 %v3278_v5, %v10861_v54  ;;  %v10958_v49 = vadd.f32 %v10892_v11, %v2520_v47  ;;  %v14178_v25 = vunpack.i.h.bf16 %v14171_v34  ;;  %8902 = vset.pattern.permute.xlu1 %v14116_v15 }
 0x14e   : > { %v3364_v50 = vpack.c.bf16 %v10883_v14, %v10859_v61  ;;  %v1784_v31 = vadd.f32 %v10721_v0, %v1367_v20  ;;  %v10969_v54 = vmul.f32 1.050701, %v3185_v32  ;;  %v10971_v30 = vmul.f32 1.050701, %v3188_v45  ;;  %v693_v14 = vld [vmem:[%s9710_s23 + $0x2f0] sm:$0xff]  ;;  %s6699_s23 = ssub.s32 (%p9685_p4), 625, %s9696_s30 }
 0x14f   : > { %v1362_v1 = vmul.f32 %v14178_v25, %v14163_v26  ;;  %vm2706_vm2 = vcmp.gt.f32.partialorder %v10780_v58, 0.0  ;;  %v10975_v35 = vmul.f32 %v8648_v56, %v10059_v9  ;;  %v10978_v34 = vadd.f32 %v10892_v11, %v2518_v42  ;;  %8011 = vmatprep.mubr.msk.bf16.mxu1 %vm3424_vm7, %v3363_v21  ;;  %v8991_v41 = vpop.eup %8990  ;;  %v10996_v56 = vpop.f32.mrf.mxu0  ;;  %p6700_p8 = scmp.lt.s32.totalorder (%p9685_p4), %s6699_s23, 96 }
 0x150   : > { %v3093_v23 = vmul.f32 1.6732632, %v7256_v46  ;;  %v10982_v61 = vmul.f32 %v8647_v4, %v10059_v9  ;;  %v10985_v15 = vadd.f32 %v10892_v11, %v2521_v27  ;;  %8012 = vmatmul.mubr.msk.bf16.gmra.mxu1 %vm3424_vm7, %v3364_v50  ;;  %v2524_v0 = vadd.f32 %v10857_v40, %v1784_v31  ;;  %v8663_v50 = vpop.permute.xlu1 %8662 }
 0x151   : > { %v10991_v16 = vmul.f32 1.050701, %v3191_v22  ;;  %v2423_v36 = vmul.f32 %v8614_v17, %v10059_v9  ;;  %v8654_v57 = vunpack.i.h.bf16 %v10960_v38  ;;  %v8653_v60 = vunpack.i.l.bf16 %v10960_v38  ;;  %v8993_v4 = vpop.eup %8992  ;;  %v11020_v25 = vpop.f32.mrf.mxu0 }
 0x152   : > { %v3096_v63 = vmul.f32 1.6732632, %v7259_v3  ;;  %v2843_v32 = vmul.f32 1.442695, %v10952_v44  ;;  %v2853_v47 = vmul.f32 1.442695, %v10958_v49  ;;  %v1763_v40 = vadd.f32 %v10710_v33, %v1362_v1 }
 0x153   : > { %vm2715_vm3 = vcmp.gt.f32.partialorder %v10838_v19, 0.0  ;;  %v2849_v5 = vmul.f32 1.442695, %v10978_v34  ;;  %v14179_v45 = vunpack.i.l.bf16 %v10735_v55  ;;  %v14180_v20 = vunpack.i.h.bf16 %v14176_v13 }
 0x154   : > { %v3189_v17 = vsel %vm2709_vm0, %v10795_v8, %v3093_v23  ;;  %v7262_v27 = vadd.f32 -1.0, %v8991_v41  ;;  %v2855_v33 = vmul.f32 1.442695, %v10985_v15  ;;  %v11016_v22 = vadd.f32 %v10892_v11, %v2524_v0 }
 0x155   : > { %v1365_v42 = vmul.f32 %v14179_v45, %v14163_v26  ;;  %v1368_v46 = vmul.f32 %v14180_v20, %v14163_v26  ;;  %v3192_v13 = vsel %vm2712_vm1, %v10800_v53, %v3096_v63  ;;  %v11025_v1 = vadd.f32 -1.0, %v8993_v4 }
 0x156   : > { %8998 = vpow2.f32 %v2853_v47  ;;  %v3090_v8 = vmul.f32 1.6732632, %v10936_v39  ;;  %v2519_v31 = vadd.f32 %v2423_v36, %v1763_v40  ;;  %v8903_v0 = vpack.i.bf16 %v694_v43, %v693_v14  ;;  %v8640_v36 = vpop.permute.xlu0 %8639 }
 0x157   : > { %v1776_v3 = vadd.f32 %v10737_v12, %v1365_v42  ;;  %v1787_v21 = vadd.f32 %v10751_v48, %v1368_v46  ;;  %9000 = vpow2.f32 %v2849_v5  ;;  %v8995_v12 = vpop.eup %8994  ;;  %v11029_v41 = vmul.f32 1.050701, %v3189_v17 }
 0x158   : > { %v3099_v48 = vmul.f32 1.6732632, %v7262_v27  ;;  %9002 = vpow2.f32 %v2843_v32  ;;  %v3186_v53 = vsel %vm2706_vm2, %v10780_v58, %v3090_v8  ;;  %v8997_v4 = vpop.eup %8996  ;;  %v2861_v63 = vmul.f32 1.442695, %v11016_v22  ;;  %8904 = vperm.xlu1 %8902, %v8903_v0  }
 0x159   : > { %v2522_v23 = vadd.f32 %v10851_v24, %v1776_v3  ;;  %9004 = vpow2.f32 %v2855_v33  ;;  %v2525_v39 = vadd.f32 %v10854_v7, %v1787_v21  ;;  %v3282_v47 = vmul.f32 1.050701, %v3186_v53  ;;  %v11036_v24 = vpop.f32.mrf.mxu0 }
 0x15a   : > { %v11038_v14 = vmul.f32 1.050701, %v3192_v13  ;;  %vm2713_vm4 = vcmp.gt.f32.partialorder %v10895_v10, 0.0  ;;  %v8665_v43 = vunpack.i.h.bf16 %v8663_v50  ;;  %v7260_v58 = vadd.f32 -1.0, %v8995_v12 }
 0x15b   : > { %v11042_v32 = vadd.f32 %v10892_v11, %v2522_v23  ;;  %v8664_v40 = vunpack.i.l.bf16 %v8663_v50  ;;  %v11045_v5 = vadd.f32 %v10892_v11, %v2519_v31  ;;  %v14181_v7 = vunpack.i.l.bf16 %v10867_v6  ;;  %v11062_v21 = vpop.f32.mrf.mxu0 }
 0x15c   : > { %v3195_v42 = vsel %vm2715_vm3, %v10838_v19, %v3099_v48  ;;  %v7263_v20 = vadd.f32 -1.0, %v8997_v4  ;;  %v8641_v46 = vunpack.i.l.bf16 %v8640_v36  ;;  %v3365_v17 = vpack.c.bf16 %v3282_v47, %v10969_v54  ;;  %8914 = vset.pattern.permute.xlu1 %v14111_v29  ;;  %v8668_v54 = vpop.permute.xlu1 %8667  ;;  %v14183_v48 = vld [vmem:[#allocation7_spill] sm:$0xff]  ;;  %v11084_v4 = vpop.permute.xlu0 %8656 }
 0x15d   : > { %v1371_v45 = vmul.f32 %v14181_v7, %v14163_v26  ;;  %vm2710_vm5 = vcmp.gt.f32.partialorder %v10843_v51, 0.0  ;;  %9006 = vpow2.f32 %v2861_v63  ;;  %v11056_v27 = vadd.f32 %v10892_v11, %v2525_v39  ;;  %8916 = vperm.xlu1 %8914, %v8903_v0  }
 0x15e   : > { %v3366_v33 = vpack.c.bf16 %v10971_v30, %v10905_v18  ;;  %vm2716_vm6 = vcmp.gt.f32.partialorder %v10909_v62, 0.0  ;;  %v11066_v19 = vmul.f32 %v8665_v43, %v10059_v9  ;;  %v8635_v13 = vunpack.i.l.bf16 %v11003_v28  ;;  %8015 = vmatprep.mubr.msk.bf16.mxu1 %vm3424_vm7, %v3365_v17  ;;  %v11087_v43 = vpop.f32.mrf.mxu0 }
 0x15f   : > { %v1800_v3 = vadd.f32 %v10775_v2, %v1371_v45  ;;  %v2857_v8 = vmul.f32 1.442695, %v11042_v32  ;;  %v14182_v50 = vunpack.i.h.bf16 %v10735_v55  ;;  %v3097_v29 = vmul.f32 1.6732632, %v7260_v58 }
 0x160   : > { %v11075_v2 = vmul.f32 %v8664_v40, %v10059_v9  ;;  %v2851_v30 = vmul.f32 1.442695, %v11045_v5  ;;  %8016 = vmatmul.mubr.msk.bf16.gmra.mxu1 %vm3424_vm7, %v3366_v33  ;;  %v11080_v23 = vmul.f32 1.050701, %v3195_v42  ;;  %v8642_v12 = vunpack.i.h.bf16 %v8640_v36  ;;  %v14184_v36 = vld [vmem:[#allocation15_spill] sm:$0xff] }
 0x161   : > { %v1366_v18 = vmul.f32 %v14182_v50, %v14163_v26  ;;  %v2528_v31 = vadd.f32 %v10982_v61, %v1800_v3  ;;  %v1369_v55 = vmul.f32 %v8641_v46, %v14163_v26  ;;  %v3100_v0 = vmul.f32 1.6732632, %v7263_v20 }
 0x162   : > { %v8670_v63 = vunpack.i.h.bf16 %v8668_v54  ;;  %v8669_v39 = vunpack.i.l.bf16 %v8668_v54  ;;  %v2863_v47 = vmul.f32 1.442695, %v11056_v27  ;;  %v2430_v58 = vmul.f32 %v8635_v13, %v10059_v9 }
 0x163   : > { %v1779_v53 = vadd.f32 %v14183_v48, %v1366_v18  ;;  %9008 = vpow2.f32 %v2857_v8  ;;  %v11091_v61 = vadd.f32 %v10892_v11, %v2528_v31  ;;  %v1792_v40 = vadd.f32 %v14184_v36, %v1369_v55  ;;  %v8999_v7 = vpop.eup %8998  ;;  %v14187_v36 = vld [vmem:[#allocation18_spill] sm:$0xff] }
 0x164   : > { %v3193_v45 = vsel %vm2713_vm4, %v10895_v10, %v3097_v29  ;;  %9010 = vpow2.f32 %v2851_v30  ;;  %v8658_v42 = vunpack.i.l.bf16 %v11084_v4  ;;  %v14185_v20 = vunpack.i.h.bf16 %v10867_v6  ;;  %v9001_v17 = vpop.eup %9000  ;;  %v14186_v6 = vld [vmem:[#allocation3_spill] sm:$0xff]  ;;  %v11111_v29 = vpop.f32.mrf.mxu0 }
 0x165   : > { %v8636_v33 = vunpack.i.h.bf16 %v11003_v28  ;;  %v2523_v3 = vadd.f32 %v10831_v37, %v1779_v53  ;;  %v1370_v54 = vmul.f32 %v8642_v12, %v14163_v26  ;;  %v3094_v13 = vmul.f32 1.6732632, %v11025_v1  ;;  %v9003_v8 = vpop.eup %9002  ;;  %v11114_v37 = vpop.permute.xlu1 %8678 }
 0x166   : > { %v1372_v46 = vmul.f32 %v14185_v20, %v14163_v26  ;;  %vm2719_vm8 = vcmp.gt.f32.partialorder %v10958_v49, 0.0  ;;  %v11107_v10 = vmul.f32 %v8670_v63, %v10059_v9  ;;  %v2436_v50 = vmul.f32 %v8669_v39, %v10059_v9  ;;  %v9005_v28 = vpop.eup %9004  ;;  %v14188_v20 = vld [vmem:[#allocation10_spill] sm:$0xff] }
 0x167   : > { %9012 = vpow2.f32 %v2863_v47  ;;  %v7266_v30 = vadd.f32 -1.0, %v8999_v7  ;;  %vm2717_vm9 = vcmp.gt.f32.partialorder %v10978_v34, 0.0  ;;  %v2869_v1 = vmul.f32 1.442695, %v11091_v61 }
 0x168   : > { %v1803_v18 = vadd.f32 %v14186_v6, %v1372_v46  ;;  %v2526_v31 = vadd.f32 %v2430_v58, %v1792_v40  ;;  %v3190_v12 = vsel %vm2710_vm5, %v10843_v51, %v3094_v13  ;;  %v3196_v48 = vsel %vm2716_vm6, %v10909_v62, %v3100_v0  ;;  %v11131_v51 = vpop.permute.xlu0 %8672  ;;  %v11137_v46 = vpop.f32.mrf.mxu0 }
 0x169   : > { %v7264_v53 = vadd.f32 -1.0, %v9001_v17  ;;  %v3286_v55 = vmul.f32 1.050701, %v3190_v12  ;;  %v1375_v63 = vmul.f32 %v8658_v42, %v14163_v26  ;;  %vm2720_vm10 = vcmp.gt.f32.partialorder %v10985_v15, 0.0 }
 0x16a   : > { %v2431_v39 = vmul.f32 %v8636_v33, %v10059_v9  ;;  %v11127_v47 = vadd.f32 %v10892_v11, %v2523_v3  ;;  %v2529_v58 = vadd.f32 %v10975_v35, %v1803_v18  ;;  %v1795_v40 = vadd.f32 %v14187_v36, %v1370_v54  ;;  %v9007_v17 = vpop.eup %9006  ;;  %v8685_v18 = vpop.permute.xlu1 %8684 }
 0x16b   : > { %v11133_v7 = vmul.f32 1.050701, %v3193_v45  ;;  %v7267_v62 = vadd.f32 -1.0, %v9005_v28  ;;  %v3367_v0 = vpack.c.bf16 %v3286_v55, %v11029_v41  ;;  %v1816_v42 = vadd.f32 %v14188_v20, %v1375_v63  ;;  %v14189_v55 = vld [vmem:[#allocation9_spill] sm:$0xff] }
 0x16c   : > { %v3103_v33 = vmul.f32 1.6732632, %v7266_v30  ;;  %9014 = vpow2.f32 %v2869_v1  ;;  %v11140_v3 = vadd.f32 %v10892_v11, %v2526_v31  ;;  %v3368_v35 = vpack.c.bf16 %v11038_v14, %v10991_v16  ;;  %v11159_v31 = vpop.f32.mrf.mxu0 }
 0x16d   : > { %v11144_v54 = vmul.f32 1.050701, %v3196_v48  ;;  %v7261_v45 = vadd.f32 -1.0, %v9003_v8  ;;  %v3101_v13 = vmul.f32 1.6732632, %v7264_v53  ;;  %v8659_v6 = vunpack.i.h.bf16 %v11084_v4  ;;  %8019 = vmatprep.mubr.msk.bf16.mxu1 %vm3424_vm7, %v3367_v0 }
 0x16e   : > { %vm2714_vm11 = vcmp.gt.f32.partialorder %v10952_v44, 0.0  ;;  %vm2723_vm12 = vcmp.gt.f32.partialorder %v11016_v22, 0.0  ;;  %v2859_v41 = vmul.f32 1.442695, %v11127_v47  ;;  %v11152_v28 = vadd.f32 %v10892_v11, %v2529_v58  ;;  %8020 = vmatmul.mubr.msk.bf16.gmra.mxu1 %vm3424_vm7, %v3368_v35 }
 0x16f   : > { %v2527_v30 = vadd.f32 %v2431_v39, %v1795_v40  ;;  %v1373_v16 = vmul.f32 %v8653_v60, %v14163_v26  ;;  %v3104_v14 = vmul.f32 1.6732632, %v7267_v62  ;;  %v7270_v4 = vadd.f32 -1.0, %v9007_v17  ;;  %v11167_v39 = vpop.permute.xlu0 %8695 }
 0x170   : > { %v8681_v8 = vunpack.i.h.bf16 %v11114_v37  ;;  %v2532_v1 = vadd.f32 %v2436_v50, %v1816_v42  ;;  %v3199_v12 = vsel %vm2719_vm8, %v10958_v49, %v3103_v33  ;;  %v8680_v48 = vunpack.i.l.bf16 %v11114_v37  ;;  %v9009_v60 = vpop.eup %9008  ;;  %v14190_v33 = vld [vmem:[#allocation6_spill] sm:$0xff] }
 0x171   : > { %v2865_v53 = vmul.f32 1.442695, %v11140_v3  ;;  %v1808_v63 = vadd.f32 %v14189_v55, %v1373_v16  ;;  %v3197_v58 = vsel %vm2717_vm9, %v10978_v34, %v3101_v13  ;;  %v8687_v50 = vunpack.i.h.bf16 %v8685_v18  ;;  %v9011_v62 = vpop.eup %9010  ;;  %v11186_v13 = vpop.f32.mrf.mxu0 }
 0x172   : > { %v8686_v36 = vunpack.i.l.bf16 %v8685_v18  ;;  %v1376_v40 = vmul.f32 %v8659_v6, %v14163_v26  ;;  %9016 = vpow2.f32 %v2859_v41  ;;  %v2871_v49 = vmul.f32 1.442695, %v11152_v28  ;;  %v11188_v18 = vpop.permute.xlu1 %8690 }
 0x173   : > { %v11175_v0 = vadd.f32 %v10892_v11, %v2527_v30  ;;  %v2530_v20 = vadd.f32 %v11075_v2, %v1808_v63  ;;  %v3200_v42 = vsel %vm2720_vm10, %v10985_v15, %v3104_v14  ;;  %v3107_v17 = vmul.f32 1.6732632, %v7270_v4  ;;  %v11204_v63 = vpop.permute.xlu0 %8701 }
 0x174   : > { %vm2721_vm13 = vcmp.gt.f32.partialorder %v11042_v32, 0.0  ;;  %v11183_v34 = vadd.f32 %v10892_v11, %v2532_v1  ;;  %v1819_v35 = vadd.f32 %v14190_v33, %v1376_v40  ;;  %v9013_v6 = vpop.eup %9012  ;;  %v7268_v41 = vadd.f32 -1.0, %v9009_v60 }
 0x175   : > { %9018 = vpow2.f32 %v2865_v53  ;;  %v11191_v2 = vadd.f32 %v10892_v11, %v2530_v20  ;;  %v3098_v30 = vmul.f32 1.6732632, %v7261_v45  ;;  %v11193_v15 = vmul.f32 1.050701, %v3199_v12 }
 0x176   : > { %v11195_v16 = vmul.f32 1.050701, %v3197_v58  ;;  %v7265_v14 = vadd.f32 -1.0, %v9011_v62  ;;  %v2533_v4 = vadd.f32 %v11107_v10, %v1819_v35  ;;  %v11198_v1 = vmul.f32 1.050701, %v3200_v42  ;;  %v11214_v58 = vpop.f32.mrf.mxu0  ;;  %v11230_v35 = vpop.permute.xlu1 %8707 }
 0x177   : > { %v11201_v55 = vmul.f32 %v8687_v50, %v10059_v9  ;;  %9020 = vpow2.f32 %v2871_v49  ;;  %v2867_v53 = vmul.f32 1.442695, %v11175_v0  ;;  %v3203_v45 = vsel %vm2723_vm12, %v11016_v22, %v3107_v17 }
 0x178   : > { %vm2724_vm14 = vcmp.gt.f32.partialorder %v11056_v27, 0.0  ;;  %v7271_v12 = vadd.f32 -1.0, %v9013_v6  ;;  %v2877_v60 = vmul.f32 1.442695, %v11183_v34  ;;  %v3194_v10 = vsel %vm2714_vm11, %v10952_v44, %v3098_v30 }
 0x179   : > { %v3105_v50 = vmul.f32 1.6732632, %v7268_v41  ;;  %v2440_v40 = vmul.f32 %v8686_v36, %v10059_v9  ;;  %v2873_v62 = vmul.f32 1.442695, %v11191_v2  ;;  %v3290_v49 = vmul.f32 1.050701, %v3194_v10  ;;  %v9015_v20 = vpop.eup %9014 }
 0x17a   : > { %vm2718_vm15 = vcmp.gt.f32.partialorder %v11045_v5, 0.0  ;;  %v8674_v22 = vunpack.i.l.bf16 %v11131_v51  ;;  %v11221_v42 = vadd.f32 %v10892_v11, %v2533_v4  ;;  %v1374_v44 = vmul.f32 %v8654_v57, %v14163_v26  ;;  %v14191_v41 = vld [vmem:[#allocation19_spill] sm:$0xff]  ;;  %v11237_v57 = vpop.f32.mrf.mxu0 }
 0x17b   : > { %v8703_v17 = vunpack.i.l.bf16 %v11204_v63  ;;  %v11227_v33 = vmul.f32 1.050701, %v3203_v45  ;;  %9022 = vpow2.f32 %v2867_v53  ;;  %v8675_v36 = vunpack.i.h.bf16 %v11131_v51 }
 0x17c   : > { %v3369_v6 = vpack.c.bf16 %v3290_v49, %v11133_v7  ;;  %9024 = vpow2.f32 %v2877_v60  ;;  %v1811_v30 = vadd.f32 %v14191_v41, %v1374_v44  ;;  %v3370_v4 = vpack.c.bf16 %v11144_v54, %v11080_v23 }
 0x17d   : > { %v1379_v38 = vmul.f32 %v8680_v48, %v14163_v26  ;;  %v3201_v53 = vsel %vm2721_vm13, %v11042_v32, %v3105_v50  ;;  %v3108_v45 = vmul.f32 1.6732632, %v7271_v12  ;;  %vm2727_vm0 = vcmp.gt.f32.partialorder %v11091_v61, 0.0 }
 0x17e   : > { %v7274_v51 = vadd.f32 -1.0, %v9015_v20  ;;  %9026 = vpow2.f32 %v2873_v62  ;;  %8023 = vmatprep.mubr.msk.bf16.mxu1 %vm3424_vm7, %v3369_v6  ;;  %v2879_v7 = vmul.f32 1.442695, %v11221_v42  ;;  %v2438_v23 = vmul.f32 %v8703_v17, %v10059_v9  ;;  %v11257_v17 = vpop.f32.mrf.mxu0  ;;  %v8713_v6 = vpop.permute.xlu1 %8712 }
 0x17f   : > { %8024 = vmatmul.mubr.msk.bf16.gmra.mxu1 %vm3424_vm7, %v3370_v4  ;;  %v1832_v54 = vadd.f32 %v10931_v52, %v1379_v38  ;;  %v1377_v48 = vmul.f32 %v8674_v22, %v14163_v26  ;;  %v8693_v60 = vunpack.i.h.bf16 %v11188_v18  ;;  %v8692_v32 = vunpack.i.l.bf16 %v11188_v18  ;;  %v9017_v50 = vpop.eup %9016 }
 0x180   : > { %v8698_v12 = vunpack.i.h.bf16 %v11167_v39  ;;  %v8697_v10 = vunpack.i.l.bf16 %v11167_v39  ;;  %v11253_v62 = vmul.f32 1.050701, %v3201_v53  ;;  %v2531_v49 = vadd.f32 %v11066_v19, %v1811_v30 }
 0x181   : > { %v2536_v20 = vadd.f32 %v2440_v40, %v1832_v54  ;;  %v1824_v44 = vadd.f32 %v10955_v59, %v1377_v48  ;;  %v3204_v52 = vsel %vm2724_vm14, %v11056_v27, %v3108_v45  ;;  %v3111_v22 = vmul.f32 1.6732632, %v7274_v51 }
 0x182   : > { %v1380_v41 = vmul.f32 %v8681_v8, %v14163_v26  ;;  %v3102_v4 = vmul.f32 1.6732632, %v7265_v14  ;;  %v9019_v38 = vpop.eup %9018  ;;  %9028 = vpow2.f32 %v2879_v7  ;;  %v8704_v19 = vunpack.i.h.bf16 %v11204_v63  ;;  %v11284_v7 = vpop.f32.mrf.mxu0 }
 0x183   : > { %v11267_v40 = vadd.f32 %v10892_v11, %v2536_v20  ;;  %v2534_v59 = vadd.f32 %v2438_v23, %v1824_v44  ;;  %v11269_v30 = vadd.f32 -1.0, %v9017_v50  ;;  %v1378_v27 = vmul.f32 %v8675_v36, %v14163_v26 }
 0x184   : > { %v1835_v53 = vadd.f32 %v10996_v56, %v1380_v41  ;;  %v3198_v37 = vsel %vm2718_vm15, %v11045_v5, %v3102_v4  ;;  %v9021_v8 = vpop.eup %9020  ;;  %v11276_v14 = vmul.f32 1.050701, %v3204_v52  ;;  %vm2725_vm1 = vcmp.gt.f32.partialorder %v11140_v3, 0.0  ;;  %v11297_v41 = vpop.permute.xlu1 %8718 }
 0x185   : > { %v8710_v63 = vunpack.i.h.bf16 %v11230_v35  ;;  %v11281_v45 = vadd.f32 %v10892_v11, %v2531_v49  ;;  %v2885_v51 = vmul.f32 1.442695, %v11267_v40  ;;  %v7272_v56 = vadd.f32 -1.0, %v9019_v38 }
 0x186   : > { %v11287_v36 = vadd.f32 %v10892_v11, %v2534_v59  ;;  %v2537_v5 = vadd.f32 %v11201_v55, %v1835_v53  ;;  %v3294_v23 = vmul.f32 1.050701, %v3198_v37  ;;  %v3207_v54 = vsel %vm2727_vm0, %v11091_v61, %v3111_v22  ;;  %v11305_v22 = vpop.f32.mrf.mxu0 }
 0x187   : > { %vm2728_vm2 = vcmp.gt.f32.partialorder %v11152_v28, 0.0  ;;  %v8709_v48 = vunpack.i.l.bf16 %v11230_v35  ;;  %v2439_v50 = vmul.f32 %v8704_v19, %v10059_v9  ;;  %v8714_v49 = vunpack.i.l.bf16 %v8713_v6 }
 0x188   : > { %v7275_v20 = vadd.f32 -1.0, %v9021_v8  ;;  %9030 = vpow2.f32 %v2885_v51  ;;  %v8715_v44 = vunpack.i.h.bf16 %v8713_v6  ;;  %v1827_v52 = vadd.f32 %v11020_v25, %v1378_v27  ;;  %v9023_v55 = vpop.eup %9022 }
 0x189   : > { %v2875_v4 = vmul.f32 1.442695, %v11281_v45  ;;  %v11301_v38 = vadd.f32 %v10892_v11, %v2537_v5  ;;  %v3371_v61 = vpack.c.bf16 %v3294_v23, %v11195_v16  ;;  %v1383_v35 = vmul.f32 %v8697_v10, %v14163_v26  ;;  %v9025_v19 = vpop.eup %9024 }
 0x18a   : > { %v3109_v59 = vmul.f32 1.6732632, %v7272_v56  ;;  %v11308_v6 = vmul.f32 %v8710_v63, %v10059_v9  ;;  %v2881_v25 = vmul.f32 1.442695, %v11287_v36  ;;  %v3372_v53 = vpack.c.bf16 %v11198_v1, %v11193_v15  ;;  %v11322_v15 = vpop.permute.xlu0 %8723 }
 0x18b   : > { %v9027_v27 = vpop.eup %9026  ;;  %v11313_v37 = vmul.f32 1.050701, %v3207_v54  ;;  %v2442_v8 = vmul.f32 %v8709_v48, %v10059_v9  ;;  %v2444_v16 = vmul.f32 %v8714_v49, %v10059_v9  ;;  %8027 = vmatprep.mubr.msk.bf16.mxu1 %vm3424_vm7, %v3371_v61  ;;  %v1848_v10 = vadd.f32 %v11036_v24, %v1383_v35  ;;  %v11328_v24 = vpop.f32.mrf.mxu0 }
 0x18c   : > { %vm2722_vm3 = vcmp.gt.f32.partialorder %v11127_v47, 0.0  ;;  %v3112_v63 = vmul.f32 1.6732632, %v7275_v20  ;;  %v2445_v51 = vmul.f32 %v8715_v44, %v10059_v9  ;;  %v2535_v56 = vadd.f32 %v2439_v50, %v1827_v52  ;;  %8028 = vmatmul.mubr.msk.bf16.gmra.mxu1 %vm3424_vm7, %v3372_v53 }
 0x18d   : > { %v1381_v1 = vmul.f32 %v8692_v32, %v14163_v26  ;;  %v7278_v5 = vadd.f32 -1.0, %v9025_v19  ;;  %9032 = vpow2.f32 %v2875_v4  ;;  %v2887_v23 = vmul.f32 1.442695, %v11301_v38  ;;  %v11336_v32 = vpop.permute.xlu1 %8735  ;;  %v11356_v53 = vpop.f32.mrf.mxu0 }
 0x18e   : > { %v2540_v54 = vadd.f32 %v2444_v16, %v1848_v10  ;;  %v3205_v48 = vsel %vm2725_vm1, %v11140_v3, %v3109_v59  ;;  %vm2731_vm4 = vcmp.gt.f32.partialorder %v11183_v34, 0.0  ;;  %vm2729_vm5 = vcmp.gt.f32.partialorder %v11191_v2, 0.0  ;;  %v11362_v10 = vpop.permute.xlu0 %8729 }
 0x18f   : > { %v7276_v50 = vadd.f32 -1.0, %v9027_v27  ;;  %9034 = vpow2.f32 %v2881_v25  ;;  %v1840_v49 = vadd.f32 %v11062_v21, %v1381_v1  ;;  %v11338_v20 = vadd.f32 -1.0, %v9023_v55  ;;  %v9029_v3 = vpop.eup %9028 }
 0x190   : > { %v8721_v44 = vunpack.i.h.bf16 %v11297_v41  ;;  %v8720_v52 = vunpack.i.l.bf16 %v11297_v41  ;;  %v11343_v4 = vadd.f32 %v10892_v11, %v2540_v54  ;;  %v3208_v61 = vsel %vm2728_vm2, %v11152_v28, %v3112_v63 }
 0x191   : > { %v11349_v35 = vadd.f32 %v10892_v11, %v2535_v56  ;;  %v2538_v21 = vadd.f32 %v2442_v8, %v1840_v49  ;;  %v1384_v55 = vmul.f32 %v8698_v12, %v14163_v26  ;;  %v3115_v19 = vmul.f32 1.6732632, %v7278_v5 }
 0x192   : > { %9036 = vpow2.f32 %v2887_v23  ;;  %v2893_v59 = vmul.f32 1.442695, %v11343_v4  ;;  %v8737_v25 = vunpack.i.l.bf16 %v11336_v32  ;;  %v3113_v27 = vmul.f32 1.6732632, %v7276_v50  ;;  %v11379_v50 = vpop.f32.mrf.mxu0 }
 0x193   : > { %v11359_v16 = vadd.f32 %v10892_v11, %v2538_v21  ;;  %v1851_v28 = vadd.f32 %v11087_v43, %v1384_v55  ;;  %v1382_v39 = vmul.f32 %v8693_v60, %v14163_v26  ;;  %v7279_v12 = vadd.f32 -1.0, %v9029_v3 }
 0x194   : > { %9038 = vpow2.f32 %v2893_v59  ;;  %v3106_v8 = vmul.f32 1.6732632, %v11269_v30  ;;  %v1387_v63 = vmul.f32 %v8720_v52, %v14163_v26  ;;  %vm2732_vm6 = vcmp.gt.f32.partialorder %v11221_v42, 0.0  ;;  %v11385_v52 = vpop.permute.xlu1 %8741 }
 0x195   : > { %v2883_v56 = vmul.f32 1.442695, %v11349_v35  ;;  %v2889_v1 = vmul.f32 1.442695, %v11359_v16  ;;  %v2541_v5 = vadd.f32 %v2445_v51, %v1851_v28  ;;  %v1843_v43 = vadd.f32 %v11111_v29, %v1382_v39  ;;  %v9031_v23 = vpop.eup %9030  ;;  %v8925_v28 = vld [vmem:[%s14080_s7] sm:$0xff]  }
 0x196   : > { %v2448_v54 = vmul.f32 %v8737_v25, %v10059_v9  ;;  %v8731_v18 = vunpack.i.l.bf16 %v11362_v10  ;;  %v3202_v60 = vsel %vm2722_vm3, %v11127_v47, %v3106_v8  ;;  %v1864_v30 = vadd.f32 %v11137_v46, %v1387_v63  ;;  %8089 = vmatprep.subr.bf16.mxu0 %v8925_v28 }
 0x197   : > { %v8725_v49 = vunpack.i.l.bf16 %v11322_v15  ;;  %9040 = vpow2.f32 %v2889_v1  ;;  %v11383_v51 = vadd.f32 %v10892_v11, %v2541_v5  ;;  %v3298_v29 = vmul.f32 1.050701, %v3202_v60  ;;  %8090 = vmatpush3.bf16.msra.mxu0 %v8925_v28 }
 0x198   : > { %v3211_v3 = vsel %vm2731_vm4, %v11183_v34, %v3115_v19  ;;  %v3209_v47 = vsel %vm2729_vm5, %v11191_v2, %v3113_v27  ;;  %v2539_v46 = vadd.f32 %v11308_v6, %v1843_v43  ;;  %v2544_v21 = vadd.f32 %v2448_v54, %v1864_v30  ;;  %v11406_v27 = vpop.f32.mrf.mxu0  ;;  %v11427_v43 = vpop.permute.xlu1 %8752 }
 0x199   : > { %v3116_v55 = vmul.f32 1.6732632, %v7279_v12  ;;  %v7282_v59 = vadd.f32 -1.0, %v9031_v23  ;;  %9042 = vpow2.f32 %v2883_v56  ;;  %v3373_v25 = vpack.c.bf16 %v3298_v29, %v11253_v62 }
 0x19a   : > { %vm2726_vm8 = vcmp.gt.f32.partialorder %v11175_v0, 0.0  ;;  %v2895_v34 = vmul.f32 1.442695, %v11383_v51  ;;  %v3374_v19 = vpack.c.bf16 %v11276_v14, %v11227_v33  ;;  %v11403_v2 = vadd.f32 %v10892_v11, %v2544_v21  ;;  %v9033_v39 = vpop.eup %9032  ;;  %v11437_v54 = vpop.f32.mrf.mxu0 }
 0x19b   : > { %v1385_v6 = vmul.f32 %v8731_v18, %v14163_v26  ;;  %v11408_v62 = vmul.f32 1.050701, %v3205_v48  ;;  %v11410_v12 = vmul.f32 1.050701, %v3208_v61  ;;  %v8726_v8 = vunpack.i.h.bf16 %v11322_v15  ;;  %8031 = vmatprep.mubr.msk.bf16.mxu1 %vm3424_vm7, %v3373_v25 }
 0x19c   : > { %v2446_v63 = vmul.f32 %v8725_v49, %v10059_v9  ;;  %v9035_v33 = vpop.eup %9034  ;;  %vm2735_vm9 = vcmp.gt.f32.partialorder %v11267_v40, 0.0  ;;  %v8738_v14 = vunpack.i.h.bf16 %v11336_v32  ;;  %v8732_v56 = vunpack.i.h.bf16 %v11362_v10  ;;  %8032 = vmatmul.mubr.msk.bf16.gmra.mxu1 %vm3424_vm7, %v3374_v19 }
 0x19d   : > { %v11419_v1 = vadd.f32 %v10892_v11, %v2539_v46  ;;  %v11422_v48 = vmul.f32 1.050701, %v3211_v3  ;;  %v11424_v15 = vmul.f32 1.050701, %v3209_v47  ;;  %v3119_v61 = vmul.f32 1.6732632, %v7282_v59  ;;  %v11444_v3 = vpop.permute.xlu0 %8746 }
 0x19e   : > { %v1856_v5 = vadd.f32 %v11159_v31, %v1385_v6  ;;  %v3212_v32 = vsel %vm2732_vm6, %v11221_v42, %v3116_v55  ;;  %vm2733_vm10 = vcmp.gt.f32.partialorder %v11287_v36, 0.0  ;;  %9044 = vpow2.f32 %v2895_v34  ;;  %v11459_v34 = vpop.f32.mrf.mxu0 }
 0x19f   : > { %v2901_v10 = vmul.f32 1.442695, %v11403_v2  ;;  %v1388_v23 = vmul.f32 %v8721_v44, %v14163_v26  ;;  %v9037_v18 = vpop.eup %9036  ;;  %v11439_v60 = vadd.f32 -1.0, %v9033_v39  ;;  %v7280_v31 = vadd.f32 -1.0, %v9035_v33 }
 0x1a0   : > { %v2447_v30 = vmul.f32 %v8726_v8, %v10059_v9  ;;  %v2542_v49 = vadd.f32 %v2446_v63, %v1856_v5  ;;  %v2449_v42 = vmul.f32 %v8738_v14, %v10059_v9  ;;  %v2891_v29 = vmul.f32 1.442695, %v11419_v1  ;;  %v8758_v8 = vpop.permute.xlu1 %8757 }
 0x1a1   : > { %v1867_v47 = vadd.f32 %v11186_v13, %v1388_v23  ;;  %v1386_v41 = vmul.f32 %v8732_v56, %v14163_v26  ;;  %v9039_v44 = vpop.eup %9038  ;;  %v11448_v46 = vmul.f32 1.050701, %v3212_v32  ;;  %v3215_v21 = vsel %vm2735_vm9, %v11267_v40, %v3119_v61 }
 0x1a2   : > { %vm2736_vm11 = vcmp.gt.f32.partialorder %v11301_v38, 0.0  ;;  %v11455_v55 = vadd.f32 %v10892_v11, %v2542_v49  ;;  %v3110_v59 = vmul.f32 1.6732632, %v11338_v20  ;;  %v7283_v25 = vadd.f32 -1.0, %v9037_v18  ;;  %v11477_v18 = vpop.permute.xlu0 %8762 }
 0x1a3   : > { %9046 = vpow2.f32 %v2901_v10  ;;  %v2545_v28 = vadd.f32 %v2449_v42, %v1867_v47  ;;  %v1859_v13 = vadd.f32 %v11214_v58, %v1386_v41  ;;  %v3117_v19 = vmul.f32 1.6732632, %v7280_v31 }
 0x1a4   : > { %v2897_v6 = vmul.f32 1.442695, %v11455_v55  ;;  %v8748_v39 = vunpack.i.l.bf16 %v11444_v3  ;;  %v3206_v40 = vsel %vm2726_vm8, %v11175_v0, %v3110_v59  ;;  %v9041_v63 = vpop.eup %9040  ;;  %vm2739_vm12 = vcmp.gt.f32.partialorder %v11343_v4, 0.0 }
 0x1a5   : > { %v7286_v20 = vadd.f32 -1.0, %v9039_v44  ;;  %vm2737_vm13 = vcmp.gt.f32.partialorder %v11359_v16, 0.0  ;;  %9048 = vpow2.f32 %v2891_v29  ;;  %v11469_v58 = vadd.f32 %v10892_v11, %v2545_v28  ;;  %v11479_v11 = vpop.f32.mrf.mxu0 }
 0x1a6   : > { %v3302_v33 = vmul.f32 1.050701, %v3206_v40  ;;  %vm2730_vm14 = vcmp.gt.f32.partialorder %v11281_v45, 0.0  ;;  %v7284_v14 = vadd.f32 -1.0, %v9041_v63  ;;  %v8743_v56 = vunpack.i.l.bf16 %v11385_v52  ;;  %v9043_v0 = vpop.eup %9042  ;;  %v11518_v63 = vpop.permute.xlu0 %8785 }
 0x1a7   : > { %9050 = vpow2.f32 %v2897_v6  ;;  %v2543_v61 = vadd.f32 %v2447_v30, %v1859_v13  ;;  %v11473_v5 = vmul.f32 1.050701, %v3215_v21  ;;  %v3120_v32 = vmul.f32 1.6732632, %v7283_v25  ;;  %v11493_v21 = vld [vmem:[%s14077_s4] ss:$0 sm:$0xff]  ;;  %v11500_v25 = vpop.permute.xlu1 %8768  ;;  %v11510_v28 = vpop.f32.mrf.mxu0 }
 0x1a8   : > { %v8744_v10 = vunpack.i.h.bf16 %v11385_v52  ;;  %v2903_v23 = vmul.f32 1.442695, %v11469_v58  ;;  %v3213_v31 = vsel %vm2733_vm10, %v11287_v36, %v3117_v19  ;;  %v8754_v49 = vunpack.i.l.bf16 %v11427_v43 }
 0x1a9   : > { %v3375_v30 = vpack.c.bf16 %v3302_v33, %v11408_v62  ;;  %v1391_v42 = vmul.f32 %v8748_v39, %v14163_v26  ;;  %v3123_v29 = vmul.f32 1.6732632, %v7286_v20  ;;  %v8749_v47 = vunpack.i.h.bf16 %v11444_v3 }
 0x1aa   : > { %v3376_v52 = vpack.c.bf16 %v11410_v12, %v11313_v37  ;;  %v8760_v41 = vunpack.i.h.bf16 %v8758_v8  ;;  %v3121_v44 = vmul.f32 1.6732632, %v7284_v14  ;;  %v11496_v36 = vadd.f32 %v11493_v21, %v2543_v61 }
 0x1ab   : > { %8035 = vmatprep.mubr.msk.bf16.mxu1 %vm3424_vm7, %v3375_v30  ;;  %v8759_v62 = vunpack.i.l.bf16 %v8758_v8  ;;  %v1389_v59 = vmul.f32 %v8743_v56, %v14163_v26  ;;  %v11502_v3 = vmul.f32 1.050701, %v3213_v31  ;;  %v3216_v37 = vsel %vm2736_vm11, %v11301_v38, %v3120_v32  ;;  %v9045_v13 = vpop.eup %9044  ;;  %v11535_v32 = vpop.f32.mrf.mxu0 }
 0x1ac   : > { %v11507_v12 = vadd.f32 -1.0, %v9043_v0  ;;  %9052 = vpow2.f32 %v2903_v23  ;;  %8036 = vmatmul.mubr.msk.bf16.gmra.mxu1 %vm3424_vm7, %v3376_v52  ;;  %v8755_v19 = vunpack.i.h.bf16 %v11427_v43  ;;  %v2450_v6 = vmul.f32 %v8754_v49, %v10059_v9  ;;  %v8775_v30 = vpop.permute.xlu1 %8774 }
 0x1ad   : > { %v1880_v39 = vadd.f32 %v11237_v57, %v1391_v42  ;;  %v1872_v40 = vadd.f32 %v11257_v17, %v1389_v59  ;;  %v2453_v8 = vmul.f32 %v8760_v41, %v10059_v9  ;;  %v2452_v38 = vmul.f32 %v8759_v62, %v10059_v9 }
 0x1ae   : > { %v1392_v20 = vmul.f32 %v8749_v47, %v14163_v26  ;;  %v3114_v33 = vmul.f32 1.6732632, %v11439_v60  ;;  %v3219_v43 = vsel %vm2739_vm12, %v11343_v4, %v3123_v29  ;;  %v3217_v57 = vsel %vm2737_vm13, %v11359_v16, %v3121_v44 }
 0x1af   : > { %vm2740_vm15 = vcmp.gt.f32.partialorder %v11383_v51, 0.0  ;;  %v2899_v17 = vmul.f32 1.442695, %v11496_v36  ;;  %v2546_v14 = vadd.f32 %v2450_v6, %v1872_v40  ;;  %v7287_v56 = vadd.f32 -1.0, %v9045_v13  ;;  %v11554_v6 = vpop.f32.mrf.mxu0 }
 0x1b0   : > { %v1883_v61 = vadd.f32 %v11284_v7, %v1392_v20  ;;  %v1390_v0 = vmul.f32 %v8744_v10, %v14163_v26  ;;  %v3210_v60 = vsel %vm2730_vm14, %v11281_v45, %v3114_v33  ;;  %v9047_v4 = vpop.eup %9046  ;;  %v11537_v23 = vmul.f32 1.050701, %v3216_v37 }
 0x1b1   : > { %v2451_v16 = vmul.f32 %v8755_v19, %v10059_v9  ;;  %v11541_v31 = vadd.f32 %v11493_v21, %v2546_v14  ;;  %v3306_v49 = vmul.f32 1.050701, %v3210_v60  ;;  %v8765_v7 = vunpack.i.h.bf16 %v11477_v18  ;;  %v8792_v19 = vpop.permute.xlu0 %8791  ;;  %v11573_v14 = vpop.permute.xlu1 %8780 }
 0x1b2   : > { %v2548_v42 = vadd.f32 %v2452_v38, %v1880_v39  ;;  %v2549_v10 = vadd.f32 %v2453_v8, %v1883_v61  ;;  %v1875_v29 = vadd.f32 %v11305_v22, %v1390_v0  ;;  %v9049_v47 = vpop.eup %9048  ;;  %v11545_v45 = vmul.f32 1.050701, %v3219_v43  ;;  %v11580_v0 = vpop.f32.mrf.mxu0 }
 0x1b3   : > { %v11547_v52 = vmul.f32 1.050701, %v3217_v57  ;;  %9054 = vpow2.f32 %v2899_v17  ;;  %v8764_v41 = vunpack.i.l.bf16 %v11477_v18  ;;  %v3124_v62 = vmul.f32 1.6732632, %v7287_v56 }
 0x1b4   : > { %v9051_v44 = vpop.eup %9050  ;;  %v7290_v59 = vadd.f32 -1.0, %v9047_v4  ;;  %v11551_v37 = vadd.f32 %v11493_v21, %v2549_v10  ;;  %v3377_v13 = vpack.c.bf16 %v3306_v49, %v11424_v15  ;;  %vm2734_vm0 = vcmp.gt.f32.partialorder %v11349_v35, 0.0 }
 0x1b5   : > { %vm2743_vm1 = vcmp.gt.f32.partialorder %v11403_v2, 0.0  ;;  %v2905_v22 = vmul.f32 1.442695, %v11541_v31  ;;  %v8788_v39 = vunpack.i.h.bf16 %v11518_v63  ;;  %v8770_v18 = vunpack.i.l.bf16 %v11500_v25 }
 0x1b6   : > { %v3378_v40 = vpack.c.bf16 %v11448_v46, %v11422_v48  ;;  %v7288_v8 = vadd.f32 -1.0, %v9051_v44  ;;  %v11564_v38 = vadd.f32 %v11493_v21, %v2548_v42  ;;  %v2911_v15 = vmul.f32 1.442695, %v11551_v37  ;;  %8039 = vmatprep.mubr.msk.bf16.mxu1 %vm3424_vm7, %v3377_v13 }
 0x1b7   : > { %v2547_v20 = vadd.f32 %v2451_v16, %v1875_v29  ;;  %v11568_v33 = vadd.f32 -1.0, %v9049_v47  ;;  %v8787_v43 = vunpack.i.l.bf16 %v11518_v63  ;;  %v8771_v57 = vunpack.i.h.bf16 %v11500_v25 }
 0x1b8   : > { %8040 = vmatmul.mubr.msk.bf16.gmra.mxu1 %vm3424_vm7, %v3378_v40  ;;  %v8793_v17 = vunpack.i.l.bf16 %v8792_v19  ;;  %v3220_v48 = vsel %vm2740_vm15, %v11383_v51, %v3124_v62  ;;  %v3127_v46 = vmul.f32 1.6732632, %v7290_v59  ;;  %vm2741_vm2 = vcmp.gt.f32.partialorder %v11455_v55, 0.0 }
 0x1b9   : > { %v8794_v56 = vunpack.i.h.bf16 %v8792_v19  ;;  %v1393_v61 = vmul.f32 %v8764_v41, %v14163_v26  ;;  %v9053_v60 = vpop.eup %9052  ;;  %9056 = vpow2.f32 %v2905_v22  ;;  %v1395_v4 = vmul.f32 %v8770_v18, %v14163_v26  ;;  %v11595_v19 = vpop.f32.mrf.mxu0 }
 0x1ba   : > { %v2454_v25 = vmul.f32 %v8793_v17, %v10059_v9  ;;  %v8777_v16 = vunpack.i.h.bf16 %v8775_v30  ;;  %v3125_v49 = vmul.f32 1.6732632, %v7288_v8  ;;  %v2909_v42 = vmul.f32 1.442695, %v11564_v38  ;;  %v8798_v8 = vpop.permute.xlu1 %8797 }
 0x1bb   : > { %9058 = vpow2.f32 %v2911_v15  ;;  %v11586_v51 = vadd.f32 %v11493_v21, %v2547_v20  ;;  %vm2744_vm3 = vcmp.gt.f32.partialorder %v11469_v58, 0.0  ;;  %v1888_v10 = vadd.f32 %v11356_v53, %v1393_v61 }
 0x1bc   : > { %v2457_v29 = vmul.f32 %v8777_v16, %v10059_v9  ;;  %v8776_v47 = vunpack.i.l.bf16 %v8775_v30  ;;  %v1396_v41 = vmul.f32 %v8771_v57, %v14163_v26  ;;  %v7291_v44 = vadd.f32 -1.0, %v9053_v60  ;;  %v8814_v60 = vpop.permute.xlu0 %8813 }
 0x1bd   : > { %v2455_v62 = vmul.f32 %v8794_v56, %v10059_v9  ;;  %v1394_v59 = vmul.f32 %v8765_v7, %v14163_v26  ;;  %v3118_v13 = vmul.f32 1.6732632, %v11507_v12  ;;  %v1896_v22 = vadd.f32 %v11328_v24, %v1395_v4 }
 0x1be   : > { %v2550_v18 = vadd.f32 %v2454_v25, %v1888_v10  ;;  %v2456_v40 = vmul.f32 %v8776_v47, %v10059_v9  ;;  %v1899_v53 = vadd.f32 %v11379_v50, %v1396_v41  ;;  %v11600_v30 = vmul.f32 1.050701, %v3220_v48  ;;  %v8803_v47 = vpop.permute.xlu1 %8802 }
 0x1bf   : > { %v3223_v15 = vsel %vm2743_vm1, %v11403_v2, %v3127_v46  ;;  %v1891_v7 = vadd.f32 %v11406_v27, %v1394_v59  ;;  %v3214_v12 = vsel %vm2734_vm0, %v11349_v35, %v3118_v13  ;;  %v3128_v56 = vmul.f32 1.6732632, %v7291_v44  ;;  %v11613_v2 = vpop.f32.mrf.mxu0 }
 0x1c0   : > { %v11610_v24 = vadd.f32 %v11493_v21, %v2550_v18  ;;  %v2552_v20 = vadd.f32 %v2456_v40, %v1896_v22  ;;  %v2553_v57 = vadd.f32 %v2457_v29, %v1899_v53  ;;  %v3310_v17 = vmul.f32 1.050701, %v3214_v12  ;;  %v9055_v50 = vpop.eup %9054  ;;  %v8820_v40 = vpop.permute.xlu0 %8819 }
 0x1c1   : > { %9060 = vpow2.f32 %v2909_v42  ;;  %v2907_v48 = vmul.f32 1.442695, %v11586_v51  ;;  %v2551_v61 = vadd.f32 %v2455_v62, %v1891_v7  ;;  %v3221_v27 = vsel %vm2741_vm2, %v11455_v55, %v3125_v49 }
 0x1c2   : > { %v2913_v35 = vmul.f32 1.442695, %v11610_v24  ;;  %v11620_v46 = vadd.f32 %v11493_v21, %v2553_v57  ;;  %v8782_v25 = vunpack.i.l.bf16 %v11573_v14  ;;  %v3379_v16 = vpack.c.bf16 %v3310_v17, %v11502_v3 }
 0x1c3   : > { %v11624_v4 = vadd.f32 %v11493_v21, %v2551_v61  ;;  %v3380_v42 = vpack.c.bf16 %v11537_v23, %v11473_v5  ;;  %v1399_v10 = vmul.f32 %v8787_v43, %v14163_v26  ;;  %vm2738_vm4 = vcmp.gt.f32.partialorder %v11419_v1, 0.0  ;;  %v11642_v23 = vpop.f32.mrf.mxu0 }
 0x1c4   : > { %9062 = vpow2.f32 %v2913_v35  ;;  %v11632_v55 = vadd.f32 %v11493_v21, %v2552_v20  ;;  %v2919_v49 = vmul.f32 1.442695, %v11620_v46  ;;  %v8816_v29 = vunpack.i.h.bf16 %v8814_v60  ;;  %8043 = vmatprep.mubr.msk.bf16.mxu1 %vm3424_vm7, %v3379_v16 }
 0x1c5   : > { %v11635_v41 = vmul.f32 1.050701, %v3223_v15  ;;  %v3224_v3 = vsel %vm2744_vm3, %v11469_v58, %v3128_v56  ;;  %9064 = vpow2.f32 %v2907_v48  ;;  %v2915_v5 = vmul.f32 1.442695, %v11624_v4  ;;  %8044 = vmatmul.mubr.msk.bf16.gmra.mxu1 %vm3424_vm7, %v3380_v42  ;;  %v11660_v17 = vpop.f32.mrf.mxu0 }
 0x1c6   : > { %v11644_v43 = vmul.f32 1.050701, %v3221_v27  ;;  %v8783_v44 = vunpack.i.h.bf16 %v11573_v14  ;;  %v1397_v62 = vmul.f32 %v8782_v25, %v14163_v26  ;;  %v8800_v59 = vunpack.i.h.bf16 %v8798_v8  ;;  %v9057_v13 = vpop.eup %9056 }
 0x1c7   : > { %v7289_v22 = vadd.f32 -1.0, %v9055_v50  ;;  %9066 = vpow2.f32 %v2919_v49  ;;  %v8815_v58 = vunpack.i.l.bf16 %v8814_v60  ;;  %v8799_v18 = vunpack.i.l.bf16 %v8798_v8 }
 0x1c8   : > { %v9059_v53 = vpop.eup %9058  ;;  %v11649_v15 = vmul.f32 1.050701, %v3224_v3  ;;  %vm2742_vm5 = vcmp.gt.f32.partialorder %v11496_v36, 0.0  ;;  %v2917_v7 = vmul.f32 1.442695, %v11632_v55  ;;  %v1912_v12 = vadd.f32 %v11437_v54, %v1399_v10  ;;  %v11664_v54 = vpop.permute.xlu1 %8808 }
 0x1c9   : > { %v2463_v14 = vmul.f32 %v8816_v29, %v10059_v9  ;;  %9068 = vpow2.f32 %v2915_v5  ;;  %v1904_v20 = vadd.f32 %v11459_v34, %v1397_v62  ;;  %v1400_v57 = vmul.f32 %v8788_v39, %v14163_v26 }
 0x1ca   : > { %v2458_v8 = vmul.f32 %v8799_v18, %v10059_v9  ;;  %v2459_v50 = vmul.f32 %v8800_v59, %v10059_v9  ;;  %v8822_v56 = vunpack.i.h.bf16 %v8820_v40  ;;  %v8821_v48 = vunpack.i.l.bf16 %v8820_v40 }
 0x1cb   : > { %v1398_v61 = vmul.f32 %v8783_v44, %v14163_v26  ;;  %v7292_v60 = vadd.f32 -1.0, %v9057_v13  ;;  %v2462_v27 = vmul.f32 %v8815_v58, %v10059_v9  ;;  %v3122_v35 = vmul.f32 1.6732632, %v11568_v33  ;;  %v11677_v33 = vpop.f32.mrf.mxu0 }
 0x1cc   : > { %v2554_v34 = vadd.f32 %v2458_v8, %v1904_v20  ;;  %v7295_v63 = vadd.f32 -1.0, %v9059_v53  ;;  %v8805_v25 = vunpack.i.h.bf16 %v8803_v47  ;;  %v8804_v16 = vunpack.i.l.bf16 %v8803_v47  ;;  %v11692_v53 = vpop.permute.xlu1 %8825 }
 0x1cd   : > { %v1907_v39 = vadd.f32 %v11510_v28, %v1398_v61  ;;  %vm2745_vm6 = vcmp.gt.f32.partialorder %v11541_v31, 0.0  ;;  %vm2748_vm8 = vcmp.gt.f32.partialorder %v11551_v37, 0.0  ;;  %v1915_v42 = vadd.f32 %v11479_v11, %v1400_v57 }
 0x1ce   : > { %v3218_v10 = vsel %vm2738_vm4, %v11419_v1, %v3122_v35  ;;  %v1401_v49 = vmul.f32 %v8821_v48, %v14163_v26  ;;  %v1402_v29 = vmul.f32 %v8822_v56, %v14163_v26  ;;  %v11679_v3 = vpop.eup %9060  ;;  %vm2749_vm9 = vcmp.gt.f32.partialorder %v11610_v24, 0.0 }
 0x1cf   : > { %v2555_v28 = vadd.f32 %v2459_v50, %v1907_v39  ;;  %v3314_v47 = vmul.f32 1.050701, %v3218_v10  ;;  %v2461_v5 = vmul.f32 %v8805_v25, %v10059_v9  ;;  %v2460_v11 = vmul.f32 %v8804_v16, %v10059_v9 }
 0x1d0   : > { %v11685_v44 = vadd.f32 %v11493_v21, %v2554_v34  ;;  %v1920_v1 = vadd.f32 %v11554_v6, %v1401_v49  ;;  %v1923_v62 = vadd.f32 %v11595_v19, %v1402_v29  ;;  %v3126_v59 = vmul.f32 1.6732632, %v7289_v22  ;;  %v11700_v19 = vpop.permute.xlu0 %8836 }
 0x1d1   : > { %v3381_v13 = vpack.c.bf16 %v3314_v47, %v11547_v52  ;;  %v3382_v58 = vpack.c.bf16 %v11600_v30, %v11545_v45  ;;  %v2556_v18 = vadd.f32 %v2460_v11, %v1912_v12  ;;  %v2557_v40 = vadd.f32 %v2461_v5, %v1915_v42  ;;  %v9063_v20 = vpop.eup %9062  ;;  %v11702_v52 = vpop.f32.mrf.mxu0 }
 0x1d2   : > { %v11695_v57 = vadd.f32 %v11493_v21, %v2555_v28  ;;  %v2558_v8 = vadd.f32 %v2462_v27, %v1920_v1  ;;  %v2559_v50 = vadd.f32 %v2463_v14, %v1923_v62  ;;  %v3222_v6 = vsel %vm2742_vm5, %v11496_v36, %v3126_v59  ;;  %v9065_v22 = vpop.eup %9064  ;;  %v11733_v28 = vpop.permute.xlu1 %8831 }
 0x1d3   : > { %v3129_v45 = vmul.f32 1.6732632, %v7292_v60  ;;  %v3132_v30 = vmul.f32 1.6732632, %v7295_v63  ;;  %v7296_v12 = vadd.f32 -1.0, %v9063_v20  ;;  %8047 = vmatprep.mubr.msk.bf16.mxu1 %vm3424_vm7, %v3381_v13  ;;  %v11706_v56 = vadd.f32 %v11493_v21, %v2556_v18  ;;  %v11723_v16 = vpop.f32.mrf.mxu0 }
 0x1d4   : > { %vm2752_vm10 = vcmp.gt.f32.partialorder %v11620_v46, 0.0  ;;  %v2921_v14 = vmul.f32 1.442695, %v11685_v44  ;;  %8048 = vmatmul.mubr.msk.bf16.gmra.mxu1 %vm3424_vm7, %v3382_v58  ;;  %v11712_v36 = vadd.f32 %v11493_v21, %v2557_v40  ;;  %v11715_v48 = vadd.f32 %v11493_v21, %v2558_v8  ;;  %v9067_v61 = vpop.eup %9066  ;;  %v11739_v1 = vpop.permute.xlu0 %8852 }
 0x1d5   : > { %v3133_v60 = vmul.f32 1.6732632, %v7296_v12  ;;  %9070 = vpow2.f32 %v2917_v7  ;;  %v11718_v27 = vadd.f32 %v11493_v21, %v2559_v50  ;;  %v3318_v34 = vmul.f32 1.050701, %v3222_v6  ;;  %v11748_v58 = vpop.f32.mrf.mxu0 }
 0x1d6   : > { %vm2746_vm11 = vcmp.gt.f32.partialorder %v11586_v51, 0.0  ;;  %v7293_v35 = vadd.f32 -1.0, %v9065_v22  ;;  %v7299_v63 = vadd.f32 -1.0, %v9067_v61  ;;  %v2923_v39 = vmul.f32 1.442695, %v11695_v57  ;;  %v9069_v42 = vpop.eup %9068  ;;  %v8843_v6 = vpop.permute.xlu1 %8842 }
 0x1d7   : > { %v2929_v25 = vmul.f32 1.442695, %v11715_v48  ;;  %v3225_v10 = vsel %vm2745_vm6, %v11541_v31, %v3129_v45  ;;  %v3228_v7 = vsel %vm2748_vm8, %v11551_v37, %v3132_v30  ;;  %v2925_v49 = vmul.f32 1.442695, %v11706_v56  ;;  %v11764_v22 = vpop.f32.mrf.mxu1  ;;  %v1954_v61 = vpop.f32.mrf.mxu0 }
 0x1d8   : > { %v8811_v29 = vunpack.i.h.bf16 %v11664_v54  ;;  %v3229_v47 = vsel %vm2749_vm9, %v11610_v24, %v3133_v60  ;;  %v3136_v5 = vmul.f32 1.6732632, %v7299_v63  ;;  %9072 = vpow2.f32 %v2921_v14 }
 0x1d9   : > { %v2927_v11 = vmul.f32 1.442695, %v11712_v36  ;;  %9074 = vpow2.f32 %v2929_v25  ;;  %v2931_v31 = vmul.f32 1.442695, %v11718_v27  ;;  %v3383_v37 = vpack.c.bf16 %v3318_v34, %v11644_v43  ;;  %v11776_v63 = vpop.f32.mrf.mxu1 }
 0x1da   : > { %v8810_v62 = vunpack.i.l.bf16 %v11664_v54  ;;  %v3321_v59 = vmul.f32 1.050701, %v3225_v10  ;;  %v11744_v13 = vmul.f32 1.050701, %v3228_v7  ;;  %9076 = vpow2.f32 %v2923_v39 }
 0x1db   : > { %v3384_v24 = vpack.c.bf16 %v11649_v15, %v11635_v41  ;;  %v11750_v18 = vadd.f32 -1.0, %v9069_v42  ;;  %9078 = vpow2.f32 %v2925_v49  ;;  %8051 = vmatprep.mubr.msk.bf16.mxu1 %vm3424_vm7, %v3383_v37  ;;  %v1404_v40 = vmul.f32 %v8811_v29, %v14163_v26  ;;  %v11782_v10 = vpop.f32.mrf.mxu1 }
 0x1dc   : > { %v1403_v43 = vmul.f32 %v8810_v62, %v14163_v26  ;;  %v11755_v20 = vmul.f32 1.050701, %v3229_v47  ;;  %9080 = vpow2.f32 %v2927_v11  ;;  %v8828_v54 = vunpack.i.h.bf16 %v11692_v53 }
 0x1dd   : > { %8052 = vmatmul.mubr.msk.bf16.gmra.mxu1 %vm3424_vm7, %v3384_v24  ;;  %v8827_v41 = vunpack.i.l.bf16 %v11692_v53  ;;  %v3232_v15 = vsel %vm2752_vm10, %v11620_v46, %v3136_v5  ;;  %9082 = vpow2.f32 %v2931_v31  ;;  %v8839_v8 = vunpack.i.h.bf16 %v11700_v19  ;;  %v8865_v53 = vpop.permute.xlu0 %8864  ;;  %v11786_v5 = vpop.f32.mrf.mxu0 }
 0x1de   : > { %v3130_v50 = vmul.f32 1.6732632, %v7293_v35  ;;  %v1928_v45 = vadd.f32 %v11535_v32, %v1403_v43  ;;  %v2465_v30 = vmul.f32 %v8828_v54, %v10059_v9  ;;  %v7294_v14 = vadd.f32 -1.0, %v11679_v3  ;;  %v11792_v24 = vpop.permute.xlu1 %8847 }
 0x1df   : > { %v2464_v12 = vmul.f32 %v8827_v41, %v10059_v9  ;;  %v1931_v60 = vadd.f32 %v11580_v0, %v1404_v40  ;;  %v8838_v46 = vunpack.i.l.bf16 %v11700_v19  ;;  %v8854_v34 = vunpack.i.l.bf16 %v11739_v1 }
 0x1e0   : > { %v3226_v35 = vsel %vm2746_vm11, %v11586_v51, %v3130_v50  ;;  %vm2747_vm12 = vcmp.gt.f32.partialorder %v11564_v38, 0.0  ;;  %v3131_v25 = vmul.f32 1.6732632, %v7294_v14  ;;  %vm2750_vm13 = vcmp.gt.f32.partialorder %v11624_v4, 0.0 }
 0x1e1   : > { %v2560_v32 = vadd.f32 %v2464_v12, %v1928_v45  ;;  %v3322_v39 = vmul.f32 1.050701, %v3226_v35  ;;  %v2561_v3 = vadd.f32 %v2465_v30, %v1931_v60  ;;  %v8866_v42 = vunpack.i.l.bf16 %v8865_v53  ;;  %v11809_v45 = vpop.permute.xlu0 %8882 }
 0x1e2   : > { %v8834_v0 = vunpack.i.h.bf16 %v11733_v28  ;;  %v8833_v19 = vunpack.i.l.bf16 %v11733_v28  ;;  %v9071_v7 = vpop.eup %9070  ;;  %v8855_v51 = vunpack.i.h.bf16 %v11739_v1  ;;  %v3227_v29 = vsel %vm2747_vm12, %v11564_v38, %v3131_v25  ;;  %v11794_v28 = vpop.f32.mrf.mxu1 }
 0x1e3   : > { %v3385_v49 = vpack.c.bf16 %v3322_v39, %v3321_v59  ;;  %v8867_v47 = vunpack.i.h.bf16 %v8865_v53  ;;  %v11788_v11 = vmul.f32 1.050701, %v3232_v15  ;;  %v1407_v31 = vmul.f32 %v8838_v46, %v14163_v26  ;;  %v11815_v46 = vpop.f32.mrf.mxu0 }
 0x1e4   : > { %v3323_v37 = vmul.f32 1.050701, %v3227_v29  ;;  %v1406_v62 = vmul.f32 %v8834_v0, %v14163_v26  ;;  %v11797_v40 = vadd.f32 %v11493_v21, %v2560_v32  ;;  %v2470_v38 = vmul.f32 %v8866_v42, %v10059_v9  ;;  %v11834_v29 = vpop.permute.xlu1 %8858 }
 0x1e5   : > { %8055 = vmatprep.mubr.msk.bf16.mxu1 %vm3424_vm7, %v3385_v49  ;;  %v1405_v1 = vmul.f32 %v8833_v19, %v14163_v26  ;;  %v1409_v59 = vmul.f32 %v8854_v34, %v14163_v26  ;;  %v11803_v43 = vpop.eup %9072  ;;  %v11806_v54 = vadd.f32 %v11493_v21, %v2561_v3  ;;  %v8845_v15 = vunpack.i.h.bf16 %v8843_v6  ;;  %v11817_v34 = vpop.f32.mrf.mxu1 }
 0x1e6   : > { %v3386_v41 = vpack.c.bf16 %v11744_v13, %v3323_v37  ;;  %v8844_v50 = vunpack.i.l.bf16 %v8843_v6  ;;  %v9075_v30 = vpop.eup %9074  ;;  %v1408_v12 = vmul.f32 %v8839_v8, %v14163_v26  ;;  %v2471_v14 = vmul.f32 %v8867_v47, %v10059_v9 }
 0x1e7   : > { %v1952_v53 = vadd.f32 %v11723_v16, %v1409_v59  ;;  %v1410_v60 = vmul.f32 %v8855_v51, %v14163_v26  ;;  %v9077_v35 = vpop.eup %9076  ;;  %vm2757_vm14 = vcmp.gt.f32.partialorder %v11715_v48, 0.0  ;;  %v1936_v13 = vadd.f32 %v11642_v23, %v1405_v1  ;;  %v11828_v0 = vpop.f32.mrf.mxu1 }
 0x1e8   : > { %8056 = vmatmul.mubr.msk.bf16.gmra.mxu1 %vm3424_vm7, %v3386_v41  ;;  %v1939_v6 = vadd.f32 %v11677_v33, %v1406_v62  ;;  %v2467_v8 = vmul.f32 %v8845_v15, %v10059_v9  ;;  %v2466_v32 = vmul.f32 %v8844_v50, %v10059_v9  ;;  %v11825_v16 = vpop.eup %9078  ;;  %v7304_v39 = vadd.f32 -1.0, %v9075_v30  ;;  %v11849_v50 = vpop.permute.xlu0 %8898 }
 0x1e9   : > { %v2566_v25 = vadd.f32 %v2470_v38, %v1952_v53  ;;  %v1955_v3 = vadd.f32 %v1954_v61, %v1410_v60  ;;  %v3134_v42 = vmul.f32 1.6732632, %v11750_v18  ;;  %v11830_v19 = vpop.eup %9080  ;;  %v2933_v51 = vmul.f32 1.442695, %v11797_v40  ;;  %v11842_v38 = vpop.f32.mrf.mxu0 }
 0x1ea   : > { %v2935_v23 = vmul.f32 1.442695, %v11806_v54  ;;  %v2562_v33 = vadd.f32 %v2466_v32, %v1936_v13  ;;  %v2563_v49 = vadd.f32 %v2467_v8, %v1939_v6  ;;  %v9083_v47 = vpop.eup %9082  ;;  %v7298_v61 = vadd.f32 -1.0, %v9071_v7  ;;  %v11851_v30 = vpop.f32.mrf.mxu1 }
 0x1eb   : > { %v11837_v37 = vadd.f32 %v11493_v21, %v2566_v25  ;;  %v2567_v62 = vadd.f32 %v2471_v14, %v1955_v3  ;;  %v3230_v18 = vsel %vm2750_vm13, %v11624_v4, %v3134_v42  ;;  %v1944_v1 = vadd.f32 %v11613_v2, %v1407_v31  ;;  %v11864_v13 = vpop.f32.mrf.mxu0 }
 0x1ec   : > { %v1947_v59 = vadd.f32 %v11660_v17, %v1408_v12  ;;  %v11847_v41 = vadd.f32 %v11493_v21, %v2562_v33  ;;  %v3326_v15 = vmul.f32 1.050701, %v3230_v18  ;;  %v3141_v14 = vmul.f32 1.6732632, %v7304_v39  ;;  %v11871_v32 = vpop.f32.mrf.mxu1  ;;  %v8911_v33 = vpop.permute.xlu0 %8910 }
 0x1ed   : > { %v2945_v53 = vmul.f32 1.442695, %v11837_v37  ;;  %v11855_v4 = vadd.f32 %v11493_v21, %v2563_v49  ;;  %v11858_v7 = vadd.f32 %v11493_v21, %v2567_v62  ;;  %v7301_v2 = vadd.f32 -1.0, %v9077_v35  ;;  %v11885_v62 = vpop.f32.mrf.mxu0 }
 0x1ee   : > { %9084 = vpow2.f32 %v2933_v51  ;;  %v3387_v17 = vpack.c.bf16 %v3326_v15, %v11755_v20  ;;  %v3135_v31 = vmul.f32 1.6732632, %v7298_v61  ;;  %v2937_v12 = vmul.f32 1.442695, %v11847_v41  ;;  %v8871_v20 = vpop.permute.xlu1 %8870 }
 0x1ef   : > { %9086 = vpow2.f32 %v2935_v23  ;;  %v2947_v60 = vmul.f32 1.442695, %v11858_v7  ;;  %vm2751_vm15 = vcmp.gt.f32.partialorder %v11632_v55, 0.0  ;;  %v11866_v6 = vadd.f32 -1.0, %v9083_v47 }
 0x1f0   : > { %9088 = vpow2.f32 %v2945_v53  ;;  %8059 = vmatprep.mubr.msk.bf16.mxu1 %vm3424_vm7, %v3387_v17  ;;  %v3231_v35 = vsel %vm2751_vm15, %v11632_v55, %v3135_v31  ;;  %v8850_v8 = vunpack.i.h.bf16 %v11792_v24  ;;  %vm2754_vm0 = vcmp.gt.f32.partialorder %v11695_v57, 0.0 }
 0x1f1   : > { %v3237_v39 = vsel %vm2757_vm14, %v11715_v48, %v3141_v14  ;;  %v2939_v25 = vmul.f32 1.442695, %v11855_v4  ;;  %v3327_v3 = vmul.f32 1.050701, %v3231_v35  ;;  %v8849_v42 = vunpack.i.l.bf16 %v11792_v24  ;;  %v11889_v14 = vpop.f32.mrf.mxu1 }
 0x1f2   : > { %9090 = vpow2.f32 %v2947_v60  ;;  %v8885_v51 = vunpack.i.h.bf16 %v11809_v45  ;;  %v8884_v55 = vunpack.i.l.bf16 %v11809_v45  ;;  %v2469_v23 = vmul.f32 %v8850_v8, %v10059_v9 }
 0x1f3   : > { %9092 = vpow2.f32 %v2937_v12  ;;  %v3388_v49 = vpack.c.bf16 %v11788_v11, %v3327_v3  ;;  %v2468_v47 = vmul.f32 %v8849_v42, %v10059_v9  ;;  %v8861_v48 = vunpack.i.h.bf16 %v11834_v29  ;;  %v11902_v12 = vpop.permute.xlu1 %8876  ;;  %v11904_v60 = vpop.f32.mrf.mxu1 }
 0x1f4   : > { %v2565_v18 = vadd.f32 %v2469_v23, %v1947_v59  ;;  %v8900_v24 = vunpack.i.l.bf16 %v11849_v50  ;;  %v8860_v61 = vunpack.i.l.bf16 %v11834_v29  ;;  %v8913_v15 = vunpack.i.h.bf16 %v8911_v33 }
 0x1f5   : > { %v11891_v45 = vmul.f32 1.050701, %v3237_v39  ;;  %9094 = vpow2.f32 %v2939_v25  ;;  %8060 = vmatmul.mubr.msk.bf16.gmra.mxu1 %vm3424_vm7, %v3388_v49  ;;  %v2564_v11 = vadd.f32 %v2468_v47, %v1944_v1  ;;  %v8912_v53 = vunpack.i.l.bf16 %v8911_v33  ;;  %v1983_v25 = vpop.f32.mrf.mxu0  ;;  %v11920_v49 = vpop.f32.mrf.mxu1 }
 0x1f6   : > { %v11895_v17 = vmul.f32 %v8884_v55, %v14163_v26  ;;  %v11898_v31 = vadd.f32 %v11493_v21, %v2565_v18  ;;  %v8901_v59 = vunpack.i.h.bf16 %v11849_v50  ;;  %v1412_v29 = vmul.f32 %v8861_v48, %v14163_v26  ;;  %14192 = vst [vmem:[#allocation17_spill] sm:$0xff] %v11920_v49 }
 0x1f7   : > { %v11907_v35 = vmul.f32 %v8885_v51, %v14163_v26  ;;  %v1411_v1 = vmul.f32 %v8860_v61, %v14163_v26  ;;  %v11911_v8 = vmul.f32 %v8913_v15, %v10059_v9  ;;  %v7300_v39 = vadd.f32 -1.0, %v11803_v43  ;;  %v11936_v49 = vpop.f32.mrf.mxu0 }
 0x1f8   : > { %v11915_v3 = vadd.f32 %v11493_v21, %v2564_v11  ;;  %v2478_v50 = vmul.f32 %v8912_v53, %v10059_v9  ;;  %v3138_v42 = vmul.f32 1.6732632, %v7301_v2  ;;  %v1417_v55 = vmul.f32 %v8900_v24, %v14163_v26 }
 0x1f9   : > { %vm2753_vm1 = vcmp.gt.f32.partialorder %v11685_v44, 0.0  ;;  %v3137_v51 = vmul.f32 1.6732632, %v7300_v39  ;;  %v8873_v23 = vunpack.i.h.bf16 %v8871_v20  ;;  %v8872_v33 = vunpack.i.l.bf16 %v8871_v20 }
 0x1fa   : > { %v2943_v47 = vmul.f32 1.442695, %v11898_v31  ;;  %v1963_v43 = vadd.f32 %v11748_v58, %v1412_v29  ;;  %v3234_v48 = vsel %vm2754_vm0, %v11695_v57, %v3138_v42  ;;  %v1984_v18 = vadd.f32 %v1983_v25, %v1417_v55  ;;  %v11938_v57 = vpop.permute.xlu1 %8888  ;;  %v11944_v42 = vpop.f32.mrf.mxu1 }
 0x1fb   : > { %v11927_v61 = vpop.eup %9084  ;;  %v1960_v2 = vadd.f32 %v11702_v52, %v1411_v1  ;;  %v3233_v24 = vsel %vm2753_vm1, %v11685_v44, %v3137_v51  ;;  %v3330_v15 = vmul.f32 1.050701, %v3234_v48  ;;  %v2473_v20 = vmul.f32 %v8873_v23, %v10059_v9 }
 0x1fc   : > { %v11932_v11 = vpop.eup %9086  ;;  %v2941_v53 = vmul.f32 1.442695, %v11915_v3  ;;  %v3329_v39 = vmul.f32 1.050701, %v3233_v24  ;;  %v2574_v58 = vadd.f32 %v2478_v50, %v1984_v18  ;;  %v2472_v29 = vmul.f32 %v8872_v33, %v10059_v9 }
 0x1fd   : > { %v9089_v25 = vpop.eup %9088  ;;  %vm2758_vm2 = vcmp.gt.f32.partialorder %v11718_v27, 0.0  ;;  %v2569_v52 = vadd.f32 %v2473_v20, %v1963_v43  ;;  %vm2755_vm3 = vcmp.gt.f32.partialorder %v11706_v56, 0.0  ;;  %v7302_v44 = vadd.f32 -1.0, %v11825_v16  ;;  %v1986_v20 = vpop.f32.mrf.mxu0 }
 0x1fe   : > { %v7303_v1 = vadd.f32 -1.0, %v11830_v19  ;;  %vm2766_vm4 = vcmp.gt.f32.partialorder %v11858_v7, 0.0  ;;  %v3389_v50 = vpack.c.bf16 %v3330_v15, %v3329_v39  ;;  %v11948_v55 = vadd.f32 %v11493_v21, %v2574_v58 }
 0x1ff   : > { %v2568_v51 = vadd.f32 %v2472_v29, %v1960_v2  ;;  %vm2756_vm5 = vcmp.gt.f32.partialorder %v11712_v36, 0.0  ;;  %v9091_v23 = vpop.eup %9090  ;;  %v11952_v33 = vadd.f32 %v11493_v21, %v2569_v52  ;;  %v3139_v43 = vmul.f32 1.6732632, %v7302_v44  ;;  %v11969_v29 = vpop.f32.mrf.mxu1 }
 0x200   : > { %v3140_v48 = vmul.f32 1.6732632, %v7303_v1  ;;  %v1418_v16 = vmul.f32 %v8901_v59, %v14163_v26  ;;  %v11955_v19 = vpop.eup %9092  ;;  %v7312_v18 = vadd.f32 -1.0, %v9089_v25  ;;  %v7313_v24 = vadd.f32 -1.0, %v9091_v23  ;;  %8063 = vmatprep.mubr.msk.bf16.mxu1 %vm3424_vm7, %v3389_v50  ;;  %v8894_v1 = vpop.permute.xlu1 %8893 }
 0x201   : > { %v2961_v15 = vmul.f32 1.442695, %v11948_v55  ;;  %v11960_v2 = vadd.f32 %v11493_v21, %v2568_v51  ;;  %9096 = vpow2.f32 %v2943_v47  ;;  %v2951_v39 = vmul.f32 1.442695, %v11952_v33  ;;  %v11979_v23 = vpop.f32.mrf.mxu1 }
 0x202   : > { %v3235_v58 = vsel %vm2755_vm3, %v11706_v56, %v3139_v43  ;;  %v3236_v59 = vsel %vm2756_vm5, %v11712_v36, %v3140_v48  ;;  %v11971_v25 = vpop.eup %9094  ;;  %v3150_v52 = vmul.f32 1.6732632, %v7313_v24  ;;  %v11975_v44 = vadd.f32 %v11786_v5, %v11895_v17 }
 0x203   : > { %9098 = vpow2.f32 %v2941_v53  ;;  %v1979_v47 = vadd.f32 %v11842_v38, %v11907_v35  ;;  %v3331_v56 = vmul.f32 1.050701, %v3235_v58  ;;  %v3332_v50 = vmul.f32 1.050701, %v3236_v59  ;;  %v11988_v35 = vpop.f32.mrf.mxu1 }
 0x204   : > { %9100 = vpow2.f32 %v2961_v15  ;;  %v1987_v51 = vadd.f32 %v1986_v20, %v1418_v16  ;;  %v11981_v36 = vmul.f32 1.6732632, %v7312_v18  ;;  %v2949_v43 = vmul.f32 1.442695, %v11960_v2 }
 0x205   : > { %v3142_v48 = vmul.f32 1.6732632, %v11866_v6  ;;  %v8879_v5 = vunpack.i.h.bf16 %v11902_v12  ;;  %9102 = vpow2.f32 %v2951_v39  ;;  %v3390_v17 = vpack.c.bf16 %v3332_v50, %v3331_v56  ;;  %v12011_v56 = vpop.f32.mrf.mxu1 }
 0x206   : > { %v2575_v53 = vadd.f32 %v11911_v8, %v1987_v51  ;;  %v8878_v38 = vunpack.i.l.bf16 %v11902_v12  ;;  %v8891_v24 = vunpack.i.h.bf16 %v11938_v57  ;;  %v8890_v6 = vunpack.i.l.bf16 %v11938_v57  ;;  %v8905_v57 = vpop.permute.xlu1 %8904 }
 0x207   : > { %v3238_v16 = vsel %vm2758_vm2, %v11718_v27, %v3142_v48  ;;  %v1414_v18 = vmul.f32 %v8879_v5, %v14163_v26  ;;  %v3246_v15 = vsel %vm2766_vm4, %v11858_v7, %v3150_v52  ;;  %8064 = vmatmul.mubr.msk.bf16.gmra.mxu1 %vm3424_vm7, %v3390_v17  ;;  %9104 = vpow2.f32 %v2949_v43 }
 0x208   : > { %v12001_v12 = vadd.f32 %v11493_v21, %v2575_v53  ;;  %v3334_v8 = vmul.f32 1.050701, %v3238_v16  ;;  %v1413_v20 = vmul.f32 %v8878_v38, %v14163_v26  ;;  %v2475_v39 = vmul.f32 %v8891_v24, %v10059_v9 }
 0x209   : > { %v1971_v27 = vadd.f32 %v11864_v13, %v1414_v18  ;;  %v2474_v58 = vmul.f32 %v8890_v6, %v10059_v9  ;;  %vm2759_vm6 = vcmp.gt.f32.partialorder %v11797_v40, 0.0  ;;  %v7306_v51 = vadd.f32 -1.0, %v11927_v61  ;;  %v12025_v18 = vpop.f32.mrf.mxu1 }
 0x20a   : > { %v2963_v59 = vmul.f32 1.442695, %v12001_v12  ;;  %v3391_v7 = vpack.c.bf16 %v3334_v8, %v11891_v45  ;;  %v1968_v52 = vadd.f32 %v11815_v46, %v1413_v20  ;;  %v7307_v13 = vadd.f32 -1.0, %v11932_v11 }
 0x20b   : > { %v2571_v50 = vadd.f32 %v2475_v39, %v1971_v27  ;;  %v8896_v43 = vunpack.i.h.bf16 %v8894_v1  ;;  %v8895_v5 = vunpack.i.l.bf16 %v8894_v1  ;;  %v8907_v17 = vunpack.i.h.bf16 %v8905_v57 }
 0x20c   : > { %9106 = vpow2.f32 %v2963_v59  ;;  %8067 = vmatprep.mubr.msk.bf16.mxu1 %vm3424_vm7, %v3391_v7  ;;  %v2570_v48 = vadd.f32 %v2474_v58, %v1968_v52  ;;  %v3143_v46 = vmul.f32 1.6732632, %v7306_v51  ;;  %v3144_v53 = vmul.f32 1.6732632, %v7307_v13  ;;  %v9506_v52 = vld [vmem:[%s14077_s4] ss:$0 sm:$0xff] }
 0x20d   : > { %v12017_v45 = vadd.f32 %v11493_v21, %v2571_v50  ;;  %v2477_v38 = vmul.f32 %v8896_v43, %v10059_v9  ;;  %vm2760_vm8 = vcmp.gt.f32.partialorder %v11806_v54, 0.0  ;;  %v2476_v61 = vmul.f32 %v8895_v5, %v10059_v9 }
 0x20e   : > { %v12021_v16 = vadd.f32 %v11493_v21, %v2570_v48  ;;  %v8906_v11 = vunpack.i.l.bf16 %v8905_v57  ;;  %v9097_v24 = vpop.eup %9096  ;;  %v3239_v6 = vsel %vm2759_vm6, %v11797_v40, %v3143_v46  ;;  %v3240_v8 = vsel %vm2760_vm8, %v11806_v54, %v3144_v53  ;;  %v12034_v57 = vpop.f32.mrf.mxu1 }
 0x20f   : > { %v2955_v1 = vmul.f32 1.442695, %v12017_v45  ;;  %v2573_v20 = vadd.f32 %v2477_v38, %v1979_v47  ;;  %v3335_v39 = vmul.f32 1.050701, %v3239_v6  ;;  %v3336_v58 = vmul.f32 1.050701, %v3240_v8 }
 0x210   : > { %v9099_v27 = vpop.eup %9098  ;;  %v2953_v21 = vmul.f32 1.442695, %v12021_v16  ;;  %v2572_v59 = vadd.f32 %v2476_v61, %v11975_v44  ;;  %v1420_v40 = vmul.f32 %v8907_v17, %v14163_v26  ;;  %v1419_v54 = vmul.f32 %v8906_v11, %v14163_v26  ;;  %v8917_v44 = vpop.permute.xlu1 %8916 }
 0x211   : > { %v9101_v7 = vpop.eup %9100  ;;  %9108 = vpow2.f32 %v2955_v1  ;;  %v12039_v50 = vadd.f32 %v9506_v52, %v2573_v20  ;;  %vm2765_vm9 = vcmp.gt.f32.partialorder %v11837_v37, 0.0  ;;  %v3392_v47 = vpack.c.bf16 %v3336_v58, %v3335_v39  ;;  %v12051_v46 = vpop.f32.mrf.mxu1 }
 0x212   : > { %9110 = vpow2.f32 %v2953_v21  ;;  %v12044_v51 = vadd.f32 %v9506_v52, %v2572_v59  ;;  %v9103_v13 = vpop.eup %9102  ;;  %v3245_v43 = vsel %vm2765_vm9, %v11837_v37, %v11981_v36  ;;  %v12048_v48 = vmul.f32 1.050701, %v3246_v15 }
 0x213   : > { %v2959_v5 = vmul.f32 1.442695, %v12039_v50  ;;  %v7320_v17 = vadd.f32 -1.0, %v9101_v7  ;;  %8068 = vmatmul.mubr.msk.bf16.gmra.mxu1 %vm3424_vm7, %v3392_v47  ;;  %v7308_v53 = vadd.f32 -1.0, %v11955_v19  ;;  %v7309_v38 = vadd.f32 -1.0, %v11971_v25  ;;  %v12063_v25 = vpop.f32.mrf.mxu1 }
 0x214   : > { %v2957_v26 = vmul.f32 1.442695, %v12044_v51  ;;  %v1992_v61 = vadd.f32 %v11885_v62, %v1419_v54  ;;  %v1995_v11 = vadd.f32 %v11936_v49, %v1420_v40  ;;  %v8919_v37 = vunpack.i.h.bf16 %v8917_v44  ;;  %v9105_v15 = vpop.eup %9104 }
 0x215   : > { %v8918_v36 = vunpack.i.l.bf16 %v8917_v44  ;;  %9112 = vpow2.f32 %v2959_v5  ;;  %vm2761_vm10 = vcmp.gt.f32.partialorder %v11847_v41, 0.0  ;;  %v3145_v1 = vmul.f32 1.6732632, %v7308_v53 }
 0x216   : > { %v3146_v6 = vmul.f32 1.6732632, %v7309_v38  ;;  %9114 = vpow2.f32 %v2957_v26  ;;  %vm2762_vm11 = vcmp.gt.f32.partialorder %v11855_v4, 0.0  ;;  %v2481_v8 = vmul.f32 %v8919_v37, %v10059_v9  ;;  %v12084_v38 = vld [vmem:[%s14079_s6] ss:$0 sm:$0xff] }
 0x217   : > { %v2480_v19 = vmul.f32 %v8918_v36, %v10059_v9  ;;  %v3241_v62 = vsel %vm2761_vm10, %v11847_v41, %v3145_v1  ;;  %v7310_v20 = vadd.f32 -1.0, %v9099_v27  ;;  %v7311_v21 = vadd.f32 -1.0, %v9097_v24  ;;  %v8926_v9 = vld [vmem:[%s14082_s9 + $0x8] sm:$0xff]  }
 0x218   : > { %v3242_v49 = vsel %vm2762_vm11, %v11855_v4, %v3146_v6  ;;  %v3337_v58 = vmul.f32 1.050701, %v3241_v62  ;;  %v2577_v40 = vadd.f32 %v2481_v8, %v1995_v11  ;;  %vm2763_vm12 = vcmp.gt.f32.partialorder %v11915_v3, 0.0  ;;  %v12076_v4 = vpop.f32.mrf.mxu1  ;;  %8187 = vmatprep.subr.bf16.mxu1 %v8926_v9 }
 0x219   : > { %v9107_v39 = vpop.eup %9106  ;;  %v3338_v59 = vmul.f32 1.050701, %v3242_v49  ;;  %v2576_v7 = vadd.f32 %v2480_v19, %v1992_v61  ;;  %v3147_v54 = vmul.f32 1.6732632, %v7310_v20  ;;  %v3148_v47 = vmul.f32 1.6732632, %v7311_v21  ;;  %8188 = vmatpush3.bf16.msra.mxu1 %v8926_v9 }
 0x21a   : > { %v12073_v41 = vadd.f32 %v9506_v52, %v2577_v40  ;;  %vm2764_vm13 = vcmp.gt.f32.partialorder %v11898_v31, 0.0  ;;  %v3341_v24 = vmul.f32 1.050701, %v3245_v43  ;;  %vm2773_vm14 = vcmp.gt.f32.partialorder %v11948_v55, 0.0  ;;  %v12090_v1 = vpop.f32.mrf.mxu1 }
 0x21b   : > { %v3393_v44 = vpack.c.bf16 %v3338_v59, %v3337_v58  ;;  %v12071_v5 = vadd.f32 %v9506_v52, %v2576_v7  ;;  %v7321_v27 = vadd.f32 -1.0, %v9107_v39  ;;  %v3243_v26 = vsel %vm2763_vm12, %v11915_v3, %v3147_v54 }
 0x21c   : > { %v3244_v53 = vsel %vm2764_vm13, %v11898_v31, %v3148_v47  ;;  %v3157_v52 = vmul.f32 1.6732632, %v7320_v17  ;;  %v2967_v43 = vmul.f32 1.442695, %v12073_v41  ;;  %v3339_v37 = vmul.f32 1.050701, %v3243_v26  ;;  %v12106_v39 = vpop.f32.mrf.mxu1 }
 0x21d   : > { %8071 = vmatprep.mubr.msk.bf16.mxu1 %vm3424_vm7, %v3393_v44  ;;  %v2965_v61 = vmul.f32 1.442695, %v12071_v5  ;;  %v3340_v36 = vmul.f32 1.050701, %v3244_v53  ;;  %v3395_v3 = vpack.c.bf16 %v12048_v48, %v3341_v24  ;;  %v7314_v31 = vadd.f32 -1.0, %v9105_v15 }
 0x21e   : > { %v9109_v11 = vpop.eup %9108  ;;  %vm2767_vm15 = vcmp.gt.f32.partialorder %v11960_v2, 0.0  ;;  %v7315_v17 = vadd.f32 -1.0, %v9103_v13  ;;  %v12095_v8 = vadd.f32 %v11764_v22, %v12084_v38  ;;  %v3158_v19 = vmul.f32 1.6732632, %v7321_v27  ;;  %v12126_v26 = vpop.f32.mrf.mxu1 }
 0x21f   : > { %v9111_v6 = vpop.eup %9110  ;;  %9116 = vpow2.f32 %v2965_v61  ;;  %v3394_v62 = vpack.c.bf16 %v3340_v36, %v3339_v37  ;;  %v3151_v49 = vmul.f32 1.6732632, %v7314_v31  ;;  %vm2768_vm0 = vcmp.gt.f32.partialorder %v11952_v33, 0.0 }
 0x220   : > { %9118 = vpow2.f32 %v2967_v43  ;;  %v3152_v20 = vmul.f32 1.6732632, %v7315_v17  ;;  %v4086_v48 = vmul.f32 1.442695, %v12095_v8  ;;  %vm2769_vm1 = vcmp.gt.f32.partialorder %v12021_v16, 0.0  ;;  %v12147_v31 = vpop.f32.mrf.mxu1 }
 0x221   : > { %8072 = vmatmul.mubr.msk.bf16.gmra.mxu1 %vm3424_vm7, %v3394_v62  ;;  %v3247_v15 = vsel %vm2767_vm15, %v11960_v2, %v3151_v49  ;;  %v7316_v13 = vadd.f32 -1.0, %v9111_v6  ;;  %v7317_v21 = vadd.f32 -1.0, %v9109_v11  ;;  %v12104_v22 = vadd.f32 %v12084_v38, %v11776_v63 }
 0x222   : > { %v9113_v58 = vpop.eup %9112  ;;  %8075 = vmatprep.mubr.msk.bf16.mxu1 %vm3424_vm7, %v3395_v3  ;;  %v3248_v59 = vsel %vm2768_vm0, %v11952_v33, %v3152_v20  ;;  %v3343_v7 = vmul.f32 1.050701, %v3247_v15  ;;  %9120 = vpow2.f32 %v4086_v48  ;;  %v12112_v40 = vadd.f32 %v11782_v10, %v12084_v38  ;;  %v12159_v62 = vpop.f32.mrf.mxu1 }
 0x223   : > { %v9115_v2 = vpop.eup %9114  ;;  %v3344_v54 = vmul.f32 1.050701, %v3248_v59  ;;  %v3153_v47 = vmul.f32 1.6732632, %v7316_v13  ;;  %v3154_v9 = vmul.f32 1.6732632, %v7317_v21  ;;  %v12119_v24 = vadd.f32 %v12084_v38, %v11794_v28 }
 0x224   : > { %vm2770_vm2 = vcmp.gt.f32.partialorder %v12017_v45, 0.0  ;;  %v4082_v63 = vmul.f32 1.442695, %v12104_v22  ;;  %v4088_v44 = vmul.f32 1.442695, %v12112_v40  ;;  %vm2774_vm3 = vcmp.gt.f32.partialorder %v12001_v12, 0.0 }
 0x225   : > { %v3396_v33 = vpack.c.bf16 %v3344_v54, %v3343_v7  ;;  %v3249_v10 = vsel %vm2769_vm1, %v12021_v16, %v3153_v47  ;;  %v3250_v27 = vsel %vm2770_vm2, %v12017_v45, %v3154_v9  ;;  %v3253_v53 = vsel %vm2773_vm14, %v11948_v55, %v3157_v52  ;;  %v12167_v7 = vpop.f32.mrf.mxu1  ;;  %v14193_v47 = vld [vmem:[#allocation17_spill] sm:$0xff] }
 0x226   : > { %v3345_v61 = vmul.f32 1.050701, %v3249_v10  ;;  %v3346_v43 = vmul.f32 1.050701, %v3250_v27  ;;  %9122 = vpow2.f32 %v4082_v63  ;;  %v3254_v28 = vsel %vm2774_vm3, %v12001_v12, %v3158_v19 }
 0x227   : > { %9124 = vpow2.f32 %v4088_v44  ;;  %v7318_v11 = vadd.f32 -1.0, %v9115_v2  ;;  %v7319_v37 = vadd.f32 -1.0, %v9113_v58  ;;  %vm2771_vm4 = vcmp.gt.f32.partialorder %v12044_v51, 0.0 }
 0x228   : > { %v3397_v36 = vpack.c.bf16 %v3346_v43, %v3345_v61  ;;  %v4084_v16 = vmul.f32 1.442695, %v12119_v24  ;;  %v12136_v45 = vadd.f32 %v11817_v34, %v12084_v38  ;;  %v12141_v3 = vadd.f32 %v12084_v38, %v11828_v0  ;;  %v12189_v43 = vpop.f32.mrf.mxu1 }
 0x229   : > { %8076 = vmatmul.mubr.msk.bf16.gmra.mxu1 %vm3424_vm7, %v3396_v33  ;;  %v3155_v55 = vmul.f32 1.6732632, %v7318_v11  ;;  %v3156_v52 = vmul.f32 1.6732632, %v7319_v37  ;;  %v12145_v12 = vadd.f32 %v11851_v30, %v12084_v38  ;;  %vm2772_vm5 = vcmp.gt.f32.partialorder %v12039_v50, 0.0 }
 0x22a   : > { %8079 = vmatprep.mubr.msk.bf16.mxu1 %vm3424_vm7, %v3397_v36  ;;  %9126 = vpow2.f32 %v4084_v16  ;;  %v4094_v34 = vmul.f32 1.442695, %v12136_v45  ;;  %v12154_v6 = vadd.f32 %v12084_v38, %v11871_v32  ;;  %v4090_v30 = vmul.f32 1.442695, %v12141_v3 }
 0x22b   : > { %v3251_v0 = vsel %vm2771_vm4, %v12044_v51, %v3155_v55  ;;  %v3252_v19 = vsel %vm2772_vm5, %v12039_v50, %v3156_v52  ;;  %v3350_v20 = vmul.f32 1.050701, %v3254_v28  ;;  %v3349_v13 = vmul.f32 1.050701, %v3253_v53 }
 0x22c   : > { %v9117_v17 = vpop.eup %9116  ;;  %v3347_v48 = vmul.f32 1.050701, %v3251_v0  ;;  %v3348_v15 = vmul.f32 1.050701, %v3252_v19  ;;  %9128 = vpow2.f32 %v4094_v34  ;;  %v4096_v21 = vmul.f32 1.442695, %v12145_v12 }
 0x22d   : > { %v9119_v49 = vpop.eup %9118  ;;  %9130 = vpow2.f32 %v4090_v30  ;;  %v4092_v32 = vmul.f32 1.442695, %v12154_v6  ;;  %v7322_v59 = vadd.f32 -1.0, %v9117_v17  ;;  %v12165_v50 = vadd.f32 %v11889_v14, %v12084_v38 }
 0x22e   : > { %v3398_v58 = vpack.c.bf16 %v3348_v15, %v3347_v48  ;;  %v7323_v51 = vadd.f32 -1.0, %v9119_v49  ;;  %9132 = vpow2.f32 %v4096_v21  ;;  %v12171_v54 = vadd.f32 %v12084_v38, %v11904_v60 }
 0x22f   : > { %v9121_v2 = vpop.eup %9120  ;;  %v12175_v9 = vadd.f32 %v14193_v47, %v12084_v38  ;;  %v3399_v63 = vpack.c.bf16 %v3350_v20, %v3349_v13  ;;  %9134 = vpow2.f32 %v4092_v32  ;;  %v3159_v44 = vmul.f32 1.6732632, %v7322_v59 }
 0x230   : > { %v3160_v33 = vmul.f32 1.6732632, %v7323_v51  ;;  %vm2775_vm6 = vcmp.gt.f32.partialorder %v12071_v5, 0.0  ;;  %vm2776_vm8 = vcmp.gt.f32.partialorder %v12073_v41, 0.0  ;;  %v4102_v14 = vmul.f32 1.442695, %v12165_v50 }
 0x231   : > { %8080 = vmatmul.mubr.msk.bf16.gmra.mxu1 %vm3424_vm7, %v3398_v58  ;;  %v4098_v10 = vmul.f32 1.442695, %v12171_v54  ;;  %v7377_v60 = vadd.f32 -1.0, %v9121_v2  ;;  %v3255_v27 = vsel %vm2775_vm6, %v12071_v5, %v3159_v44  ;;  %v12187_v61 = vadd.f32 %v12084_v38, %v11944_v42 }
 0x232   : > { %8083 = vmatprep.mubr.msk.bf16.mxu1 %vm3424_vm7, %v3399_v63  ;;  %v3256_v53 = vsel %vm2776_vm8, %v12073_v41, %v3160_v33  ;;  %v3351_v11 = vmul.f32 1.050701, %v3255_v27  ;;  %9136 = vpow2.f32 %v4102_v14  ;;  %v4104_v36 = vmul.f32 1.442695, %v12175_v9  ;;  %v12197_v41 = vpop.f32.mrf.mxu1 }
 0x233   : > { %v9123_v28 = vpop.eup %9122  ;;  %v3352_v37 = vmul.f32 1.050701, %v3256_v53  ;;  %9138 = vpow2.f32 %v4098_v10  ;;  %v4100_v5 = vmul.f32 1.442695, %v12187_v61  ;;  %v12195_v42 = vadd.f32 %v11969_v29, %v12084_v38 }
 0x234   : > { %v9125_v16 = vpop.eup %9124  ;;  %v7375_v55 = vadd.f32 -1.0, %v9123_v28  ;;  %9140 = vpow2.f32 %v4104_v36  ;;  %v4372_v0 = vmul.f32 1.6732632, %v7377_v60  ;;  %v12201_v30 = vadd.f32 %v12084_v38, %v11979_v23  ;;  %v12212_v23 = vpop.f32.mrf.mxu1 }
 0x235   : > { %v7378_v52 = vadd.f32 -1.0, %v9125_v16  ;;  %v3400_v34 = vpack.c.bf16 %v3352_v37, %v3351_v11  ;;  %v12205_v49 = vadd.f32 %v11988_v35, %v12084_v38  ;;  %9142 = vpow2.f32 %v4100_v5 }
 0x236   : > { %v4370_v20 = vmul.f32 1.6732632, %v7375_v55  ;;  %vm3988_vm9 = vcmp.gt.f32.partialorder %v12095_v8, 0.0  ;;  %vm3986_vm10 = vcmp.gt.f32.partialorder %v12104_v22, 0.0  ;;  %vm3989_vm11 = vcmp.gt.f32.partialorder %v12112_v40, 0.0 }
 0x237   : > { %v9127_v17 = vpop.eup %9126  ;;  %v4373_v19 = vmul.f32 1.6732632, %v7378_v52  ;;  %v4110_v29 = vmul.f32 1.442695, %v12195_v42  ;;  %vm3987_vm12 = vcmp.gt.f32.partialorder %v12119_v24, 0.0  ;;  %v12218_v32 = vadd.f32 %v12084_v38, %v12011_v56 }
 0x238   : > { %v7376_v48 = vadd.f32 -1.0, %v9127_v17  ;;  %v4468_v58 = vsel %vm3988_vm9, %v12095_v8, %v4372_v0  ;;  %v4106_v51 = vmul.f32 1.442695, %v12201_v30  ;;  %v4112_v2 = vmul.f32 1.442695, %v12205_v49  ;;  %v12229_v8 = vpop.f32.mrf.mxu1 }
 0x239   : > { %v9129_v15 = vpop.eup %9128  ;;  %8084 = vmatmul.mubr.msk.bf16.gmra.mxu1 %vm3424_vm7, %v3400_v34  ;;  %v4469_v35 = vsel %vm3989_vm11, %v12112_v40, %v4373_v19  ;;  %v4466_v63 = vsel %vm3986_vm10, %v12104_v22, %v4370_v20  ;;  %9144 = vpow2.f32 %v4110_v29  ;;  %v12227_v40 = vadd.f32 %v12025_v18, %v12084_v38 }
 0x23a   : > { %v9131_v13 = vpop.eup %9130  ;;  %v4371_v21 = vmul.f32 1.6732632, %v7376_v48  ;;  %v4565_v56 = vmul.f32 1.050701, %v4469_v35  ;;  %9146 = vpow2.f32 %v4106_v51  ;;  %v7381_v60 = vadd.f32 -1.0, %v9129_v15  ;;  %v12239_v34 = vpop.f32.mrf.mxu1 }
 0x23b   : > { %v7379_v59 = vadd.f32 -1.0, %v9131_v13  ;;  %v9133_v47 = vpop.eup %9132  ;;  %9148 = vpow2.f32 %v4112_v2  ;;  %v4108_v53 = vmul.f32 1.442695, %v12218_v32  ;;  %v4562_v22 = vmul.f32 1.050701, %v4466_v63 }
 0x23c   : > { %v4467_v44 = vsel %vm3987_vm12, %v12119_v24, %v4371_v21  ;;  %v9135_v33 = vpop.eup %9134  ;;  %v7382_v10 = vadd.f32 -1.0, %v9133_v47  ;;  %v4564_v37 = vmul.f32 1.050701, %v4468_v58  ;;  %vm3992_vm13 = vcmp.gt.f32.partialorder %v12136_v45, 0.0 }
 0x23d   : > { %v4563_v14 = vmul.f32 1.050701, %v4467_v44  ;;  %v7380_v27 = vadd.f32 -1.0, %v9135_v33  ;;  %v4374_v28 = vmul.f32 1.6732632, %v7379_v59  ;;  %9150 = vpow2.f32 %v4108_v53 }
 0x23e   : > { %v4377_v24 = vmul.f32 1.6732632, %v7382_v10  ;;  %vm3990_vm14 = vcmp.gt.f32.partialorder %v12141_v3, 0.0  ;;  %v4118_v16 = vmul.f32 1.442695, %v12227_v40  ;;  %v12237_v55 = vadd.f32 %v12084_v38, %v12034_v57 }
 0x23f   : > { %v9137_v11 = vpop.eup %9136  ;;  %v4375_v18 = vmul.f32 1.6732632, %v7380_v27  ;;  %v4658_v52 = vpack.c.bf16 %v4563_v14, %v4562_v22  ;;  %v4659_v17 = vpack.c.bf16 %v4565_v56, %v4564_v37  ;;  %v4376_v0 = vmul.f32 1.6732632, %v7381_v60 }
 0x240   : > { %v9139_v36 = vpop.eup %9138  ;;  %vm3993_vm15 = vcmp.gt.f32.partialorder %v12145_v12, 0.0  ;;  %vm3991_vm0 = vcmp.gt.f32.partialorder %v12154_v6, 0.0  ;;  %v4470_v19 = vsel %vm3990_vm14, %v12141_v3, %v4374_v28  ;;  %vm3996_vm1 = vcmp.gt.f32.partialorder %v12165_v50, 0.0 }
 0x241   : > { %v9141_v5 = vpop.eup %9140  ;;  %v4473_v20 = vsel %vm3993_vm15, %v12145_v12, %v4377_v24  ;;  %v4471_v48 = vsel %vm3991_vm0, %v12154_v6, %v4375_v18  ;;  %8091 = vmatprep.mubr.msk.bf16.mxu0 %vm3424_vm7, %v4658_v52  ;;  %v7385_v57 = vadd.f32 -1.0, %v9137_v11  ;;  %v4114_v29 = vmul.f32 1.442695, %v12237_v55  ;;  %v12259_v6 = vpop.f32.mrf.mxu1 }
 0x242   : > { %v7386_v15 = vadd.f32 -1.0, %v9141_v5  ;;  %8092 = vmatmul.mubr.msk.bf16.vlgmr.msra.gmra.mxu0 %vm3424_vm7, %v4659_v17  ;;  %v12252_v13 = vadd.f32 %v12051_v46, %v12084_v38  ;;  %v9143_v35 = vpop.eup %9142  ;;  %vm3994_vm2 = vcmp.gt.f32.partialorder %v12171_v54, 0.0  ;;  %v7383_v3 = vadd.f32 -1.0, %v9139_v36 }
 0x243   : > { %9152 = vpow2.f32 %v4118_v16  ;;  %v12257_v12 = vadd.f32 %v12084_v38, %v12063_v25  ;;  %v4472_v21 = vsel %vm3992_vm13, %v12136_v45, %v4376_v0  ;;  %v4567_v58 = vmul.f32 1.050701, %v4471_v48  ;;  %v12269_v63 = vpop.f32.mrf.mxu1 }
 0x244   : > { %v7384_v59 = vadd.f32 -1.0, %v9143_v35  ;;  %9154 = vpow2.f32 %v4114_v29  ;;  %v4566_v46 = vmul.f32 1.050701, %v4470_v19  ;;  %v4569_v51 = vmul.f32 1.050701, %v4473_v20 }
 0x245   : > { %v4120_v2 = vmul.f32 1.442695, %v12252_v13  ;;  %v12267_v47 = vadd.f32 %v12076_v4, %v12084_v38  ;;  %v4380_v25 = vmul.f32 1.6732632, %v7385_v57  ;;  %v4381_v44 = vmul.f32 1.6732632, %v7386_v15  ;;  %v12278_v53 = vpop.f32.mrf.mxu1 }
 0x246   : > { %v4379_v33 = vmul.f32 1.6732632, %v7384_v59  ;;  %v9145_v56 = vpop.eup %9144  ;;  %v4568_v14 = vmul.f32 1.050701, %v4472_v21  ;;  %v4378_v10 = vmul.f32 1.6732632, %v7383_v3  ;;  %v12276_v4 = vadd.f32 %v12084_v38, %v12090_v1 }
 0x247   : > { %9156 = vpow2.f32 %v4120_v2  ;;  %v4116_v45 = vmul.f32 1.442695, %v12257_v12  ;;  %v9147_v60 = vpop.eup %9146  ;;  %vm3997_vm3 = vcmp.gt.f32.partialorder %v12175_v9, 0.0  ;;  %vm3995_vm4 = vcmp.gt.f32.partialorder %v12187_v61, 0.0  ;;  %v12301_v19 = vpop.f32.mrf.mxu1 }
 0x248   : > { %v4660_v27 = vpack.c.bf16 %v4567_v58, %v4566_v46  ;;  %v9149_v22 = vpop.eup %9148  ;;  %v4661_v28 = vpack.c.bf16 %v4569_v51, %v4568_v14  ;;  %v4475_v24 = vsel %vm3995_vm4, %v12187_v61, %v4379_v33  ;;  %v4126_v11 = vmul.f32 1.442695, %v12267_v47 }
 0x249   : > { %9158 = vpow2.f32 %v4116_v45  ;;  %v4476_v37 = vsel %vm3996_vm1, %v12165_v50, %v4380_v25  ;;  %v4477_v18 = vsel %vm3997_vm3, %v12175_v9, %v4381_v44  ;;  %v7389_v36 = vadd.f32 -1.0, %v9145_v56 }
 0x24a   : > { %v4122_v1 = vmul.f32 1.442695, %v12276_v4  ;;  %8095 = vmatprep.mubr.msk.bf16.mxu0 %vm3424_vm7, %v4660_v27  ;;  %v9151_v16 = vpop.eup %9150  ;;  %v4474_v52 = vsel %vm3994_vm2, %v12171_v54, %v4378_v10  ;;  %v7390_v61 = vadd.f32 -1.0, %v9149_v22  ;;  %v12294_v5 = vadd.f32 %v12106_v39, %v12084_v38 }
 0x24b   : > { %8096 = vmatmul.mubr.msk.bf16.gmra.mxu0 %vm3424_vm7, %v4661_v28  ;;  %v12298_v50 = vadd.f32 %v12084_v38, %v12126_v26  ;;  %v4571_v9 = vmul.f32 1.050701, %v4475_v24  ;;  %vm4000_vm5 = vcmp.gt.f32.partialorder %v12195_v42, 0.0  ;;  %v7387_v17 = vadd.f32 -1.0, %v9147_v60 }
 0x24c   : > { %v7388_v0 = vadd.f32 -1.0, %v9151_v16  ;;  %v4572_v20 = vmul.f32 1.050701, %v4476_v37  ;;  %v4573_v54 = vmul.f32 1.050701, %v4477_v18  ;;  %9160 = vpow2.f32 %v4126_v11  ;;  %v12314_v46 = vpop.f32.mrf.mxu1 }
 0x24d   : > { %v4128_v48 = vmul.f32 1.442695, %v12294_v5  ;;  %v4570_v57 = vmul.f32 1.050701, %v4474_v52  ;;  %v4384_v15 = vmul.f32 1.6732632, %v7389_v36  ;;  %9162 = vpow2.f32 %v4122_v1 }
 0x24e   : > { %v4383_v39 = vmul.f32 1.6732632, %v7388_v0  ;;  %v4385_v29 = vmul.f32 1.6732632, %v7390_v61  ;;  %v4124_v26 = vmul.f32 1.442695, %v12298_v50  ;;  %v12307_v35 = vadd.f32 %v12147_v31, %v12084_v38  ;;  %v12335_v14 = vpop.f32.mrf.mxu1 }
 0x24f   : > { %9164 = vpow2.f32 %v4128_v48  ;;  %v4382_v21 = vmul.f32 1.6732632, %v7387_v17  ;;  %vm3999_vm6 = vcmp.gt.f32.partialorder %v12218_v32, 0.0  ;;  %v12312_v58 = vadd.f32 %v12084_v38, %v12159_v62 }
 0x250   : > { %v9153_v3 = vpop.eup %9152  ;;  %v4662_v59 = vpack.c.bf16 %v4571_v9, %v4570_v57  ;;  %v4663_v2 = vpack.c.bf16 %v4573_v54, %v4572_v20  ;;  %vm3998_vm8 = vcmp.gt.f32.partialorder %v12201_v30, 0.0  ;;  %v4479_v25 = vsel %vm3999_vm6, %v12218_v32, %v4383_v39 }
 0x251   : > { %v9155_v51 = vpop.eup %9154  ;;  %9166 = vpow2.f32 %v4124_v26  ;;  %v4480_v31 = vsel %vm4000_vm5, %v12195_v42, %v4384_v15  ;;  %vm4001_vm9 = vcmp.gt.f32.partialorder %v12205_v49, 0.0  ;;  %v4134_v62 = vmul.f32 1.442695, %v12307_v35 }
 0x252   : > { %v7391_v44 = vadd.f32 -1.0, %v9155_v51  ;;  %8099 = vmatprep.mubr.msk.bf16.mxu0 %vm3424_vm7, %v4662_v59  ;;  %v4481_v33 = vsel %vm4001_vm9, %v12205_v49, %v4385_v29  ;;  %v4130_v56 = vmul.f32 1.442695, %v12312_v58  ;;  %v12329_v32 = vadd.f32 %v12167_v7, %v12084_v38 }
 0x253   : > { %8100 = vmatmul.mubr.msk.bf16.gmra.mxu0 %vm3424_vm7, %v4663_v2  ;;  %v12333_v42 = vadd.f32 %v12084_v38, %v12189_v43  ;;  %v4478_v45 = vsel %vm3998_vm8, %v12201_v30, %v4382_v21  ;;  %v4575_v60 = vmul.f32 1.050701, %v4479_v25  ;;  %v7393_v27 = vadd.f32 -1.0, %v9153_v3 }
 0x254   : > { %v9157_v10 = vpop.eup %9156  ;;  %v12340_v49 = vadd.f32 %v12197_v41, %v12084_v38  ;;  %v4386_v22 = vmul.f32 1.6732632, %v7391_v44  ;;  %9168 = vpow2.f32 %v4134_v62  ;;  %v4136_v7 = vmul.f32 1.442695, %v12329_v32  ;;  %v12348_v41 = vpop.f32.mrf.mxu1 }
 0x255   : > { %v7394_v28 = vadd.f32 -1.0, %v9157_v10  ;;  %v4577_v11 = vmul.f32 1.050701, %v4481_v33  ;;  %9170 = vpow2.f32 %v4130_v56  ;;  %v4132_v43 = vmul.f32 1.442695, %v12333_v42 }
 0x256   : > { %v9159_v24 = vpop.eup %9158  ;;  %v12346_v37 = vadd.f32 %v12084_v38, %v12212_v23  ;;  %v4574_v30 = vmul.f32 1.050701, %v4478_v45  ;;  %9172 = vpow2.f32 %v4136_v7  ;;  %v4576_v1 = vmul.f32 1.050701, %v4480_v31  ;;  %v12367_v39 = vpop.f32.mrf.mxu1 }
 0x257   : > { %v4389_v18 = vmul.f32 1.6732632, %v7394_v28  ;;  %v7392_v36 = vadd.f32 -1.0, %v9159_v24  ;;  %vm4002_vm10 = vcmp.gt.f32.partialorder %v12237_v55, 0.0  ;;  %9174 = vpow2.f32 %v4132_v43 }
 0x258   : > { %v4142_v16 = vmul.f32 1.442695, %v12340_v49  ;;  %v4388_v52 = vmul.f32 1.6732632, %v7393_v27  ;;  %v4482_v61 = vsel %vm4002_vm10, %v12237_v55, %v4386_v22  ;;  %v4664_v17 = vpack.c.bf16 %v4575_v60, %v4574_v30 }
 0x259   : > { %v4387_v9 = vmul.f32 1.6732632, %v7392_v36  ;;  %v9161_v0 = vpop.eup %9160  ;;  %v4665_v23 = vpack.c.bf16 %v4577_v11, %v4576_v1  ;;  %vm4005_vm11 = vcmp.gt.f32.partialorder %v12252_v13, 0.0  ;;  %vm4003_vm12 = vcmp.gt.f32.partialorder %v12257_v12, 0.0 }
 0x25a   : > { %v4138_v20 = vmul.f32 1.442695, %v12346_v37  ;;  %v9163_v54 = vpop.eup %9162  ;;  %v4485_v48 = vsel %vm4005_vm11, %v12252_v13, %v4389_v18  ;;  %8103 = vmatprep.mubr.msk.bf16.mxu0 %vm3424_vm7, %v4664_v17  ;;  %v12361_v55 = vadd.f32 %v12229_v8, %v12084_v38  ;;  %v12365_v15 = vadd.f32 %v12084_v38, %v12239_v34 }
 0x25b   : > { %v4483_v57 = vsel %vm4003_vm12, %v12257_v12, %v4387_v9  ;;  %vm4004_vm13 = vcmp.gt.f32.partialorder %v12227_v40, 0.0  ;;  %v4578_v26 = vmul.f32 1.050701, %v4482_v61  ;;  %9176 = vpow2.f32 %v4142_v16  ;;  %8104 = vmatmul.mubr.msk.bf16.gmra.mxu0 %vm3424_vm7, %v4665_v23 }
 0x25c   : > { %v9165_v29 = vpop.eup %9164  ;;  %v4484_v13 = vsel %vm4004_vm13, %v12227_v40, %v4388_v52  ;;  %v4579_v12 = vmul.f32 1.050701, %v4483_v57  ;;  %v4144_v8 = vmul.f32 1.442695, %v12361_v55  ;;  %v4581_v59 = vmul.f32 1.050701, %v4485_v48  ;;  %v12378_v44 = vpop.f32.mrf.mxu1 }
 0x25d   : > { %v7398_v3 = vadd.f32 -1.0, %v9165_v29  ;;  %v7395_v51 = vadd.f32 -1.0, %v9163_v54  ;;  %9178 = vpow2.f32 %v4138_v20  ;;  %v4140_v34 = vmul.f32 1.442695, %v12365_v15 }
 0x25e   : > { %v9167_v21 = vpop.eup %9166  ;;  %v7397_v2 = vadd.f32 -1.0, %v9161_v0  ;;  %9180 = vpow2.f32 %v4144_v8  ;;  %v12376_v31 = vadd.f32 %v12259_v6, %v12084_v38  ;;  %v4580_v40 = vmul.f32 1.050701, %v4484_v13  ;;  %v12388_v60 = vpop.f32.mrf.mxu1 }
 0x25f   : > { %v7396_v25 = vadd.f32 -1.0, %v9167_v21  ;;  %v4393_v62 = vmul.f32 1.6732632, %v7398_v3  ;;  %9182 = vpow2.f32 %v4140_v34  ;;  %v12382_v33 = vadd.f32 %v12084_v38, %v12269_v63 }
 0x260   : > { %v4666_v10 = vpack.c.bf16 %v4579_v12, %v4578_v26  ;;  %v12386_v45 = vadd.f32 %v12278_v53, %v12084_v38  ;;  %v4667_v6 = vpack.c.bf16 %v4581_v59, %v4580_v40  ;;  %v4390_v22 = vmul.f32 1.6732632, %v7395_v51  ;;  %v12404_v52 = vpop.f32.mrf.mxu1 }
 0x261   : > { %v4391_v56 = vmul.f32 1.6732632, %v7396_v25  ;;  %v9169_v27 = vpop.eup %9168  ;;  %vm4009_vm14 = vcmp.gt.f32.partialorder %v12294_v5, 0.0  ;;  %vm4007_vm15 = vcmp.gt.f32.partialorder %v12298_v50, 0.0  ;;  %v4392_v7 = vmul.f32 1.6732632, %v7397_v2 }
 0x262   : > { %v9171_v28 = vpop.eup %9170  ;;  %v4150_v63 = vmul.f32 1.442695, %v12376_v31  ;;  %v4146_v24 = vmul.f32 1.442695, %v12382_v33  ;;  %8107 = vmatprep.mubr.msk.bf16.mxu0 %vm3424_vm7, %v4666_v10  ;;  %vm4006_vm0 = vcmp.gt.f32.partialorder %v12276_v4, 0.0  ;;  %v4489_v53 = vsel %vm4009_vm14, %v12294_v5, %v4393_v62 }
 0x263   : > { %v9173_v11 = vpop.eup %9172  ;;  %v4487_v43 = vsel %vm4007_vm15, %v12298_v50, %v4391_v56  ;;  %8108 = vmatmul.mubr.msk.bf16.gmra.mxu0 %vm3424_vm7, %v4667_v6  ;;  %v4152_v30 = vmul.f32 1.442695, %v12386_v45  ;;  %v7401_v36 = vadd.f32 -1.0, %v9169_v27  ;;  %v12402_v16 = vadd.f32 %v12084_v38, %v12301_v19 }
 0x264   : > { %v9175_v18 = vpop.eup %9174  ;;  %v7402_v1 = vadd.f32 -1.0, %v9173_v11  ;;  %9184 = vpow2.f32 %v4146_v24  ;;  %vm4008_vm1 = vcmp.gt.f32.partialorder %v12267_v47, 0.0  ;;  %v4486_v5 = vsel %vm4006_vm0, %v12276_v4, %v4390_v22  ;;  %v12415_v4 = vpop.f32.mrf.mxu1 }
 0x265   : > { %9186 = vpow2.f32 %v4152_v30  ;;  %v4488_v50 = vsel %vm4008_vm1, %v12267_v47, %v4392_v7  ;;  %v4583_v61 = vmul.f32 1.050701, %v4487_v43  ;;  %v7400_v9 = vadd.f32 -1.0, %v9175_v18 }
 0x266   : > { %9188 = vpow2.f32 %v4150_v63  ;;  %v4585_v17 = vmul.f32 1.050701, %v4489_v53  ;;  %vm4012_vm2 = vcmp.gt.f32.partialorder %v12307_v35, 0.0  ;;  %v7399_v0 = vadd.f32 -1.0, %v9171_v28 }
 0x267   : > { %v4397_v23 = vmul.f32 1.6732632, %v7402_v1  ;;  %v4582_v19 = vmul.f32 1.050701, %v4486_v5  ;;  %v4396_v54 = vmul.f32 1.6732632, %v7401_v36  ;;  %v12413_v57 = vadd.f32 %v12314_v46, %v12084_v38 }
 0x268   : > { %v9177_v20 = vpop.eup %9176  ;;  %v4148_v48 = vmul.f32 1.442695, %v12402_v16  ;;  %v4584_v47 = vmul.f32 1.050701, %v4488_v50  ;;  %vm4010_vm3 = vcmp.gt.f32.partialorder %v12312_v58, 0.0  ;;  %vm4013_vm4 = vcmp.gt.f32.partialorder %v12329_v32, 0.0 }
 0x269   : > { %v12421_v29 = vadd.f32 %v12084_v38, %v12335_v14  ;;  %vm4011_vm5 = vcmp.gt.f32.partialorder %v12333_v42, 0.0  ;;  %v4395_v13 = vmul.f32 1.6732632, %v7400_v9  ;;  %v4668_v12 = vpack.c.bf16 %v4583_v61, %v4582_v19 }
 0x26a   : > { %v9179_v26 = vpop.eup %9178  ;;  %9190 = vpow2.f32 %v4148_v48  ;;  %v4669_v46 = vpack.c.bf16 %v4585_v17, %v4584_v47  ;;  %v4394_v8 = vmul.f32 1.6732632, %v7399_v0  ;;  %v4493_v21 = vsel %vm4013_vm4, %v12329_v32, %v4397_v23 }
 0x26b   : > { %v9181_v3 = vpop.eup %9180  ;;  %vm4016_vm6 = vcmp.gt.f32.partialorder %v12340_v49, 0.0  ;;  %v7405_v59 = vadd.f32 -1.0, %v9177_v20  ;;  %v4492_v14 = vsel %vm4012_vm2, %v12307_v35, %v4396_v54  ;;  %vm4014_vm8 = vcmp.gt.f32.partialorder %v12346_v37, 0.0  ;;  %8111 = vmatprep.mubr.msk.bf16.mxu0 %vm3424_vm7, %v4668_v12 }
 0x26c   : > { %v9183_v51 = vpop.eup %9182  ;;  %v4158_v34 = vmul.f32 1.442695, %v12413_v57  ;;  %v4154_v2 = vmul.f32 1.442695, %v12421_v29  ;;  %v8037_v25 = vpop.f32.mrf.mxu1  ;;  %v7403_v40 = vadd.f32 -1.0, %v9179_v26  ;;  %vm4017_vm9 = vcmp.gt.f32.partialorder %v12361_v55, 0.0  ;;  %8112 = vmatmul.mubr.msk.bf16.gmra.mxu0 %vm3424_vm7, %v4669_v46 }
 0x26d   : > { %v7404_v32 = vadd.f32 -1.0, %v9183_v51  ;;  %v12437_v62 = vadd.f32 %v12348_v41, %v12084_v38  ;;  %v12441_v35 = vadd.f32 %v12084_v38, %v12367_v39  ;;  %v4589_v56 = vmul.f32 1.050701, %v4493_v21 }
 0x26e   : > { %v4491_v10 = vsel %vm4011_vm5, %v12333_v42, %v4395_v13  ;;  %v7406_v27 = vadd.f32 -1.0, %v9181_v3  ;;  %9192 = vpow2.f32 %v4154_v2  ;;  %v3779_v6 = vpop.f32.mrf.mxu1  ;;  %v4490_v22 = vsel %vm4010_vm3, %v12312_v58, %v4394_v8 }
 0x26f   : > { %v4400_v28 = vmul.f32 1.6732632, %v7405_v59  ;;  %v4399_v7 = vmul.f32 1.6732632, %v7404_v32  ;;  %v4160_v41 = vmul.f32 1.442695, %v12437_v62  ;;  %9194 = vpow2.f32 %v4158_v34 }
 0x270   : > { %v4156_v39 = vmul.f32 1.442695, %v12441_v35  ;;  %v12453_v63 = vadd.f32 %v12378_v44, %v12084_v38  ;;  %v12457_v42 = vadd.f32 %v12084_v38, %v12388_v60  ;;  %v8038_v24 = vpop.f32.mrf.mxu1  ;;  %v4587_v53 = vmul.f32 1.050701, %v4491_v10 }
 0x271   : > { %v9185_v11 = vpop.eup %9184  ;;  %v4398_v43 = vmul.f32 1.6732632, %v7403_v40  ;;  %vm4015_vm10 = vcmp.gt.f32.partialorder %v12365_v15, 0.0  ;;  %9196 = vpow2.f32 %v4160_v41  ;;  %v4588_v30 = vmul.f32 1.050701, %v4492_v14 }
 0x272   : > { %v9187_v58 = vpop.eup %9186  ;;  %v4401_v18 = vmul.f32 1.6732632, %v7406_v27  ;;  %vm4018_vm11 = vcmp.gt.f32.partialorder %v12382_v33, 0.0  ;;  %vm4021_vm12 = vcmp.gt.f32.partialorder %v12386_v45, 0.0  ;;  %9198 = vpow2.f32 %v4156_v39  ;;  %v3782_v50 = vpop.f32.mrf.mxu1 }
 0x273   : > { %v9189_v44 = vpop.eup %9188  ;;  %v4586_v36 = vmul.f32 1.050701, %v4490_v22  ;;  %v4495_v60 = vsel %vm4015_vm10, %v12365_v15, %v4399_v7  ;;  %v7407_v1 = vadd.f32 -1.0, %v9185_v11  ;;  %v7410_v5 = vadd.f32 -1.0, %v9187_v58 }
 0x274   : > { %v4671_v61 = vpack.c.bf16 %v4589_v56, %v4588_v30  ;;  %v4496_v9 = vsel %vm4016_vm6, %v12340_v49, %v4400_v28  ;;  %v4166_v17 = vmul.f32 1.442695, %v12453_v63  ;;  %v4162_v0 = vmul.f32 1.442695, %v12457_v42 }
 0x275   : > { %v4494_v23 = vsel %vm4014_vm8, %v12346_v37, %v4398_v43  ;;  %v4670_v20 = vpack.c.bf16 %v4587_v53, %v4586_v36  ;;  %v12473_v15 = vadd.f32 %v12404_v52, %v12084_v38  ;;  %v12477_v19 = vadd.f32 %v12084_v38, %v12415_v4 }
 0x276   : > { %v4497_v49 = vsel %vm4017_vm9, %v12361_v55, %v4401_v18  ;;  %v4591_v54 = vmul.f32 1.050701, %v4495_v60  ;;  %v7409_v48 = vadd.f32 -1.0, %v9189_v44  ;;  %9200 = vpow2.f32 %v4162_v0 }
 0x277   : > { %v9191_v47 = vpop.eup %9190  ;;  %v4402_v26 = vmul.f32 1.6732632, %v7407_v1  ;;  %v4405_v13 = vmul.f32 1.6732632, %v7410_v5  ;;  %8115 = vmatprep.mubr.msk.bf16.mxu0 %vm3424_vm7, %v4670_v20  ;;  %v4168_v37 = vmul.f32 1.442695, %v12473_v15  ;;  %v12485_v52 = vadd.f32 %v12084_v38, %v3779_v6 }
 0x278   : > { %v8041_v12 = vpop.f32.mrf.mxu1  ;;  %v7408_v4 = vadd.f32 -1.0, %v9191_v47  ;;  %9202 = vpow2.f32 %v4166_v17  ;;  %8116 = vmatmul.mubr.msk.bf16.gmra.mxu0 %vm3424_vm7, %v4671_v61  ;;  %v4164_v55 = vmul.f32 1.442695, %v12477_v19  ;;  %v12490_v3 = vadd.f32 %v8037_v25, %v12084_v38 }
 0x279   : > { %v4592_v46 = vmul.f32 1.050701, %v4496_v9  ;;  %v4590_v8 = vmul.f32 1.050701, %v4494_v23  ;;  %vm4019_vm13 = vcmp.gt.f32.partialorder %v12402_v16, 0.0  ;;  %9204 = vpow2.f32 %v4168_v37 }
 0x27a   : > { %v3795_v21 = vpop.f32.mrf.mxu1  ;;  %v4593_v59 = vmul.f32 1.050701, %v4497_v49  ;;  %v4404_v51 = vmul.f32 1.6732632, %v7409_v48  ;;  %v4403_v14 = vmul.f32 1.6732632, %v7408_v4  ;;  %9206 = vpow2.f32 %v4164_v55 }
 0x27b   : > { %v9193_v34 = vpop.eup %9192  ;;  %v4498_v2 = vsel %vm4018_vm11, %v12382_v33, %v4402_v26  ;;  %v4501_v25 = vsel %vm4021_vm12, %v12386_v45, %v4405_v13  ;;  %v4170_v40 = vmul.f32 1.442695, %v12485_v52  ;;  %v4672_v32 = vpack.c.bf16 %v4591_v54, %v4590_v8 }
 0x27c   : > { %v4499_v56 = vsel %vm4019_vm13, %v12402_v16, %v4403_v14  ;;  %v4174_v10 = vmul.f32 1.442695, %v12490_v3  ;;  %v12503_v27 = vadd.f32 %v8038_v24, %v12084_v38  ;;  %v12506_v6 = vadd.f32 %v12084_v38, %v3782_v50  ;;  %v9195_v22 = vpop.eup %9194  ;;  %v8042_v7 = vpop.f32.mrf.mxu1 }
 0x27d   : > { %v4595_v28 = vmul.f32 1.050701, %v4499_v56  ;;  %v7411_v33 = vadd.f32 -1.0, %v9193_v34  ;;  %9208 = vpow2.f32 %v4170_v40  ;;  %8119 = vmatprep.mubr.msk.bf16.mxu0 %vm3424_vm7, %v4672_v32  ;;  %v12510_v45 = vadd.f32 %v8041_v12, %v12084_v38 }
 0x27e   : > { %v9197_v41 = vpop.eup %9196  ;;  %v4673_v16 = vpack.c.bf16 %v4593_v59, %v4592_v46  ;;  %vm4020_vm14 = vcmp.gt.f32.partialorder %v12376_v31, 0.0  ;;  %v4594_v39 = vmul.f32 1.050701, %v4498_v2  ;;  %v4597_v24 = vmul.f32 1.050701, %v4501_v25  ;;  %v3798_v5 = vpop.f32.mrf.mxu1 }
 0x27f   : > { %v9199_v11 = vpop.eup %9198  ;;  %v4500_v53 = vsel %vm4020_vm14, %v12376_v31, %v4404_v51  ;;  %vm4024_vm15 = vcmp.gt.f32.partialorder %v12413_v57, 0.0  ;;  %v7414_v43 = vadd.f32 -1.0, %v9197_v41  ;;  %v4176_v58 = vmul.f32 1.442695, %v12503_v27 }
 0x280   : > { %v4172_v30 = vmul.f32 1.442695, %v12506_v6  ;;  %v7413_v18 = vadd.f32 -1.0, %v9195_v22  ;;  %v7412_v44 = vadd.f32 -1.0, %v9199_v11  ;;  %9210 = vpow2.f32 %v4174_v10  ;;  %8120 = vmatmul.mubr.msk.bf16.gmra.mxu0 %vm3424_vm7, %v4673_v16 }
 0x281   : > { %v12519_v36 = vadd.f32 %v12084_v38, %v3795_v21  ;;  %v4406_v60 = vmul.f32 1.6732632, %v7411_v33  ;;  %9212 = vpow2.f32 %v4176_v58  ;;  %v4182_v1 = vmul.f32 1.442695, %v12510_v45  ;;  %v12529_v38 = vld [vmem:[%s14079_s6] ss:$0 sm:$0xff] }
 0x282   : > { %v4674_v31 = vpack.c.bf16 %v4595_v28, %v4594_v39  ;;  %vm4022_vm0 = vcmp.gt.f32.partialorder %v12421_v29, 0.0  ;;  %v4409_v50 = vmul.f32 1.6732632, %v7414_v43  ;;  %v4407_v61 = vmul.f32 1.6732632, %v7412_v44 }
 0x283   : > { %9214 = vpow2.f32 %v4172_v30  ;;  %v9201_v9 = vpop.eup %9200  ;;  %v4596_v17 = vmul.f32 1.050701, %v4500_v53  ;;  %vm4023_vm1 = vcmp.gt.f32.partialorder %v12441_v35, 0.0  ;;  %v4178_v0 = vmul.f32 1.442695, %v12519_v36 }
 0x284   : > { %8123 = vmatprep.mubr.msk.bf16.mxu0 %vm3424_vm7, %v4674_v31  ;;  %v12532_v23 = vadd.f32 %v12529_v38, %v8042_v7  ;;  %v4408_v20 = vmul.f32 1.6732632, %v7413_v18  ;;  %vm4025_vm2 = vcmp.gt.f32.partialorder %v12437_v62, 0.0  ;;  %v4503_v49 = vsel %vm4023_vm1, %v12441_v35, %v4407_v61  ;;  %v8927_v35 = vld [vmem:[%s14082_s9] sm:$0xff]  }
 0x285   : > { %v7415_v54 = vadd.f32 -1.0, %v9201_v9  ;;  %v9203_v48 = vpop.eup %9202  ;;  %v4675_v47 = vpack.c.bf16 %v4597_v24, %v4596_v17  ;;  %v4502_v26 = vsel %vm4022_vm0, %v12421_v29, %v4406_v60  ;;  %9216 = vpow2.f32 %v4182_v1  ;;  %v8045_v37 = vpop.f32.mrf.mxu1  ;;  %8189 = vmatprep.subr.bf16.mxu1 %v8927_v35 }
 0x286   : > { %v4184_v13 = vmul.f32 1.442695, %v12532_v23  ;;  %v9205_v12 = vpop.eup %9204  ;;  %v4505_v4 = vsel %vm4025_vm2, %v12437_v62, %v4409_v50  ;;  %9218 = vpow2.f32 %v4178_v0  ;;  %v12542_v46 = vadd.f32 %v12529_v38, %v3798_v5  ;;  %8190 = vmatpush3.bf16.msra.mxu1 %v8927_v35 }
 0x287   : > { %v4410_v55 = vmul.f32 1.6732632, %v7415_v54  ;;  %v9207_v8 = vpop.eup %9206  ;;  %v4599_v21 = vmul.f32 1.050701, %v4503_v49  ;;  %vm4026_vm3 = vcmp.gt.f32.partialorder %v12457_v42, 0.0  ;;  %v7418_v29 = vadd.f32 -1.0, %v9205_v12  ;;  %v3811_v59 = vpop.f32.mrf.mxu1 }
 0x288   : > { %9220 = vpow2.f32 %v4184_v13  ;;  %v4504_v62 = vsel %vm4024_vm15, %v12413_v57, %v4408_v20  ;;  %v7417_v51 = vadd.f32 -1.0, %v9203_v48  ;;  %v7416_v14 = vadd.f32 -1.0, %v9207_v8  ;;  %8124 = vmatmul.mubr.msk.bf16.gmra.mxu0 %vm3424_vm7, %v4675_v47 }
 0x289   : > { %v4180_v34 = vmul.f32 1.442695, %v12542_v46  ;;  %v4598_v2 = vmul.f32 1.050701, %v4502_v26  ;;  %v4601_v25 = vmul.f32 1.050701, %v4505_v4  ;;  %v4506_v40 = vsel %vm4026_vm3, %v12457_v42, %v4410_v55  ;;  %v8046_v56 = vpop.f32.mrf.mxu1 }
 0x28a   : > { %v12555_v32 = vadd.f32 %v12529_v38, %v8045_v37  ;;  %v9209_v10 = vpop.eup %9208  ;;  %v4413_v22 = vmul.f32 1.6732632, %v7418_v29  ;;  %v4411_v28 = vmul.f32 1.6732632, %v7416_v14  ;;  %v12558_v57 = vadd.f32 %v12529_v38, %v3811_v59 }
 0x28b   : > { %9222 = vpow2.f32 %v4180_v34  ;;  %vm4029_vm4 = vcmp.gt.f32.partialorder %v12473_v15, 0.0  ;;  %vm4027_vm5 = vcmp.gt.f32.partialorder %v12477_v19, 0.0  ;;  %v7419_v33 = vadd.f32 -1.0, %v9209_v10  ;;  %v3814_v41 = vpop.f32.mrf.mxu1 }
 0x28c   : > { %v4676_v7 = vpack.c.bf16 %v4599_v21, %v4598_v2  ;;  %v4600_v42 = vmul.f32 1.050701, %v4504_v62  ;;  %v4412_v16 = vmul.f32 1.6732632, %v7417_v51  ;;  %v4602_v39 = vmul.f32 1.050701, %v4506_v40 }
 0x28d   : > { %v4507_v24 = vsel %vm4027_vm5, %v12477_v19, %v4411_v28  ;;  %v9211_v11 = vpop.eup %9210  ;;  %v4190_v43 = vmul.f32 1.442695, %v12555_v32  ;;  %v4186_v58 = vmul.f32 1.442695, %v12558_v57  ;;  %v4509_v44 = vsel %vm4029_vm4, %v12473_v15, %v4413_v22 }
 0x28e   : > { %v4603_v53 = vmul.f32 1.050701, %v4507_v24  ;;  %8127 = vmatprep.mubr.msk.bf16.mxu0 %vm3424_vm7, %v4676_v7  ;;  %v9213_v30 = vpop.eup %9212  ;;  %v4677_v18 = vpack.c.bf16 %v4601_v25, %v4600_v42  ;;  %v12570_v60 = vadd.f32 %v12529_v38, %v8046_v56  ;;  %v12573_v1 = vadd.f32 %v12529_v38, %v3814_v41 }
 0x28f   : > { %v4414_v31 = vmul.f32 1.6732632, %v7419_v33  ;;  %v7422_v5 = vadd.f32 -1.0, %v9213_v30  ;;  %9224 = vpow2.f32 %v4186_v58  ;;  %vm4028_vm6 = vcmp.gt.f32.partialorder %v12453_v63, 0.0 }
 0x290   : > { %v9215_v19 = vpop.eup %9214  ;;  %v4678_v50 = vpack.c.bf16 %v4603_v53, %v4602_v39  ;;  %8128 = vmatmul.mubr.msk.bf16.gmra.mxu0 %vm3424_vm7, %v4677_v18  ;;  %v4192_v9 = vmul.f32 1.442695, %v12570_v60  ;;  %v4508_v15 = vsel %vm4028_vm6, %v12453_v63, %v4412_v16  ;;  %v7421_v17 = vadd.f32 -1.0, %v9211_v11 }
 0x291   : > { %v7420_v61 = vadd.f32 -1.0, %v9215_v19  ;;  %9226 = vpow2.f32 %v4190_v43  ;;  %v4188_v0 = vmul.f32 1.442695, %v12573_v1  ;;  %v4605_v49 = vmul.f32 1.050701, %v4509_v44 }
 0x292   : > { %8131 = vmatprep.mubr.msk.bf16.mxu0 %vm3424_vm7, %v4678_v50  ;;  %v9217_v20 = vpop.eup %9216  ;;  %vm4030_vm8 = vcmp.gt.f32.partialorder %v12485_v52, 0.0  ;;  %9228 = vpow2.f32 %v4192_v9  ;;  %v4417_v13 = vmul.f32 1.6732632, %v7422_v5  ;;  %vm4031_vm9 = vcmp.gt.f32.partialorder %v12506_v6, 0.0 }
 0x293   : > { %v4415_v54 = vmul.f32 1.6732632, %v7420_v61  ;;  %v9219_v47 = vpop.eup %9218  ;;  %v4510_v26 = vsel %vm4030_vm8, %v12485_v52, %v4414_v31  ;;  %9230 = vpow2.f32 %v4188_v0  ;;  %v4604_v37 = vmul.f32 1.050701, %v4508_v15 }
 0x294   : > { %v8049_v48 = vpop.f32.mrf.mxu1  ;;  %vm4032_vm10 = vcmp.gt.f32.partialorder %v12490_v3, 0.0  ;;  %v4416_v35 = vmul.f32 1.6732632, %v7421_v17  ;;  %vm4033_vm11 = vcmp.gt.f32.partialorder %v12503_v27, 0.0  ;;  %v7425_v21 = vadd.f32 -1.0, %v9217_v20 }
 0x295   : > { %v9221_v63 = vpop.eup %9220  ;;  %v4511_v12 = vsel %vm4031_vm9, %v12506_v6, %v4415_v54  ;;  %v12587_v4 = vadd.f32 %v12529_v38, %v8049_v48  ;;  %v4679_v52 = vpack.c.bf16 %v4605_v49, %v4604_v37  ;;  %v4606_v29 = vmul.f32 1.050701, %v4510_v26 }
 0x296   : > { %v3827_v55 = vpop.f32.mrf.mxu1  ;;  %v4607_v8 = vmul.f32 1.050701, %v4511_v12  ;;  %v7423_v59 = vadd.f32 -1.0, %v9219_v47  ;;  %v4513_v34 = vsel %vm4033_vm11, %v12503_v27, %v4417_v13  ;;  %v7426_v2 = vadd.f32 -1.0, %v9221_v63 }
 0x297   : > { %v4198_v62 = vmul.f32 1.442695, %v12587_v4  ;;  %v12593_v6 = vadd.f32 %v12529_v38, %v3827_v55  ;;  %vm4036_vm12 = vcmp.gt.f32.partialorder %v12510_v45, 0.0  ;;  %v4512_v22 = vsel %vm4032_vm10, %v12490_v3, %v4416_v35 }
 0x298   : > { %v8050_v51 = vpop.f32.mrf.mxu1  ;;  %v9223_v14 = vpop.eup %9222  ;;  %8132 = vmatmul.mubr.msk.bf16.gmra.mxu0 %vm3424_vm7, %v4679_v52  ;;  %v4680_v10 = vpack.c.bf16 %v4607_v8, %v4606_v29  ;;  %v4420_v27 = vmul.f32 1.6732632, %v7425_v21  ;;  %vm4035_vm13 = vcmp.gt.f32.partialorder %v12542_v46, 0.0  ;;  %v4609_v33 = vmul.f32 1.050701, %v4513_v34 }
 0x299   : > { %v12596_v25 = vadd.f32 %v12529_v38, %v8050_v51  ;;  %v7424_v40 = vadd.f32 -1.0, %v9223_v14  ;;  %9232 = vpow2.f32 %v4198_v62  ;;  %v4194_v28 = vmul.f32 1.442695, %v12593_v6 }
 0x29a   : > { %v3830_v56 = vpop.f32.mrf.mxu1  ;;  %v4418_v7 = vmul.f32 1.6732632, %v7423_v59  ;;  %8135 = vmatprep.mubr.msk.bf16.mxu0 %vm3424_vm7, %v4680_v10  ;;  %v4421_v39 = vmul.f32 1.6732632, %v7426_v2  ;;  %v4608_v53 = vmul.f32 1.050701, %v4512_v22  ;;  %v4516_v30 = vsel %vm4036_vm12, %v12510_v45, %v4420_v27 }
 0x29b   : > { %v4419_v41 = vmul.f32 1.6732632, %v7424_v40  ;;  %v12606_v42 = vadd.f32 %v12529_v38, %v3830_v56  ;;  %9234 = vpow2.f32 %v4194_v28  ;;  %v4200_v24 = vmul.f32 1.442695, %v12596_v25 }
 0x29c   : > { %v9225_v11 = vpop.eup %9224  ;;  %vm4034_vm14 = vcmp.gt.f32.partialorder %v12519_v36, 0.0  ;;  %vm4037_vm15 = vcmp.gt.f32.partialorder %v12532_v23, 0.0  ;;  %v4681_v31 = vpack.c.bf16 %v4609_v33, %v4608_v53  ;;  %vm4038_vm0 = vcmp.gt.f32.partialorder %v12558_v57, 0.0 }
 0x29d   : > { %v8053_v16 = vpop.f32.mrf.mxu1  ;;  %v4515_v43 = vsel %vm4035_vm13, %v12542_v46, %v4419_v41  ;;  %v7427_v18 = vadd.f32 -1.0, %v9225_v11  ;;  %9236 = vpow2.f32 %v4200_v24  ;;  %v4196_v44 = vmul.f32 1.442695, %v12606_v42 }
 0x29e   : > { %v12611_v3 = vadd.f32 %v12529_v38, %v8053_v16  ;;  %v9227_v19 = vpop.eup %9226  ;;  %v4514_v5 = vsel %vm4034_vm14, %v12519_v36, %v4418_v7  ;;  %v4517_v15 = vsel %vm4037_vm15, %v12532_v23, %v4421_v39  ;;  %v4611_v17 = vmul.f32 1.050701, %v4515_v43 }
 0x29f   : > { %v3843_v58 = vpop.f32.mrf.mxu1  ;;  %v9229_v46 = vpop.eup %9228  ;;  %9238 = vpow2.f32 %v4196_v44  ;;  %v4422_v20 = vmul.f32 1.6732632, %v7427_v18  ;;  %v4610_v48 = vmul.f32 1.050701, %v4514_v5  ;;  %v7429_v47 = vadd.f32 -1.0, %v9227_v19 }
 0x2a0   : > { %v4206_v50 = vmul.f32 1.442695, %v12611_v3  ;;  %v12625_v61 = vadd.f32 %v12529_v38, %v3843_v58  ;;  %v9231_v0 = vpop.eup %9230  ;;  %v7430_v49 = vadd.f32 -1.0, %v9229_v46  ;;  %8136 = vmatmul.mubr.msk.bf16.gmra.mxu0 %vm3424_vm7, %v4681_v31  ;;  %v4613_v23 = vmul.f32 1.050701, %v4517_v15 }
 0x2a1   : > { %v8054_v9 = vpop.f32.mrf.mxu1  ;;  %v7428_v26 = vadd.f32 -1.0, %v9231_v0  ;;  %v4682_v55 = vpack.c.bf16 %v4611_v17, %v4610_v48  ;;  %v4612_v35 = vmul.f32 1.050701, %v4516_v30  ;;  %v4518_v8 = vsel %vm4038_vm0, %v12558_v57, %v4422_v20 }
 0x2a2   : > { %v12629_v45 = vadd.f32 %v12529_v38, %v8054_v9  ;;  %9240 = vpow2.f32 %v4206_v50  ;;  %v4202_v36 = vmul.f32 1.442695, %v12625_v61  ;;  %v4425_v37 = vmul.f32 1.6732632, %v7430_v49 }
 0x2a3   : > { %v3846_v54 = vpop.f32.mrf.mxu1  ;;  %v4423_v12 = vmul.f32 1.6732632, %v7428_v26  ;;  %vm4039_vm1 = vcmp.gt.f32.partialorder %v12573_v1, 0.0  ;;  %v4424_v29 = vmul.f32 1.6732632, %v7429_v47  ;;  %vm4041_vm2 = vcmp.gt.f32.partialorder %v12570_v60, 0.0  ;;  %8139 = vmatprep.mubr.msk.bf16.mxu0 %vm3424_vm7, %v4682_v55 }
 0x2a4   : > { %v4208_v13 = vmul.f32 1.442695, %v12629_v45  ;;  %9242 = vpow2.f32 %v4202_v36  ;;  %v12636_v63 = vadd.f32 %v12529_v38, %v3846_v54  ;;  %v4683_v51 = vpack.c.bf16 %v4613_v23, %v4612_v35 }
 0x2a5   : > { %v4519_v59 = vsel %vm4039_vm1, %v12573_v1, %v4423_v12  ;;  %v4614_v57 = vmul.f32 1.050701, %v4518_v8  ;;  %v4521_v2 = vsel %vm4041_vm2, %v12570_v60, %v4425_v37  ;;  %vm4040_vm3 = vcmp.gt.f32.partialorder %v12555_v32, 0.0 }
 0x2a6   : > { %9244 = vpow2.f32 %v4208_v13  ;;  %v4204_v21 = vmul.f32 1.442695, %v12636_v63  ;;  %v9233_v52 = vpop.eup %9232  ;;  %v4615_v14 = vmul.f32 1.050701, %v4519_v59  ;;  %v4520_v27 = vsel %vm4040_vm3, %v12555_v32, %v4424_v29 }
 0x2a7   : > { %v7433_v10 = vadd.f32 -1.0, %v9233_v52  ;;  %v4617_v16 = vmul.f32 1.050701, %v4521_v2  ;;  %v4616_v58 = vmul.f32 1.050701, %v4520_v27  ;;  %vm4044_vm4 = vcmp.gt.f32.partialorder %v12587_v4, 0.0 }
 0x2a8   : > { %v8057_v62 = vpop.f32.mrf.mxu1  ;;  %9246 = vpow2.f32 %v4204_v21  ;;  %v9235_v56 = vpop.eup %9234  ;;  %8140 = vmatmul.mubr.msk.bf16.gmra.mxu0 %vm3424_vm7, %v4683_v51  ;;  %v4684_v7 = vpack.c.bf16 %v4615_v14, %v4614_v57  ;;  %vm4042_vm5 = vcmp.gt.f32.partialorder %v12593_v6, 0.0  ;;  %vm4045_vm6 = vcmp.gt.f32.partialorder %v12596_v25, 0.0 }
 0x2a9   : > { %v12645_v34 = vadd.f32 %v12529_v38, %v8057_v62  ;;  %v7431_v28 = vadd.f32 -1.0, %v9235_v56  ;;  %v4428_v30 = vmul.f32 1.6732632, %v7433_v10  ;;  %v4685_v31 = vpack.c.bf16 %v4617_v16, %v4616_v58 }
 0x2aa   : > { %v3859_v40 = vpop.f32.mrf.mxu1  ;;  %v9237_v41 = vpop.eup %9236  ;;  %8143 = vmatprep.mubr.msk.bf16.mxu0 %vm3424_vm7, %v4684_v7  ;;  %vm4043_vm8 = vcmp.gt.f32.partialorder %v12606_v42, 0.0  ;;  %vm4048_vm9 = vcmp.gt.f32.partialorder %v12611_v3, 0.0  ;;  %vm4046_vm10 = vcmp.gt.f32.partialorder %v12625_v61, 0.0  ;;  %vm4049_vm11 = vcmp.gt.f32.partialorder %v12629_v45, 0.0 }
 0x2ab   : > { %v4214_v22 = vmul.f32 1.442695, %v12645_v34  ;;  %v12651_v1 = vadd.f32 %v12529_v38, %v3859_v40  ;;  %v4426_v39 = vmul.f32 1.6732632, %v7431_v28  ;;  %v7434_v24 = vadd.f32 -1.0, %v9237_v41 }
 0x2ac   : > { %v8058_v33 = vpop.f32.mrf.mxu1  ;;  %v9239_v43 = vpop.eup %9238  ;;  %v4524_v20 = vsel %vm4044_vm4, %v12587_v4, %v4428_v30  ;;  %vm4047_vm12 = vcmp.gt.f32.partialorder %v12636_v63, 0.0  ;;  %vm4052_vm14 = vcmp.gt.f32.partialorder %v12645_v34, 0.0 }
 0x2ad   : > { %9248 = vpow2.f32 %v4214_v22  ;;  %v4210_v60 = vmul.f32 1.442695, %v12651_v1  ;;  %v12657_v11 = vadd.f32 %v12529_v38, %v8058_v33  ;;  %v4429_v44 = vmul.f32 1.6732632, %v7434_v24 }
 0x2ae   : > { %v3862_v53 = vpop.f32.mrf.mxu1  ;;  %v7432_v19 = vadd.f32 -1.0, %v9239_v43  ;;  %v4522_v5 = vsel %vm4042_vm5, %v12593_v6, %v4426_v39  ;;  %v4620_v4 = vmul.f32 1.050701, %v4524_v20  ;;  %vm4050_vm13 = vcmp.gt.f32.partialorder %v12651_v1, 0.0 }
 0x2af   : > { %9250 = vpow2.f32 %v4210_v60  ;;  %v12661_v32 = vadd.f32 %v12529_v38, %v3862_v53  ;;  %v9241_v18 = vpop.eup %9240  ;;  %v4216_v50 = vmul.f32 1.442695, %v12657_v11  ;;  %v4525_v46 = vsel %vm4045_vm6, %v12596_v25, %v4429_v44 }
 0x2b0   : > { %v4427_v15 = vmul.f32 1.6732632, %v7432_v19  ;;  %v7437_v49 = vadd.f32 -1.0, %v9241_v18  ;;  %8144 = vmatmul.mubr.msk.bf16.gmra.mxu0 %vm3424_vm7, %v4685_v31  ;;  %v4618_v6 = vmul.f32 1.050701, %v4522_v5  ;;  %vm4053_vm15 = vcmp.gt.f32.partialorder %v12657_v11, 0.0 }
 0x2b1   : > { %v9243_v9 = vpop.eup %9242  ;;  %v4212_v17 = vmul.f32 1.442695, %v12661_v32  ;;  %9252 = vpow2.f32 %v4216_v50  ;;  %v4621_v47 = vmul.f32 1.050701, %v4525_v46  ;;  %vm4051_vm0 = vcmp.gt.f32.partialorder %v12661_v32, 0.0 }
 0x2b2   : > { %v7435_v36 = vadd.f32 -1.0, %v9243_v9  ;;  %v4523_v54 = vsel %vm4043_vm8, %v12606_v42, %v4427_v15  ;;  %v4432_v55 = vmul.f32 1.6732632, %v7437_v49 }
 0x2b3   : > { %v9245_v0 = vpop.eup %9244  ;;  %9254 = vpow2.f32 %v4212_v17  ;;  %v4619_v25 = vmul.f32 1.050701, %v4523_v54  ;;  %v4687_v52 = vpack.c.bf16 %v4621_v47, %v4620_v4 }
 0x2b4   : > { %v7438_v48 = vadd.f32 -1.0, %v9245_v0  ;;  %v4430_v26 = vmul.f32 1.6732632, %v7435_v36  ;;  %v4528_v40 = vsel %vm4048_vm9, %v12611_v3, %v4432_v55 }
 0x2b5   : > { %v8061_v13 = vpop.f32.mrf.mxu1  ;;  %v9247_v23 = vpop.eup %9246  ;;  %v4686_v21 = vpack.c.bf16 %v4619_v25, %v4618_v6  ;;  %v4624_v60 = vmul.f32 1.050701, %v4528_v40 }
 0x2b6   : > { %v4433_v37 = vmul.f32 1.6732632, %v7438_v48  ;;  %v12675_v12 = vadd.f32 %v12529_v38, %v8061_v13  ;;  %v7436_v35 = vadd.f32 -1.0, %v9247_v23  ;;  %v4526_v29 = vsel %vm4046_vm10, %v12625_v61, %v4430_v26 }
 0x2b7   : > { %v3875_v8 = vpop.f32.mrf.mxu1  ;;  %8147 = vmatprep.mubr.msk.bf16.mxu0 %vm3424_vm7, %v4686_v21  ;;  %v4622_v22 = vmul.f32 1.050701, %v4526_v29 }
 0x2b8   : > { %v4222_v42 = vmul.f32 1.442695, %v12675_v12  ;;  %v4431_v59 = vmul.f32 1.6732632, %v7436_v35  ;;  %v12683_v62 = vadd.f32 %v12529_v38, %v3875_v8  ;;  %v4529_v57 = vsel %vm4049_vm11, %v12629_v45, %v4433_v37  ;;  %8148 = vmatmul.mubr.msk.bf16.gmra.mxu0 %vm3424_vm7, %v4687_v52 }
 0x2b9   : > { %v8062_v51 = vpop.f32.mrf.mxu1  ;;  %v4625_v33 = vmul.f32 1.050701, %v4529_v57  ;;  %vm4056_vm1 = vcmp.gt.f32.partialorder %v12675_v12, 0.0 }
 0x2ba   : > { %v9249_v14 = vpop.eup %9248  ;;  %9256 = vpow2.f32 %v4222_v42  ;;  %v12689_v2 = vadd.f32 %v12529_v38, %v8062_v51  ;;  %v4527_v61 = vsel %vm4047_vm12, %v12636_v63, %v4431_v59  ;;  %v4218_v28 = vmul.f32 1.442695, %v12683_v62 }
 0x2bb   : > { %v3878_v56 = vpop.f32.mrf.mxu1  ;;  %v4623_v27 = vmul.f32 1.050701, %v4527_v61  ;;  %v7441_v7 = vadd.f32 -1.0, %v9249_v14  ;;  %v4689_v43 = vpack.c.bf16 %v4625_v33, %v4624_v60  ;;  %vm4054_vm2 = vcmp.gt.f32.partialorder %v12683_v62, 0.0 }
 0x2bc   : > { %v9251_v10 = vpop.eup %9250  ;;  %v12696_v45 = vadd.f32 %v12529_v38, %v3878_v56  ;;  %v4224_v16 = vmul.f32 1.442695, %v12689_v2  ;;  %9258 = vpow2.f32 %v4218_v28  ;;  %vm4057_vm3 = vcmp.gt.f32.partialorder %v12689_v2, 0.0 }
 0x2bd   : > { %v7439_v41 = vadd.f32 -1.0, %v9251_v10  ;;  %v4688_v63 = vpack.c.bf16 %v4623_v27, %v4622_v22  ;;  %v4436_v58 = vmul.f32 1.6732632, %v7441_v7 }
 0x2be   : > { %v4220_v3 = vmul.f32 1.442695, %v12696_v45  ;;  %9260 = vpow2.f32 %v4224_v16  ;;  %v9253_v39 = vpop.eup %9252  ;;  %vm4055_vm4 = vcmp.gt.f32.partialorder %v12696_v45, 0.0 }
 0x2bf   : > { %v4434_v24 = vmul.f32 1.6732632, %v7439_v41  ;;  %8151 = vmatprep.mubr.msk.bf16.mxu0 %vm3424_vm7, %v4688_v63  ;;  %v7442_v30 = vadd.f32 -1.0, %v9253_v39  ;;  %v4532_v5 = vsel %vm4052_vm14, %v12645_v34, %v4436_v58 }
 0x2c0   : > { %9262 = vpow2.f32 %v4220_v3  ;;  %v9255_v53 = vpop.eup %9254  ;;  %8152 = vmatmul.mubr.msk.bf16.gmra.mxu0 %vm3424_vm7, %v4689_v43  ;;  %v4628_v49 = vmul.f32 1.050701, %v4532_v5 }
 0x2c1   : > { %v7440_v18 = vadd.f32 -1.0, %v9255_v53  ;;  %v4437_v44 = vmul.f32 1.6732632, %v7442_v30  ;;  %v4530_v19 = vsel %vm4050_vm13, %v12651_v1, %v4434_v24 }
 0x2c2   : > { %v4626_v17 = vmul.f32 1.050701, %v4530_v19 }
 0x2c3   : > { %v4435_v31 = vmul.f32 1.6732632, %v7440_v18  ;;  %v4533_v50 = vsel %vm4053_vm15, %v12657_v11, %v4437_v44 }
 0x2c4   : > { %v4629_v9 = vmul.f32 1.050701, %v4533_v50 }
 0x2c5   : > { %v4531_v46 = vsel %vm4051_vm0, %v12661_v32, %v4435_v31 }
 0x2c6   : > { %v4627_v0 = vmul.f32 1.050701, %v4531_v46  ;;  %v4691_v48 = vpack.c.bf16 %v4629_v9, %v4628_v49 }
 0x2c7   : > { %v9257_v15 = vpop.eup %9256  ;;  %v8065_v20 = vpop.f32.mrf.mxu1 }
 0x2c8   : > { %v12711_v36 = vadd.f32 %v12529_v38, %v8065_v20  ;;  %v7445_v1 = vadd.f32 -1.0, %v9257_v15  ;;  %v4690_v54 = vpack.c.bf16 %v4627_v0, %v4626_v17 }
 0x2c9   : > { %v3891_v6 = vpop.f32.mrf.mxu1  ;;  %v9259_v47 = vpop.eup %9258 }
 0x2ca   : > { %v4230_v34 = vmul.f32 1.442695, %v12711_v36  ;;  %v12715_v11 = vadd.f32 %v12529_v38, %v3891_v6  ;;  %8155 = vmatprep.mubr.msk.bf16.mxu0 %vm3424_vm7, %v4690_v54  ;;  %v7443_v26 = vadd.f32 -1.0, %v9259_v47  ;;  %v4440_v23 = vmul.f32 1.6732632, %v7445_v1 }
 0x2cb   : > { %v8066_v25 = vpop.f32.mrf.mxu1  ;;  %v9261_v32 = vpop.eup %9260  ;;  %8156 = vmatmul.mubr.msk.bf16.gmra.mxu0 %vm3424_vm7, %v4691_v48  ;;  %vm4060_vm5 = vcmp.gt.f32.partialorder %v12711_v36, 0.0 }
 0x2cc   : > { %9264 = vpow2.f32 %v4230_v34  ;;  %v7446_v37 = vadd.f32 -1.0, %v9261_v32  ;;  %v4226_v4 = vmul.f32 1.442695, %v12715_v11  ;;  %v12721_v55 = vadd.f32 %v12529_v38, %v8066_v25 }
 0x2cd   : > { %v9263_v13 = vpop.eup %9262  ;;  %v3894_v35 = vpop.f32.mrf.mxu1  ;;  %v4438_v8 = vmul.f32 1.6732632, %v7443_v26  ;;  %v4536_v57 = vsel %vm4056_vm1, %v12675_v12, %v4440_v23  ;;  %vm4058_vm6 = vcmp.gt.f32.partialorder %v12715_v11, 0.0 }
 0x2ce   : > { %v7444_v21 = vadd.f32 -1.0, %v9263_v13  ;;  %v12725_v42 = vadd.f32 %v12529_v38, %v3894_v35  ;;  %v4441_v52 = vmul.f32 1.6732632, %v7446_v37  ;;  %9266 = vpow2.f32 %v4226_v4 }
 0x2cf   : > { %v4232_v29 = vmul.f32 1.442695, %v12721_v55  ;;  %v4534_v59 = vsel %vm4054_vm2, %v12683_v62, %v4438_v8  ;;  %v4632_v62 = vmul.f32 1.050701, %v4536_v57  ;;  %vm4061_vm8 = vcmp.gt.f32.partialorder %v12721_v55, 0.0 }
 0x2d0   : > { %v4439_v51 = vmul.f32 1.6732632, %v7444_v21  ;;  %v4228_v14 = vmul.f32 1.442695, %v12725_v42  ;;  %v4537_v40 = vsel %vm4057_vm3, %v12689_v2, %v4441_v52  ;;  %v4630_v10 = vmul.f32 1.050701, %v4534_v59 }
 0x2d1   : > { %9268 = vpow2.f32 %v4232_v29  ;;  %v4633_v61 = vmul.f32 1.050701, %v4537_v40  ;;  %vm4059_vm9 = vcmp.gt.f32.partialorder %v12725_v42, 0.0 }
 0x2d2   : > { %v4535_v56 = vsel %vm4055_vm4, %v12696_v45, %v4439_v51  ;;  %9270 = vpow2.f32 %v4228_v14 }
 0x2d3   : > { %v4631_v22 = vmul.f32 1.050701, %v4535_v56  ;;  %v8069_v27 = vpop.f32.mrf.mxu1  ;;  %v4693_v41 = vpack.c.bf16 %v4633_v61, %v4632_v62 }
 0x2d4   : > { %v12737_v28 = vadd.f32 %v12529_v38, %v8069_v27 }
 0x2d5   : > { %v3907_v33 = vpop.f32.mrf.mxu1  ;;  %v4692_v7 = vpack.c.bf16 %v4631_v22, %v4630_v10 }
 0x2d6   : > { %v4238_v12 = vmul.f32 1.442695, %v12737_v28  ;;  %v12741_v2 = vadd.f32 %v12529_v38, %v3907_v33  ;;  %vm4064_vm12 = vcmp.gt.f32.partialorder %v12737_v28, 0.0 }
 0x2d7   : > { %v8070_v16 = vpop.f32.mrf.mxu1  ;;  %8159 = vmatprep.mubr.msk.bf16.mxu0 %vm3424_vm7, %v4692_v7 }
 0x2d8   : > { %9272 = vpow2.f32 %v4238_v12  ;;  %v4234_v45 = vmul.f32 1.442695, %v12741_v2  ;;  %v12746_v3 = vadd.f32 %v12529_v38, %v8070_v16  ;;  %8160 = vmatmul.mubr.msk.bf16.gmra.mxu0 %vm3424_vm7, %v4693_v41  ;;  %vm4062_vm11 = vcmp.gt.f32.partialorder %v12741_v2, 0.0 }
 0x2d9   : > { %v9265_v63 = vpop.eup %9264  ;;  %v3910_v60 = vpop.f32.mrf.mxu1 }
 0x2da   : > { %9274 = vpow2.f32 %v4234_v45  ;;  %v4240_v39 = vmul.f32 1.442695, %v12746_v3  ;;  %v7449_v24 = vadd.f32 -1.0, %v9265_v63  ;;  %v12751_v53 = vadd.f32 %v12529_v38, %v3910_v60 }
 0x2db   : > { %v9267_v43 = vpop.eup %9266  ;;  %vm4065_vm10 = vcmp.gt.f32.partialorder %v12746_v3, 0.0 }
 0x2dc   : > { %9276 = vpow2.f32 %v4240_v39  ;;  %v7447_v58 = vadd.f32 -1.0, %v9267_v43  ;;  %v4236_v30 = vmul.f32 1.442695, %v12751_v53  ;;  %v4444_v19 = vmul.f32 1.6732632, %v7449_v24 }
 0x2dd   : > { %vm4063_vm13 = vcmp.gt.f32.partialorder %v12751_v53, 0.0 }
 0x2de   : > { %v9269_v18 = vpop.eup %9268  ;;  %v4442_v31 = vmul.f32 1.6732632, %v7447_v58  ;;  %9278 = vpow2.f32 %v4236_v30  ;;  %v4540_v20 = vsel %vm4060_vm5, %v12711_v36, %v4444_v19 }
 0x2df   : > { %v9271_v44 = vpop.eup %9270  ;;  %v7450_v5 = vadd.f32 -1.0, %v9269_v18  ;;  %v4636_v26 = vmul.f32 1.050701, %v4540_v20 }
 0x2e0   : > { %v7448_v50 = vadd.f32 -1.0, %v9271_v44  ;;  %v4538_v15 = vsel %vm4058_vm6, %v12715_v11, %v4442_v31 }
 0x2e1   : > { %v4445_v9 = vmul.f32 1.6732632, %v7450_v5  ;;  %v8073_v46 = vpop.f32.mrf.mxu1  ;;  %v4634_v11 = vmul.f32 1.050701, %v4538_v15 }
 0x2e2   : > { %v4443_v17 = vmul.f32 1.6732632, %v7448_v50  ;;  %v12759_v0 = vadd.f32 %v12529_v38, %v8073_v46 }
 0x2e3   : > { %v4541_v49 = vsel %vm4061_vm8, %v12721_v55, %v4445_v9  ;;  %v3923_v1 = vpop.f32.mrf.mxu1 }
 0x2e4   : > { %v4637_v6 = vmul.f32 1.050701, %v4541_v49  ;;  %v4539_v54 = vsel %vm4059_vm9, %v12725_v42, %v4443_v17  ;;  %v4246_v48 = vmul.f32 1.442695, %v12759_v0  ;;  %v12767_v25 = vadd.f32 %v12529_v38, %v3923_v1 }
 0x2e5   : > { %v9273_v34 = vpop.eup %9272  ;;  %v4635_v47 = vmul.f32 1.050701, %v4539_v54  ;;  %v8074_v32 = vpop.f32.mrf.mxu1  ;;  %vm4068_vm15 = vcmp.gt.f32.partialorder %v12759_v0, 0.0 }
 0x2e6   : > { %9280 = vpow2.f32 %v4246_v48  ;;  %v12770_v36 = vadd.f32 %v12529_v38, %v8074_v32  ;;  %v4242_v23 = vmul.f32 1.442695, %v12767_v25  ;;  %v4695_v55 = vpack.c.bf16 %v4637_v6, %v4636_v26 }
 0x2e7   : > { %v9275_v13 = vpop.eup %9274  ;;  %v3926_v37 = vpop.f32.mrf.mxu1  ;;  %v4694_v4 = vpack.c.bf16 %v4635_v47, %v4634_v11  ;;  %v7453_v35 = vadd.f32 -1.0, %v9273_v34  ;;  %vm4066_vm0 = vcmp.gt.f32.partialorder %v12767_v25, 0.0 }
 0x2e8   : > { %v7451_v8 = vadd.f32 -1.0, %v9275_v13  ;;  %v4248_v21 = vmul.f32 1.442695, %v12770_v36  ;;  %9282 = vpow2.f32 %v4242_v23  ;;  %v12775_v52 = vadd.f32 %v12529_v38, %v3926_v37 }
 0x2e9   : > { %v9277_v42 = vpop.eup %9276  ;;  %v8077_v29 = vpop.f32.mrf.mxu1  ;;  %8163 = vmatprep.mubr.msk.bf16.mxu0 %vm3424_vm7, %v4694_v4  ;;  %v4448_v56 = vmul.f32 1.6732632, %v7453_v35  ;;  %vm4069_vm14 = vcmp.gt.f32.partialorder %v12770_v36, 0.0 }
 0x2ea   : > { %v7454_v59 = vadd.f32 -1.0, %v9277_v42  ;;  %9284 = vpow2.f32 %v4248_v21  ;;  %8164 = vmatmul.mubr.msk.bf16.gmra.mxu0 %vm3424_vm7, %v4695_v55  ;;  %v4446_v51 = vmul.f32 1.6732632, %v7451_v8  ;;  %v4244_v14 = vmul.f32 1.442695, %v12775_v52 }
 0x2eb   : > { %v12781_v57 = vadd.f32 %v12529_v38, %v8077_v29  ;;  %v3939_v40 = vpop.f32.mrf.mxu1  ;;  %v9279_v61 = vpop.eup %9278  ;;  %v4544_v60 = vsel %vm4064_vm12, %v12737_v28, %v4448_v56  ;;  %vm4067_vm1 = vcmp.gt.f32.partialorder %v12775_v52, 0.0 }
 0x2ec   : > { %v4449_v10 = vmul.f32 1.6732632, %v7454_v59  ;;  %v12784_v22 = vadd.f32 %v12529_v38, %v3939_v40  ;;  %v7452_v27 = vadd.f32 -1.0, %v9279_v61  ;;  %9286 = vpow2.f32 %v4244_v14 }
 0x2ed   : > { %v8078_v62 = vpop.f32.mrf.mxu1  ;;  %v4254_v7 = vmul.f32 1.442695, %v12781_v57  ;;  %v4542_v12 = vsel %vm4062_vm11, %v12741_v2, %v4446_v51  ;;  %v4640_v28 = vmul.f32 1.050701, %v4544_v60  ;;  %vm4072_vm2 = vcmp.gt.f32.partialorder %v12781_v57, 0.0 }
 0x2ee   : > { %v4545_v33 = vsel %vm4065_vm10, %v12746_v3, %v4449_v10  ;;  %v4250_v41 = vmul.f32 1.442695, %v12784_v22  ;;  %v4447_v16 = vmul.f32 1.6732632, %v7452_v27  ;;  %v12794_v45 = vadd.f32 %v12529_v38, %v8078_v62 }
 0x2ef   : > { %v3942_v63 = vpop.f32.mrf.mxu1  ;;  %9288 = vpow2.f32 %v4254_v7  ;;  %v4641_v39 = vmul.f32 1.050701, %v4545_v33  ;;  %v4638_v58 = vmul.f32 1.050701, %v4542_v12  ;;  %vm4070_vm3 = vcmp.gt.f32.partialorder %v12784_v22, 0.0 }
 0x2f0   : > { %v12799_v3 = vadd.f32 %v12529_v38, %v3942_v63  ;;  %v4543_v24 = vsel %vm4063_vm13, %v12751_v53, %v4447_v16  ;;  %9290 = vpow2.f32 %v4250_v41  ;;  %v4256_v30 = vmul.f32 1.442695, %v12794_v45 }
 0x2f1   : > { %v8081_v43 = vpop.f32.mrf.mxu1  ;;  %v4639_v2 = vmul.f32 1.050701, %v4543_v24  ;;  %v4697_v50 = vpack.c.bf16 %v4641_v39, %v4640_v28  ;;  %vm4073_vm4 = vcmp.gt.f32.partialorder %v12794_v45, 0.0 }
 0x2f2   : > { %v12804_v18 = vadd.f32 %v12529_v38, %v8081_v43  ;;  %v4252_v19 = vmul.f32 1.442695, %v12799_v3  ;;  %9292 = vpow2.f32 %v4256_v30  ;;  %vm4071_vm5 = vcmp.gt.f32.partialorder %v12799_v3, 0.0 }
 0x2f3   : > { %v9281_v44 = vpop.eup %9280  ;;  %v3955_v31 = vpop.f32.mrf.mxu1  ;;  %v4696_v5 = vpack.c.bf16 %v4639_v2, %v4638_v58 }
 0x2f4   : > { %9294 = vpow2.f32 %v4252_v19  ;;  %v4262_v53 = vmul.f32 1.442695, %v12804_v18  ;;  %v12809_v9 = vadd.f32 %v12529_v38, %v3955_v31  ;;  %v7457_v17 = vadd.f32 -1.0, %v9281_v44 }
 0x2f5   : > { %v8082_v46 = vpop.f32.mrf.mxu1  ;;  %v9283_v15 = vpop.eup %9282  ;;  %8167 = vmatprep.mubr.msk.bf16.mxu0 %vm3424_vm7, %v4696_v5  ;;  %vm4076_vm9 = vcmp.gt.f32.partialorder %v12804_v18, 0.0 }
 0x2f6   : > { %v12813_v20 = vadd.f32 %v12529_v38, %v8082_v46  ;;  %v7455_v1 = vadd.f32 -1.0, %v9283_v15  ;;  %8168 = vmatmul.mubr.msk.bf16.gmra.mxu0 %vm3424_vm7, %v4697_v50  ;;  %9296 = vpow2.f32 %v4262_v53  ;;  %v4258_v6 = vmul.f32 1.442695, %v12809_v9 }
 0x2f7   : > { %v9285_v49 = vpop.eup %9284  ;;  %v3958_v54 = vpop.f32.mrf.mxu1  ;;  %v4452_v13 = vmul.f32 1.6732632, %v7457_v17  ;;  %vm4074_vm6 = vcmp.gt.f32.partialorder %v12809_v9, 0.0 }
 0x2f8   : > { %v7458_v48 = vadd.f32 -1.0, %v9285_v49  ;;  %v4264_v34 = vmul.f32 1.442695, %v12813_v20  ;;  %v4450_v11 = vmul.f32 1.6732632, %v7455_v1  ;;  %9298 = vpow2.f32 %v4258_v6 }
 0x2f9   : > { %v12819_v47 = vadd.f32 %v12529_v38, %v3958_v54  ;;  %v8085_v32 = vpop.f32.mrf.mxu1  ;;  %v9287_v26 = vpop.eup %9286  ;;  %v4548_v61 = vsel %vm4068_vm15, %v12759_v0, %v4452_v13  ;;  %vm4077_vm8 = vcmp.gt.f32.partialorder %v12813_v20, 0.0 }
 0x2fa   : > { %v4453_v23 = vmul.f32 1.6732632, %v7458_v48  ;;  %9300 = vpow2.f32 %v4264_v34  ;;  %v12822_v37 = vadd.f32 %v12529_v38, %v8085_v32  ;;  %v7456_v4 = vadd.f32 -1.0, %v9287_v26 }
 0x2fb   : > { %v4260_v55 = vmul.f32 1.442695, %v12819_v47  ;;  %v3971_v35 = vpop.f32.mrf.mxu1  ;;  %v4546_v29 = vsel %vm4066_vm0, %v12767_v25, %v4450_v11  ;;  %v4644_v16 = vmul.f32 1.050701, %v4548_v61  ;;  %vm4075_vm10 = vcmp.gt.f32.partialorder %v12819_v47, 0.0 }
 0x2fc   : > { %v4549_v8 = vsel %vm4069_vm14, %v12770_v36, %v4453_v23  ;;  %v4270_v21 = vmul.f32 1.442695, %v12822_v37  ;;  %v9289_v42 = vpop.eup %9288  ;;  %v4451_v59 = vmul.f32 1.6732632, %v7456_v4  ;;  %v12832_v51 = vadd.f32 %v12529_v38, %v3971_v35 }
 0x2fd   : > { %9302 = vpow2.f32 %v4260_v55  ;;  %v8086_v14 = vpop.f32.mrf.mxu1  ;;  %v9291_v40 = vpop.eup %9290  ;;  %v7461_v56 = vadd.f32 -1.0, %v9289_v42  ;;  %v4645_v36 = vmul.f32 1.050701, %v4549_v8  ;;  %v4642_v33 = vmul.f32 1.050701, %v4546_v29 }
 0x2fe   : > { %v12837_v10 = vadd.f32 %v12529_v38, %v8086_v14  ;;  %v4547_v27 = vsel %vm4067_vm1, %v12775_v52, %v4451_v59  ;;  %v7459_v62 = vadd.f32 -1.0, %v9291_v40  ;;  %9304 = vpow2.f32 %v4270_v21  ;;  %v12848_v52 = vld [vmem:[%s14081_s8] ss:$0 sm:$0xff] }
 0x2ff   : > { %v3974_v25 = vpop.f32.mrf.mxu1  ;;  %v4643_v7 = vmul.f32 1.050701, %v4547_v27  ;;  %v4266_v41 = vmul.f32 1.442695, %v12832_v51  ;;  %v9293_v12 = vpop.eup %9292  ;;  %v4456_v43 = vmul.f32 1.6732632, %v7461_v56  ;;  %v4699_v2 = vpack.c.bf16 %v4645_v36, %v4644_v16 }
 0x300   : > { %v4454_v63 = vmul.f32 1.6732632, %v7459_v62  ;;  %v4272_v0 = vmul.f32 1.442695, %v12837_v10  ;;  %v12843_v60 = vadd.f32 %v12529_v38, %v3974_v25  ;;  %v7462_v58 = vadd.f32 -1.0, %v9293_v12 }
 0x301   : > { %v9295_v39 = vpop.eup %9294  ;;  %v4698_v24 = vpack.c.bf16 %v4643_v7, %v4642_v33  ;;  %9306 = vpow2.f32 %v4266_v41  ;;  %v4552_v46 = vsel %vm4072_vm2, %v12781_v57, %v4456_v43  ;;  %vm4080_vm11 = vcmp.gt.f32.partialorder %v12822_v37, 0.0 }
 0x302   : > { %v7460_v30 = vadd.f32 -1.0, %v9295_v39  ;;  %9308 = vpow2.f32 %v4272_v0  ;;  %v4457_v38 = vmul.f32 1.6732632, %v7462_v58  ;;  %v8093_v28 = vpop.f32.mrf.mxu0  ;;  %v4550_v19 = vsel %vm4070_vm3, %v12784_v22, %v4454_v63 }
 0x303   : > { %v9297_v44 = vpop.eup %9296  ;;  %8171 = vmatprep.mubr.msk.bf16.mxu0 %vm3424_vm7, %v4698_v24  ;;  %v4268_v5 = vmul.f32 1.442695, %v12843_v60  ;;  %v12858_v50 = vadd.f32 %v8093_v28, %v12848_v52  ;;  %v4646_v48 = vmul.f32 1.050701, %v4550_v19  ;;  %v4648_v26 = vmul.f32 1.050701, %v4552_v46 }
 0x304   : > { %v4455_v31 = vmul.f32 1.6732632, %v7460_v30  ;;  %8172 = vmatmul.mubr.msk.bf16.gmra.mxu0 %vm3424_vm7, %v4699_v2  ;;  %v4553_v15 = vsel %vm4073_vm4, %v12794_v45, %v4457_v38  ;;  %v7465_v17 = vadd.f32 -1.0, %v9297_v44  ;;  %v4907_v49 = vpop.f32.mrf.mxu0  ;;  %vm4081_vm12 = vcmp.gt.f32.partialorder %v12837_v10, 0.0 }
 0x305   : > { %v9299_v53 = vpop.eup %9298  ;;  %v4649_v6 = vmul.f32 1.050701, %v4553_v15  ;;  %9310 = vpow2.f32 %v4268_v5  ;;  %v5390_v45 = vmul.f32 1.442695, %v12858_v50  ;;  %v12867_v35 = vadd.f32 %v12848_v52, %v4907_v49 }
 0x306   : > { %v4551_v22 = vsel %vm4071_vm5, %v12799_v3, %v4455_v31  ;;  %v7463_v54 = vadd.f32 -1.0, %v9299_v53  ;;  %v8094_v32 = vpop.f32.mrf.mxu0  ;;  %v4460_v4 = vmul.f32 1.6732632, %v7465_v17  ;;  %vm4078_vm13 = vcmp.gt.f32.partialorder %v12832_v51, 0.0 }
 0x307   : > { %v9301_v1 = vpop.eup %9300  ;;  %v4647_v34 = vmul.f32 1.050701, %v4551_v22  ;;  %v4701_v8 = vpack.c.bf16 %v4649_v6, %v4648_v26  ;;  %v12871_v42 = vadd.f32 %v8094_v32, %v12848_v52  ;;  %9312 = vpow2.f32 %v5390_v45 }
 0x308   : > { %v7466_v11 = vadd.f32 -1.0, %v9301_v1  ;;  %v4458_v57 = vmul.f32 1.6732632, %v7463_v54  ;;  %v4910_v3 = vpop.f32.mrf.mxu0  ;;  %v5386_v61 = vmul.f32 1.442695, %v12867_v35  ;;  %v4556_v27 = vsel %vm4076_vm9, %v12804_v18, %v4460_v4 }
 0x309   : > { %v4700_v23 = vpack.c.bf16 %v4647_v34, %v4646_v48  ;;  %v12882_v56 = vadd.f32 %v12848_v52, %v4910_v3  ;;  %v4652_v18 = vmul.f32 1.050701, %v4556_v27  ;;  %vm4079_vm14 = vcmp.gt.f32.partialorder %v12843_v60, 0.0 }
 0x30a   : > { %v9303_v13 = vpop.eup %9302  ;;  %v4461_v55 = vmul.f32 1.6732632, %v7466_v11  ;;  %v4554_v29 = vsel %vm4074_vm6, %v12809_v9, %v4458_v57  ;;  %v5392_v9 = vmul.f32 1.442695, %v12871_v42  ;;  %9314 = vpow2.f32 %v5386_v61 }
 0x30b   : > { %v7464_v21 = vadd.f32 -1.0, %v9303_v13  ;;  %8175 = vmatprep.mubr.msk.bf16.mxu0 %vm3424_vm7, %v4700_v23  ;;  %v9305_v14 = vpop.eup %9304  ;;  %v8097_v36 = vpop.f32.mrf.mxu0  ;;  %v4650_v25 = vmul.f32 1.050701, %v4554_v29  ;;  %v5388_v24 = vmul.f32 1.442695, %v12882_v56  ;;  %vm5292_vm15 = vcmp.gt.f32.partialorder %v12858_v50, 0.0 }
 0x30c   : > { %v4557_v59 = vsel %vm4077_vm8, %v12813_v20, %v4461_v55  ;;  %8176 = vmatmul.mubr.msk.bf16.gmra.mxu0 %vm3424_vm7, %v4701_v8  ;;  %v12888_v20 = vadd.f32 %v8097_v36, %v12848_v52  ;;  %v7469_v63 = vadd.f32 -1.0, %v9305_v14  ;;  %9316 = vpow2.f32 %v5392_v9 }
 0x30d   : > { %v4459_v40 = vmul.f32 1.6732632, %v7464_v21  ;;  %v4653_v33 = vmul.f32 1.050701, %v4557_v59  ;;  %v4923_v41 = vpop.f32.mrf.mxu0  ;;  %9318 = vpow2.f32 %v5388_v24  ;;  %vm5290_vm0 = vcmp.gt.f32.partialorder %v12867_v35, 0.0 }
 0x30e   : > { %v9307_v62 = vpop.eup %9306  ;;  %v5398_v2 = vmul.f32 1.442695, %v12888_v20  ;;  %v12894_v30 = vadd.f32 %v12848_v52, %v4923_v41  ;;  %v4464_v19 = vmul.f32 1.6732632, %v7469_v63  ;;  %vm5293_vm1 = vcmp.gt.f32.partialorder %v12871_v42, 0.0 }
 0x30f   : > { %v4555_v7 = vsel %vm4075_vm10, %v12819_v47, %v4459_v40  ;;  %v9309_v12 = vpop.eup %9308  ;;  %v7467_v0 = vadd.f32 -1.0, %v9307_v62  ;;  %v8098_v43 = vpop.f32.mrf.mxu0  ;;  %v4703_v44 = vpack.c.bf16 %v4653_v33, %v4652_v18  ;;  %vm5291_vm2 = vcmp.gt.f32.partialorder %v12882_v56, 0.0 }
 0x310   : > { %v4651_v16 = vmul.f32 1.050701, %v4555_v7  ;;  %v7470_v39 = vadd.f32 -1.0, %v9309_v12  ;;  %v12897_v38 = vadd.f32 %v8098_v43, %v12848_v52  ;;  %9320 = vpow2.f32 %v5398_v2 }
 0x311   : > { %v4926_v28 = vpop.f32.mrf.mxu0  ;;  %v4462_v31 = vmul.f32 1.6732632, %v7467_v0  ;;  %v5394_v5 = vmul.f32 1.442695, %v12894_v30  ;;  %v4560_v54 = vsel %vm4080_vm11, %v12822_v37, %v4464_v19  ;;  %vm5296_vm3 = vcmp.gt.f32.partialorder %v12888_v20, 0.0 }
 0x312   : > { %v4702_v58 = vpack.c.bf16 %v4651_v16, %v4650_v25  ;;  %v4465_v47 = vmul.f32 1.6732632, %v7470_v39  ;;  %v9311_v53 = vpop.eup %9310  ;;  %v5400_v46 = vmul.f32 1.442695, %v12897_v38  ;;  %v12906_v49 = vadd.f32 %v12848_v52, %v4926_v28 }
 0x313   : > { %v8101_v15 = vpop.f32.mrf.mxu0  ;;  %v7468_v17 = vadd.f32 -1.0, %v9311_v53  ;;  %9322 = vpow2.f32 %v5394_v5  ;;  %v4558_v48 = vsel %vm4078_vm13, %v12832_v51, %v4462_v31  ;;  %v4656_v51 = vmul.f32 1.050701, %v4560_v54 }
 0x314   : > { %8179 = vmatprep.mubr.msk.bf16.mxu0 %vm3424_vm7, %v4702_v58  ;;  %v4561_v1 = vsel %vm4081_vm12, %v12837_v10, %v4465_v47  ;;  %9324 = vpow2.f32 %v5400_v46  ;;  %v12911_v6 = vadd.f32 %v8101_v15, %v12848_v52  ;;  %v5396_v11 = vmul.f32 1.442695, %v12906_v49  ;;  %v9313_v32 = vpop.eup %9312 }
 0x315   : > { %8180 = vmatmul.mubr.msk.bf16.gmra.mxu0 %vm3424_vm7, %v4703_v44  ;;  %v4939_v22 = vpop.f32.mrf.mxu0  ;;  %v4463_v34 = vmul.f32 1.6732632, %v7468_v17  ;;  %v4657_v45 = vmul.f32 1.050701, %v4561_v1  ;;  %v4654_v23 = vmul.f32 1.050701, %v4558_v48 }
 0x316   : > { %v5406_v26 = vmul.f32 1.442695, %v12911_v6  ;;  %v12919_v57 = vadd.f32 %v12848_v52, %v4939_v22  ;;  %9326 = vpow2.f32 %v5396_v11  ;;  %v7524_v8 = vadd.f32 -1.0, %v9313_v32 }
 0x317   : > { %v8102_v10 = vpop.f32.mrf.mxu0  ;;  %v4559_v13 = vsel %vm4079_vm14, %v12843_v60, %v4463_v34  ;;  %v9315_v3 = vpop.eup %9314  ;;  %v4705_v61 = vpack.c.bf16 %v4657_v45, %v4656_v51  ;;  %vm5294_vm4 = vcmp.gt.f32.partialorder %v12894_v30, 0.0  ;;  %vm5297_vm5 = vcmp.gt.f32.partialorder %v12897_v38, 0.0 }
 0x318   : > { %v12923_v37 = vadd.f32 %v8102_v10, %v12848_v52  ;;  %v4655_v4 = vmul.f32 1.050701, %v4559_v13  ;;  %9328 = vpow2.f32 %v5406_v26  ;;  %v5402_v21 = vmul.f32 1.442695, %v12919_v57 }
 0x319   : > { %v4942_v55 = vpop.f32.mrf.mxu0  ;;  %v9317_v14 = vpop.eup %9316  ;;  %v7522_v40 = vadd.f32 -1.0, %v9315_v3  ;;  %v5676_v7 = vmul.f32 1.6732632, %v7524_v8  ;;  %vm5295_vm6 = vcmp.gt.f32.partialorder %v12906_v49, 0.0  ;;  %vm5300_vm8 = vcmp.gt.f32.partialorder %v12911_v6, 0.0 }
 0x31a   : > { %v5408_v29 = vmul.f32 1.442695, %v12923_v37  ;;  %v12928_v59 = vadd.f32 %v12848_v52, %v4942_v55  ;;  %v4704_v60 = vpack.c.bf16 %v4655_v4, %v4654_v23  ;;  %v7525_v36 = vadd.f32 -1.0, %v9317_v14  ;;  %v9319_v33 = vpop.eup %9318 }
 0x31b   : > { %9330 = vpow2.f32 %v5402_v21  ;;  %v8105_v27 = vpop.f32.mrf.mxu0  ;;  %v5674_v9 = vmul.f32 1.6732632, %v7522_v40  ;;  %v7523_v0 = vadd.f32 -1.0, %v9319_v33  ;;  %vm5298_vm9 = vcmp.gt.f32.partialorder %v12919_v57, 0.0 }
 0x31c   : > { %8183 = vmatprep.mubr.msk.bf16.mxu0 %vm3424_vm7, %v4704_v60  ;;  %9332 = vpow2.f32 %v5408_v29  ;;  %v5404_v62 = vmul.f32 1.442695, %v12928_v59  ;;  %v12934_v25 = vadd.f32 %v8105_v27, %v12848_v52  ;;  %v5677_v41 = vmul.f32 1.6732632, %v7525_v36 }
 0x31d   : > { %8184 = vmatmul.mubr.msk.bf16.gmra.mxu0 %vm3424_vm7, %v4705_v61  ;;  %v4955_v12 = vpop.f32.mrf.mxu0  ;;  %v9321_v16 = vpop.eup %9320  ;;  %v5770_v63 = vsel %vm5290_vm0, %v12867_v35, %v5674_v9  ;;  %v5675_v58 = vmul.f32 1.6732632, %v7523_v0  ;;  %vm5301_vm10 = vcmp.gt.f32.partialorder %v12923_v37, 0.0  ;;  %vm5299_vm11 = vcmp.gt.f32.partialorder %v12928_v59, 0.0 }
 0x31e   : > { %9334 = vpow2.f32 %v5404_v62  ;;  %v5773_v18 = vsel %vm5293_vm1, %v12871_v42, %v5677_v41  ;;  %v5414_v39 = vmul.f32 1.442695, %v12934_v25  ;;  %v7528_v2 = vadd.f32 -1.0, %v9321_v16 }
 0x31f   : > { %v8106_v24 = vpop.f32.mrf.mxu0  ;;  %v12947_v35 = vadd.f32 %v12848_v52, %v4955_v12  ;;  %v5772_v42 = vsel %vm5292_vm15, %v12858_v50, %v5676_v7  ;;  %v5866_v47 = vmul.f32 1.050701, %v5770_v63  ;;  %v5869_v31 = vmul.f32 1.050701, %v5773_v18 }
 0x320   : > { %v9323_v43 = vpop.eup %9322  ;;  %9336 = vpow2.f32 %v5414_v39  ;;  %v5771_v5 = vsel %vm5291_vm2, %v12882_v56, %v5675_v58  ;;  %v12956_v46 = vadd.f32 %v8106_v24, %v12848_v52  ;;  %v5868_v50 = vmul.f32 1.050701, %v5772_v42 }
 0x321   : > { %v9325_v44 = vpop.eup %9324  ;;  %v7526_v28 = vadd.f32 -1.0, %v9323_v43  ;;  %v4958_v19 = vpop.f32.mrf.mxu0  ;;  %v5867_v15 = vmul.f32 1.050701, %v5771_v5  ;;  %v5410_v1 = vmul.f32 1.442695, %v12947_v35  ;;  %vm5304_vm12 = vcmp.gt.f32.partialorder %v12934_v25, 0.0 }
 0x322   : > { %v7529_v53 = vadd.f32 -1.0, %v9325_v44  ;;  %v5680_v48 = vmul.f32 1.6732632, %v7528_v2  ;;  %v12960_v11 = vadd.f32 %v12848_v52, %v4958_v19  ;;  %v5963_v45 = vpack.c.bf16 %v5869_v31, %v5868_v50 }
 0x323   : > { %v5678_v17 = vmul.f32 1.6732632, %v7526_v28  ;;  %v8109_v22 = vpop.f32.mrf.mxu0  ;;  %v9327_v54 = vpop.eup %9326  ;;  %v5962_v26 = vpack.c.bf16 %v5867_v15, %v5866_v47  ;;  %9338 = vpow2.f32 %v5410_v1  ;;  %v5416_v51 = vmul.f32 1.442695, %v12956_v46 }
 0x324   : > { %v5681_v34 = vmul.f32 1.6732632, %v7529_v53  ;;  %v7527_v56 = vadd.f32 -1.0, %v9327_v54  ;;  %v12973_v3 = vadd.f32 %v8109_v22, %v12848_v52  ;;  %v5412_v29 = vmul.f32 1.442695, %v12960_v11 }
 0x325   : > { %v9329_v32 = vpop.eup %9328  ;;  %v4971_v10 = vpop.f32.mrf.mxu0  ;;  %v5774_v13 = vsel %vm5294_vm4, %v12894_v30, %v5678_v17  ;;  %8191 = vmatprep.mubr.msk.bf16.mxu1 %vm3424_vm7, %v5962_v26  ;;  %v5776_v30 = vsel %vm5296_vm3, %v12888_v20, %v5680_v48  ;;  %9340 = vpow2.f32 %v5416_v51  ;;  %vm5302_vm13 = vcmp.gt.f32.partialorder %v12947_v35, 0.0 }
 0x326   : > { %v5777_v23 = vsel %vm5297_vm5, %v12897_v38, %v5681_v34  ;;  %v5679_v4 = vmul.f32 1.6732632, %v7527_v56  ;;  %v7532_v55 = vadd.f32 -1.0, %v9329_v32  ;;  %8192 = vmatmul.mubr.msk.bf16.vlgmr.msra.gmra.mxu1 %vm3424_vm7, %v5963_v45  ;;  %v5870_v14 = vmul.f32 1.050701, %v5774_v13 }
 0x327   : > { %v8110_v8 = vpop.f32.mrf.mxu0  ;;  %v12986_v61 = vadd.f32 %v12848_v52, %v4971_v10  ;;  %v5873_v27 = vmul.f32 1.050701, %v5777_v23  ;;  %9342 = vpow2.f32 %v5412_v29  ;;  %v5422_v41 = vmul.f32 1.442695, %v12973_v3 }
 0x328   : > { %v9331_v21 = vpop.eup %9330  ;;  %v5775_v60 = vsel %vm5295_vm6, %v12906_v49, %v5679_v4  ;;  %v5684_v33 = vmul.f32 1.6732632, %v7532_v55  ;;  %v12990_v12 = vadd.f32 %v8110_v8, %v12848_v52  ;;  %v5872_v16 = vmul.f32 1.050701, %v5776_v30 }
 0x329   : > { %v9333_v38 = vpop.eup %9332  ;;  %v7530_v40 = vadd.f32 -1.0, %v9331_v21  ;;  %v4974_v36 = vpop.f32.mrf.mxu0  ;;  %v5871_v20 = vmul.f32 1.050701, %v5775_v60  ;;  %9344 = vpow2.f32 %v5422_v41  ;;  %v5418_v39 = vmul.f32 1.442695, %v12986_v61 }
 0x32a   : > { %v7533_v9 = vadd.f32 -1.0, %v9333_v38  ;;  %v5965_v58 = vpack.c.bf16 %v5873_v27, %v5872_v16  ;;  %v5424_v42 = vmul.f32 1.442695, %v12990_v12  ;;  %v13006_v28 = vadd.f32 %v12848_v52, %v4974_v36 }
 0x32b   : > { %v9335_v62 = vpop.eup %9334  ;;  %v5682_v7 = vmul.f32 1.6732632, %v7530_v40  ;;  %v5964_v63 = vpack.c.bf16 %v5871_v20, %v5870_v14  ;;  %9346 = vpow2.f32 %v5418_v39  ;;  %vm5305_vm14 = vcmp.gt.f32.partialorder %v12956_v46, 0.0 }
 0x32c   : > { %v5685_v49 = vmul.f32 1.6732632, %v7533_v9  ;;  %v7531_v0 = vadd.f32 -1.0, %v9335_v62  ;;  %v8113_v24 = vpop.f32.mrf.mxu0  ;;  %9348 = vpow2.f32 %v5424_v42  ;;  %v5420_v22 = vmul.f32 1.442695, %v13006_v28 }
 0x32d   : > { %v5778_v18 = vsel %vm5298_vm9, %v12919_v57, %v5682_v7  ;;  %v9337_v43 = vpop.eup %9336  ;;  %8195 = vmatprep.mubr.msk.bf16.mxu1 %vm3424_vm7, %v5964_v63  ;;  %v5780_v57 = vsel %vm5300_vm8, %v12911_v6, %v5684_v33  ;;  %vm5303_vm15 = vcmp.gt.f32.partialorder %v12960_v11, 0.0  ;;  %vm5308_vm0 = vcmp.gt.f32.partialorder %v12973_v3, 0.0 }
 0x32e   : > { %v5781_v2 = vsel %vm5301_vm10, %v12923_v37, %v5685_v49  ;;  %v5683_v44 = vmul.f32 1.6732632, %v7531_v0  ;;  %v5874_v47 = vmul.f32 1.050701, %v5778_v18  ;;  %v4987_v19 = vpop.f32.mrf.mxu0  ;;  %v13010_v37 = vadd.f32 %v8113_v24, %v12848_v52  ;;  %8196 = vmatmul.mubr.msk.bf16.gmra.mxu1 %vm3424_vm7, %v5965_v58 }
 0x32f   : > { %v13013_v5 = vadd.f32 %v12848_v52, %v4987_v19  ;;  %v5877_v53 = vmul.f32 1.050701, %v5781_v2  ;;  %v7536_v6 = vadd.f32 -1.0, %v9337_v43  ;;  %v5876_v50 = vmul.f32 1.050701, %v5780_v57 }
 0x330   : > { %v5779_v31 = vsel %vm5299_vm11, %v12928_v59, %v5683_v44  ;;  %v8114_v17 = vpop.f32.mrf.mxu0  ;;  %v9339_v1 = vpop.eup %9338  ;;  %v5430_v54 = vmul.f32 1.442695, %v13010_v37  ;;  %9350 = vpow2.f32 %v5420_v22  ;;  %vm5306_vm1 = vcmp.gt.f32.partialorder %v12986_v61, 0.0 }
 0x331   : > { %v5875_v15 = vmul.f32 1.050701, %v5779_v31  ;;  %v7534_v48 = vadd.f32 -1.0, %v9339_v1  ;;  %v5426_v34 = vmul.f32 1.442695, %v13013_v5  ;;  %v13020_v26 = vadd.f32 %v8114_v17, %v12848_v52 }
 0x332   : > { %v4990_v32 = vpop.f32.mrf.mxu0  ;;  %v9341_v10 = vpop.eup %9340  ;;  %v5967_v45 = vpack.c.bf16 %v5877_v53, %v5876_v50  ;;  %v5688_v13 = vmul.f32 1.6732632, %v7536_v6  ;;  %9352 = vpow2.f32 %v5430_v54  ;;  %vm5309_vm2 = vcmp.gt.f32.partialorder %v12990_v12, 0.0 }
 0x333   : > { %v5966_v59 = vpack.c.bf16 %v5875_v15, %v5874_v47  ;;  %v13023_v56 = vadd.f32 %v12848_v52, %v4990_v32  ;;  %v5686_v51 = vmul.f32 1.6732632, %v7534_v48  ;;  %v7537_v23 = vadd.f32 -1.0, %v9341_v10 }
 0x334   : > { %9354 = vpow2.f32 %v5426_v34  ;;  %v5432_v4 = vmul.f32 1.442695, %v13020_v26  ;;  %v9343_v55 = vpop.eup %9342  ;;  %v5784_v38 = vsel %vm5304_vm12, %v12934_v25, %v5688_v13  ;;  %vm5307_vm3 = vcmp.gt.f32.partialorder %v13006_v28, 0.0 }
 0x335   : > { %8199 = vmatprep.mubr.msk.bf16.mxu1 %vm3424_vm7, %v5966_v59  ;;  %v5428_v8 = vmul.f32 1.442695, %v13023_v56  ;;  %v5689_v21 = vmul.f32 1.6732632, %v7537_v23  ;;  %v7535_v30 = vadd.f32 -1.0, %v9343_v55  ;;  %v5782_v40 = vsel %vm5302_vm13, %v12947_v35, %v5686_v51 }
 0x336   : > { %9356 = vpow2.f32 %v5432_v4  ;;  %8200 = vmatmul.mubr.msk.bf16.gmra.mxu1 %vm3424_vm7, %v5967_v45  ;;  %v9345_v60 = vpop.eup %9344  ;;  %v5880_v7 = vmul.f32 1.050701, %v5784_v38  ;;  %v5878_v35 = vmul.f32 1.050701, %v5782_v40  ;;  %vm5310_vm4 = vcmp.gt.f32.partialorder %v13013_v5, 0.0 }
 0x337   : > { %9358 = vpow2.f32 %v5428_v8  ;;  %v5785_v36 = vsel %vm5305_vm14, %v12956_v46, %v5689_v21  ;;  %v5687_v27 = vmul.f32 1.6732632, %v7535_v30  ;;  %v7540_v62 = vadd.f32 -1.0, %v9345_v60 }
 0x338   : > { %v8117_v29 = vpop.f32.mrf.mxu0  ;;  %v5881_v9 = vmul.f32 1.050701, %v5785_v36  ;;  %v9347_v25 = vpop.eup %9346  ;;  %vm5313_vm5 = vcmp.gt.f32.partialorder %v13020_v26, 0.0  ;;  %vm5311_vm6 = vcmp.gt.f32.partialorder %v13023_v56, 0.0  ;;  %vm5312_vm8 = vcmp.gt.f32.partialorder %v13010_v37, 0.0 }
 0x339   : > { %v13034_v14 = vadd.f32 %v8117_v29, %v12848_v52  ;;  %v5783_v41 = vsel %vm5303_vm15, %v12960_v11, %v5687_v27  ;;  %v9349_v49 = vpop.eup %9348  ;;  %v7538_v46 = vadd.f32 -1.0, %v9347_v25  ;;  %v5692_v18 = vmul.f32 1.6732632, %v7540_v62 }
 0x33a   : > { %v5003_v20 = vpop.f32.mrf.mxu0  ;;  %v5879_v0 = vmul.f32 1.050701, %v5783_v41  ;;  %v7541_v39 = vadd.f32 -1.0, %v9349_v49  ;;  %v5969_v58 = vpack.c.bf16 %v5881_v9, %v5880_v7 }
 0x33b   : > { %v5438_v33 = vmul.f32 1.442695, %v13034_v14  ;;  %v13042_v16 = vadd.f32 %v12848_v52, %v5003_v20  ;;  %v5690_v44 = vmul.f32 1.6732632, %v7538_v46  ;;  %v5788_v6 = vsel %vm5308_vm0, %v12973_v3, %v5692_v18 }
 0x33c   : > { %v8118_v63 = vpop.f32.mrf.mxu0  ;;  %v5968_v2 = vpack.c.bf16 %v5879_v0, %v5878_v35  ;;  %v5693_v42 = vmul.f32 1.6732632, %v7541_v39  ;;  %v5884_v45 = vmul.f32 1.050701, %v5788_v6  ;;  %vm5316_vm9 = vcmp.gt.f32.partialorder %v13034_v14, 0.0 }
 0x33d   : > { %9360 = vpow2.f32 %v5438_v33  ;;  %v5434_v24 = vmul.f32 1.442695, %v13042_v16  ;;  %v13048_v11 = vadd.f32 %v8118_v63, %v12848_v52  ;;  %v9351_v19 = vpop.eup %9350  ;;  %v5786_v48 = vsel %vm5306_vm1, %v12986_v61, %v5690_v44 }
 0x33e   : > { %v5006_v43 = vpop.f32.mrf.mxu0  ;;  %8203 = vmatprep.mubr.msk.bf16.mxu1 %vm3424_vm7, %v5968_v2  ;;  %v5789_v17 = vsel %vm5309_vm2, %v12990_v12, %v5693_v42  ;;  %v7539_v1 = vadd.f32 -1.0, %v9351_v19  ;;  %v5882_v21 = vmul.f32 1.050701, %v5786_v48  ;;  %vm5314_vm10 = vcmp.gt.f32.partialorder %v13042_v16, 0.0 }
 0x33f   : > { %9362 = vpow2.f32 %v5434_v24  ;;  %v13051_v57 = vadd.f32 %v12848_v52, %v5006_v43  ;;  %v5440_v31 = vmul.f32 1.442695, %v13048_v11  ;;  %v9353_v15 = vpop.eup %9352  ;;  %8204 = vmatmul.mubr.msk.bf16.gmra.mxu1 %vm3424_vm7, %v5969_v58  ;;  %v5885_v50 = vmul.f32 1.050701, %v5789_v17 }
 0x340   : > { %v8121_v47 = vpop.f32.mrf.mxu0  ;;  %v5691_v3 = vmul.f32 1.6732632, %v7539_v1  ;;  %v7544_v13 = vadd.f32 -1.0, %v9353_v15  ;;  %vm5317_vm11 = vcmp.gt.f32.partialorder %v13048_v11, 0.0 }
 0x341   : > { %v13057_v53 = vadd.f32 %v8121_v47, %v12848_v52  ;;  %v9355_v54 = vpop.eup %9354  ;;  %9364 = vpow2.f32 %v5440_v31  ;;  %v5436_v59 = vmul.f32 1.442695, %v13051_v57  ;;  %v5971_v38 = vpack.c.bf16 %v5885_v50, %v5884_v45 }
 0x342   : > { %v5019_v22 = vpop.f32.mrf.mxu0  ;;  %v7542_v34 = vadd.f32 -1.0, %v9355_v54  ;;  %v5787_v4 = vsel %vm5307_vm3, %v13006_v28, %v5691_v3  ;;  %v5696_v28 = vmul.f32 1.6732632, %v7544_v13  ;;  %vm5315_vm12 = vcmp.gt.f32.partialorder %v13051_v57, 0.0 }
 0x343   : > { %v5446_v12 = vmul.f32 1.442695, %v13057_v53  ;;  %v9357_v10 = vpop.eup %9356  ;;  %9366 = vpow2.f32 %v5436_v59  ;;  %v13073_v51 = vadd.f32 %v12848_v52, %v5019_v22  ;;  %v5883_v30 = vmul.f32 1.050701, %v5787_v4 }
 0x344   : > { %v8122_v32 = vpop.f32.mrf.mxu0  ;;  %v9359_v23 = vpop.eup %9358  ;;  %v5694_v55 = vmul.f32 1.6732632, %v7542_v34  ;;  %v7545_v8 = vadd.f32 -1.0, %v9357_v10  ;;  %v5792_v24 = vsel %vm5312_vm8, %v13010_v37, %v5696_v28  ;;  %vm5320_vm13 = vcmp.gt.f32.partialorder %v13057_v53, 0.0 }
 0x345   : > { %9368 = vpow2.f32 %v5446_v12  ;;  %v7543_v29 = vadd.f32 -1.0, %v9359_v23  ;;  %v5442_v36 = vmul.f32 1.442695, %v13073_v51  ;;  %v5970_v20 = vpack.c.bf16 %v5883_v30, %v5882_v21 }
 0x346   : > { %v5022_v61 = vpop.f32.mrf.mxu0  ;;  %v5790_v60 = vsel %vm5310_vm4, %v13013_v5, %v5694_v55  ;;  %v5697_v40 = vmul.f32 1.6732632, %v7545_v8  ;;  %v13084_v62 = vadd.f32 %v8122_v32, %v12848_v52  ;;  %v5888_v15 = vmul.f32 1.050701, %v5792_v24 }
 0x347   : > { %v5695_v9 = vmul.f32 1.6732632, %v7543_v29  ;;  %9370 = vpow2.f32 %v5442_v36  ;;  %v13090_v25 = vadd.f32 %v12848_v52, %v5022_v61  ;;  %v5886_v63 = vmul.f32 1.050701, %v5790_v60  ;;  %8207 = vmatprep.mubr.msk.bf16.mxu1 %vm3424_vm7, %v5970_v20 }
 0x348   : > { %v8125_v27 = vpop.f32.mrf.mxu0  ;;  %v5793_v33 = vsel %vm5313_vm5, %v13020_v26, %v5697_v40  ;;  %v5448_v35 = vmul.f32 1.442695, %v13084_v62  ;;  %8208 = vmatmul.mubr.msk.bf16.gmra.mxu1 %vm3424_vm7, %v5971_v38  ;;  %vm5318_vm14 = vcmp.gt.f32.partialorder %v13073_v51, 0.0  ;;  %vm5321_vm15 = vcmp.gt.f32.partialorder %v13084_v62, 0.0 }
 0x349   : > { %v13093_v5 = vadd.f32 %v8125_v27, %v12848_v52  ;;  %v5791_v49 = vsel %vm5311_vm6, %v13023_v56, %v5695_v9  ;;  %v5444_v46 = vmul.f32 1.442695, %v13090_v25  ;;  %v5889_v43 = vmul.f32 1.050701, %v5793_v33 }
 0x34a   : > { %v5035_v7 = vpop.f32.mrf.mxu0  ;;  %v9361_v41 = vpop.eup %9360  ;;  %v5887_v26 = vmul.f32 1.050701, %v5791_v49  ;;  %9372 = vpow2.f32 %v5448_v35  ;;  %vm5319_vm0 = vcmp.gt.f32.partialorder %v13090_v25, 0.0 }
 0x34b   : > { %v7548_v0 = vadd.f32 -1.0, %v9361_v41  ;;  %v5454_v56 = vmul.f32 1.442695, %v13093_v5  ;;  %9374 = vpow2.f32 %v5444_v46  ;;  %v13106_v47 = vadd.f32 %v12848_v52, %v5035_v7 }
 0x34c   : > { %v8126_v18 = vpop.f32.mrf.mxu0  ;;  %v9363_v39 = vpop.eup %9362  ;;  %v5972_v58 = vpack.c.bf16 %v5887_v26, %v5886_v63  ;;  %v5973_v50 = vpack.c.bf16 %v5889_v43, %v5888_v15  ;;  %vm5324_vm1 = vcmp.gt.f32.partialorder %v13093_v5, 0.0 }
 0x34d   : > { %v5700_v2 = vmul.f32 1.6732632, %v7548_v0  ;;  %v7546_v44 = vadd.f32 -1.0, %v9363_v39  ;;  %9376 = vpow2.f32 %v5454_v56  ;;  %v13109_v19 = vadd.f32 %v8126_v18, %v12848_v52 }
 0x34e   : > { %v5038_v42 = vpop.f32.mrf.mxu0  ;;  %v9365_v31 = vpop.eup %9364  ;;  %8211 = vmatprep.mubr.msk.bf16.mxu1 %vm3424_vm7, %v5972_v58  ;;  %v5450_v22 = vmul.f32 1.442695, %v13106_v47  ;;  %vm5322_vm2 = vcmp.gt.f32.partialorder %v13106_v47, 0.0 }
 0x34f   : > { %v5698_v6 = vmul.f32 1.6732632, %v7546_v44  ;;  %v13112_v37 = vadd.f32 %v12848_v52, %v5038_v42  ;;  %v7549_v1 = vadd.f32 -1.0, %v9365_v31  ;;  %v5796_v59 = vsel %vm5316_vm9, %v13034_v14, %v5700_v2 }
 0x350   : > { %v8129_v17 = vpop.f32.mrf.mxu0  ;;  %v9367_v54 = vpop.eup %9366  ;;  %v5456_v48 = vmul.f32 1.442695, %v13109_v19  ;;  %9378 = vpow2.f32 %v5450_v22  ;;  %8212 = vmatmul.mubr.msk.bf16.gmra.mxu1 %vm3424_vm7, %v5973_v50  ;;  %v5892_v61 = vmul.f32 1.050701, %v5796_v59  ;;  %vm5325_vm3 = vcmp.gt.f32.partialorder %v13109_v19, 0.0 }
 0x351   : > { %v5794_v12 = vsel %vm5314_vm10, %v13042_v16, %v5698_v6  ;;  %v5701_v32 = vmul.f32 1.6732632, %v7549_v1  ;;  %v7547_v10 = vadd.f32 -1.0, %v9367_v54  ;;  %v5452_v13 = vmul.f32 1.442695, %v13112_v37 }
 0x352   : > { %v5051_v3 = vpop.f32.mrf.mxu0  ;;  %v9369_v34 = vpop.eup %9368  ;;  %9380 = vpow2.f32 %v5456_v48  ;;  %v13124_v23 = vadd.f32 %v8129_v17, %v12848_v52  ;;  %v5890_v38 = vmul.f32 1.050701, %v5794_v12  ;;  %vm5323_vm4 = vcmp.gt.f32.partialorder %v13112_v37, 0.0 }
 0x353   : > { %v7552_v45 = vadd.f32 -1.0, %v9369_v34  ;;  %v5797_v4 = vsel %vm5317_vm11, %v13048_v11, %v5701_v32  ;;  %v5699_v55 = vmul.f32 1.6732632, %v7547_v10  ;;  %v13129_v8 = vadd.f32 %v12848_v52, %v5051_v3 }
 0x354   : > { %v8130_v14 = vpop.f32.mrf.mxu0  ;;  %v5893_v21 = vmul.f32 1.050701, %v5797_v4  ;;  %9382 = vpow2.f32 %v5452_v13  ;;  %v9371_v29 = vpop.eup %9370  ;;  %v5462_v40 = vmul.f32 1.442695, %v13124_v23  ;;  %vm5328_vm5 = vcmp.gt.f32.partialorder %v13124_v23, 0.0 }
 0x355   : > { %v13132_v16 = vadd.f32 %v8130_v14, %v12848_v52  ;;  %v5795_v60 = vsel %vm5315_vm12, %v13051_v57, %v5699_v55  ;;  %v5458_v11 = vmul.f32 1.442695, %v13129_v8  ;;  %v5704_v27 = vmul.f32 1.6732632, %v7552_v45 }
 0x356   : > { %v5054_v30 = vpop.f32.mrf.mxu0  ;;  %v5891_v36 = vmul.f32 1.050701, %v5795_v60  ;;  %v7550_v20 = vadd.f32 -1.0, %v9371_v29  ;;  %v5975_v9 = vpack.c.bf16 %v5893_v21, %v5892_v61  ;;  %9384 = vpow2.f32 %v5462_v40 }
 0x357   : > { %v5464_v33 = vmul.f32 1.442695, %v13132_v16  ;;  %v9373_v7 = vpop.eup %9372  ;;  %9386 = vpow2.f32 %v5458_v11  ;;  %v13141_v57 = vadd.f32 %v12848_v52, %v5054_v30  ;;  %v5800_v39 = vsel %vm5320_vm13, %v13057_v53, %v5704_v27 }
 0x358   : > { %v8133_v28 = vpop.f32.mrf.mxu0  ;;  %v5974_v41 = vpack.c.bf16 %v5891_v36, %v5890_v38  ;;  %v5702_v63 = vmul.f32 1.6732632, %v7550_v20  ;;  %v9375_v35 = vpop.eup %9374  ;;  %v7553_v26 = vadd.f32 -1.0, %v9373_v7  ;;  %v5896_v15 = vmul.f32 1.050701, %v5800_v39 }
 0x359   : > { %9388 = vpow2.f32 %v5464_v33  ;;  %v13144_v0 = vadd.f32 %v8133_v28, %v12848_v52  ;;  %v7551_v24 = vadd.f32 -1.0, %v9375_v35  ;;  %v5460_v43 = vmul.f32 1.442695, %v13141_v57 }
 0x35a   : > { %v5067_v49 = vpop.f32.mrf.mxu0  ;;  %v9377_v18 = vpop.eup %9376  ;;  %8215 = vmatprep.mubr.msk.bf16.mxu1 %vm3424_vm7, %v5974_v41  ;;  %v5798_v58 = vsel %vm5318_vm14, %v13073_v51, %v5702_v63  ;;  %v5705_v2 = vmul.f32 1.6732632, %v7553_v26  ;;  %vm5326_vm6 = vcmp.gt.f32.partialorder %v13129_v8, 0.0  ;;  %vm5329_vm8 = vcmp.gt.f32.partialorder %v13132_v16, 0.0 }
 0x35b   : > { %v13147_v46 = vadd.f32 %v12848_v52, %v5067_v49  ;;  %8216 = vmatmul.mubr.msk.bf16.gmra.mxu1 %vm3424_vm7, %v5975_v9  ;;  %v5703_v44 = vmul.f32 1.6732632, %v7551_v24  ;;  %v7556_v53 = vadd.f32 -1.0, %v9377_v18  ;;  %9390 = vpow2.f32 %v5460_v43 }
 0x35c   : > { %v8134_v56 = vpop.f32.mrf.mxu0  ;;  %v5470_v42 = vmul.f32 1.442695, %v13144_v0  ;;  %v5801_v6 = vsel %vm5321_vm15, %v13084_v62, %v5705_v2  ;;  %v5894_v3 = vmul.f32 1.050701, %v5798_v58  ;;  %vm5327_vm9 = vcmp.gt.f32.partialorder %v13141_v57, 0.0 }
 0x35d   : > { %v5466_v51 = vmul.f32 1.442695, %v13147_v46  ;;  %v13162_v17 = vadd.f32 %v8134_v56, %v12848_v52  ;;  %v9379_v1 = vpop.eup %9378  ;;  %v5897_v22 = vmul.f32 1.050701, %v5801_v6  ;;  %v5799_v54 = vsel %vm5319_vm0, %v13090_v25, %v5703_v44 }
 0x35e   : > { %v5070_v31 = vpop.f32.mrf.mxu0  ;;  %9392 = vpow2.f32 %v5470_v42  ;;  %v5895_v34 = vmul.f32 1.050701, %v5799_v54  ;;  %v7554_v12 = vadd.f32 -1.0, %v9379_v1  ;;  %v5708_v62 = vmul.f32 1.6732632, %v7556_v53 }
 0x35f   : > { %v13166_v50 = vadd.f32 %v12848_v52, %v5070_v31  ;;  %v9381_v48 = vpop.eup %9380  ;;  %9394 = vpow2.f32 %v5466_v51  ;;  %v5977_v13 = vpack.c.bf16 %v5897_v22, %v5896_v15  ;;  %v5472_v4 = vmul.f32 1.442695, %v13162_v17  ;;  %v13207_v51 = vld [vmem:[%s14081_s8] ss:$0 sm:$0xff] }
 0x360   : > { %v8137_v59 = vpop.f32.mrf.mxu0  ;;  %v7557_v32 = vadd.f32 -1.0, %v9381_v48  ;;  %v5976_v25 = vpack.c.bf16 %v5895_v34, %v5894_v3  ;;  %v5706_v14 = vmul.f32 1.6732632, %v7554_v12  ;;  %v5804_v28 = vsel %vm5324_vm1, %v13093_v5, %v5708_v62 }
 0x361   : > { %v9383_v45 = vpop.eup %9382  ;;  %v5468_v21 = vmul.f32 1.442695, %v13166_v50  ;;  %v13173_v30 = vadd.f32 %v8137_v59, %v12848_v52  ;;  %9396 = vpow2.f32 %v5472_v4  ;;  %v5900_v5 = vmul.f32 1.050701, %v5804_v28 }
 0x362   : > { %v5083_v10 = vpop.f32.mrf.mxu0  ;;  %v5709_v55 = vmul.f32 1.6732632, %v7557_v32  ;;  %v7555_v61 = vadd.f32 -1.0, %v9383_v45  ;;  %v5802_v38 = vsel %vm5322_vm2, %v13106_v47, %v5706_v14  ;;  %8219 = vmatprep.mubr.msk.bf16.mxu1 %vm3424_vm7, %v5976_v25  ;;  %vm5330_vm10 = vcmp.gt.f32.partialorder %v13147_v46, 0.0 }
 0x363   : > { %v13178_v60 = vadd.f32 %v12848_v52, %v5083_v10  ;;  %v9385_v40 = vpop.eup %9384  ;;  %9398 = vpow2.f32 %v5468_v21  ;;  %8220 = vmatmul.mubr.msk.bf16.gmra.mxu1 %vm3424_vm7, %v5977_v13  ;;  %v5898_v9 = vmul.f32 1.050701, %v5802_v38  ;;  %v5478_v7 = vmul.f32 1.442695, %v13173_v30 }
 0x364   : > { %v8138_v29 = vpop.f32.mrf.mxu0  ;;  %v5805_v11 = vsel %vm5325_vm3, %v13109_v19, %v5709_v55  ;;  %v5707_v36 = vmul.f32 1.6732632, %v7555_v61  ;;  %v9387_v20 = vpop.eup %9386  ;;  %v7560_v33 = vadd.f32 -1.0, %v9385_v40  ;;  %vm5332_vm11 = vcmp.gt.f32.partialorder %v13144_v0, 0.0 }
 0x365   : > { %v13186_v27 = vadd.f32 %v8138_v29, %v12848_v52  ;;  %v5901_v63 = vmul.f32 1.050701, %v5805_v11  ;;  %v7558_v49 = vadd.f32 -1.0, %v9387_v20  ;;  %v5474_v52 = vmul.f32 1.442695, %v13178_v60 }
 0x366   : > { %v5086_v47 = vpop.f32.mrf.mxu0  ;;  %v9389_v41 = vpop.eup %9388  ;;  %v5803_v19 = vsel %vm5323_vm4, %v13112_v37, %v5707_v36  ;;  %v5712_v18 = vmul.f32 1.6732632, %v7560_v33  ;;  %9400 = vpow2.f32 %v5478_v7  ;;  %vm5333_vm12 = vcmp.gt.f32.partialorder %v13162_v17, 0.0 }
 0x367   : > { %v5899_v26 = vmul.f32 1.050701, %v5803_v19  ;;  %v7561_v39 = vadd.f32 -1.0, %v9389_v41  ;;  %v5710_v24 = vmul.f32 1.6732632, %v7558_v49  ;;  %9402 = vpow2.f32 %v5474_v52 }
 0x368   : > { %v8141_v35 = vpop.f32.mrf.mxu0  ;;  %v5480_v43 = vmul.f32 1.442695, %v13186_v27  ;;  %v9391_v58 = vpop.eup %9390  ;;  %v5979_v44 = vpack.c.bf16 %v5901_v63, %v5900_v5  ;;  %v5808_v15 = vsel %vm5328_vm5, %v13124_v23, %v5712_v18  ;;  %v13210_v1 = vadd.f32 %v13207_v51, %v5086_v47 }
 0x369   : > { %v5978_v2 = vpack.c.bf16 %v5899_v26, %v5898_v9  ;;  %v5713_v37 = vmul.f32 1.6732632, %v7561_v39  ;;  %v7559_v53 = vadd.f32 -1.0, %v9391_v58  ;;  %v13213_v22 = vadd.f32 %v13207_v51, %v8141_v35 }
 0x36a   : > { %v5099_v56 = vpop.f32.mrf.mxu0  ;;  %9404 = vpow2.f32 %v5480_v43  ;;  %v5806_v23 = vsel %vm5326_vm6, %v13129_v8, %v5710_v24  ;;  %v5476_v12 = vmul.f32 1.442695, %v13210_v1  ;;  %v5904_v62 = vmul.f32 1.050701, %v5808_v15 }
 0x36b   : > { %v9393_v31 = vpop.eup %9392  ;;  %v5809_v6 = vsel %vm5329_vm8, %v13132_v16, %v5713_v37  ;;  %8223 = vmatprep.mubr.msk.bf16.mxu1 %vm3424_vm7, %v5978_v2  ;;  %v5711_v59 = vmul.f32 1.6732632, %v7559_v53  ;;  %v13220_v48 = vadd.f32 %v13207_v51, %v5099_v56  ;;  %v5486_v8 = vmul.f32 1.442695, %v13213_v22 }
 0x36c   : > { %v8142_v42 = vpop.f32.mrf.mxu0  ;;  %v9395_v54 = vpop.eup %9394  ;;  %v7564_v16 = vadd.f32 -1.0, %v9393_v31  ;;  %8224 = vmatmul.mubr.msk.bf16.gmra.mxu1 %vm3424_vm7, %v5979_v44  ;;  %v5905_v32 = vmul.f32 1.050701, %v5809_v6  ;;  %v5902_v13 = vmul.f32 1.050701, %v5806_v23  ;;  %9406 = vpow2.f32 %v5476_v12 }
 0x36d   : > { %v7562_v34 = vadd.f32 -1.0, %v9395_v54  ;;  %v5807_v10 = vsel %vm5327_vm9, %v13141_v57, %v5711_v59  ;;  %9408 = vpow2.f32 %v5486_v8  ;;  %v5482_v61 = vmul.f32 1.442695, %v13220_v48 }
 0x36e   : > { %v5102_v3 = vpop.f32.mrf.mxu0  ;;  %v5903_v25 = vmul.f32 1.050701, %v5807_v10  ;;  %v9397_v4 = vpop.eup %9396  ;;  %v5716_v55 = vmul.f32 1.6732632, %v7564_v16  ;;  %v13230_v21 = vadd.f32 %v13207_v51, %v8142_v42  ;;  %v5981_v36 = vpack.c.bf16 %v5905_v32, %v5904_v62 }
 0x36f   : > { %v5714_v14 = vmul.f32 1.6732632, %v7562_v34  ;;  %v7565_v11 = vadd.f32 -1.0, %v9397_v4  ;;  %9410 = vpow2.f32 %v5482_v61  ;;  %v13239_v33 = vadd.f32 %v13207_v51, %v5102_v3 }
 0x370   : > { %v8145_v45 = vpop.f32.mrf.mxu0  ;;  %v9399_v38 = vpop.eup %9398  ;;  %v5980_v40 = vpack.c.bf16 %v5903_v25, %v5902_v13  ;;  %v5488_v9 = vmul.f32 1.442695, %v13230_v21  ;;  %vm5331_vm13 = vcmp.gt.f32.partialorder %v13166_v50, 0.0  ;;  %vm5336_vm14 = vcmp.gt.f32.partialorder %v13173_v30, 0.0 }
 0x371   : > { %v5810_v57 = vsel %vm5330_vm10, %v13147_v46, %v5714_v14  ;;  %v7563_v47 = vadd.f32 -1.0, %v9399_v38  ;;  %v5717_v28 = vmul.f32 1.6732632, %v7565_v11  ;;  %v13242_v7 = vadd.f32 %v13207_v51, %v8145_v45 }
 0x372   : > { %v5115_v29 = vpop.f32.mrf.mxu0  ;;  %8227 = vmatprep.mubr.msk.bf16.mxu1 %vm3424_vm7, %v5980_v40  ;;  %v5812_v46 = vsel %vm5332_vm11, %v13144_v0, %v5716_v55  ;;  %v5906_v41 = vmul.f32 1.050701, %v5810_v57  ;;  %9412 = vpow2.f32 %v5488_v9  ;;  %v5484_v35 = vmul.f32 1.442695, %v13239_v33 }
 0x373   : > { %v5715_v63 = vmul.f32 1.6732632, %v7563_v47  ;;  %v9401_v49 = vpop.eup %9400  ;;  %v5813_v52 = vsel %vm5333_vm12, %v13162_v17, %v5717_v28  ;;  %v13253_v26 = vadd.f32 %v13207_v51, %v5115_v29  ;;  %v5494_v17 = vmul.f32 1.442695, %v13242_v7 }
 0x374   : > { %v8146_v20 = vpop.f32.mrf.mxu0  ;;  %8228 = vmatmul.mubr.msk.bf16.gmra.mxu1 %vm3424_vm7, %v5981_v36  ;;  %v9403_v18 = vpop.eup %9402  ;;  %v5909_v0 = vmul.f32 1.050701, %v5813_v52  ;;  %v7568_v5 = vadd.f32 -1.0, %v9401_v49  ;;  %9414 = vpow2.f32 %v5484_v35  ;;  %v5908_v37 = vmul.f32 1.050701, %v5812_v46 }
 0x375   : > { %v5811_v39 = vsel %vm5331_vm13, %v13166_v50, %v5715_v63  ;;  %v13257_v24 = vadd.f32 %v13207_v51, %v8146_v20  ;;  %v7566_v2 = vadd.f32 -1.0, %v9403_v18  ;;  %9416 = vpow2.f32 %v5494_v17 }
 0x376   : > { %v5118_v19 = vpop.f32.mrf.mxu0  ;;  %v5907_v58 = vmul.f32 1.050701, %v5811_v39  ;;  %v5720_v31 = vmul.f32 1.6732632, %v7568_v5  ;;  %v5490_v15 = vmul.f32 1.442695, %v13253_v26  ;;  %v5983_v50 = vpack.c.bf16 %v5909_v0, %v5908_v37 }
 0x377   : > { %v9405_v56 = vpop.eup %9404  ;;  %v5496_v54 = vmul.f32 1.442695, %v13257_v24  ;;  %v5718_v59 = vmul.f32 1.6732632, %v7566_v2  ;;  %v13264_v16 = vadd.f32 %v13207_v51, %v5118_v19  ;;  %vm5334_vm15 = vcmp.gt.f32.partialorder %v13178_v60, 0.0 }
 0x378   : > { %v8149_v43 = vpop.f32.mrf.mxu0  ;;  %v7569_v44 = vadd.f32 -1.0, %v9405_v56  ;;  %v5982_v42 = vpack.c.bf16 %v5907_v58, %v5906_v41  ;;  %9418 = vpow2.f32 %v5490_v15  ;;  %vm5337_vm0 = vcmp.gt.f32.partialorder %v13186_v27, 0.0 }
 0x379   : > { %v9407_v3 = vpop.eup %9406  ;;  %9420 = vpow2.f32 %v5496_v54  ;;  %v13270_v34 = vadd.f32 %v13207_v51, %v8149_v43  ;;  %v5816_v32 = vsel %vm5336_vm14, %v13173_v30, %v5720_v31  ;;  %v5492_v45 = vmul.f32 1.442695, %v13264_v16 }
 0x37a   : > { %v5131_v53 = vpop.f32.mrf.mxu0  ;;  %v5721_v6 = vmul.f32 1.6732632, %v7569_v44  ;;  %8231 = vmatprep.mubr.msk.bf16.mxu1 %vm3424_vm7, %v5982_v42  ;;  %v9409_v62 = vpop.eup %9408  ;;  %v7567_v8 = vadd.f32 -1.0, %v9407_v3  ;;  %vm5335_vm1 = vcmp.gt.f32.partialorder %v13210_v1, 0.0  ;;  %v5814_v61 = vsel %vm5334_vm15, %v13178_v60, %v5718_v59 }
 0x37b   : > { %v7572_v13 = vadd.f32 -1.0, %v9409_v62  ;;  %v5502_v25 = vmul.f32 1.442695, %v13270_v34  ;;  %v13279_v14 = vadd.f32 %v13207_v51, %v5131_v53  ;;  %9422 = vpow2.f32 %v5492_v45 }
 0x37c   : > { %v8150_v23 = vpop.f32.mrf.mxu0  ;;  %8232 = vmatmul.mubr.msk.bf16.gmra.mxu1 %vm3424_vm7, %v5983_v50  ;;  %v5817_v10 = vsel %vm5337_vm0, %v13186_v27, %v5721_v6  ;;  %v9411_v55 = vpop.eup %9410  ;;  %v5719_v30 = vmul.f32 1.6732632, %v7567_v8  ;;  %v5912_v29 = vmul.f32 1.050701, %v5816_v32  ;;  %vm5340_vm2 = vcmp.gt.f32.partialorder %v13213_v22, 0.0 }
 0x37d   : > { %v13285_v27 = vadd.f32 %v13207_v51, %v8150_v23  ;;  %v5913_v38 = vmul.f32 1.050701, %v5817_v10  ;;  %v7570_v40 = vadd.f32 -1.0, %v9411_v55  ;;  %9424 = vpow2.f32 %v5502_v25 }
 0x37e   : > { %v5134_v12 = vpop.f32.mrf.mxu0  ;;  %v5815_v11 = vsel %vm5335_vm1, %v13210_v1, %v5719_v30  ;;  %v5498_v36 = vmul.f32 1.442695, %v13279_v14  ;;  %v5910_v60 = vmul.f32 1.050701, %v5814_v61  ;;  %v5724_v9 = vmul.f32 1.6732632, %v7572_v13 }
 0x37f   : > { %v5504_v47 = vmul.f32 1.442695, %v13285_v27  ;;  %v9413_v20 = vpop.eup %9412  ;;  %v5911_v28 = vmul.f32 1.050701, %v5815_v11  ;;  %v13292_v46 = vadd.f32 %v13207_v51, %v5134_v12  ;;  %v5722_v63 = vmul.f32 1.6732632, %v7570_v40 }
 0x380   : > { %v8153_v4 = vpop.f32.mrf.mxu0  ;;  %v7573_v19 = vadd.f32 -1.0, %v9413_v20  ;;  %9426 = vpow2.f32 %v5498_v36  ;;  %vm5338_vm3 = vcmp.gt.f32.partialorder %v13220_v48, 0.0  ;;  %vm5341_vm4 = vcmp.gt.f32.partialorder %v13230_v21, 0.0 }
 0x381   : > { %v13295_v49 = vadd.f32 %v13207_v51, %v8153_v4  ;;  %v9415_v1 = vpop.eup %9414  ;;  %v5984_v52 = vpack.c.bf16 %v5911_v28, %v5910_v60  ;;  %9428 = vpow2.f32 %v5504_v47  ;;  %v5985_v18 = vpack.c.bf16 %v5913_v38, %v5912_v29 }
 0x382   : > { %v5147_v57 = vpop.f32.mrf.mxu0  ;;  %v5725_v0 = vmul.f32 1.6732632, %v7573_v19  ;;  %vm5339_vm5 = vcmp.gt.f32.partialorder %v13239_v33, 0.0  ;;  %v7571_v39 = vadd.f32 -1.0, %v9415_v1  ;;  %v9417_v5 = vpop.eup %9416  ;;  %v5820_v43 = vsel %vm5340_vm2, %v13213_v22, %v5724_v9 }
 0x383   : > { %v5500_v56 = vmul.f32 1.442695, %v13292_v46  ;;  %v5510_v58 = vmul.f32 1.442695, %v13295_v49  ;;  %v13306_v2 = vadd.f32 %v13207_v51, %v5147_v57  ;;  %8235 = vmatprep.mubr.msk.bf16.mxu1 %vm3424_vm7, %v5984_v52  ;;  %v5818_v17 = vsel %vm5338_vm3, %v13220_v48, %v5722_v63 }
 0x384   : > { %v8154_v41 = vpop.f32.mrf.mxu0  ;;  %v5821_v37 = vsel %vm5341_vm4, %v13230_v21, %v5725_v0  ;;  %v5723_v44 = vmul.f32 1.6732632, %v7571_v39  ;;  %8236 = vmatmul.mubr.msk.bf16.gmra.mxu1 %vm3424_vm7, %v5985_v18  ;;  %v7576_v31 = vadd.f32 -1.0, %v9417_v5  ;;  %v5914_v59 = vmul.f32 1.050701, %v5818_v17 }
 0x385   : > { %v13313_v53 = vadd.f32 %v13207_v51, %v8154_v41  ;;  %v9419_v42 = vpop.eup %9418  ;;  %9430 = vpow2.f32 %v5500_v56  ;;  %v5506_v15 = vmul.f32 1.442695, %v13306_v2  ;;  %v5917_v54 = vmul.f32 1.050701, %v5821_v37 }
 0x386   : > { %v5150_v35 = vpop.f32.mrf.mxu0  ;;  %v9421_v6 = vpop.eup %9420  ;;  %v5819_v48 = vsel %vm5339_vm5, %v13239_v33, %v5723_v44  ;;  %v7574_v21 = vadd.f32 -1.0, %v9419_v42  ;;  %9432 = vpow2.f32 %v5510_v58  ;;  %v5916_v62 = vmul.f32 1.050701, %v5820_v43 }
 0x387   : > { %v13317_v50 = vadd.f32 %v13207_v51, %v5150_v35  ;;  %v5915_v3 = vmul.f32 1.050701, %v5819_v48  ;;  %v7577_v12 = vadd.f32 -1.0, %v9421_v6  ;;  %9434 = vpow2.f32 %v5506_v15 }
 0x388   : > { %v5726_v32 = vmul.f32 1.6732632, %v7574_v21  ;;  %v5512_v10 = vmul.f32 1.442695, %v13313_v53  ;;  %v9423_v45 = vpop.eup %9422  ;;  %v5728_v25 = vmul.f32 1.6732632, %v7576_v31  ;;  %v5987_v55 = vpack.c.bf16 %v5917_v54, %v5916_v62 }
 0x389   : > { %v5986_v13 = vpack.c.bf16 %v5915_v3, %v5914_v59  ;;  %vm5345_vm6 = vcmp.gt.f32.partialorder %v13257_v24, 0.0  ;;  %v5729_v4 = vmul.f32 1.6732632, %v7577_v12  ;;  %v7575_v33 = vadd.f32 -1.0, %v9423_v45 }
 0x38a   : > { %9436 = vpow2.f32 %v5512_v10  ;;  %v5508_v61 = vmul.f32 1.442695, %v13317_v50  ;;  %v9425_v30 = vpop.eup %9424  ;;  %vm5344_vm8 = vcmp.gt.f32.partialorder %v13242_v7, 0.0  ;;  %vm5342_vm9 = vcmp.gt.f32.partialorder %v13253_v26, 0.0 }
 0x38b   : > { %v8157_v22 = vpop.f32.mrf.mxu0  ;;  %v5825_v29 = vsel %vm5345_vm6, %v13257_v24, %v5729_v4  ;;  %8239 = vmatprep.mubr.msk.bf16.mxu1 %vm3424_vm7, %v5986_v13  ;;  %v5822_v40 = vsel %vm5342_vm9, %v13253_v26, %v5726_v32  ;;  %v5727_v57 = vmul.f32 1.6732632, %v7575_v33  ;;  %v5824_v20 = vsel %vm5344_vm8, %v13242_v7, %v5728_v25 }
 0x38c   : > { %v13329_v38 = vadd.f32 %v13207_v51, %v8157_v22  ;;  %9438 = vpow2.f32 %v5508_v61  ;;  %8240 = vmatmul.mubr.msk.bf16.gmra.mxu1 %vm3424_vm7, %v5987_v55  ;;  %vm5343_vm10 = vcmp.gt.f32.partialorder %v13264_v16, 0.0  ;;  %v5921_v26 = vmul.f32 1.050701, %v5825_v29 }
 0x38d   : > { %v5163_v23 = vpop.f32.mrf.mxu0  ;;  %v9427_v47 = vpop.eup %9426  ;;  %v5823_v9 = vsel %vm5343_vm10, %v13264_v16, %v5727_v57  ;;  %v7580_v41 = vadd.f32 -1.0, %v9425_v30  ;;  %v5918_v19 = vmul.f32 1.050701, %v5822_v40  ;;  %v5920_v35 = vmul.f32 1.050701, %v5824_v20 }
 0x38e   : > { %v13334_v11 = vadd.f32 %v13207_v51, %v5163_v23  ;;  %v5518_v24 = vmul.f32 1.442695, %v13329_v38  ;;  %v9429_v28 = vpop.eup %9428  ;;  %v7578_v63 = vadd.f32 -1.0, %v9427_v47  ;;  %v5919_v1 = vmul.f32 1.050701, %v5823_v9 }
 0x38f   : > { %v8158_v8 = vpop.f32.mrf.mxu0  ;;  %v7581_v52 = vadd.f32 -1.0, %v9429_v28  ;;  %vm5346_vm11 = vcmp.gt.f32.partialorder %v13279_v14, 0.0  ;;  %v5989_v58 = vpack.c.bf16 %v5921_v26, %v5920_v35  ;;  %v5732_v17 = vmul.f32 1.6732632, %v7580_v41 }
 0x390   : > { %v13341_v60 = vadd.f32 %v13207_v51, %v8158_v8  ;;  %9440 = vpow2.f32 %v5518_v24  ;;  %v5730_v18 = vmul.f32 1.6732632, %v7578_v63  ;;  %v5514_v7 = vmul.f32 1.442695, %v13334_v11 }
 0x391   : > { %v5166_v36 = vpop.f32.mrf.mxu0  ;;  %v5988_v5 = vpack.c.bf16 %v5919_v1, %v5918_v19  ;;  %v5733_v43 = vmul.f32 1.6732632, %v7581_v52  ;;  %vm5349_vm12 = vcmp.gt.f32.partialorder %v13285_v27, 0.0  ;;  %vm5348_vm13 = vcmp.gt.f32.partialorder %v13270_v34, 0.0 }
 0x392   : > { %v13346_v0 = vadd.f32 %v13207_v51, %v5166_v36  ;;  %v5520_v16 = vmul.f32 1.442695, %v13341_v60  ;;  %v9431_v56 = vpop.eup %9430  ;;  %9442 = vpow2.f32 %v5514_v7  ;;  %v5826_v42 = vsel %vm5346_vm11, %v13279_v14, %v5730_v18 }
 0x393   : > { %v9433_v22 = vpop.eup %9432  ;;  %v7579_v31 = vadd.f32 -1.0, %v9431_v56  ;;  %8243 = vmatprep.mubr.msk.bf16.mxu1 %vm3424_vm7, %v5988_v5  ;;  %v5829_v6 = vsel %vm5349_vm12, %v13285_v27, %v5733_v43  ;;  %vm5347_vm14 = vcmp.gt.f32.partialorder %v13292_v46, 0.0  ;;  %v5828_v59 = vsel %vm5348_vm13, %v13270_v34, %v5732_v17 }
 0x394   : > { %v5516_v37 = vmul.f32 1.442695, %v13346_v0  ;;  %9444 = vpow2.f32 %v5520_v16  ;;  %v9435_v15 = vpop.eup %9434  ;;  %8244 = vmatmul.mubr.msk.bf16.gmra.mxu1 %vm3424_vm7, %v5989_v58  ;;  %v5922_v3 = vmul.f32 1.050701, %v5826_v42  ;;  %v7584_v12 = vadd.f32 -1.0, %v9433_v22 }
 0x395   : > { %v5731_v14 = vmul.f32 1.6732632, %v7579_v31  ;;  %v7582_v21 = vadd.f32 -1.0, %v9435_v15  ;;  %v5925_v32 = vmul.f32 1.050701, %v5829_v6  ;;  %vm5350_vm15 = vcmp.gt.f32.partialorder %v13306_v2, 0.0 }
 0x396   : > { %9446 = vpow2.f32 %v5516_v37  ;;  %v5924_v34 = vmul.f32 1.050701, %v5828_v59  ;;  %v5736_v30 = vmul.f32 1.6732632, %v7584_v12  ;;  %vm5353_vm0 = vcmp.gt.f32.partialorder %v13313_v53, 0.0 }
 0x397   : > { %v9437_v62 = vpop.eup %9436  ;;  %v5827_v10 = vsel %vm5347_vm14, %v13292_v46, %v5731_v14  ;;  %v5734_v25 = vmul.f32 1.6732632, %v7582_v21  ;;  %vm5352_vm1 = vcmp.gt.f32.partialorder %v13295_v49, 0.0  ;;  %vm5351_vm2 = vcmp.gt.f32.partialorder %v13317_v50, 0.0 }
 0x398   : > { %v8161_v39 = vpop.f32.mrf.mxu0  ;;  %v5923_v13 = vmul.f32 1.050701, %v5827_v10  ;;  %v7585_v4 = vadd.f32 -1.0, %v9437_v62  ;;  %v5991_v46 = vpack.c.bf16 %v5925_v32, %v5924_v34  ;;  %v5832_v26 = vsel %vm5352_vm1, %v13295_v49, %v5736_v30 }
 0x399   : > { %v13357_v54 = vadd.f32 %v13207_v51, %v8161_v39  ;;  %v9439_v33 = vpop.eup %9438  ;;  %v5830_v20 = vsel %vm5350_vm15, %v13306_v2, %v5734_v25  ;;  %v5928_v7 = vmul.f32 1.050701, %v5832_v26  ;;  %vm5354_vm3 = vcmp.gt.f32.partialorder %v13334_v11, 0.0 }
 0x39a   : > { %v5179_v44 = vpop.f32.mrf.mxu0  ;;  %v5990_v61 = vpack.c.bf16 %v5923_v13, %v5922_v3  ;;  %v5737_v29 = vmul.f32 1.6732632, %v7585_v4  ;;  %v7583_v40 = vadd.f32 -1.0, %v9439_v33  ;;  %v5926_v19 = vmul.f32 1.050701, %v5830_v20 }
 0x39b   : > { %v13362_v23 = vadd.f32 %v13207_v51, %v5179_v44  ;;  %v5526_v27 = vmul.f32 1.442695, %v13357_v54  ;;  %vm5357_vm4 = vcmp.gt.f32.partialorder %v13341_v60, 0.0  ;;  %vm5356_vm5 = vcmp.gt.f32.partialorder %v13329_v38, 0.0 }
 0x39c   : > { %v8162_v48 = vpop.f32.mrf.mxu0  ;;  %v5833_v24 = vsel %vm5353_vm0, %v13313_v53, %v5737_v29  ;;  %v5735_v28 = vmul.f32 1.6732632, %v7583_v40  ;;  %8247 = vmatprep.mubr.msk.bf16.mxu1 %vm3424_vm7, %v5990_v61  ;;  %vm5355_vm6 = vcmp.gt.f32.partialorder %v13346_v0, 0.0  ;;  %vm5360_vm10 = vcmp.gt.f32.partialorder %v13357_v54, 0.0 }
 0x39d   : > { %v5522_v8 = vmul.f32 1.442695, %v13362_v23  ;;  %v13369_v45 = vadd.f32 %v13207_v51, %v8162_v48  ;;  %9448 = vpow2.f32 %v5526_v27  ;;  %v9441_v47 = vpop.eup %9440  ;;  %8248 = vmatmul.mubr.msk.bf16.gmra.mxu1 %vm3424_vm7, %v5991_v46  ;;  %v5929_v53 = vmul.f32 1.050701, %v5833_v24 }
 0x39e   : > { %v5182_v55 = vpop.f32.mrf.mxu0  ;;  %v5831_v9 = vsel %vm5351_vm2, %v13317_v50, %v5735_v28  ;;  %v7588_v41 = vadd.f32 -1.0, %v9441_v47  ;;  %vm5358_vm9 = vcmp.gt.f32.partialorder %v13362_v23, 0.0 }
 0x39f   : > { %9450 = vpow2.f32 %v5522_v8  ;;  %v5528_v57 = vmul.f32 1.442695, %v13369_v45  ;;  %v13375_v36 = vadd.f32 %v13207_v51, %v5182_v55  ;;  %v9443_v2 = vpop.eup %9442  ;;  %v5927_v1 = vmul.f32 1.050701, %v5831_v9 }
 0x3a0   : > { %v7586_v35 = vadd.f32 -1.0, %v9443_v2  ;;  %v5740_v43 = vmul.f32 1.6732632, %v7588_v41  ;;  %v5993_v58 = vpack.c.bf16 %v5929_v53, %v5928_v7  ;;  %vm5361_vm8 = vcmp.gt.f32.partialorder %v13369_v45, 0.0 }
 0x3a1   : > { %9452 = vpow2.f32 %v5528_v57  ;;  %v5524_v63 = vmul.f32 1.442695, %v13375_v36  ;;  %v9445_v52 = vpop.eup %9444  ;;  %v5992_v39 = vpack.c.bf16 %v5927_v1, %v5926_v19  ;;  %vm5359_vm11 = vcmp.gt.f32.partialorder %v13375_v36, 0.0 }
 0x3a2   : > { %v7589_v5 = vadd.f32 -1.0, %v9445_v52  ;;  %v5738_v16 = vmul.f32 1.6732632, %v7586_v35  ;;  %v5836_v48 = vsel %vm5356_vm5, %v13329_v38, %v5740_v43 }
 0x3a3   : > { %9454 = vpow2.f32 %v5524_v63  ;;  %v9447_v18 = vpop.eup %9446  ;;  %8251 = vmatprep.mubr.msk.bf16.mxu1 %vm3424_vm7, %v5992_v39  ;;  %v5932_v10 = vmul.f32 1.050701, %v5836_v48 }
 0x3a4   : > { %v7587_v56 = vadd.f32 -1.0, %v9447_v18  ;;  %v5741_v50 = vmul.f32 1.6732632, %v7589_v5  ;;  %v5834_v37 = vsel %vm5354_vm3, %v13334_v11, %v5738_v16 }
 0x3a5   : > { %8252 = vmatmul.mubr.msk.bf16.gmra.mxu1 %vm3424_vm7, %v5993_v58  ;;  %v5930_v14 = vmul.f32 1.050701, %v5834_v37 }
 0x3a6   : > { %v5739_v44 = vmul.f32 1.6732632, %v7587_v56  ;;  %v5837_v31 = vsel %vm5357_vm4, %v13341_v60, %v5741_v50 }
 0x3a7   : > { %v5933_v3 = vmul.f32 1.050701, %v5837_v31 }
 0x3a8   : > { %v5835_v11 = vsel %vm5355_vm6, %v13346_v0, %v5739_v44 }
 0x3a9   : > { %v5931_v12 = vmul.f32 1.050701, %v5835_v11  ;;  %v5995_v4 = vpack.c.bf16 %v5933_v3, %v5932_v10 }
 0x3aa   : > { %v8165_v49 = vpop.f32.mrf.mxu0  ;;  %v9449_v42 = vpop.eup %9448 }
 0x3ab   : > { %v13388_v17 = vadd.f32 %v13207_v51, %v8165_v49  ;;  %v5994_v8 = vpack.c.bf16 %v5931_v12, %v5930_v14  ;;  %v7592_v38 = vadd.f32 -1.0, %v9449_v42 }
 0x3ac   : > { %v5195_v22 = vpop.f32.mrf.mxu0  ;;  %v9451_v6 = vpop.eup %9450 }
 0x3ad   : > { %v5534_v15 = vmul.f32 1.442695, %v13388_v17  ;;  %v13401_v21 = vadd.f32 %v13207_v51, %v5195_v22  ;;  %v7590_v27 = vadd.f32 -1.0, %v9451_v6  ;;  %8255 = vmatprep.mubr.msk.bf16.mxu1 %vm3424_vm7, %v5994_v8  ;;  %v5744_v30 = vmul.f32 1.6732632, %v7592_v38 }
 0x3ae   : > { %v8166_v59 = vpop.f32.mrf.mxu0  ;;  %v9453_v0 = vpop.eup %9452  ;;  %8256 = vmatmul.mubr.msk.bf16.gmra.mxu1 %vm3424_vm7, %v5995_v4  ;;  %vm5364_vm14 = vcmp.gt.f32.partialorder %v13388_v17, 0.0 }
 0x3af   : > { %9456 = vpow2.f32 %v5534_v15  ;;  %v13404_v60 = vadd.f32 %v13207_v51, %v8166_v59  ;;  %v5530_v62 = vmul.f32 1.442695, %v13401_v21  ;;  %v7593_v55 = vadd.f32 -1.0, %v9453_v0 }
 0x3b0   : > { %v5198_v32 = vpop.f32.mrf.mxu0  ;;  %v5742_v33 = vmul.f32 1.6732632, %v7590_v27  ;;  %v9455_v61 = vpop.eup %9454  ;;  %v5840_v28 = vsel %vm5360_vm10, %v13357_v54, %v5744_v30  ;;  %vm5362_vm13 = vcmp.gt.f32.partialorder %v13401_v21, 0.0 }
 0x3b1   : > { %v5536_v13 = vmul.f32 1.442695, %v13404_v60  ;;  %9458 = vpow2.f32 %v5530_v62  ;;  %v13409_v25 = vadd.f32 %v13207_v51, %v5198_v32  ;;  %v5745_v29 = vmul.f32 1.6732632, %v7593_v55 }
 0x3b2   : > { %v7591_v40 = vadd.f32 -1.0, %v9455_v61  ;;  %v5838_v47 = vsel %vm5358_vm9, %v13362_v23, %v5742_v33  ;;  %v5936_v1 = vmul.f32 1.050701, %v5840_v28  ;;  %vm5365_vm12 = vcmp.gt.f32.partialorder %v13404_v60, 0.0 }
 0x3b3   : > { %9460 = vpow2.f32 %v5536_v13  ;;  %v5532_v34 = vmul.f32 1.442695, %v13409_v25  ;;  %v5841_v46 = vsel %vm5361_vm8, %v13369_v45, %v5745_v29  ;;  %v5934_v45 = vmul.f32 1.050701, %v5838_v47 }
 0x3b4   : > { %v5743_v20 = vmul.f32 1.6732632, %v7591_v40  ;;  %v5937_v9 = vmul.f32 1.050701, %v5841_v46  ;;  %vm5363_vm15 = vcmp.gt.f32.partialorder %v13409_v25, 0.0 }
 0x3b5   : > { %9462 = vpow2.f32 %v5532_v34 }
 0x3b6   : > { %v8169_v57 = vpop.f32.mrf.mxu0  ;;  %v5839_v41 = vsel %vm5359_vm11, %v13375_v36, %v5743_v20  ;;  %v5997_v7 = vpack.c.bf16 %v5937_v9, %v5936_v1 }
 0x3b7   : > { %v13420_v24 = vadd.f32 %v13207_v51, %v8169_v57  ;;  %v5935_v2 = vmul.f32 1.050701, %v5839_v41 }
 0x3b8   : > { %v5211_v26 = vpop.f32.mrf.mxu0 }
 0x3b9   : > { %v5542_v63 = vmul.f32 1.442695, %v13420_v24  ;;  %v13427_v19 = vadd.f32 %v13207_v51, %v5211_v26  ;;  %v5996_v54 = vpack.c.bf16 %v5935_v2, %v5934_v45  ;;  %vm5368_vm0 = vcmp.gt.f32.partialorder %v13420_v24, 0.0 }
 0x3ba   : > { %v8170_v23 = vpop.f32.mrf.mxu0 }
 0x3bb   : > { %9464 = vpow2.f32 %v5542_v63  ;;  %v13430_v52 = vadd.f32 %v13207_v51, %v8170_v23  ;;  %v5538_v35 = vmul.f32 1.442695, %v13427_v19  ;;  %8259 = vmatprep.mubr.msk.bf16.mxu1 %vm3424_vm7, %v5996_v54  ;;  %vm5366_vm1 = vcmp.gt.f32.partialorder %v13427_v19, 0.0 }
 0x3bc   : > { %v9457_v53 = vpop.eup %9456  ;;  %v5214_v18 = vpop.f32.mrf.mxu0  ;;  %8260 = vmatmul.mubr.msk.bf16.gmra.mxu1 %vm3424_vm7, %v5997_v7 }
 0x3bd   : > { %v5544_v36 = vmul.f32 1.442695, %v13430_v52  ;;  %v13435_v39 = vadd.f32 %v13207_v51, %v5214_v18  ;;  %v7596_v43 = vadd.f32 -1.0, %v9457_v53  ;;  %9466 = vpow2.f32 %v5538_v35 }
 0x3be   : > { %v9459_v5 = vpop.eup %9458  ;;  %vm5369_vm2 = vcmp.gt.f32.partialorder %v13430_v52, 0.0 }
 0x3bf   : > { %v7594_v56 = vadd.f32 -1.0, %v9459_v5  ;;  %9468 = vpow2.f32 %v5544_v36  ;;  %v5540_v49 = vmul.f32 1.442695, %v13435_v39  ;;  %v5748_v44 = vmul.f32 1.6732632, %v7596_v43 }
 0x3c0   : > { %v9461_v16 = vpop.eup %9460  ;;  %vm5367_vm3 = vcmp.gt.f32.partialorder %v13435_v39, 0.0 }
 0x3c1   : > { %v7597_v58 = vadd.f32 -1.0, %v9461_v16  ;;  %v5746_v50 = vmul.f32 1.6732632, %v7594_v56  ;;  %9470 = vpow2.f32 %v5540_v49  ;;  %v5844_v11 = vsel %vm5364_vm14, %v13388_v17, %v5748_v44 }
 0x3c2   : > { %v9463_v37 = vpop.eup %9462  ;;  %v5940_v8 = vmul.f32 1.050701, %v5844_v11 }
 0x3c3   : > { %v5749_v22 = vmul.f32 1.6732632, %v7597_v58  ;;  %v7595_v42 = vadd.f32 -1.0, %v9463_v37  ;;  %v5842_v6 = vsel %vm5362_vm13, %v13401_v21, %v5746_v50  ;;  %vm6594_vm13 = vcmask 23552  }
 0x3c4   : > { %v8173_v15 = vpop.f32.mrf.mxu0  ;;  %v5938_v62 = vmul.f32 1.050701, %v5842_v6 }
 0x3c5   : > { %v5845_v31 = vsel %vm5365_vm12, %v13404_v60, %v5749_v22  ;;  %v5747_v48 = vmul.f32 1.6732632, %v7595_v42  ;;  %v13446_v14 = vadd.f32 %v13207_v51, %v8173_v15 }
 0x3c6   : > { %v5227_v59 = vpop.f32.mrf.mxu0  ;;  %v5941_v3 = vmul.f32 1.050701, %v5845_v31 }
 0x3c7   : > { %v5843_v12 = vsel %vm5363_vm15, %v13409_v25, %v5747_v48  ;;  %v5550_v27 = vmul.f32 1.442695, %v13446_v14  ;;  %v13453_v10 = vadd.f32 %v13207_v51, %v5227_v59  ;;  %vm5372_vm5 = vcmp.gt.f32.partialorder %v13446_v14, 0.0 }
 0x3c8   : > { %v9465_v60 = vpop.eup %9464  ;;  %v5939_v32 = vmul.f32 1.050701, %v5843_v12  ;;  %v8174_v21 = vpop.f32.mrf.mxu0  ;;  %v5999_v55 = vpack.c.bf16 %v5941_v3, %v5940_v8 }
 0x3c9   : > { %9472 = vpow2.f32 %v5550_v27  ;;  %v13456_v38 = vadd.f32 %v13207_v51, %v8174_v21  ;;  %v7600_v13 = vadd.f32 -1.0, %v9465_v60  ;;  %v5546_v0 = vmul.f32 1.442695, %v13453_v10 }
 0x3ca   : > { %v5998_v17 = vpack.c.bf16 %v5939_v32, %v5938_v62  ;;  %v5230_v4 = vpop.f32.mrf.mxu0  ;;  %v9467_v25 = vpop.eup %9466  ;;  %vm5370_vm6 = vcmp.gt.f32.partialorder %v13453_v10, 0.0 }
 0x3cb   : > { %v5552_v33 = vmul.f32 1.442695, %v13456_v38  ;;  %v13461_v34 = vadd.f32 %v13207_v51, %v5230_v4  ;;  %v7598_v30 = vadd.f32 -1.0, %v9467_v25  ;;  %9474 = vpow2.f32 %v5546_v0 }
 0x3cc   : > { %v9469_v61 = vpop.eup %9468  ;;  %v8177_v29 = vpop.f32.mrf.mxu0  ;;  %8263 = vmatprep.mubr.msk.bf16.mxu1 %vm3424_vm7, %v5998_v17  ;;  %v5752_v57 = vmul.f32 1.6732632, %v7600_v13  ;;  %vm5373_vm4 = vcmp.gt.f32.partialorder %v13456_v38, 0.0 }
 0x3cd   : > { %v7601_v40 = vadd.f32 -1.0, %v9469_v61  ;;  %9476 = vpow2.f32 %v5552_v33  ;;  %8264 = vmatmul.mubr.msk.bf16.gmra.mxu1 %vm3424_vm7, %v5999_v55  ;;  %v5750_v47 = vmul.f32 1.6732632, %v7598_v30  ;;  %v5548_v20 = vmul.f32 1.442695, %v13461_v34 }
 0x3ce   : > { %v9471_v46 = vpop.eup %9470  ;;  %v13467_v28 = vadd.f32 %v13207_v51, %v8177_v29  ;;  %v5243_v26 = vpop.f32.mrf.mxu0  ;;  %v5848_v54 = vsel %vm5368_vm0, %v13420_v24, %v5752_v57  ;;  %vm5371_vm8 = vcmp.gt.f32.partialorder %v13461_v34, 0.0 }
 0x3cf   : > { %v5753_v9 = vmul.f32 1.6732632, %v7601_v40  ;;  %v7599_v41 = vadd.f32 -1.0, %v9471_v46  ;;  %v13471_v63 = vadd.f32 %v13207_v51, %v5243_v26  ;;  %9478 = vpow2.f32 %v5548_v20 }
 0x3d0   : > { %v5558_v45 = vmul.f32 1.442695, %v13467_v28  ;;  %v8178_v2 = vpop.f32.mrf.mxu0  ;;  %v5846_v23 = vsel %vm5366_vm1, %v13427_v19, %v5750_v47  ;;  %v5944_v56 = vmul.f32 1.050701, %v5848_v54  ;;  %vm5376_vm9 = vcmp.gt.f32.partialorder %v13467_v28, 0.0 }
 0x3d1   : > { %v5849_v53 = vsel %vm5369_vm2, %v13430_v52, %v5753_v9  ;;  %v5751_v1 = vmul.f32 1.6732632, %v7599_v41  ;;  %v5554_v35 = vmul.f32 1.442695, %v13471_v63  ;;  %v13482_v18 = vadd.f32 %v13207_v51, %v8178_v2 }
 0x3d2   : > { %9480 = vpow2.f32 %v5558_v45  ;;  %v5246_v7 = vpop.f32.mrf.mxu0  ;;  %v5945_v36 = vmul.f32 1.050701, %v5849_v53  ;;  %v5942_v19 = vmul.f32 1.050701, %v5846_v23  ;;  %vm5374_vm10 = vcmp.gt.f32.partialorder %v13471_v63, 0.0 }
 0x3d3   : > { %v5847_v5 = vsel %vm5367_vm3, %v13435_v39, %v5751_v1  ;;  %v13486_v43 = vadd.f32 %v13207_v51, %v5246_v7  ;;  %9482 = vpow2.f32 %v5554_v35  ;;  %v5560_v24 = vmul.f32 1.442695, %v13482_v18 }
 0x3d4   : > { %v5943_v52 = vmul.f32 1.050701, %v5847_v5  ;;  %v6001_v22 = vpack.c.bf16 %v5945_v36, %v5944_v56  ;;  %vm5377_vm11 = vcmp.gt.f32.partialorder %v13482_v18, 0.0 }
 0x3d5   : > { %v8181_v16 = vpop.f32.mrf.mxu0  ;;  %v5556_v49 = vmul.f32 1.442695, %v13486_v43  ;;  %9484 = vpow2.f32 %v5560_v24  ;;  %vm5375_vm12 = vcmp.gt.f32.partialorder %v13486_v43, 0.0 }
 0x3d6   : > { %v13491_v58 = vadd.f32 %v13207_v51, %v8181_v16  ;;  %v9473_v50 = vpop.eup %9472  ;;  %v6000_v37 = vpack.c.bf16 %v5943_v52, %v5942_v19 }
 0x3d7   : > { %v5259_v44 = vpop.f32.mrf.mxu0  ;;  %9486 = vpow2.f32 %v5556_v49  ;;  %v7604_v6 = vadd.f32 -1.0, %v9473_v50 }
 0x3d8   : > { %v5566_v39 = vmul.f32 1.442695, %v13491_v58  ;;  %8267 = vmatprep.mubr.msk.bf16.mxu1 %vm3424_vm7, %v6000_v37  ;;  %v13496_v42 = vadd.f32 %v13207_v51, %v5259_v44  ;;  %v9475_v15 = vpop.eup %9474  ;;  %vm5380_vm0 = vcmp.gt.f32.partialorder %v13491_v58, 0.0 }
 0x3d9   : > { %v8182_v31 = vpop.f32.mrf.mxu0  ;;  %8268 = vmatmul.mubr.msk.bf16.gmra.mxu1 %vm3424_vm7, %v6001_v22  ;;  %v7602_v59 = vadd.f32 -1.0, %v9475_v15  ;;  %v5756_v8 = vmul.f32 1.6732632, %v7604_v6 }
 0x3da   : > { %9488 = vpow2.f32 %v5566_v39  ;;  %v13500_v48 = vadd.f32 %v13207_v51, %v8182_v31  ;;  %v9477_v11 = vpop.eup %9476  ;;  %v5562_v3 = vmul.f32 1.442695, %v13496_v42  ;;  %vm5378_vm15 = vcmp.gt.f32.partialorder %v13496_v42, 0.0 }
 0x3db   : > { %v5262_v12 = vpop.f32.mrf.mxu0  ;;  %v7605_v27 = vadd.f32 -1.0, %v9477_v11  ;;  %v5754_v62 = vmul.f32 1.6732632, %v7602_v59  ;;  %v5852_v40 = vsel %vm5372_vm5, %v13446_v14, %v5756_v8  ;;  %v13551_v59 = vld [vmem:[%s14083_s10] ss:$0 sm:$0xff] }
 0x3dc   : > { %v5568_v60 = vmul.f32 1.442695, %v13500_v48  ;;  %9490 = vpow2.f32 %v5562_v3  ;;  %v13505_v32 = vadd.f32 %v13207_v51, %v5262_v12  ;;  %v9479_v21 = vpop.eup %9478  ;;  %v5948_v23 = vmul.f32 1.050701, %v5852_v40 }
 0x3dd   : > { %v5757_v17 = vmul.f32 1.6732632, %v7605_v27  ;;  %v7603_v13 = vadd.f32 -1.0, %v9479_v21  ;;  %v8185_v55 = vpop.f32.mrf.mxu0  ;;  %v5850_v33 = vsel %vm5370_vm6, %v13453_v10, %v5754_v62  ;;  %vm5381_vm14 = vcmp.gt.f32.partialorder %v13500_v48, 0.0 }
 0x3de   : > { %9492 = vpow2.f32 %v5568_v60  ;;  %v5564_v0 = vmul.f32 1.442695, %v13505_v32  ;;  %v13516_v46 = vadd.f32 %v13207_v51, %v8185_v55  ;;  %v5946_v9 = vmul.f32 1.050701, %v5850_v33 }
 0x3df   : > { %v9481_v4 = vpop.eup %9480  ;;  %v5853_v25 = vsel %vm5373_vm4, %v13456_v38, %v5757_v17  ;;  %v5755_v61 = vmul.f32 1.6732632, %v7603_v13  ;;  %v5275_v57 = vpop.f32.mrf.mxu0  ;;  %vm5379_vm1 = vcmp.gt.f32.partialorder %v13505_v32, 0.0 }
 0x3e0   : > { %v7608_v30 = vadd.f32 -1.0, %v9481_v4  ;;  %9494 = vpow2.f32 %v5564_v0  ;;  %v9483_v29 = vpop.eup %9482  ;;  %v5949_v47 = vmul.f32 1.050701, %v5853_v25  ;;  %v5574_v41 = vmul.f32 1.442695, %v13516_v46 }
 0x3e1   : > { %v5851_v20 = vsel %vm5371_vm8, %v13461_v34, %v5755_v61  ;;  %v7606_v38 = vadd.f32 -1.0, %v9483_v29  ;;  %v13522_v45 = vadd.f32 %v13207_v51, %v5275_v57  ;;  %v8186_v14 = vpop.f32.mrf.mxu0  ;;  %vm5384_vm4 = vcmp.gt.f32.partialorder %v13516_v46, 0.0 }
 0x3e2   : > { %v5760_v26 = vmul.f32 1.6732632, %v7608_v30  ;;  %v5947_v10 = vmul.f32 1.050701, %v5851_v20  ;;  %v9485_v2 = vpop.eup %9484  ;;  %v13526_v1 = vadd.f32 %v13207_v51, %v8186_v14  ;;  %v6003_v5 = vpack.c.bf16 %v5949_v47, %v5948_v23 }
 0x3e3   : > { %v5758_v53 = vmul.f32 1.6732632, %v7606_v38  ;;  %v7609_v35 = vadd.f32 -1.0, %v9485_v2  ;;  %v5278_v7 = vpop.f32.mrf.mxu0  ;;  %v5570_v16 = vmul.f32 1.442695, %v13522_v45  ;;  %9496 = vpow2.f32 %v5574_v41 }
 0x3e4   : > { %v9487_v34 = vpop.eup %9486  ;;  %v6002_v54 = vpack.c.bf16 %v5947_v10, %v5946_v9  ;;  %v5856_v19 = vsel %vm5376_vm9, %v13467_v28, %v5760_v26  ;;  %v5576_v50 = vmul.f32 1.442695, %v13526_v1  ;;  %v9509_v28 = vld [vmem:[%s14081_s8] ss:$0 sm:$0xff]  ;;  %vm5385_vm2 = vcmp.gt.f32.partialorder %v13526_v1, 0.0 }
 0x3e5   : > { %v7607_v52 = vadd.f32 -1.0, %v9487_v34  ;;  %v5854_v51 = vsel %vm5374_vm10, %v13471_v63, %v5758_v53  ;;  %v5761_v56 = vmul.f32 1.6732632, %v7609_v35  ;;  %9498 = vpow2.f32 %v5570_v16 }
 0x3e6   : > { %8271 = vmatprep.mubr.msk.bf16.mxu1 %vm3424_vm7, %v6002_v54  ;;  %v13541_v37 = vadd.f32 %v9509_v28, %v5278_v7  ;;  %v5952_v22 = vmul.f32 1.050701, %v5856_v19  ;;  %9500 = vpow2.f32 %v5576_v50  ;;  %v8193_v11 = vpop.f32.mrf.mxu1  ;;  %v5950_v3 = vmul.f32 1.050701, %v5854_v51 }
 0x3e7   : > { %v9489_v36 = vpop.eup %9488  ;;  %v5759_v49 = vmul.f32 1.6732632, %v7607_v52  ;;  %8272 = vmatmul.mubr.msk.bf16.gmra.mxu1 %vm3424_vm7, %v6003_v5  ;;  %v5857_v63 = vsel %vm5377_vm11, %v13482_v18, %v5761_v56  ;;  %v6220_v13 = vadd.f32 %v8193_v11, %v13551_v59  ;;  %vm5382_vm3 = vcmp.gt.f32.partialorder %v13522_v45, 0.0 }
 0x3e8   : > { %v7612_v24 = vadd.f32 -1.0, %v9489_v36  ;;  %v5953_v31 = vmul.f32 1.050701, %v5857_v63  ;;  %v5572_v62 = vmul.f32 1.442695, %v13541_v37  ;;  %v6211_v21 = vpop.f32.mrf.mxu1  ;;  %vm5383_vm5 = vcmp.gt.f32.partialorder %v13541_v37, 0.0 }
 0x3e9   : > { %v9491_v44 = vpop.eup %9490  ;;  %v5855_v15 = vsel %vm5375_vm12, %v13486_v43, %v5759_v49  ;;  %v6212_v0 = vadd.f32 %v13551_v59, %v6211_v21  ;;  %6597 = vst.msk [vmem:[%s13561_s26 + $0x10] sm:$0xff] %vm6594_vm13, %v6220_v13 }
 0x3ea   : > { %v7610_v6 = vadd.f32 -1.0, %v9491_v44  ;;  %v5951_v12 = vmul.f32 1.050701, %v5855_v15  ;;  %v5764_v60 = vmul.f32 1.6732632, %v7612_v24  ;;  %v6005_v4 = vpack.c.bf16 %v5953_v31, %v5952_v22  ;;  %v8194_v55 = vpop.f32.mrf.mxu1 }
 0x3eb   : > { %v9493_v39 = vpop.eup %9492  ;;  %9502 = vpow2.f32 %v5572_v62  ;;  %6595 = vst.msk [vmem:[%s13561_s26] sm:$0xff] %vm6594_vm13, %v6212_v0  ;;  %v6223_v61 = vadd.f32 %v8194_v55, %v13551_v59 }
 0x3ec   : > { %v7613_v27 = vadd.f32 -1.0, %v9493_v39  ;;  %v5762_v18 = vmul.f32 1.6732632, %v7610_v6  ;;  %v6004_v43 = vpack.c.bf16 %v5951_v12, %v5950_v3  ;;  %v5860_v40 = vsel %vm5380_vm0, %v13491_v58, %v5764_v60 }
 0x3ed   : > { %v9495_v8 = vpop.eup %9494  ;;  %6598 = vst.msk [vmem:[%s13561_s26 + $0x18] sm:$0xff] %vm6594_vm13, %v6223_v61  ;;  %v5956_v58 = vmul.f32 1.050701, %v5860_v40 }
 0x3ee   : > { %v5765_v17 = vmul.f32 1.6732632, %v7613_v27  ;;  %v7611_v25 = vadd.f32 -1.0, %v9495_v8  ;;  %8275 = vmatprep.mubr.msk.bf16.mxu1 %vm3424_vm7, %v6004_v43  ;;  %v5858_v30 = vsel %vm5378_vm15, %v13496_v42, %v5762_v18 }
 0x3ef   : > { %8276 = vmatmul.mubr.msk.bf16.gmra.mxu1 %vm3424_vm7, %v6005_v4  ;;  %v5954_v38 = vmul.f32 1.050701, %v5858_v30 }
 0x3f0   : > { %v5861_v33 = vsel %vm5381_vm14, %v13500_v48, %v5765_v17  ;;  %v5763_v29 = vmul.f32 1.6732632, %v7611_v25  ;;  %v6214_v48 = vpop.f32.mrf.mxu1  ;;  %v9497_v10 = vpop.eup %9496 }
 0x3f1   : > { %v6215_v57 = vadd.f32 %v13551_v59, %v6214_v48  ;;  %v5957_v47 = vmul.f32 1.050701, %v5861_v33  ;;  %v7616_v35 = vadd.f32 -1.0, %v9497_v10 }
 0x3f2   : > { %v5859_v20 = vsel %vm5379_vm1, %v13505_v32, %v5763_v29  ;;  %v8197_v26 = vpop.f32.mrf.mxu1  ;;  %v9499_v14 = vpop.eup %9498 }
 0x3f3   : > { %v5955_v9 = vmul.f32 1.050701, %v5859_v20  ;;  %6596 = vst.msk [vmem:[%s13561_s26 + $0x8] sm:$0xff] %vm6594_vm13, %v6215_v57  ;;  %v6236_v42 = vadd.f32 %v8197_v26, %v13551_v59  ;;  %v6007_v53 = vpack.c.bf16 %v5957_v47, %v5956_v58  ;;  %v7614_v32 = vadd.f32 -1.0, %v9499_v14  ;;  %v9501_v54 = vpop.eup %9500 }
 0x3f4   : > { %v6227_v41 = vpop.f32.mrf.mxu1  ;;  %v7617_v36 = vadd.f32 -1.0, %v9501_v54  ;;  %v5768_v24 = vmul.f32 1.6732632, %v7616_v35 }
 0x3f5   : > { %v6006_v2 = vpack.c.bf16 %v5955_v9, %v5954_v38  ;;  %6601 = vst.msk [vmem:[%s13561_s26 + $0x30] sm:$0xff] %vm6594_vm13, %v6236_v42  ;;  %v6228_v23 = vadd.f32 %v13551_v59, %v6227_v41  ;;  %v5766_v52 = vmul.f32 1.6732632, %v7614_v32 }
 0x3f6   : > { %v8198_v34 = vpop.f32.mrf.mxu1  ;;  %v5769_v16 = vmul.f32 1.6732632, %v7617_v36  ;;  %v5864_v15 = vsel %vm5384_vm4, %v13516_v46, %v5768_v24 }
 0x3f7   : > { %8279 = vmatprep.mubr.msk.bf16.mxu1 %vm3424_vm7, %v6006_v2  ;;  %6599 = vst.msk [vmem:[%s13561_s26 + $0x20] sm:$0xff] %vm6594_vm13, %v6228_v23  ;;  %v6239_v7 = vadd.f32 %v8198_v34, %v13551_v59  ;;  %v5862_v63 = vsel %vm5382_vm3, %v13522_v45, %v5766_v52  ;;  %v5960_v46 = vmul.f32 1.050701, %v5864_v15 }
 0x3f8   : > { %8280 = vmatmul.mubr.msk.bf16.gmra.mxu1 %vm3424_vm7, %v6007_v53  ;;  %v6230_v5 = vpop.f32.mrf.mxu1  ;;  %v9503_v56 = vpop.eup %9502  ;;  %v5865_v44 = vsel %vm5385_vm2, %v13526_v1, %v5769_v16  ;;  %v5958_v12 = vmul.f32 1.050701, %v5862_v63 }
 0x3f9   : > { %6602 = vst.msk [vmem:[%s13561_s26 + $0x38] sm:$0xff] %vm6594_vm13, %v6239_v7  ;;  %v6231_v19 = vadd.f32 %v13551_v59, %v6230_v5  ;;  %v7615_v50 = vadd.f32 -1.0, %v9503_v56  ;;  %v5961_v6 = vmul.f32 1.050701, %v5865_v44 }
 0x3fa   : > { %v8201_v51 = vpop.f32.mrf.mxu1 }
 0x3fb   : > { %6600 = vst.msk [vmem:[%s13561_s26 + $0x28] sm:$0xff] %vm6594_vm13, %v6231_v19  ;;  %v6252_v49 = vadd.f32 %v8201_v51, %v13551_v59  ;;  %v5767_v39 = vmul.f32 1.6732632, %v7615_v50  ;;  %v6009_v18 = vpack.c.bf16 %v5961_v6, %v5960_v46 }
 0x3fc   : > { %v6243_v28 = vpop.f32.mrf.mxu1 }
 0x3fd   : > { %6605 = vst.msk [vmem:[%s13561_s26 + $0x50] sm:$0xff] %vm6594_vm13, %v6252_v49  ;;  %v6244_v22 = vadd.f32 %v13551_v59, %v6243_v28  ;;  %v5863_v11 = vsel %vm5383_vm5, %v13541_v37, %v5767_v39 }
 0x3fe   : > { %v8202_v31 = vpop.f32.mrf.mxu1  ;;  %v5959_v27 = vmul.f32 1.050701, %v5863_v11 }
 0x3ff   : > { %6603 = vst.msk [vmem:[%s13561_s26 + $0x40] sm:$0xff] %vm6594_vm13, %v6244_v22  ;;  %v6255_v1 = vadd.f32 %v8202_v31, %v13551_v59 }
 0x400   : > { %v6246_v3 = vpop.f32.mrf.mxu1  ;;  %v6008_v60 = vpack.c.bf16 %v5959_v27, %v5958_v12 }
 0x401   : > { %6606 = vst.msk [vmem:[%s13561_s26 + $0x58] sm:$0xff] %vm6594_vm13, %v6255_v1  ;;  %v6247_v45 = vadd.f32 %v13551_v59, %v6246_v3 }
 0x402   : > { %v8205_v62 = vpop.f32.mrf.mxu1  ;;  %8283 = vmatprep.mubr.msk.bf16.mxu1 %vm3424_vm7, %v6008_v60 }
 0x403   : > { %6604 = vst.msk [vmem:[%s13561_s26 + $0x48] sm:$0xff] %vm6594_vm13, %v6247_v45  ;;  %v6268_v37 = vadd.f32 %v8205_v62, %v13551_v59  ;;  %8284 = vmatmul.mubr.msk.bf16.gmra.mxu1 %vm3424_vm7, %v6009_v18 }
 0x404   : > { %v6259_v21 = vpop.f32.mrf.mxu1 }
 0x405   : > { %6609 = vst.msk [vmem:[%s13561_s26 + $0x70] sm:$0xff] %vm6594_vm13, %v6268_v37  ;;  %v6260_v8 = vadd.f32 %v13551_v59, %v6259_v21 }
 0x406   : > { %v8206_v43 = vpop.f32.mrf.mxu1 }
 0x407   : > { %6607 = vst.msk [vmem:[%s13561_s26 + $0x60] sm:$0xff] %vm6594_vm13, %v6260_v8  ;;  %v6271_v17 = vadd.f32 %v8206_v43, %v13551_v59 }
 0x408   : > { %v6262_v13 = vpop.f32.mrf.mxu1 }
 0x409   : > { %6610 = vst.msk [vmem:[%s13561_s26 + $0x78] sm:$0xff] %vm6594_vm13, %v6271_v17  ;;  %v6263_v0 = vadd.f32 %v13551_v59, %v6262_v13 }
 0x40a   : > { %v8209_v4 = vpop.f32.mrf.mxu1 }
 0x40b   : > { %6608 = vst.msk [vmem:[%s13561_s26 + $0x68] sm:$0xff] %vm6594_vm13, %v6263_v0  ;;  %v6284_v25 = vadd.f32 %v8209_v4, %v13551_v59 }
 0x40c   : > { %v6275_v55 = vpop.f32.mrf.mxu1 }
 0x40d   : > { %6613 = vst.msk [vmem:[%s13561_s26 + $0x90] sm:$0xff] %vm6594_vm13, %v6284_v25  ;;  %v6276_v33 = vadd.f32 %v13551_v59, %v6275_v55 }
 0x40e   : > { %v8210_v61 = vpop.f32.mrf.mxu1 }
 0x40f   : > { %6611 = vst.msk [vmem:[%s13561_s26 + $0x80] sm:$0xff] %vm6594_vm13, %v6276_v33  ;;  %v6287_v30 = vadd.f32 %v8210_v61, %v13551_v59 }
 0x410   : > { %v6278_v29 = vpop.f32.mrf.mxu1 }
 0x411   : > { %6614 = vst.msk [vmem:[%s13561_s26 + $0x98] sm:$0xff] %vm6594_vm13, %v6287_v30  ;;  %v6279_v48 = vadd.f32 %v13551_v59, %v6278_v29 }
 0x412   : > { %v8213_v40 = vpop.f32.mrf.mxu1 }
 0x413   : > { %6612 = vst.msk [vmem:[%s13561_s26 + $0x88] sm:$0xff] %vm6594_vm13, %v6279_v48  ;;  %v6300_v57 = vadd.f32 %v8213_v40, %v13551_v59 }
 0x414   : > { %v6291_v47 = vpop.f32.mrf.mxu1 }
 0x415   : > { %6617 = vst.msk [vmem:[%s13561_s26 + $0xb0] sm:$0xff] %vm6594_vm13, %v6300_v57  ;;  %v6292_v20 = vadd.f32 %v13551_v59, %v6291_v47 }
 0x416   : > { %v8214_v26 = vpop.f32.mrf.mxu1 }
 0x417   : > { %6615 = vst.msk [vmem:[%s13561_s26 + $0xa0] sm:$0xff] %vm6594_vm13, %v6292_v20  ;;  %v6303_v38 = vadd.f32 %v8214_v26, %v13551_v59 }
 0x418   : > { %v6294_v9 = vpop.f32.mrf.mxu1 }
 0x419   : > { %6618 = vst.msk [vmem:[%s13561_s26 + $0xb8] sm:$0xff] %vm6594_vm13, %v6303_v38  ;;  %v6295_v42 = vadd.f32 %v13551_v59, %v6294_v9 }
 0x41b   : > { %6616 = vst.msk [vmem:[%s13561_s26 + $0xa8] sm:$0xff] %vm6594_vm13, %v6295_v42  ;;  %v8217_v10 = vpop.f32.mrf.mxu1 }
 0x41c   : > { %v6316_v58 = vadd.f32 %v8217_v10, %v13551_v59 }
 0x41d   : > { %v6307_v41 = vpop.f32.mrf.mxu1 }
 0x41e   : > { %6621 = vst.msk [vmem:[%s13561_s26 + $0xd0] sm:$0xff] %vm6594_vm13, %v6316_v58  ;;  %v6308_v14 = vadd.f32 %v13551_v59, %v6307_v41 }
 0x41f   : > { %v8218_v2 = vpop.f32.mrf.mxu1 }
 0x420   : > { %6619 = vst.msk [vmem:[%s13561_s26 + $0xc0] sm:$0xff] %vm6594_vm13, %v6308_v14  ;;  %v6319_v23 = vadd.f32 %v8218_v2, %v13551_v59 }
 0x421   : > { %v6310_v53 = vpop.f32.mrf.mxu1 }
 0x422   : > { %6622 = vst.msk [vmem:[%s13561_s26 + $0xd8] sm:$0xff] %vm6594_vm13, %v6319_v23  ;;  %v6311_v32 = vadd.f32 %v13551_v59, %v6310_v53 }
 0x423   : > { %v8221_v34 = vpop.f32.mrf.mxu1 }
 0x424   : > { %6620 = vst.msk [vmem:[%s13561_s26 + $0xc8] sm:$0xff] %vm6594_vm13, %v6311_v32  ;;  %v6332_v54 = vadd.f32 %v8221_v34, %v13551_v59 }
 0x425   : > { %v6323_v35 = vpop.f32.mrf.mxu1 }
 0x426   : > { %6625 = vst.msk [vmem:[%s13561_s26 + $0xf0] sm:$0xff] %vm6594_vm13, %v6332_v54  ;;  %v6324_v7 = vadd.f32 %v13551_v59, %v6323_v35 }
 0x427   : > { %v8222_v36 = vpop.f32.mrf.mxu1 }
 0x428   : > { %6623 = vst.msk [vmem:[%s13561_s26 + $0xe0] sm:$0xff] %vm6594_vm13, %v6324_v7  ;;  %v6335_v5 = vadd.f32 %v8222_v36, %v13551_v59 }
 0x429   : > { %v6326_v19 = vpop.f32.mrf.mxu1 }
 0x42a   : > { %6626 = vst.msk [vmem:[%s13561_s26 + $0xf8] sm:$0xff] %vm6594_vm13, %v6335_v5  ;;  %v6327_v52 = vadd.f32 %v13551_v59, %v6326_v19 }
 0x42c   : > { %v8225_v16 = vpop.f32.mrf.mxu1  ;;  %6624 = vst.msk [vmem:[%s13561_s26 + $0xe8] sm:$0xff] %vm6594_vm13, %v6327_v52 }
 0x42d   : > { %v6348_v51 = vadd.f32 %v8225_v16, %v13551_v59 }
 0x42e   : > { %v6339_v56 = vpop.f32.mrf.mxu1 }
 0x42f   : > { %6629 = vst.msk [vmem:[%s13561_s26 + $0x110] sm:$0xff] %vm6594_vm13, %v6348_v51  ;;  %v6340_v24 = vadd.f32 %v13551_v59, %v6339_v56 }
 0x430   : > { %v8226_v49 = vpop.f32.mrf.mxu1 }
 0x431   : > { %6627 = vst.msk [vmem:[%s13561_s26 + $0x100] sm:$0xff] %vm6594_vm13, %v6340_v24  ;;  %v6351_v50 = vadd.f32 %v8226_v49, %v13551_v59 }
 0x432   : > { %v6342_v28 = vpop.f32.mrf.mxu1 }
 0x433   : > { %6630 = vst.msk [vmem:[%s13561_s26 + $0x118] sm:$0xff] %vm6594_vm13, %v6351_v50  ;;  %v6343_v44 = vadd.f32 %v13551_v59, %v6342_v28 }
 0x434   : > { %v8229_v22 = vpop.f32.mrf.mxu1 }
 0x435   : > { %6628 = vst.msk [vmem:[%s13561_s26 + $0x108] sm:$0xff] %vm6594_vm13, %v6343_v44  ;;  %v6364_v63 = vadd.f32 %v8229_v22, %v13551_v59 }
 0x436   : > { %v6355_v39 = vpop.f32.mrf.mxu1 }
 0x437   : > { %6633 = vst.msk [vmem:[%s13561_s26 + $0x130] sm:$0xff] %vm6594_vm13, %v6364_v63  ;;  %v6356_v31 = vadd.f32 %v13551_v59, %v6355_v39 }
 0x438   : > { %v8230_v15 = vpop.f32.mrf.mxu1 }
 0x439   : > { %6631 = vst.msk [vmem:[%s13561_s26 + $0x120] sm:$0xff] %vm6594_vm13, %v6356_v31  ;;  %v6367_v1 = vadd.f32 %v8230_v15, %v13551_v59 }
 0x43a   : > { %v6358_v6 = vpop.f32.mrf.mxu1 }
 0x43b   : > { %6634 = vst.msk [vmem:[%s13561_s26 + $0x138] sm:$0xff] %vm6594_vm13, %v6367_v1  ;;  %v6359_v11 = vadd.f32 %v13551_v59, %v6358_v6 }
 0x43c   : > { %v8233_v3 = vpop.f32.mrf.mxu1 }
 0x43d   : > { %6632 = vst.msk [vmem:[%s13561_s26 + $0x128] sm:$0xff] %vm6594_vm13, %v6359_v11  ;;  %v6380_v12 = vadd.f32 %v8233_v3, %v13551_v59 }
 0x43e   : > { %v6371_v27 = vpop.f32.mrf.mxu1 }
 0x43f   : > { %6637 = vst.msk [vmem:[%s13561_s26 + $0x150] sm:$0xff] %vm6594_vm13, %v6380_v12  ;;  %v6372_v45 = vadd.f32 %v13551_v59, %v6371_v27 }
 0x440   : > { %v8234_v46 = vpop.f32.mrf.mxu1 }
 0x441   : > { %6635 = vst.msk [vmem:[%s13561_s26 + $0x140] sm:$0xff] %vm6594_vm13, %v6372_v45  ;;  %v6383_v60 = vadd.f32 %v8234_v46, %v13551_v59 }
 0x442   : > { %v6374_v18 = vpop.f32.mrf.mxu1 }
 0x443   : > { %6638 = vst.msk [vmem:[%s13561_s26 + $0x158] sm:$0xff] %vm6594_vm13, %v6383_v60  ;;  %v6375_v62 = vadd.f32 %v13551_v59, %v6374_v18 }
 0x444   : > { %v8237_v37 = vpop.f32.mrf.mxu1 }
 0x445   : > { %6636 = vst.msk [vmem:[%s13561_s26 + $0x148] sm:$0xff] %vm6594_vm13, %v6375_v62  ;;  %v6396_v21 = vadd.f32 %v8237_v37, %v13551_v59 }
 0x446   : > { %v6387_v8 = vpop.f32.mrf.mxu1 }
 0x447   : > { %6641 = vst.msk [vmem:[%s13561_s26 + $0x170] sm:$0xff] %vm6594_vm13, %v6396_v21  ;;  %v6388_v43 = vadd.f32 %v13551_v59, %v6387_v8 }
 0x448   : > { %v8238_v17 = vpop.f32.mrf.mxu1 }
 0x449   : > { %6639 = vst.msk [vmem:[%s13561_s26 + $0x160] sm:$0xff] %vm6594_vm13, %v6388_v43  ;;  %v6399_v13 = vadd.f32 %v8238_v17, %v13551_v59 }
 0x44a   : > { %v6390_v0 = vpop.f32.mrf.mxu1 }
 0x44b   : > { %6642 = vst.msk [vmem:[%s13561_s26 + $0x178] sm:$0xff] %vm6594_vm13, %v6399_v13  ;;  %v6391_v4 = vadd.f32 %v13551_v59, %v6390_v0 }
 0x44c   : > { %v8241_v25 = vpop.f32.mrf.mxu1 }
 0x44d   : > { %6640 = vst.msk [vmem:[%s13561_s26 + $0x168] sm:$0xff] %vm6594_vm13, %v6391_v4  ;;  %v6412_v55 = vadd.f32 %v8241_v25, %v13551_v59 }
 0x44e   : > { %v6403_v33 = vpop.f32.mrf.mxu1 }
 0x44f   : > { %6645 = vst.msk [vmem:[%s13561_s26 + $0x190] sm:$0xff] %vm6594_vm13, %v6412_v55  ;;  %v6404_v61 = vadd.f32 %v13551_v59, %v6403_v33 }
 0x450   : > { %v8242_v30 = vpop.f32.mrf.mxu1 }
 0x451   : > { %6643 = vst.msk [vmem:[%s13561_s26 + $0x180] sm:$0xff] %vm6594_vm13, %v6404_v61  ;;  %v6415_v29 = vadd.f32 %v8242_v30, %v13551_v59 }
 0x452   : > { %v6406_v48 = vpop.f32.mrf.mxu1 }
 0x453   : > { %6646 = vst.msk [vmem:[%s13561_s26 + $0x198] sm:$0xff] %vm6594_vm13, %v6415_v29  ;;  %v6407_v40 = vadd.f32 %v13551_v59, %v6406_v48 }
 0x454   : > { %v8245_v57 = vpop.f32.mrf.mxu1 }
 0x455   : > { %6644 = vst.msk [vmem:[%s13561_s26 + $0x188] sm:$0xff] %vm6594_vm13, %v6407_v40  ;;  %v6428_v47 = vadd.f32 %v8245_v57, %v13551_v59 }
 0x456   : > { %v6419_v20 = vpop.f32.mrf.mxu1 }
 0x457   : > { %6649 = vst.msk [vmem:[%s13561_s26 + $0x1b0] sm:$0xff] %vm6594_vm13, %v6428_v47  ;;  %v6420_v26 = vadd.f32 %v13551_v59, %v6419_v20 }
 0x458   : > { %v8246_v38 = vpop.f32.mrf.mxu1 }
 0x459   : > { %6647 = vst.msk [vmem:[%s13561_s26 + $0x1a0] sm:$0xff] %vm6594_vm13, %v6420_v26  ;;  %v6431_v9 = vadd.f32 %v8246_v38, %v13551_v59 }
 0x45a   : > { %v6422_v42 = vpop.f32.mrf.mxu1 }
 0x45b   : > { %6650 = vst.msk [vmem:[%s13561_s26 + $0x1b8] sm:$0xff] %vm6594_vm13, %v6431_v9  ;;  %v6423_v10 = vadd.f32 %v13551_v59, %v6422_v42 }
 0x45d   : > { %6648 = vst.msk [vmem:[%s13561_s26 + $0x1a8] sm:$0xff] %vm6594_vm13, %v6423_v10  ;;  %v8249_v58 = vpop.f32.mrf.mxu1 }
 0x45e   : > { %v6444_v41 = vadd.f32 %v8249_v58, %v13551_v59 }
 0x45f   : > { %v6435_v14 = vpop.f32.mrf.mxu1 }
 0x460   : > { %6653 = vst.msk [vmem:[%s13561_s26 + $0x1d0] sm:$0xff] %vm6594_vm13, %v6444_v41  ;;  %v6436_v2 = vadd.f32 %v13551_v59, %v6435_v14 }
 0x461   : > { %v8250_v23 = vpop.f32.mrf.mxu1 }
 0x462   : > { %6651 = vst.msk [vmem:[%s13561_s26 + $0x1c0] sm:$0xff] %vm6594_vm13, %v6436_v2  ;;  %v6447_v53 = vadd.f32 %v8250_v23, %v13551_v59 }
 0x463   : > { %v6438_v32 = vpop.f32.mrf.mxu1 }
 0x464   : > { %6654 = vst.msk [vmem:[%s13561_s26 + $0x1d8] sm:$0xff] %vm6594_vm13, %v6447_v53  ;;  %v6439_v34 = vadd.f32 %v13551_v59, %v6438_v32 }
 0x465   : > { %v8253_v54 = vpop.f32.mrf.mxu1 }
 0x466   : > { %6652 = vst.msk [vmem:[%s13561_s26 + $0x1c8] sm:$0xff] %vm6594_vm13, %v6439_v34  ;;  %v6460_v35 = vadd.f32 %v8253_v54, %v13551_v59 }
 0x467   : > { %v6451_v7 = vpop.f32.mrf.mxu1 }
 0x468   : > { %6657 = vst.msk [vmem:[%s13561_s26 + $0x1f0] sm:$0xff] %vm6594_vm13, %v6460_v35  ;;  %v6452_v36 = vadd.f32 %v13551_v59, %v6451_v7 }
 0x469   : > { %v8254_v5 = vpop.f32.mrf.mxu1 }
 0x46a   : > { %6655 = vst.msk [vmem:[%s13561_s26 + $0x1e0] sm:$0xff] %vm6594_vm13, %v6452_v36  ;;  %v6463_v19 = vadd.f32 %v8254_v5, %v13551_v59 }
 0x46b   : > { %v6454_v52 = vpop.f32.mrf.mxu1 }
 0x46c   : > { %6658 = vst.msk [vmem:[%s13561_s26 + $0x1f8] sm:$0xff] %vm6594_vm13, %v6463_v19  ;;  %v6455_v16 = vadd.f32 %v13551_v59, %v6454_v52 }
 0x46e   : > { %v8257_v51 = vpop.f32.mrf.mxu1  ;;  %6656 = vst.msk [vmem:[%s13561_s26 + $0x1e8] sm:$0xff] %vm6594_vm13, %v6455_v16 }
 0x46f   : > { %v6476_v56 = vadd.f32 %v8257_v51, %v13551_v59 }
 0x470   : > { %v6467_v24 = vpop.f32.mrf.mxu1 }
 0x471   : > { %6661 = vst.msk [vmem:[%s13561_s26 + $0x210] sm:$0xff] %vm6594_vm13, %v6476_v56  ;;  %v6468_v49 = vadd.f32 %v13551_v59, %v6467_v24 }
 0x472   : > { %v8258_v50 = vpop.f32.mrf.mxu1 }
 0x473   : > { %6659 = vst.msk [vmem:[%s13561_s26 + $0x200] sm:$0xff] %vm6594_vm13, %v6468_v49  ;;  %v6479_v28 = vadd.f32 %v8258_v50, %v13551_v59 }
 0x474   : > { %v6470_v44 = vpop.f32.mrf.mxu1 }
 0x475   : > { %6662 = vst.msk [vmem:[%s13561_s26 + $0x218] sm:$0xff] %vm6594_vm13, %v6479_v28  ;;  %v6471_v22 = vadd.f32 %v13551_v59, %v6470_v44 }
 0x477   : > { %6660 = vst.msk [vmem:[%s13561_s26 + $0x208] sm:$0xff] %vm6594_vm13, %v6471_v22 }
 0x47c   : > { %v8261_v63 = vpop.f32.mrf.mxu1 }
 0x47d   : > { %v6492_v39 = vadd.f32 %v8261_v63, %v13551_v59 }
 0x47e   : > { %v6483_v31 = vpop.f32.mrf.mxu1 }
 0x47f   : > { %6665 = vst.msk [vmem:[%s13561_s26 + $0x230] sm:$0xff] %vm6594_vm13, %v6492_v39  ;;  %v6484_v15 = vadd.f32 %v13551_v59, %v6483_v31 }
 0x480   : > { %v8262_v1 = vpop.f32.mrf.mxu1 }
 0x481   : > { %6663 = vst.msk [vmem:[%s13561_s26 + $0x220] sm:$0xff] %vm6594_vm13, %v6484_v15  ;;  %v6495_v6 = vadd.f32 %v8262_v1, %v13551_v59 }
 0x482   : > { %v6486_v11 = vpop.f32.mrf.mxu1 }
 0x483   : > { %6666 = vst.msk [vmem:[%s13561_s26 + $0x238] sm:$0xff] %vm6594_vm13, %v6495_v6  ;;  %v6487_v3 = vadd.f32 %v13551_v59, %v6486_v11 }
 0x485   : > { %6664 = vst.msk [vmem:[%s13561_s26 + $0x228] sm:$0xff] %vm6594_vm13, %v6487_v3 }
 0x48d   : > { %v8265_v12 = vpop.f32.mrf.mxu1 }
 0x48e   : > { %v6508_v27 = vadd.f32 %v8265_v12, %v13551_v59 }
 0x48f   : > { %v6499_v45 = vpop.f32.mrf.mxu1 }
 0x490   : > { %6669 = vst.msk [vmem:[%s13561_s26 + $0x250] sm:$0xff] %vm6594_vm13, %v6508_v27  ;;  %v6500_v46 = vadd.f32 %v13551_v59, %v6499_v45 }
 0x491   : > { %v8266_v60 = vpop.f32.mrf.mxu1 }
 0x492   : > { %6667 = vst.msk [vmem:[%s13561_s26 + $0x240] sm:$0xff] %vm6594_vm13, %v6500_v46  ;;  %v6511_v18 = vadd.f32 %v8266_v60, %v13551_v59 }
 0x493   : > { %v6502_v62 = vpop.f32.mrf.mxu1 }
 0x494   : > { %6670 = vst.msk [vmem:[%s13561_s26 + $0x258] sm:$0xff] %vm6594_vm13, %v6511_v18  ;;  %v6503_v37 = vadd.f32 %v13551_v59, %v6502_v62 }
 0x496   : > { %6668 = vst.msk [vmem:[%s13561_s26 + $0x248] sm:$0xff] %vm6594_vm13, %v6503_v37 }
 0x499   : > { %v8269_v21 = vpop.f32.mrf.mxu1 }
 0x49a   : > { %v6524_v8 = vadd.f32 %v8269_v21, %v13551_v59 }
 0x49b   : > { %v6515_v43 = vpop.f32.mrf.mxu1 }
 0x49c   : > { %6673 = vst.msk [vmem:[%s13561_s26 + $0x270] sm:$0xff] %vm6594_vm13, %v6524_v8  ;;  %v6516_v17 = vadd.f32 %v13551_v59, %v6515_v43 }
 0x49d   : > { %v8270_v13 = vpop.f32.mrf.mxu1 }
 0x49e   : > { %6671 = vst.msk [vmem:[%s13561_s26 + $0x260] sm:$0xff] %vm6594_vm13, %v6516_v17  ;;  %v6527_v0 = vadd.f32 %v8270_v13, %v13551_v59 }
 0x49f   : > { %v6518_v4 = vpop.f32.mrf.mxu1 }
 0x4a0   : > { %6674 = vst.msk [vmem:[%s13561_s26 + $0x278] sm:$0xff] %vm6594_vm13, %v6527_v0  ;;  %v6519_v25 = vadd.f32 %v13551_v59, %v6518_v4 }
 0x4a2   : > { %6672 = vst.msk [vmem:[%s13561_s26 + $0x268] sm:$0xff] %vm6594_vm13, %v6519_v25 }
 0x4a7   : > { %v8273_v55 = vpop.f32.mrf.mxu1 }
 0x4a8   : > { %v6540_v33 = vadd.f32 %v8273_v55, %v13551_v59 }
 0x4a9   : > { %v6531_v61 = vpop.f32.mrf.mxu1 }
 0x4aa   : > { %6677 = vst.msk [vmem:[%s13561_s26 + $0x290] sm:$0xff] %vm6594_vm13, %v6540_v33  ;;  %v6532_v30 = vadd.f32 %v13551_v59, %v6531_v61 }
 0x4ab   : > { %v8274_v29 = vpop.f32.mrf.mxu1 }
 0x4ac   : > { %6675 = vst.msk [vmem:[%s13561_s26 + $0x280] sm:$0xff] %vm6594_vm13, %v6532_v30  ;;  %v6543_v48 = vadd.f32 %v8274_v29, %v13551_v59 }
 0x4ad   : > { %v6534_v40 = vpop.f32.mrf.mxu1 }
 0x4ae   : > { %6678 = vst.msk [vmem:[%s13561_s26 + $0x298] sm:$0xff] %vm6594_vm13, %v6543_v48  ;;  %v6535_v57 = vadd.f32 %v13551_v59, %v6534_v40 }
 0x4af   : > { %v8277_v47 = vpop.f32.mrf.mxu1 }
 0x4b0   : > { %6676 = vst.msk [vmem:[%s13561_s26 + $0x288] sm:$0xff] %vm6594_vm13, %v6535_v57  ;;  %v6556_v20 = vadd.f32 %v8277_v47, %v13551_v59 }
 0x4b1   : > { %v6547_v26 = vpop.f32.mrf.mxu1 }
 0x4b2   : > { %6681 = vst.msk [vmem:[%s13561_s26 + $0x2b0] sm:$0xff] %vm6594_vm13, %v6556_v20  ;;  %v6548_v38 = vadd.f32 %v13551_v59, %v6547_v26 }
 0x4b3   : > { %v8278_v9 = vpop.f32.mrf.mxu1 }
 0x4b4   : > { %6679 = vst.msk [vmem:[%s13561_s26 + $0x2a0] sm:$0xff] %vm6594_vm13, %v6548_v38  ;;  %v6559_v42 = vadd.f32 %v8278_v9, %v13551_v59 }
 0x4b5   : > { %v6550_v10 = vpop.f32.mrf.mxu1 }
 0x4b6   : > { %6682 = vst.msk [vmem:[%s13561_s26 + $0x2b8] sm:$0xff] %vm6594_vm13, %v6559_v42  ;;  %v6551_v58 = vadd.f32 %v13551_v59, %v6550_v10 }
 0x4b8   : > { %v8281_v41 = vpop.f32.mrf.mxu1  ;;  %6680 = vst.msk [vmem:[%s13561_s26 + $0x2a8] sm:$0xff] %vm6594_vm13, %v6551_v58 }
 0x4b9   : > { %v6572_v14 = vadd.f32 %v8281_v41, %v13551_v59 }
 0x4ba   : > { %v6563_v2 = vpop.f32.mrf.mxu1 }
 0x4bb   : > { %6685 = vst.msk [vmem:[%s13561_s26 + $0x2d0] sm:$0xff] %vm6594_vm13, %v6572_v14  ;;  %v6564_v23 = vadd.f32 %v13551_v59, %v6563_v2 }
 0x4bc   : > { %v8282_v53 = vpop.f32.mrf.mxu1 }
 0x4bd   : > { %6683 = vst.msk [vmem:[%s13561_s26 + $0x2c0] sm:$0xff] %vm6594_vm13, %v6564_v23  ;;  %v6575_v32 = vadd.f32 %v8282_v53, %v13551_v59 }
 0x4be   : > { %v6566_v34 = vpop.f32.mrf.mxu1 }
 0x4bf   : > { %6686 = vst.msk [vmem:[%s13561_s26 + $0x2d8] sm:$0xff] %vm6594_vm13, %v6575_v32  ;;  %v6567_v54 = vadd.f32 %v13551_v59, %v6566_v34 }
 0x4c1   : > { %6684 = vst.msk [vmem:[%s13561_s26 + $0x2c8] sm:$0xff] %vm6594_vm13, %v6567_v54 }
 0x4c3   : > { %v8285_v35 = vpop.f32.mrf.mxu1 }
 0x4c4   : > { %v6588_v7 = vadd.f32 %v8285_v35, %v13551_v59 }
 0x4c5   : > { %v6579_v36 = vpop.f32.mrf.mxu1 }
 0x4c6   : > { %6689 = vst.msk [vmem:[%s13561_s26 + $0x2f0] sm:$0xff] %vm6594_vm13, %v6588_v7  ;;  %v6580_v5 = vadd.f32 %v13551_v59, %v6579_v36 }
 0x4c7   : > { %v8286_v19 = vpop.f32.mrf.mxu1 }
 0x4c8   : > { %6687 = vst.msk [vmem:[%s13561_s26 + $0x2e0] sm:$0xff] %vm6594_vm13, %v6580_v5  ;;  %v6591_v52 = vadd.f32 %v8286_v19, %v13551_v59  ;;  %6697 = sbr.rel (!%p9685_p4) target bundleno = 1293 (0x50d), region = 68 }
 0x4c9   : > { %v6582_v16 = vpop.f32.mrf.mxu1 }
 0x4ca   : > { %6690 = vst.msk [vmem:[%s13561_s26 + $0x2f8] sm:$0xff] %vm6594_vm13, %v6591_v52  ;;  %v6583_v51 = vadd.f32 %v13551_v59, %v6582_v16 }
 0x4cc   : > { %6688 = vst.msk [vmem:[%s13561_s26 + $0x2e8] sm:$0xff] %vm6594_vm13, %v6583_v51 }
 0x4cd   : > { %s14203_s23 = smov (!%p6700_p8, %s6699_s23), 96 }
 0x4ce   : > { %s7669_s13 = sshll.u32 %s14203_s23, 7 }
 0x4cf   : > { %p7672_p9 = scmp.eq.s32.totalorder %s7669_s13, 0 }
 0x4d0   : > { %s13880_s14 = sshrl.u32 (!%p7672_p9), %s14203_s23, 6 }
 0x4d1   : > { %6708 = sbr.rel (%p7672_p9) target bundleno = 1293 (0x50d), region = 72  ;;  %p7673_p10 = scmp.le.s32.totalorder (!%p7672_p9), %s13880_s14, 0 }
 0x4d6   : > { %7121 = sbr.rel (%p7673_p10) target bundleno = 1276 (0x4fc), region = 151  ;;  %s14194_s20 = smov (!%p7673_p10), %s13874_s12 }
 0x4d7   : > { %s14195_s25 = smov (!%p7673_p10), %s13561_s26  ;;  %s13889_s30 = smov (!%p7673_p10), 0  }
 0x4d8   : > { %s13891_s17 = smov (!%p7673_p10), 0  }
 0x4db LB: >> { %v6897_v59 = vld [vmem:[%s9572_s25] sm:$0xff]  ;;  %v6899_v56 = vld [vmem:[%s9572_s25 + $0x8] sm:$0xff]  ;;  %v6901_v24 = vld [vmem:[%s9572_s25 + $0x10] sm:$0xff]  ;;  %s7025_s15 = sadd.s32 1, %s9576_s30  ;;  %s6891_s17 = sadd.s32 1, %s9580_s17   ;;  %s9580_s17 = sphi %s13891_s17, %s6891_s17   ;;  %s9576_s30 = sphi %s13889_s30, %s14198_s30   ;;  %s9572_s25 = sphi %s14195_s25, %s14197_s25   ;;  %s9568_s20 = sphi %s14194_s20, %s14196_s20  }
 0x4dc   : >> { %6898 = vst [vmem:[%s9568_s20] sm:$0xff] %v6897_v59  ;;  %6900 = vst [vmem:[%s9568_s20 + $0x8] sm:$0xff] %v6899_v56  ;;  %v6903_v49 = vld [vmem:[%s9572_s25 + $0x18] sm:$0xff]  ;;  %v6905_v50 = vld [vmem:[%s9572_s25 + $0x20] sm:$0xff]  ;;  %p7026_p11 = scmp.ge.s32.totalorder %s7025_s15, %s13880_s14  ;;  %p6890_p12 = scmp.ge.s32.totalorder %s6891_s17, %s13880_s14 }
 0x4dd   : >> { %6902 = vst [vmem:[%s9568_s20 + $0x10] sm:$0xff] %v6901_v24  ;;  %v6907_v28 = vld [vmem:[%s9572_s25 + $0x28] sm:$0xff]  ;;  %6904 = vst [vmem:[%s9568_s20 + $0x18] sm:$0xff] %v6903_v49  ;;  %v6909_v44 = vld [vmem:[%s9572_s25 + $0x30] sm:$0xff] }
 0x4de   : >> { %6906 = vst [vmem:[%s9568_s20 + $0x20] sm:$0xff] %v6905_v50  ;;  %6908 = vst [vmem:[%s9568_s20 + $0x28] sm:$0xff] %v6907_v28  ;;  %v6911_v22 = vld [vmem:[%s9572_s25 + $0x38] sm:$0xff]  ;;  %v6913_v63 = vld [vmem:[%s9572_s25 + $0x40] sm:$0xff]  ;;  %s14205_s15 = smov (%p7026_p11, %s7025_s15), 0 }
 0x4df   : >> { %6910 = vst [vmem:[%s9568_s20 + $0x30] sm:$0xff] %v6909_v44  ;;  %6912 = vst [vmem:[%s9568_s20 + $0x38] sm:$0xff] %v6911_v22  ;;  %v6915_v39 = vld [vmem:[%s9572_s25 + $0x48] sm:$0xff]  ;;  %v6917_v31 = vld [vmem:[%s9572_s25 + $0x50] sm:$0xff]  ;;  %s7674_s16 = sshll.u32 %s14205_s15, 9  ;;  %s14198_s30 = smov %s14205_s15 }
 0x4e0   : >> { %6914 = vst [vmem:[%s9568_s20 + $0x40] sm:$0xff] %v6913_v63  ;;  %v6919_v15 = vld [vmem:[%s9572_s25 + $0x58] sm:$0xff]  ;;  %6916 = vst [vmem:[%s9568_s20 + $0x48] sm:$0xff] %v6915_v39  ;;  %v6921_v1 = vld [vmem:[%s9572_s25 + $0x60] sm:$0xff]  ;;  %s13947_s19 = scalar_lea.vmem %s13561_s26, %s7674_s16 [#allocation2]   ;;  %s13950_s22 = scalar_lea.vmem %s13874_s12, %s7674_s16  }
 0x4e1   : >> { %6918 = vst [vmem:[%s9568_s20 + $0x50] sm:$0xff] %v6917_v31  ;;  %6920 = vst [vmem:[%s9568_s20 + $0x58] sm:$0xff] %v6919_v15  ;;  %v6923_v6 = vld [vmem:[%s9572_s25 + $0x68] sm:$0xff]  ;;  %v6925_v11 = vld [vmem:[%s9572_s25 + $0x70] sm:$0xff] }
 0x4e2   : >> { %6922 = vst [vmem:[%s9568_s20 + $0x60] sm:$0xff] %v6921_v1  ;;  %6924 = vst [vmem:[%s9568_s20 + $0x68] sm:$0xff] %v6923_v6  ;;  %v6927_v3 = vld [vmem:[%s9572_s25 + $0x78] sm:$0xff]  ;;  %v6929_v12 = vld [vmem:[%s9572_s25 + $0x80] sm:$0xff] }
 0x4e3   : >> { %6926 = vst [vmem:[%s9568_s20 + $0x70] sm:$0xff] %v6925_v11  ;;  %v6931_v27 = vld [vmem:[%s9572_s25 + $0x88] sm:$0xff]  ;;  %6928 = vst [vmem:[%s9568_s20 + $0x78] sm:$0xff] %v6927_v3  ;;  %v6933_v45 = vld [vmem:[%s9572_s25 + $0x90] sm:$0xff] }
 0x4e4   : >> { %6930 = vst [vmem:[%s9568_s20 + $0x80] sm:$0xff] %v6929_v12  ;;  %6932 = vst [vmem:[%s9568_s20 + $0x88] sm:$0xff] %v6931_v27  ;;  %v6935_v46 = vld [vmem:[%s9572_s25 + $0x98] sm:$0xff]  ;;  %v6937_v60 = vld [vmem:[%s9572_s25 + $0xa0] sm:$0xff] }
 0x4e5   : >> { %6934 = vst [vmem:[%s9568_s20 + $0x90] sm:$0xff] %v6933_v45  ;;  %6936 = vst [vmem:[%s9568_s20 + $0x98] sm:$0xff] %v6935_v46  ;;  %v6939_v18 = vld [vmem:[%s9572_s25 + $0xa8] sm:$0xff]  ;;  %v6941_v62 = vld [vmem:[%s9572_s25 + $0xb0] sm:$0xff] }
 0x4e6   : >> { %6938 = vst [vmem:[%s9568_s20 + $0xa0] sm:$0xff] %v6937_v60  ;;  %v6943_v37 = vld [vmem:[%s9572_s25 + $0xb8] sm:$0xff]  ;;  %6940 = vst [vmem:[%s9568_s20 + $0xa8] sm:$0xff] %v6939_v18  ;;  %v6945_v21 = vld [vmem:[%s9572_s25 + $0xc0] sm:$0xff] }
 0x4e7   : >> { %6942 = vst [vmem:[%s9568_s20 + $0xb0] sm:$0xff] %v6941_v62  ;;  %6944 = vst [vmem:[%s9568_s20 + $0xb8] sm:$0xff] %v6943_v37  ;;  %v6947_v8 = vld [vmem:[%s9572_s25 + $0xc8] sm:$0xff]  ;;  %v6949_v43 = vld [vmem:[%s9572_s25 + $0xd0] sm:$0xff] }
 0x4e8   : >> { %6946 = vst [vmem:[%s9568_s20 + $0xc0] sm:$0xff] %v6945_v21  ;;  %6948 = vst [vmem:[%s9568_s20 + $0xc8] sm:$0xff] %v6947_v8  ;;  %v6951_v17 = vld [vmem:[%s9572_s25 + $0xd8] sm:$0xff]  ;;  %v6953_v13 = vld [vmem:[%s9572_s25 + $0xe0] sm:$0xff] }
 0x4e9   : >> { %6950 = vst [vmem:[%s9568_s20 + $0xd0] sm:$0xff] %v6949_v43  ;;  %v6955_v0 = vld [vmem:[%s9572_s25 + $0xe8] sm:$0xff]  ;;  %6952 = vst [vmem:[%s9568_s20 + $0xd8] sm:$0xff] %v6951_v17  ;;  %v6957_v4 = vld [vmem:[%s9572_s25 + $0xf0] sm:$0xff] }
 0x4ea   : >> { %6954 = vst [vmem:[%s9568_s20 + $0xe0] sm:$0xff] %v6953_v13  ;;  %6956 = vst [vmem:[%s9568_s20 + $0xe8] sm:$0xff] %v6955_v0  ;;  %v6959_v25 = vld [vmem:[%s9572_s25 + $0xf8] sm:$0xff]  ;;  %v6961_v55 = vld [vmem:[%s9572_s25 + $0x100] sm:$0xff] }
 0x4eb   : >> { %6958 = vst [vmem:[%s9568_s20 + $0xf0] sm:$0xff] %v6957_v4  ;;  %6960 = vst [vmem:[%s9568_s20 + $0xf8] sm:$0xff] %v6959_v25  ;;  %v6963_v33 = vld [vmem:[%s9572_s25 + $0x108] sm:$0xff]  ;;  %v6965_v61 = vld [vmem:[%s9572_s25 + $0x110] sm:$0xff] }
 0x4ec   : >> { %6962 = vst [vmem:[%s9568_s20 + $0x100] sm:$0xff] %v6961_v55  ;;  %v6967_v30 = vld [vmem:[%s9572_s25 + $0x118] sm:$0xff]  ;;  %6964 = vst [vmem:[%s9568_s20 + $0x108] sm:$0xff] %v6963_v33  ;;  %v6969_v29 = vld [vmem:[%s9572_s25 + $0x120] sm:$0xff] }
 0x4ed   : >> { %6966 = vst [vmem:[%s9568_s20 + $0x110] sm:$0xff] %v6965_v61  ;;  %6968 = vst [vmem:[%s9568_s20 + $0x118] sm:$0xff] %v6967_v30  ;;  %v6971_v48 = vld [vmem:[%s9572_s25 + $0x128] sm:$0xff]  ;;  %v6973_v40 = vld [vmem:[%s9572_s25 + $0x130] sm:$0xff] }
 0x4ee   : >> { %6970 = vst [vmem:[%s9568_s20 + $0x120] sm:$0xff] %v6969_v29  ;;  %6972 = vst [vmem:[%s9568_s20 + $0x128] sm:$0xff] %v6971_v48  ;;  %v6975_v57 = vld [vmem:[%s9572_s25 + $0x138] sm:$0xff]  ;;  %v6977_v47 = vld [vmem:[%s9572_s25 + $0x140] sm:$0xff] }
 0x4ef   : >> { %6974 = vst [vmem:[%s9568_s20 + $0x130] sm:$0xff] %v6973_v40  ;;  %v6979_v20 = vld [vmem:[%s9572_s25 + $0x148] sm:$0xff]  ;;  %6976 = vst [vmem:[%s9568_s20 + $0x138] sm:$0xff] %v6975_v57  ;;  %v6981_v26 = vld [vmem:[%s9572_s25 + $0x150] sm:$0xff] }
 0x4f0   : >> { %6978 = vst [vmem:[%s9568_s20 + $0x140] sm:$0xff] %v6977_v47  ;;  %6980 = vst [vmem:[%s9568_s20 + $0x148] sm:$0xff] %v6979_v20  ;;  %v6983_v38 = vld [vmem:[%s9572_s25 + $0x158] sm:$0xff]  ;;  %v6985_v9 = vld [vmem:[%s9572_s25 + $0x160] sm:$0xff] }
 0x4f1   : >> { %6982 = vst [vmem:[%s9568_s20 + $0x150] sm:$0xff] %v6981_v26  ;;  %6984 = vst [vmem:[%s9568_s20 + $0x158] sm:$0xff] %v6983_v38  ;;  %v6987_v42 = vld [vmem:[%s9572_s25 + $0x168] sm:$0xff]  ;;  %v6989_v10 = vld [vmem:[%s9572_s25 + $0x170] sm:$0xff] }
 0x4f2   : >> { %6986 = vst [vmem:[%s9568_s20 + $0x160] sm:$0xff] %v6985_v9  ;;  %v6991_v58 = vld [vmem:[%s9572_s25 + $0x178] sm:$0xff]  ;;  %6988 = vst [vmem:[%s9568_s20 + $0x168] sm:$0xff] %v6987_v42  ;;  %v6993_v41 = vld [vmem:[%s9572_s25 + $0x180] sm:$0xff] }
 0x4f3   : >> { %6990 = vst [vmem:[%s9568_s20 + $0x170] sm:$0xff] %v6989_v10  ;;  %6992 = vst [vmem:[%s9568_s20 + $0x178] sm:$0xff] %v6991_v58  ;;  %v6995_v14 = vld [vmem:[%s9572_s25 + $0x188] sm:$0xff]  ;;  %v6997_v2 = vld [vmem:[%s9572_s25 + $0x190] sm:$0xff] }
 0x4f4   : >> { %6994 = vst [vmem:[%s9568_s20 + $0x180] sm:$0xff] %v6993_v41  ;;  %6996 = vst [vmem:[%s9568_s20 + $0x188] sm:$0xff] %v6995_v14  ;;  %v6999_v23 = vld [vmem:[%s9572_s25 + $0x198] sm:$0xff]  ;;  %v7001_v53 = vld [vmem:[%s9572_s25 + $0x1a0] sm:$0xff] }
 0x4f5   : >> { %6998 = vst [vmem:[%s9568_s20 + $0x190] sm:$0xff] %v6997_v2  ;;  %v7003_v32 = vld [vmem:[%s9572_s25 + $0x1a8] sm:$0xff]  ;;  %7000 = vst [vmem:[%s9568_s20 + $0x198] sm:$0xff] %v6999_v23  ;;  %v7005_v34 = vld [vmem:[%s9572_s25 + $0x1b0] sm:$0xff] }
 0x4f6   : >> { %7002 = vst [vmem:[%s9568_s20 + $0x1a0] sm:$0xff] %v7001_v53  ;;  %7004 = vst [vmem:[%s9568_s20 + $0x1a8] sm:$0xff] %v7003_v32  ;;  %v7007_v54 = vld [vmem:[%s9572_s25 + $0x1b8] sm:$0xff]  ;;  %v7009_v35 = vld [vmem:[%s9572_s25 + $0x1c0] sm:$0xff] }
 0x4f7   : >> { %7006 = vst [vmem:[%s9568_s20 + $0x1b0] sm:$0xff] %v7005_v34  ;;  %7008 = vst [vmem:[%s9568_s20 + $0x1b8] sm:$0xff] %v7007_v54  ;;  %v7011_v7 = vld [vmem:[%s9572_s25 + $0x1c8] sm:$0xff]  ;;  %v7013_v36 = vld [vmem:[%s9572_s25 + $0x1d0] sm:$0xff]  ;;  %6893 = sbr.rel (!%p6890_p12) target bundleno = 1243 (0x4db), region = 157 }
 0x4f8   : >> { %7010 = vst [vmem:[%s9568_s20 + $0x1c0] sm:$0xff] %v7009_v35  ;;  %v7015_v5 = vld [vmem:[%s9572_s25 + $0x1d8] sm:$0xff]  ;;  %7012 = vst [vmem:[%s9568_s20 + $0x1c8] sm:$0xff] %v7011_v7  ;;  %v7017_v19 = vld [vmem:[%s9572_s25 + $0x1e0] sm:$0xff] }
 0x4f9   : >> { %7014 = vst [vmem:[%s9568_s20 + $0x1d0] sm:$0xff] %v7013_v36  ;;  %7016 = vst [vmem:[%s9568_s20 + $0x1d8] sm:$0xff] %v7015_v5  ;;  %v7019_v52 = vld [vmem:[%s9572_s25 + $0x1e8] sm:$0xff]  ;;  %v7021_v16 = vld [vmem:[%s9572_s25 + $0x1f0] sm:$0xff] }
 0x4fa   : >> { %7018 = vst [vmem:[%s9568_s20 + $0x1e0] sm:$0xff] %v7017_v19  ;;  %7020 = vst [vmem:[%s9568_s20 + $0x1e8] sm:$0xff] %v7019_v52  ;;  %v7023_v51 = vld [vmem:[%s9572_s25 + $0x1f8] sm:$0xff]  ;;  %s14197_s25 = smov %s13947_s19 }
 0x4fb   : >> { %7022 = vst [vmem:[%s9568_s20 + $0x1f0] sm:$0xff] %v7021_v16  ;;  %7024 = vst [vmem:[%s9568_s20 + $0x1f8] sm:$0xff] %v7023_v51  ;;  %s14196_s20 = smov %s13950_s22 }
 0x4fc PF: > { %s14055_s27 = sand.u32 63, %s14203_s23   ;;  %s7685_s28 = sshll.u32 %s13880_s14, 9 }
 0x4fd   : > { %s7036_s29 = scalar_lea.vmem %s13561_s26, %s7685_s28 [#allocation2]   ;;  %s7038_s13 = scalar_lea.vmem %s13874_s12, %s7685_s28  }
 0x4fe   : > { %p7679_p13 = scmp.le.s32.totalorder %s14055_s27, 0 }
 0x4ff   : > { %s9582_s16 = smov (!%p7679_p13), %s7038_s13   ;;  %s9586_s19 = smov (!%p7679_p13), %s7036_s29  }
 0x500   : > { %7135 = sbr.rel (%p7679_p13) target bundleno = 1293 (0x50d), region = 162  ;;  %s9590_s22 = smov (!%p7679_p13), 0  }
 0x501   : > { %s9594_s15 = smov (!%p7679_p13), 0  }
 0x505 LB: >> { %v7048_v59 = vld [vmem:[%s9588_s19] sm:$0xff]  ;;  %s7050_s23 = sadd.s32 1, %s9592_s22  ;;  %s7042_s15 = sadd.s32 1, %s9596_s15   ;;  %s9596_s15 = sphi %s9594_s15, %s7042_s15   ;;  %s9592_s22 = sphi %s9590_s22, %s9591_s22   ;;  %s9588_s19 = sphi %s9586_s19, %s7055_s19   ;;  %s9584_s16 = sphi %s9582_s16, %s7056_s16  }
 0x506   : >> { %7049 = vst [vmem:[%s9584_s16] sm:$0xff] %v7048_v59  ;;  %p7051_p0 = scmp.ge.s32.totalorder %s7050_s23, %s14055_s27  ;;  %p7041_p1 = scmp.ge.s32.totalorder %s7042_s15, %s14055_s27 }
 0x508   : >> { %s14207_s23 = smov (%p7051_p0, %s7050_s23), 0  ;;  %7044 = sbr.rel (!%p7041_p1) target bundleno = 1285 (0x505), region = 168 }
 0x509   : >> { %s7680_s26 = sshll.u32 %s14207_s23, 3  ;;  %s9591_s22 = smov %s14207_s23  }
 0x50a   : >> { %s7055_s19 = scalar_lea.vmem %s7036_s29, %s7680_s26 [#allocation2]   ;;  %s7056_s16 = scalar_lea.vmem %s7038_s13, %s7680_s26  }
 0x50d PF: > { %p18_p2 = scmp.ge.s32.totalorder %s9675_s21, 9   ;;  %s14199_s17 = smov %s9560_s18 }
 0x50e   : > { %s14200_s18 = smov %s9683_s24  ;;  %s14201_s19 = smov %s9675_s21 }
 0x50f   :  { %20 = sbr.rel (!%p18_p2) target bundleno = 2 (0x2), region = 179 }

</bundles_post_ra>
